<compile_context>
chip_gen: v7x
topology: tpu7x:2x2x1
jax: 0.10.0
libtpu: 0.0.40
codegen_flags: <defaults>
</compile_context>

<pallas_src>
import jax
import jax.numpy as jnp
from jax import lax
from jax.experimental import pallas as pl
from jax.experimental.pallas import tpu as pltpu


def _round_up(v, m):
    return ((v + m - 1) // m) * m


# ----------------------------- fused Pallas kernel -------------------------- #

def _make_fused_kernel(kernel_sizes, cin_pads, cout_pads, Wp, M_rows, GUARD,
                       act, neg_slope, scratch_width):
    """Build the fused residual-block kernel (all shape info is static)."""
    n_layers = len(kernel_sizes)
    last = n_layers - 1

    def kernel(*refs):
        x_ref = refs[0]                               # (Mg, cin_pad0)  guarded flat input
        mask_ref = refs[1]                            # (M_rows, 1)     1=interior, 0=pad ring
        w_refs = refs[2:2 + n_layers]                 # (k*k, cin_pad, cout_pad) each
        b_refs = refs[2 + n_layers:2 + 2 * n_layers]  # (1, cout_pad) each
        ws_ref = refs[2 + 2 * n_layers]               # (cin_pad0, cout_padL) shortcut
        out_ref = refs[2 + 2 * n_layers + 1]          # (M_rows, cout_padL)  lane-dense
        h_ref = refs[2 + 2 * n_layers + 2]            # (Mg, scratch_width)  VMEM scratch

        if n_layers > 1:
            # One-time init: guard rows / spare columns of the scratch must be
            # zero so shifted taps read correct zero padding.  Interior rows
            # are fully overwritten (masked) by every intermediate layer.
            h_ref[...] = jnp.zeros_like(h_ref)
            mask = mask_ref[...]

        for li in range(n_layers):
            k = kernel_sizes[li]
            p = (k - 1) // 2
            cin = cin_pads[li]
            cout = cout_pads[li]
            src = x_ref if li == 0 else h_ref

            # K*K shifted-GEMM taps, accumulated in f32 on the MXU.
            acc = jnp.broadcast_to(b_refs[li][...], (M_rows, cout))
            for dy in range(k):
                for dx in range(k):
                    off = GUARD + (dy - p) * Wp + (dx - p)      # static python int
                    if li == 0 or cin == scratch_width:
                        tap = src[pl.ds(off, M_rows), :]
                    else:
                        tap = src[pl.ds(off, M_rows), pl.ds(0, cin)]
                    w_tap = w_refs[li][dy * k + dx]             # (cin, cout)
                    acc = acc + jnp.dot(tap, w_tap,
                                        preferred_element_type=jnp.float32)

            if li == last:
                # fused residual shortcut (1x1 projection or identity-as-eye) + final ReLU
                x_c = x_ref[pl.ds(GUARD, M_rows), :]
                acc = acc + jnp.dot(x_c, ws_ref[...],
                                    preferred_element_type=jnp.float32)
                out_ref[...] = jnp.maximum(acc, 0.0)
            else:
                if act == 'relu':
                    h = jnp.maximum(acc, 0.0)
                else:  # lrelu
                    h = jnp.where(acc > 0.0, acc, acc * neg_slope)
                h = h * mask                                   # zero the padding ring
                if cout == scratch_width:
                    h_ref[pl.ds(GUARD, M_rows), :] = h
                else:
                    h_ref[pl.ds(GUARD, M_rows), pl.ds(0, cout)] = h

    return kernel


# --------------------------------- module ----------------------------------- #

class ResidualBlockPallas:
    """Inference-mode ResidualBlock, whole forward pass in one Pallas kernel."""

    def __init__(self, in_channels, channels, kernel_sizes, key,
                 batchnorm=False, dropout=0.0, activation_type='relu',
                 activation_params=None):
        assert channels and kernel_sizes and len(channels) == len(kernel_sizes)
        assert all(k % 2 == 1 for k in kernel_sizes)
        if activation_type not in ('relu', 'lrelu'):
            raise ValueError('Unsupported activation type')
        # TODO(synk): batchnorm / dropout>0 not implemented (identity in this config).
        assert not batchnorm and dropout == 0.0

        self.in_channels = in_channels
        self.channels = list(channels)
        self.kernel_sizes = list(kernel_sizes)
        self.activation_type = activation_type
        self.neg_slope = float((activation_params or {}).get('negative_slope', 0.01))

        # padded channel widths: inputs/intermediates -> multiple of 8 (sublane),
        # final output -> multiple of 128 (lane-dense stores, full MXU columns).
        self.cin_pads = ([_round_up(in_channels, 8)]
                         + [_round_up(c, 8) for c in channels[:-1]])
        self.cout_pads = ([_round_up(c, 8) for c in channels[:-1]]
                          + [_round_up(channels[-1], 128)])

        # un-padded parameters (HWIO) -- used by the plain-JAX reference.
        self.weights, self.biases = [], []
        cin = in_channels
        for cout, k in zip(channels, kernel_sizes):
            key, kw, kb = jax.random.split(key, 3)
            scale = 1.0 / jnp.sqrt(jnp.float32(cin * k * k))
            self.weights.append(
                jax.random.normal(kw, (k, k, cin, cout), jnp.float32) * scale)
            self.biases.append(
                jax.random.normal(kb, (1, cout), jnp.float32) * 0.1)
            cin = cout

        if channels[-1] != in_channels:
            key, ks = jax.random.split(key)
            self.w_shortcut = (jax.random.normal(
                ks, (in_channels, channels[-1]), jnp.float32)
                / jnp.sqrt(jnp.float32(in_channels)))
        else:
            self.w_shortcut = None

        # padded, GEMM-ready parameters for the fused kernel.
        self.w_gemm, self.b_pad = [], []
        for li, (wgt, b, k) in enumerate(zip(self.weights, self.biases, kernel_sizes)):
            cin_p, cout_p = self.cin_pads[li], self.cout_pads[li]
            wp = jnp.zeros((k, k, cin_p, cout_p), jnp.float32)
            wp = wp.at[:, :, :wgt.shape[2], :wgt.shape[3]].set(wgt)
            self.w_gemm.append(wp.reshape(k * k, cin_p, cout_p))
            bp = jnp.zeros((1, cout_p), jnp.float32).at[:, :b.shape[1]].set(b)
            self.b_pad.append(bp)

        cin_p0, cout_pL = self.cin_pads[0], self.cout_pads[-1]
        ws = jnp.zeros((cin_p0, cout_pL), jnp.float32)
        if self.w_shortcut is not None:
            ws = ws.at[:in_channels, :channels[-1]].set(self.w_shortcut)
        else:
            # identity shortcut expressed as a (padded) eye so it fuses as one GEMM.
            ws = ws.at[:in_channels, :in_channels].set(
                jnp.eye(in_channels, dtype=jnp.float32))
        self.ws_pad = ws

        self._jit_forward = jax.jit(self._forward)

    # one-time layout conversion + single fused pallas_call
    def _forward(self, x_nchw):
        n_layers = len(self.channels)
        P = max((k - 1) // 2 for k in self.kernel_sizes)   # common zero-ring width
        N, Cin, H, W = x_nchw.shape
        Hp, Wp = H + 2 * P, W + 2 * P
        M_rows = N * Hp * Wp
        GUARD = _round_up(P * Wp + P, 8)                   # sublane-aligned guard rows
        Mg = M_rows + 2 * GUARD
        cin_p0 = self.cin_pads[0]
        cout_pL = self.cout_pads[-1]
        scratch_w = max([8] + self.cout_pads[:-1])

        # NCHW -> NHWC, channel pad, spatial zero ring, flatten, add guard rows.
        x = jnp.transpose(x_nchw, (0, 2, 3, 1))
        x = jnp.pad(x, ((0, 0), (P, P), (P, P), (0, cin_p0 - Cin)))
        x_flat = x.reshape(M_rows, cin_p0)
        x_flat = jnp.pad(x_flat, ((GUARD, GUARD), (0, 0)))

        # interior mask (1 at valid HxW positions, 0 on the padding ring).
        yy = jnp.arange(Hp)
        xx = jnp.arange(Wp)
        m2d = (((yy >= P) & (yy < P + H))[:, None]
               & ((xx >= P) & (xx < P + W))[None, :])
        mask = jnp.broadcast_to(m2d[None], (N, Hp, Wp)).reshape(M_rows, 1)
        mask = mask.astype(jnp.float32)

        kernel = _make_fused_kernel(tuple(self.kernel_sizes), tuple(self.cin_pads),
                                    tuple(self.cout_pads), Wp, M_rows, GUARD,
                                    self.activation_type, self.neg_slope, scratch_w)

        n_in = 2 + 2 * n_layers + 1
        out_flat = pl.pallas_call(
            kernel,
            out_shape=jax.ShapeDtypeStruct((M_rows, cout_pL), jnp.float32),
            in_specs=[pl.BlockSpec(memory_space=pltpu.MemorySpace.VMEM)] * n_in,
            out_specs=pl.BlockSpec(memory_space=pltpu.MemorySpace.VMEM),
            scratch_shapes=[pltpu.VMEM((Mg, scratch_w), jnp.float32)],
        )(x_flat, mask, *self.w_gemm, *self.b_pad, self.ws_pad)

        out = out_flat.reshape(N, Hp, Wp, cout_pL)[:, P:P + H, P:P + W,
                                                   :self.channels[-1]]
        return jnp.transpose(out, (0, 3, 1, 2))            # NHWC -> NCHW

    def __call__(self, x_nchw):
        return self._jit_forward(x_nchw)


# ------------------------------- reference ---------------------------------- #

def _reference_forward(block, x_nchw):
    """Plain-JAX reference (lax.conv) for correctness checking."""
    x = jnp.transpose(x_nchw, (0, 2, 3, 1))
    dn = ('NHWC', 'HWIO', 'NHWC')
    out = x
    last = len(block.weights) - 1
    for i, (wgt, b) in enumerate(zip(block.weights, block.biases)):
        out = lax.conv_general_dilated(out, wgt, (1, 1), 'SAME',
                                       dimension_numbers=dn)
        out = out + b.reshape(1, 1, 1, -1)
        if i < last:
            if block.activation_type == 'relu':
                out = jnp.maximum(out, 0.0)
            else:
                out = jnp.where(out > 0, out, out * block.neg_slope)
    if block.w_shortcut is not None:
        ws = block.w_shortcut.reshape(1, 1, *block.w_shortcut.shape)
        sc = lax.conv_general_dilated(x, ws, (1, 1), 'SAME',
                                      dimension_numbers=dn)
    else:
        sc = x
    out = jnp.maximum(out + sc, 0.0)
    return jnp.transpose(out, (0, 3, 1, 2))


# ---------------------------------- main ------------------------------------ #

if __name__ == "__main__":
    key = jax.random.PRNGKey(0)
    key_x, key_p = jax.random.split(key)

    # PyTorch NCHW convention: (batch=2, in_channels=4, 16, 16)
    x = jax.random.normal(key_x, (2, 4, 16, 16), jnp.float32)

    block = ResidualBlockPallas(in_channels=4, channels=[8, 8],
                                kernel_sizes=[3, 3], key=key_p,
                                batchnorm=False, dropout=0.0,
                                activation_type='relu')

    y = jax.block_until_ready(block(x))
    y_ref = jax.block_until_ready(_reference_forward(block, x))

    assert y.shape == (2, 8, 16, 16)
    err = float(jnp.max(jnp.abs(y - y_ref)))
    assert jnp.allclose(y, y_ref, atol=1e-4, rtol=1e-4), f"max abs err = {err}"

    print("KERNEL_OK")
</pallas_src>

<mosaic_0001>
module attributes {stable_mosaic.version = 11 : i64} {
  func.func @kernel(%arg0: memref<696x8xf32, #tpu.memory_space<vmem>>, %arg1: memref<648x1xf32, #tpu.memory_space<vmem>>, %arg2: memref<9x8x8xf32, #tpu.memory_space<vmem>>, %arg3: memref<9x8x128xf32, #tpu.memory_space<vmem>>, %arg4: memref<1x8xf32, #tpu.memory_space<vmem>>, %arg5: memref<1x128xf32, #tpu.memory_space<vmem>>, %arg6: memref<8x128xf32, #tpu.memory_space<vmem>>, %arg7: memref<648x128xf32, #tpu.memory_space<vmem>>, %arg8: memref<696x8xf32, #tpu.memory_space<vmem>>) attributes {dimension_semantics = [], scalar_prefetch = 0 : i64, scratch_operands = 1 : i64, tpu.core_type = #tpu.core_type<tc>} {
    %cst = arith.constant 0.000000e+00 : f32
    %0 = vector.broadcast %cst : f32 to vector<696x8xf32>
    %c0 = arith.constant 0 : index
    %c0_0 = arith.constant 0 : index
    %1 = vector.load %arg8[%c0, %c0_0] : memref<696x8xf32, #tpu.memory_space<vmem>>, vector<696x8xf32>
    tpu.vector_store %arg8[%c0, %c0_0], %0 {strides = array<i32>} : memref<696x8xf32, #tpu.memory_space<vmem>>, vector<696x8xf32>,
    %c0_1 = arith.constant 0 : index
    %c0_2 = arith.constant 0 : index
    %2 = vector.load %arg1[%c0_1, %c0_2] : memref<648x1xf32, #tpu.memory_space<vmem>>, vector<648x1xf32>
    %c0_3 = arith.constant 0 : index
    %c0_4 = arith.constant 0 : index
    %3 = vector.load %arg4[%c0_3, %c0_4] : memref<1x8xf32, #tpu.memory_space<vmem>>, vector<1x8xf32>
    %4 = vector.shape_cast %3 : vector<1x8xf32> to vector<1x8xf32>
    %5 = vector.broadcast %4 : vector<1x8xf32> to vector<648x8xf32>
    %c5 = arith.constant 5 : index
    %c0_5 = arith.constant 0 : index
    %6 = vector.load %arg0[%c5, %c0_5] : memref<696x8xf32, #tpu.memory_space<vmem>>, vector<648x8xf32>
    %c0_6 = arith.constant 0 : index
    %c0_7 = arith.constant 0 : index
    %c0_8 = arith.constant 0 : index
    %7 = vector.load %arg2[%c0_6, %c0_7, %c0_8] : memref<9x8x8xf32, #tpu.memory_space<vmem>>, vector<1x8x8xf32>
    %8 = vector.shape_cast %7 : vector<1x8x8xf32> to vector<8x8xf32>
    %cst_9 = arith.constant dense<0.000000e+00> : vector<648x8xf32>
    %9 = tpu.matmul %6, %8, %cst_9 {dimension_numbers = #tpu.dot_dimension_numbers<[1], [0], [0], [1], [0, 0, 1, 1], [], []>} : vector<648x8xf32>, vector<8x8xf32>, vector<648x8xf32> -> vector<648x8xf32>
    %10 = arith.addf %5, %9 : vector<648x8xf32>
    %c6 = arith.constant 6 : index
    %c0_10 = arith.constant 0 : index
    %11 = vector.load %arg0[%c6, %c0_10] : memref<696x8xf32, #tpu.memory_space<vmem>>, vector<648x8xf32>
    %c1 = arith.constant 1 : index
    %c0_11 = arith.constant 0 : index
    %c0_12 = arith.constant 0 : index
    %12 = vector.load %arg2[%c1, %c0_11, %c0_12] : memref<9x8x8xf32, #tpu.memory_space<vmem>>, vector<1x8x8xf32>
    %13 = vector.shape_cast %12 : vector<1x8x8xf32> to vector<8x8xf32>
    %cst_13 = arith.constant dense<0.000000e+00> : vector<648x8xf32>
    %14 = tpu.matmul %11, %13, %cst_13 {dimension_numbers = #tpu.dot_dimension_numbers<[1], [0], [0], [1], [0, 0, 1, 1], [], []>} : vector<648x8xf32>, vector<8x8xf32>, vector<648x8xf32> -> vector<648x8xf32>
    %15 = arith.addf %10, %14 : vector<648x8xf32>
    %c7 = arith.constant 7 : index
    %c0_14 = arith.constant 0 : index
    %16 = vector.load %arg0[%c7, %c0_14] : memref<696x8xf32, #tpu.memory_space<vmem>>, vector<648x8xf32>
    %c2 = arith.constant 2 : index
    %c0_15 = arith.constant 0 : index
    %c0_16 = arith.constant 0 : index
    %17 = vector.load %arg2[%c2, %c0_15, %c0_16] : memref<9x8x8xf32, #tpu.memory_space<vmem>>, vector<1x8x8xf32>
    %18 = vector.shape_cast %17 : vector<1x8x8xf32> to vector<8x8xf32>
    %cst_17 = arith.constant dense<0.000000e+00> : vector<648x8xf32>
    %19 = tpu.matmul %16, %18, %cst_17 {dimension_numbers = #tpu.dot_dimension_numbers<[1], [0], [0], [1], [0, 0, 1, 1], [], []>} : vector<648x8xf32>, vector<8x8xf32>, vector<648x8xf32> -> vector<648x8xf32>
    %20 = arith.addf %15, %19 : vector<648x8xf32>
    %c23 = arith.constant 23 : index
    %c0_18 = arith.constant 0 : index
    %21 = vector.load %arg0[%c23, %c0_18] : memref<696x8xf32, #tpu.memory_space<vmem>>, vector<648x8xf32>
    %c3 = arith.constant 3 : index
    %c0_19 = arith.constant 0 : index
    %c0_20 = arith.constant 0 : index
    %22 = vector.load %arg2[%c3, %c0_19, %c0_20] : memref<9x8x8xf32, #tpu.memory_space<vmem>>, vector<1x8x8xf32>
    %23 = vector.shape_cast %22 : vector<1x8x8xf32> to vector<8x8xf32>
    %cst_21 = arith.constant dense<0.000000e+00> : vector<648x8xf32>
    %24 = tpu.matmul %21, %23, %cst_21 {dimension_numbers = #tpu.dot_dimension_numbers<[1], [0], [0], [1], [0, 0, 1, 1], [], []>} : vector<648x8xf32>, vector<8x8xf32>, vector<648x8xf32> -> vector<648x8xf32>
    %25 = arith.addf %20, %24 : vector<648x8xf32>
    %c24 = arith.constant 24 : index
    %c0_22 = arith.constant 0 : index
    %26 = vector.load %arg0[%c24, %c0_22] : memref<696x8xf32, #tpu.memory_space<vmem>>, vector<648x8xf32>
    %c4 = arith.constant 4 : index
    %c0_23 = arith.constant 0 : index
    %c0_24 = arith.constant 0 : index
    %27 = vector.load %arg2[%c4, %c0_23, %c0_24] : memref<9x8x8xf32, #tpu.memory_space<vmem>>, vector<1x8x8xf32>
    %28 = vector.shape_cast %27 : vector<1x8x8xf32> to vector<8x8xf32>
    %cst_25 = arith.constant dense<0.000000e+00> : vector<648x8xf32>
    %29 = tpu.matmul %26, %28, %cst_25 {dimension_numbers = #tpu.dot_dimension_numbers<[1], [0], [0], [1], [0, 0, 1, 1], [], []>} : vector<648x8xf32>, vector<8x8xf32>, vector<648x8xf32> -> vector<648x8xf32>
    %30 = arith.addf %25, %29 : vector<648x8xf32>
    %c25 = arith.constant 25 : index
    %c0_26 = arith.constant 0 : index
    %31 = vector.load %arg0[%c25, %c0_26] : memref<696x8xf32, #tpu.memory_space<vmem>>, vector<648x8xf32>
    %c5_27 = arith.constant 5 : index
    %c0_28 = arith.constant 0 : index
    %c0_29 = arith.constant 0 : index
    %32 = vector.load %arg2[%c5_27, %c0_28, %c0_29] : memref<9x8x8xf32, #tpu.memory_space<vmem>>, vector<1x8x8xf32>
    %33 = vector.shape_cast %32 : vector<1x8x8xf32> to vector<8x8xf32>
    %cst_30 = arith.constant dense<0.000000e+00> : vector<648x8xf32>
    %34 = tpu.matmul %31, %33, %cst_30 {dimension_numbers = #tpu.dot_dimension_numbers<[1], [0], [0], [1], [0, 0, 1, 1], [], []>} : vector<648x8xf32>, vector<8x8xf32>, vector<648x8xf32> -> vector<648x8xf32>
    %35 = arith.addf %30, %34 : vector<648x8xf32>
    %c41 = arith.constant 41 : index
    %c0_31 = arith.constant 0 : index
    %36 = vector.load %arg0[%c41, %c0_31] : memref<696x8xf32, #tpu.memory_space<vmem>>, vector<648x8xf32>
    %c6_32 = arith.constant 6 : index
    %c0_33 = arith.constant 0 : index
    %c0_34 = arith.constant 0 : index
    %37 = vector.load %arg2[%c6_32, %c0_33, %c0_34] : memref<9x8x8xf32, #tpu.memory_space<vmem>>, vector<1x8x8xf32>
    %38 = vector.shape_cast %37 : vector<1x8x8xf32> to vector<8x8xf32>
    %cst_35 = arith.constant dense<0.000000e+00> : vector<648x8xf32>
    %39 = tpu.matmul %36, %38, %cst_35 {dimension_numbers = #tpu.dot_dimension_numbers<[1], [0], [0], [1], [0, 0, 1, 1], [], []>} : vector<648x8xf32>, vector<8x8xf32>, vector<648x8xf32> -> vector<648x8xf32>
    %40 = arith.addf %35, %39 : vector<648x8xf32>
    %c42 = arith.constant 42 : index
    %c0_36 = arith.constant 0 : index
    %41 = vector.load %arg0[%c42, %c0_36] : memref<696x8xf32, #tpu.memory_space<vmem>>, vector<648x8xf32>
    %c7_37 = arith.constant 7 : index
    %c0_38 = arith.constant 0 : index
    %c0_39 = arith.constant 0 : index
    %42 = vector.load %arg2[%c7_37, %c0_38, %c0_39] : memref<9x8x8xf32, #tpu.memory_space<vmem>>, vector<1x8x8xf32>
    %43 = vector.shape_cast %42 : vector<1x8x8xf32> to vector<8x8xf32>
    %cst_40 = arith.constant dense<0.000000e+00> : vector<648x8xf32>
    %44 = tpu.matmul %41, %43, %cst_40 {dimension_numbers = #tpu.dot_dimension_numbers<[1], [0], [0], [1], [0, 0, 1, 1], [], []>} : vector<648x8xf32>, vector<8x8xf32>, vector<648x8xf32> -> vector<648x8xf32>
    %45 = arith.addf %40, %44 : vector<648x8xf32>
    %c43 = arith.constant 43 : index
    %c0_41 = arith.constant 0 : index
    %46 = vector.load %arg0[%c43, %c0_41] : memref<696x8xf32, #tpu.memory_space<vmem>>, vector<648x8xf32>
    %c8 = arith.constant 8 : index
    %c0_42 = arith.constant 0 : index
    %c0_43 = arith.constant 0 : index
    %47 = vector.load %arg2[%c8, %c0_42, %c0_43] : memref<9x8x8xf32, #tpu.memory_space<vmem>>, vector<1x8x8xf32>
    %48 = vector.shape_cast %47 : vector<1x8x8xf32> to vector<8x8xf32>
    %cst_44 = arith.constant dense<0.000000e+00> : vector<648x8xf32>
    %49 = tpu.matmul %46, %48, %cst_44 {dimension_numbers = #tpu.dot_dimension_numbers<[1], [0], [0], [1], [0, 0, 1, 1], [], []>} : vector<648x8xf32>, vector<8x8xf32>, vector<648x8xf32> -> vector<648x8xf32>
    %50 = arith.addf %45, %49 : vector<648x8xf32>
    %cst_45 = arith.constant 0.000000e+00 : f32
    %51 = vector.broadcast %cst_45 : f32 to vector<648x8xf32>
    %52 = arith.maximumf %50, %51 : vector<648x8xf32>
    %53 = vector.broadcast %2 : vector<648x1xf32> to vector<648x8xf32>
    %54 = arith.mulf %52, %53 : vector<648x8xf32>
    %c24_46 = arith.constant 24 : index
    %c0_47 = arith.constant 0 : index
    %55 = vector.load %arg8[%c24_46, %c0_47] : memref<696x8xf32, #tpu.memory_space<vmem>>, vector<648x8xf32>
    tpu.vector_store %arg8[%c24_46, %c0_47], %54 {strides = array<i32>} : memref<696x8xf32, #tpu.memory_space<vmem>>, vector<648x8xf32>,
    %c0_48 = arith.constant 0 : index
    %c0_49 = arith.constant 0 : index
    %56 = vector.load %arg5[%c0_48, %c0_49] : memref<1x128xf32, #tpu.memory_space<vmem>>, vector<1x128xf32>
    %57 = vector.shape_cast %56 : vector<1x128xf32> to vector<1x128xf32>
    %58 = vector.broadcast %57 : vector<1x128xf32> to vector<648x128xf32>
    %c5_50 = arith.constant 5 : index
    %c0_51 = arith.constant 0 : index
    %59 = vector.load %arg8[%c5_50, %c0_51] : memref<696x8xf32, #tpu.memory_space<vmem>>, vector<648x8xf32>
    %c0_52 = arith.constant 0 : index
    %c0_53 = arith.constant 0 : index
    %c0_54 = arith.constant 0 : index
    %60 = vector.load %arg3[%c0_52, %c0_53, %c0_54] : memref<9x8x128xf32, #tpu.memory_space<vmem>>, vector<1x8x128xf32>
    %61 = vector.shape_cast %60 : vector<1x8x128xf32> to vector<8x128xf32>
    %cst_55 = arith.constant dense<0.000000e+00> : vector<648x128xf32>
    %62 = tpu.matmul %59, %61, %cst_55 {dimension_numbers = #tpu.dot_dimension_numbers<[1], [0], [0], [1], [0, 0, 1, 1], [], []>} : vector<648x8xf32>, vector<8x128xf32>, vector<648x128xf32> -> vector<648x128xf32>
    %63 = arith.addf %58, %62 : vector<648x128xf32>
    %c6_56 = arith.constant 6 : index
    %c0_57 = arith.constant 0 : index
    %64 = vector.load %arg8[%c6_56, %c0_57] : memref<696x8xf32, #tpu.memory_space<vmem>>, vector<648x8xf32>
    %c1_58 = arith.constant 1 : index
    %c0_59 = arith.constant 0 : index
    %c0_60 = arith.constant 0 : index
    %65 = vector.load %arg3[%c1_58, %c0_59, %c0_60] : memref<9x8x128xf32, #tpu.memory_space<vmem>>, vector<1x8x128xf32>
    %66 = vector.shape_cast %65 : vector<1x8x128xf32> to vector<8x128xf32>
    %cst_61 = arith.constant dense<0.000000e+00> : vector<648x128xf32>
    %67 = tpu.matmul %64, %66, %cst_61 {dimension_numbers = #tpu.dot_dimension_numbers<[1], [0], [0], [1], [0, 0, 1, 1], [], []>} : vector<648x8xf32>, vector<8x128xf32>, vector<648x128xf32> -> vector<648x128xf32>
    %68 = arith.addf %63, %67 : vector<648x128xf32>
    %c7_62 = arith.constant 7 : index
    %c0_63 = arith.constant 0 : index
    %69 = vector.load %arg8[%c7_62, %c0_63] : memref<696x8xf32, #tpu.memory_space<vmem>>, vector<648x8xf32>
    %c2_64 = arith.constant 2 : index
    %c0_65 = arith.constant 0 : index
    %c0_66 = arith.constant 0 : index
    %70 = vector.load %arg3[%c2_64, %c0_65, %c0_66] : memref<9x8x128xf32, #tpu.memory_space<vmem>>, vector<1x8x128xf32>
    %71 = vector.shape_cast %70 : vector<1x8x128xf32> to vector<8x128xf32>
    %cst_67 = arith.constant dense<0.000000e+00> : vector<648x128xf32>
    %72 = tpu.matmul %69, %71, %cst_67 {dimension_numbers = #tpu.dot_dimension_numbers<[1], [0], [0], [1], [0, 0, 1, 1], [], []>} : vector<648x8xf32>, vector<8x128xf32>, vector<648x128xf32> -> vector<648x128xf32>
    %73 = arith.addf %68, %72 : vector<648x128xf32>
    %c23_68 = arith.constant 23 : index
    %c0_69 = arith.constant 0 : index
    %74 = vector.load %arg8[%c23_68, %c0_69] : memref<696x8xf32, #tpu.memory_space<vmem>>, vector<648x8xf32>
    %c3_70 = arith.constant 3 : index
    %c0_71 = arith.constant 0 : index
    %c0_72 = arith.constant 0 : index
    %75 = vector.load %arg3[%c3_70, %c0_71, %c0_72] : memref<9x8x128xf32, #tpu.memory_space<vmem>>, vector<1x8x128xf32>
    %76 = vector.shape_cast %75 : vector<1x8x128xf32> to vector<8x128xf32>
    %cst_73 = arith.constant dense<0.000000e+00> : vector<648x128xf32>
    %77 = tpu.matmul %74, %76, %cst_73 {dimension_numbers = #tpu.dot_dimension_numbers<[1], [0], [0], [1], [0, 0, 1, 1], [], []>} : vector<648x8xf32>, vector<8x128xf32>, vector<648x128xf32> -> vector<648x128xf32>
    %78 = arith.addf %73, %77 : vector<648x128xf32>
    %c24_74 = arith.constant 24 : index
    %c0_75 = arith.constant 0 : index
    %79 = vector.load %arg8[%c24_74, %c0_75] : memref<696x8xf32, #tpu.memory_space<vmem>>, vector<648x8xf32>
    %c4_76 = arith.constant 4 : index
    %c0_77 = arith.constant 0 : index
    %c0_78 = arith.constant 0 : index
    %80 = vector.load %arg3[%c4_76, %c0_77, %c0_78] : memref<9x8x128xf32, #tpu.memory_space<vmem>>, vector<1x8x128xf32>
    %81 = vector.shape_cast %80 : vector<1x8x128xf32> to vector<8x128xf32>
    %cst_79 = arith.constant dense<0.000000e+00> : vector<648x128xf32>
    %82 = tpu.matmul %79, %81, %cst_79 {dimension_numbers = #tpu.dot_dimension_numbers<[1], [0], [0], [1], [0, 0, 1, 1], [], []>} : vector<648x8xf32>, vector<8x128xf32>, vector<648x128xf32> -> vector<648x128xf32>
    %83 = arith.addf %78, %82 : vector<648x128xf32>
    %c25_80 = arith.constant 25 : index
    %c0_81 = arith.constant 0 : index
    %84 = vector.load %arg8[%c25_80, %c0_81] : memref<696x8xf32, #tpu.memory_space<vmem>>, vector<648x8xf32>
    %c5_82 = arith.constant 5 : index
    %c0_83 = arith.constant 0 : index
    %c0_84 = arith.constant 0 : index
    %85 = vector.load %arg3[%c5_82, %c0_83, %c0_84] : memref<9x8x128xf32, #tpu.memory_space<vmem>>, vector<1x8x128xf32>
    %86 = vector.shape_cast %85 : vector<1x8x128xf32> to vector<8x128xf32>
    %cst_85 = arith.constant dense<0.000000e+00> : vector<648x128xf32>
    %87 = tpu.matmul %84, %86, %cst_85 {dimension_numbers = #tpu.dot_dimension_numbers<[1], [0], [0], [1], [0, 0, 1, 1], [], []>} : vector<648x8xf32>, vector<8x128xf32>, vector<648x128xf32> -> vector<648x128xf32>
    %88 = arith.addf %83, %87 : vector<648x128xf32>
    %c41_86 = arith.constant 41 : index
    %c0_87 = arith.constant 0 : index
    %89 = vector.load %arg8[%c41_86, %c0_87] : memref<696x8xf32, #tpu.memory_space<vmem>>, vector<648x8xf32>
    %c6_88 = arith.constant 6 : index
    %c0_89 = arith.constant 0 : index
    %c0_90 = arith.constant 0 : index
    %90 = vector.load %arg3[%c6_88, %c0_89, %c0_90] : memref<9x8x128xf32, #tpu.memory_space<vmem>>, vector<1x8x128xf32>
    %91 = vector.shape_cast %90 : vector<1x8x128xf32> to vector<8x128xf32>
    %cst_91 = arith.constant dense<0.000000e+00> : vector<648x128xf32>
    %92 = tpu.matmul %89, %91, %cst_91 {dimension_numbers = #tpu.dot_dimension_numbers<[1], [0], [0], [1], [0, 0, 1, 1], [], []>} : vector<648x8xf32>, vector<8x128xf32>, vector<648x128xf32> -> vector<648x128xf32>
    %93 = arith.addf %88, %92 : vector<648x128xf32>
    %c42_92 = arith.constant 42 : index
    %c0_93 = arith.constant 0 : index
    %94 = vector.load %arg8[%c42_92, %c0_93] : memref<696x8xf32, #tpu.memory_space<vmem>>, vector<648x8xf32>
    %c7_94 = arith.constant 7 : index
    %c0_95 = arith.constant 0 : index
    %c0_96 = arith.constant 0 : index
    %95 = vector.load %arg3[%c7_94, %c0_95, %c0_96] : memref<9x8x128xf32, #tpu.memory_space<vmem>>, vector<1x8x128xf32>
    %96 = vector.shape_cast %95 : vector<1x8x128xf32> to vector<8x128xf32>
    %cst_97 = arith.constant dense<0.000000e+00> : vector<648x128xf32>
    %97 = tpu.matmul %94, %96, %cst_97 {dimension_numbers = #tpu.dot_dimension_numbers<[1], [0], [0], [1], [0, 0, 1, 1], [], []>} : vector<648x8xf32>, vector<8x128xf32>, vector<648x128xf32> -> vector<648x128xf32>
    %98 = arith.addf %93, %97 : vector<648x128xf32>
    %c43_98 = arith.constant 43 : index
    %c0_99 = arith.constant 0 : index
    %99 = vector.load %arg8[%c43_98, %c0_99] : memref<696x8xf32, #tpu.memory_space<vmem>>, vector<648x8xf32>
    %c8_100 = arith.constant 8 : index
    %c0_101 = arith.constant 0 : index
    %c0_102 = arith.constant 0 : index
    %100 = vector.load %arg3[%c8_100, %c0_101, %c0_102] : memref<9x8x128xf32, #tpu.memory_space<vmem>>, vector<1x8x128xf32>
    %101 = vector.shape_cast %100 : vector<1x8x128xf32> to vector<8x128xf32>
    %cst_103 = arith.constant dense<0.000000e+00> : vector<648x128xf32>
    %102 = tpu.matmul %99, %101, %cst_103 {dimension_numbers = #tpu.dot_dimension_numbers<[1], [0], [0], [1], [0, 0, 1, 1], [], []>} : vector<648x8xf32>, vector<8x128xf32>, vector<648x128xf32> -> vector<648x128xf32>
    %103 = arith.addf %98, %102 : vector<648x128xf32>
    %c24_104 = arith.constant 24 : index
    %c0_105 = arith.constant 0 : index
    %104 = vector.load %arg0[%c24_104, %c0_105] : memref<696x8xf32, #tpu.memory_space<vmem>>, vector<648x8xf32>
    %c0_106 = arith.constant 0 : index
    %c0_107 = arith.constant 0 : index
    %105 = vector.load %arg6[%c0_106, %c0_107] : memref<8x128xf32, #tpu.memory_space<vmem>>, vector<8x128xf32>
    %cst_108 = arith.constant dense<0.000000e+00> : vector<648x128xf32>
    %106 = tpu.matmul %104, %105, %cst_108 {dimension_numbers = #tpu.dot_dimension_numbers<[1], [0], [0], [1], [0, 0, 1, 1], [], []>} : vector<648x8xf32>, vector<8x128xf32>, vector<648x128xf32> -> vector<648x128xf32>
    %107 = arith.addf %103, %106 : vector<648x128xf32>
    %cst_109 = arith.constant 0.000000e+00 : f32
    %108 = vector.broadcast %cst_109 : f32 to vector<648x128xf32>
    %109 = arith.maximumf %107, %108 : vector<648x128xf32>
    %c0_110 = arith.constant 0 : index
    %c0_111 = arith.constant 0 : index
    %110 = vector.load %arg7[%c0_110, %c0_111] : memref<648x128xf32, #tpu.memory_space<vmem>>, vector<648x128xf32>
    tpu.vector_store %arg7[%c0_110, %c0_111], %109 {strides = array<i32>} : memref<648x128xf32, #tpu.memory_space<vmem>>, vector<648x128xf32>,
    return
  }
}

</mosaic_0001>

<bundles_post_ra>
// kernel: _forward.1
= control target key start
LH: loop header
LB: loop body
LE: loop exit
PB: predicated region body
PF: predicated region fallthrough
CT: control target
= control target key end

     0   :  { %vm26_vm0 = vcmask 64512   ;;  %v28338_v0 = vmov 0.0   ;;  %vm28339_vm1 = vmmov 0   ;;  %s37464_s2 = inlined_call_operand.vmem [shape: f32[9,8,8], index: 2, kind: input, shape index: {}]   ;;  %s37465_s0 = inlined_call_operand.vmem [shape: f32[696,8], index: 0, kind: input, shape index: {}]   ;;  %s37466_s1 = inlined_call_operand.vmem [shape: f32[648,1], index: 1, kind: input, shape index: {}]   ;;  %s37467_s3 = inlined_call_operand.vmem [shape: f32[9,8,128], index: 3, kind: input, shape index: {}]   ;;  %s37468_s4 = inlined_call_operand.vmem [shape: f32[1,8], index: 4, kind: input, shape index: {}]   ;;  %s37469_s6 = inlined_call_operand.vmem [shape: f32[8,128], index: 6, kind: input, shape index: {}]   ;;  %s37470_s5 = inlined_call_operand.vmem [shape: f32[1,128], index: 5, kind: input, shape index: {}]   ;;  %s37471_s7 = inlined_call_operand.vmem [shape: f32[648,128], index: 7, kind: output, shape index: {}]  }
   0x1   :  { %20798 = vmatprep.subr.mxu0 %v28338_v0  ;;  %v28385_v1 = vld [vmem:[%s37464_s2] sm:$0xff]  ;;  %20800 = vmatprep.mubr.msk.f32.mxu0 %vm28339_vm1, %v28338_v0  ;;  %27 = vst.msk [vmem:[#allocation2] sm:$0xff] %vm26_vm0, %v28338_v0  ;;  %28 = vst.msk [vmem:[#allocation2 + $0x8] sm:$0xff] %vm26_vm0, %v28338_v0  ;;  %v17765_v3 = vld [vmem:[%s37464_s2 + $0x8] sm:$0xff] }
   0x2   :  { %v28392_v2 = vld [vmem:[%s37465_s0 + $0x5] sm:$0xff]  ;;  %29 = vst.msk [vmem:[#allocation2 + $0x10] sm:$0xff] %vm26_vm0, %v28338_v0  ;;  %30 = vst.msk [vmem:[#allocation2 + $0x18] sm:$0xff] %vm26_vm0, %v28338_v0  ;;  %20799 = vmatpush3.msra.mxu0 %v28385_v1  ;;  %25453 = vmatprep.subr.mxu1 %v28338_v0  ;;  %v203_v4 = vld [vmem:[%s37465_s0 + $0xd] sm:$0xff] }
   0x3   :  { %31 = vst.msk [vmem:[#allocation2 + $0x20] sm:$0xff] %vm26_vm0, %v28338_v0  ;;  %32 = vst.msk [vmem:[#allocation2 + $0x28] sm:$0xff] %vm26_vm0, %v28338_v0  ;;  %20801 = vmatmul.mubr.msk.f32.vlgmr.msra.gmra.mrb[0].mxu0 %vm26_vm0, %v28392_v2  ;;  %21043 = vmatprep.subr.mxu0 %v28338_v0  ;;  %v204_v5 = vld [vmem:[%s37465_s0 + $0x15] sm:$0xff]  ;;  %v205_v6 = vld [vmem:[%s37465_s0 + $0x1d] sm:$0xff] }
   0x4   :  { %33 = vst.msk [vmem:[#allocation2 + $0x30] sm:$0xff] %vm26_vm0, %v28338_v0  ;;  %34 = vst.msk [vmem:[#allocation2 + $0x38] sm:$0xff] %vm26_vm0, %v28338_v0  ;;  %21044 = vmatpush3.msra.mxu0 %v17765_v3  ;;  %20803 = vmatprep.mubr.msk.f32.mxu0 %vm28339_vm1, %v28338_v0  ;;  %v206_v7 = vld [vmem:[%s37465_s0 + $0x25] sm:$0xff]  ;;  %v207_v8 = vld [vmem:[%s37465_s0 + $0x2d] sm:$0xff] }
   0x5   :  { %35 = vst.msk [vmem:[#allocation2 + $0x40] sm:$0xff] %vm26_vm0, %v28338_v0  ;;  %36 = vst.msk [vmem:[#allocation2 + $0x48] sm:$0xff] %vm26_vm0, %v28338_v0  ;;  %21288 = vmatprep.subr.mxu0 %v28338_v0  ;;  %23125 = vmatprep.mubr.msk.f32.mxu1 %vm28339_vm1, %v28338_v0  ;;  %v208_v9 = vld [vmem:[%s37465_s0 + $0x35] sm:$0xff]  ;;  %v209_v10 = vld [vmem:[%s37465_s0 + $0x3d] sm:$0xff] }
   0x6   :  { %37 = vst.msk [vmem:[#allocation2 + $0x50] sm:$0xff] %vm26_vm0, %v28338_v0  ;;  %38 = vst.msk [vmem:[#allocation2 + $0x58] sm:$0xff] %vm26_vm0, %v28338_v0  ;;  %v210_v11 = vld [vmem:[%s37465_s0 + $0x45] sm:$0xff]  ;;  %v211_v12 = vld [vmem:[%s37465_s0 + $0x4d] sm:$0xff] }
   0x7   :  { %39 = vst.msk [vmem:[#allocation2 + $0x60] sm:$0xff] %vm26_vm0, %v28338_v0  ;;  %40 = vst.msk [vmem:[#allocation2 + $0x68] sm:$0xff] %vm26_vm0, %v28338_v0  ;;  %20804 = vmatmul.mubr.msk.f32.gmra.mrb[2].mxu0 %vm26_vm0, %v203_v4  ;;  %v212_v13 = vld [vmem:[%s37465_s0 + $0x55] sm:$0xff]  ;;  %v213_v14 = vld [vmem:[%s37465_s0 + $0x5d] sm:$0xff] }
   0x8   :  { %41 = vst.msk [vmem:[#allocation2 + $0x70] sm:$0xff] %vm26_vm0, %v28338_v0  ;;  %42 = vst.msk [vmem:[#allocation2 + $0x78] sm:$0xff] %vm26_vm0, %v28338_v0  ;;  %20806 = vmatprep.mubr.msk.f32.mxu0 %vm28339_vm1, %v28338_v0  ;;  %v214_v15 = vld [vmem:[%s37465_s0 + $0x65] sm:$0xff]  ;;  %v215_v16 = vld [vmem:[%s37465_s0 + $0x6d] sm:$0xff] }
   0x9   :  { %43 = vst.msk [vmem:[#allocation2 + $0x80] sm:$0xff] %vm26_vm0, %v28338_v0  ;;  %44 = vst.msk [vmem:[#allocation2 + $0x88] sm:$0xff] %vm26_vm0, %v28338_v0  ;;  %v216_v17 = vld [vmem:[%s37465_s0 + $0x75] sm:$0xff]  ;;  %v217_v18 = vld [vmem:[%s37465_s0 + $0x7d] sm:$0xff] }
   0xa   :  { %45 = vst.msk [vmem:[#allocation2 + $0x90] sm:$0xff] %vm26_vm0, %v28338_v0  ;;  %46 = vst.msk [vmem:[#allocation2 + $0x98] sm:$0xff] %vm26_vm0, %v28338_v0  ;;  %v218_v19 = vld [vmem:[%s37465_s0 + $0x85] sm:$0xff]  ;;  %v219_v20 = vld [vmem:[%s37465_s0 + $0x8d] sm:$0xff] }
   0xb   :  { %47 = vst.msk [vmem:[#allocation2 + $0xa0] sm:$0xff] %vm26_vm0, %v28338_v0  ;;  %48 = vst.msk [vmem:[#allocation2 + $0xa8] sm:$0xff] %vm26_vm0, %v28338_v0  ;;  %20807 = vmatmul.mubr.msk.f32.gmra.mrb[4].mxu0 %vm26_vm0, %v204_v5  ;;  %v220_v21 = vld [vmem:[%s37465_s0 + $0x95] sm:$0xff]  ;;  %v221_v22 = vld [vmem:[%s37465_s0 + $0x9d] sm:$0xff] }
   0xc   :  { %49 = vst.msk [vmem:[#allocation2 + $0xb0] sm:$0xff] %vm26_vm0, %v28338_v0  ;;  %50 = vst.msk [vmem:[#allocation2 + $0xb8] sm:$0xff] %vm26_vm0, %v28338_v0  ;;  %20809 = vmatprep.mubr.msk.f32.mxu0 %vm28339_vm1, %v28338_v0  ;;  %v222_v23 = vld [vmem:[%s37465_s0 + $0xa5] sm:$0xff]  ;;  %v223_v24 = vld [vmem:[%s37465_s0 + $0xad] sm:$0xff] }
   0xd   :  { %51 = vst.msk [vmem:[#allocation2 + $0xc0] sm:$0xff] %vm26_vm0, %v28338_v0  ;;  %52 = vst.msk [vmem:[#allocation2 + $0xc8] sm:$0xff] %vm26_vm0, %v28338_v0  ;;  %v224_v25 = vld [vmem:[%s37465_s0 + $0xb5] sm:$0xff]  ;;  %v225_v26 = vld [vmem:[%s37465_s0 + $0xbd] sm:$0xff] }
   0xe   :  { %53 = vst.msk [vmem:[#allocation2 + $0xd0] sm:$0xff] %vm26_vm0, %v28338_v0  ;;  %54 = vst.msk [vmem:[#allocation2 + $0xd8] sm:$0xff] %vm26_vm0, %v28338_v0  ;;  %v226_v27 = vld [vmem:[%s37465_s0 + $0xc5] sm:$0xff]  ;;  %v227_v28 = vld [vmem:[%s37465_s0 + $0xcd] sm:$0xff] }
   0xf   :  { %55 = vst.msk [vmem:[#allocation2 + $0xe0] sm:$0xff] %vm26_vm0, %v28338_v0  ;;  %56 = vst.msk [vmem:[#allocation2 + $0xe8] sm:$0xff] %vm26_vm0, %v28338_v0  ;;  %20810 = vmatmul.mubr.msk.f32.gmra.mrb[6].mxu0 %vm26_vm0, %v205_v6  ;;  %v228_v29 = vld [vmem:[%s37465_s0 + $0xd5] sm:$0xff]  ;;  %v229_v30 = vld [vmem:[%s37465_s0 + $0xdd] sm:$0xff] }
  0x10   :  { %57 = vst.msk [vmem:[#allocation2 + $0xf0] sm:$0xff] %vm26_vm0, %v28338_v0  ;;  %58 = vst.msk [vmem:[#allocation2 + $0xf8] sm:$0xff] %vm26_vm0, %v28338_v0  ;;  %20812 = vmatprep.mubr.msk.f32.mxu0 %vm28339_vm1, %v28338_v0  ;;  %v230_v31 = vld [vmem:[%s37465_s0 + $0xe5] sm:$0xff]  ;;  %v231_v32 = vld [vmem:[%s37465_s0 + $0xed] sm:$0xff] }
  0x11   :  { %59 = vst.msk [vmem:[#allocation2 + $0x100] sm:$0xff] %vm26_vm0, %v28338_v0  ;;  %60 = vst.msk [vmem:[#allocation2 + $0x108] sm:$0xff] %vm26_vm0, %v28338_v0  ;;  %v232_v33 = vld [vmem:[%s37465_s0 + $0xf5] sm:$0xff]  ;;  %v233_v34 = vld [vmem:[%s37465_s0 + $0xfd] sm:$0xff] }
  0x12   :  { %61 = vst.msk [vmem:[#allocation2 + $0x110] sm:$0xff] %vm26_vm0, %v28338_v0  ;;  %62 = vst.msk [vmem:[#allocation2 + $0x118] sm:$0xff] %vm26_vm0, %v28338_v0  ;;  %v234_v35 = vld [vmem:[%s37465_s0 + $0x105] sm:$0xff]  ;;  %v235_v36 = vld [vmem:[%s37465_s0 + $0x10d] sm:$0xff] }
  0x13   :  { %63 = vst.msk [vmem:[#allocation2 + $0x120] sm:$0xff] %vm26_vm0, %v28338_v0  ;;  %64 = vst.msk [vmem:[#allocation2 + $0x128] sm:$0xff] %vm26_vm0, %v28338_v0  ;;  %20813 = vmatmul.mubr.msk.f32.gmra.mrb[8].mxu0 %vm26_vm0, %v206_v7  ;;  %v236_v37 = vld [vmem:[%s37465_s0 + $0x115] sm:$0xff]  ;;  %v237_v38 = vld [vmem:[%s37465_s0 + $0x11d] sm:$0xff] }
  0x14   :  { %65 = vst.msk [vmem:[#allocation2 + $0x130] sm:$0xff] %vm26_vm0, %v28338_v0  ;;  %66 = vst.msk [vmem:[#allocation2 + $0x138] sm:$0xff] %vm26_vm0, %v28338_v0  ;;  %20815 = vmatprep.mubr.msk.f32.mxu0 %vm28339_vm1, %v28338_v0  ;;  %v238_v39 = vld [vmem:[%s37465_s0 + $0x125] sm:$0xff]  ;;  %v239_v40 = vld [vmem:[%s37465_s0 + $0x12d] sm:$0xff] }
  0x15   :  { %67 = vst.msk [vmem:[#allocation2 + $0x140] sm:$0xff] %vm26_vm0, %v28338_v0  ;;  %68 = vst.msk [vmem:[#allocation2 + $0x148] sm:$0xff] %vm26_vm0, %v28338_v0  ;;  %v240_v41 = vld [vmem:[%s37465_s0 + $0x135] sm:$0xff]  ;;  %v241_v42 = vld [vmem:[%s37465_s0 + $0x13d] sm:$0xff] }
  0x16   :  { %69 = vst.msk [vmem:[#allocation2 + $0x150] sm:$0xff] %vm26_vm0, %v28338_v0  ;;  %70 = vst.msk [vmem:[#allocation2 + $0x158] sm:$0xff] %vm26_vm0, %v28338_v0  ;;  %v242_v43 = vld [vmem:[%s37465_s0 + $0x145] sm:$0xff]  ;;  %v243_v44 = vld [vmem:[%s37465_s0 + $0x14d] sm:$0xff] }
  0x17   :  { %71 = vst.msk [vmem:[#allocation2 + $0x160] sm:$0xff] %vm26_vm0, %v28338_v0  ;;  %72 = vst.msk [vmem:[#allocation2 + $0x168] sm:$0xff] %vm26_vm0, %v28338_v0  ;;  %20816 = vmatmul.mubr.msk.f32.gmra.mrb[10].mxu0 %vm26_vm0, %v207_v8  ;;  %v244_v45 = vld [vmem:[%s37465_s0 + $0x155] sm:$0xff]  ;;  %v245_v46 = vld [vmem:[%s37465_s0 + $0x15d] sm:$0xff] }
  0x18   :  { %73 = vst.msk [vmem:[#allocation2 + $0x170] sm:$0xff] %vm26_vm0, %v28338_v0  ;;  %74 = vst.msk [vmem:[#allocation2 + $0x178] sm:$0xff] %vm26_vm0, %v28338_v0  ;;  %20818 = vmatprep.mubr.msk.f32.mxu0 %vm28339_vm1, %v28338_v0  ;;  %v246_v47 = vld [vmem:[%s37465_s0 + $0x165] sm:$0xff]  ;;  %v247_v48 = vld [vmem:[%s37465_s0 + $0x16d] sm:$0xff] }
  0x19   :  { %75 = vst.msk [vmem:[#allocation2 + $0x180] sm:$0xff] %vm26_vm0, %v28338_v0  ;;  %76 = vst.msk [vmem:[#allocation2 + $0x188] sm:$0xff] %vm26_vm0, %v28338_v0  ;;  %v248_v49 = vld [vmem:[%s37465_s0 + $0x175] sm:$0xff]  ;;  %v249_v50 = vld [vmem:[%s37465_s0 + $0x17d] sm:$0xff] }
  0x1a   :  { %77 = vst.msk [vmem:[#allocation2 + $0x190] sm:$0xff] %vm26_vm0, %v28338_v0  ;;  %78 = vst.msk [vmem:[#allocation2 + $0x198] sm:$0xff] %vm26_vm0, %v28338_v0  ;;  %v250_v51 = vld [vmem:[%s37465_s0 + $0x185] sm:$0xff]  ;;  %v251_v52 = vld [vmem:[%s37465_s0 + $0x18d] sm:$0xff] }
  0x1b   :  { %79 = vst.msk [vmem:[#allocation2 + $0x1a0] sm:$0xff] %vm26_vm0, %v28338_v0  ;;  %80 = vst.msk [vmem:[#allocation2 + $0x1a8] sm:$0xff] %vm26_vm0, %v28338_v0  ;;  %20819 = vmatmul.mubr.msk.f32.gmra.mrb[12].mxu0 %vm26_vm0, %v208_v9  ;;  %v252_v53 = vld [vmem:[%s37465_s0 + $0x195] sm:$0xff]  ;;  %v253_v54 = vld [vmem:[%s37465_s0 + $0x19d] sm:$0xff] }
  0x1c   :  { %81 = vst.msk [vmem:[#allocation2 + $0x1b0] sm:$0xff] %vm26_vm0, %v28338_v0  ;;  %82 = vst.msk [vmem:[#allocation2 + $0x1b8] sm:$0xff] %vm26_vm0, %v28338_v0  ;;  %20821 = vmatprep.mubr.msk.f32.mxu0 %vm28339_vm1, %v28338_v0  ;;  %v254_v55 = vld [vmem:[%s37465_s0 + $0x1a5] sm:$0xff]  ;;  %v255_v56 = vld [vmem:[%s37465_s0 + $0x1ad] sm:$0xff] }
  0x1d   :  { %83 = vst.msk [vmem:[#allocation2 + $0x1c0] sm:$0xff] %vm26_vm0, %v28338_v0  ;;  %84 = vst.msk [vmem:[#allocation2 + $0x1c8] sm:$0xff] %vm26_vm0, %v28338_v0  ;;  %v256_v57 = vld [vmem:[%s37465_s0 + $0x1b5] sm:$0xff]  ;;  %v257_v58 = vld [vmem:[%s37465_s0 + $0x1bd] sm:$0xff] }
  0x1e   :  { %85 = vst.msk [vmem:[#allocation2 + $0x1d0] sm:$0xff] %vm26_vm0, %v28338_v0  ;;  %86 = vst.msk [vmem:[#allocation2 + $0x1d8] sm:$0xff] %vm26_vm0, %v28338_v0  ;;  %v258_v59 = vld [vmem:[%s37465_s0 + $0x1c5] sm:$0xff]  ;;  %v259_v60 = vld [vmem:[%s37465_s0 + $0x1cd] sm:$0xff] }
  0x1f   :  { %87 = vst.msk [vmem:[#allocation2 + $0x1e0] sm:$0xff] %vm26_vm0, %v28338_v0  ;;  %88 = vst.msk [vmem:[#allocation2 + $0x1e8] sm:$0xff] %vm26_vm0, %v28338_v0  ;;  %20822 = vmatmul.mubr.msk.f32.gmra.mrb[14].mxu0 %vm26_vm0, %v209_v10  ;;  %v260_v61 = vld [vmem:[%s37465_s0 + $0x1d5] sm:$0xff]  ;;  %v261_v62 = vld [vmem:[%s37465_s0 + $0x1dd] sm:$0xff] }
  0x20   :  { %89 = vst.msk [vmem:[#allocation2 + $0x1f0] sm:$0xff] %vm26_vm0, %v28338_v0  ;;  %90 = vst.msk [vmem:[#allocation2 + $0x1f8] sm:$0xff] %vm26_vm0, %v28338_v0  ;;  %20824 = vmatprep.mubr.msk.f32.mxu0 %vm28339_vm1, %v28338_v0  ;;  %v262_v63 = vld [vmem:[%s37465_s0 + $0x1e5] sm:$0xff]  ;;  %v263_v1 = vld [vmem:[%s37465_s0 + $0x1ed] sm:$0xff] }
  0x21   :  { %91 = vst.msk [vmem:[#allocation2 + $0x200] sm:$0xff] %vm26_vm0, %v28338_v0  ;;  %92 = vst.msk [vmem:[#allocation2 + $0x208] sm:$0xff] %vm26_vm0, %v28338_v0  ;;  %v264_v2 = vld [vmem:[%s37465_s0 + $0x1f5] sm:$0xff]  ;;  %v265_v3 = vld [vmem:[%s37465_s0 + $0x1fd] sm:$0xff] }
  0x22   :  { %93 = vst.msk [vmem:[#allocation2 + $0x210] sm:$0xff] %vm26_vm0, %v28338_v0  ;;  %94 = vst.msk [vmem:[#allocation2 + $0x218] sm:$0xff] %vm26_vm0, %v28338_v0  ;;  %v266_v4 = vld [vmem:[%s37465_s0 + $0x205] sm:$0xff]  ;;  %v267_v5 = vld [vmem:[%s37465_s0 + $0x20d] sm:$0xff] }
  0x23   :  { %95 = vst.msk [vmem:[#allocation2 + $0x220] sm:$0xff] %vm26_vm0, %v28338_v0  ;;  %96 = vst.msk [vmem:[#allocation2 + $0x228] sm:$0xff] %vm26_vm0, %v28338_v0  ;;  %20825 = vmatmul.mubr.msk.f32.gmra.mrb[16].mxu0 %vm26_vm0, %v210_v11  ;;  %v268_v6 = vld [vmem:[%s37465_s0 + $0x215] sm:$0xff]  ;;  %v269_v7 = vld [vmem:[%s37465_s0 + $0x21d] sm:$0xff] }
  0x24   :  { %97 = vst.msk [vmem:[#allocation2 + $0x230] sm:$0xff] %vm26_vm0, %v28338_v0  ;;  %98 = vst.msk [vmem:[#allocation2 + $0x238] sm:$0xff] %vm26_vm0, %v28338_v0  ;;  %20827 = vmatprep.mubr.msk.f32.mxu0 %vm28339_vm1, %v28338_v0  ;;  %v270_v8 = vld [vmem:[%s37465_s0 + $0x225] sm:$0xff]  ;;  %v271_v9 = vld [vmem:[%s37465_s0 + $0x22d] sm:$0xff] }
  0x25   :  { %99 = vst.msk [vmem:[#allocation2 + $0x240] sm:$0xff] %vm26_vm0, %v28338_v0  ;;  %100 = vst.msk [vmem:[#allocation2 + $0x248] sm:$0xff] %vm26_vm0, %v28338_v0  ;;  %v272_v10 = vld [vmem:[%s37465_s0 + $0x235] sm:$0xff]  ;;  %v273_v11 = vld [vmem:[%s37465_s0 + $0x23d] sm:$0xff] }
  0x26   :  { %101 = vst.msk [vmem:[#allocation2 + $0x250] sm:$0xff] %vm26_vm0, %v28338_v0  ;;  %102 = vst.msk [vmem:[#allocation2 + $0x258] sm:$0xff] %vm26_vm0, %v28338_v0 }
  0x27   :  { %103 = vst.msk [vmem:[#allocation2 + $0x260] sm:$0xff] %vm26_vm0, %v28338_v0  ;;  %104 = vst.msk [vmem:[#allocation2 + $0x268] sm:$0xff] %vm26_vm0, %v28338_v0  ;;  %20828 = vmatmul.mubr.msk.f32.gmra.mrb[18].mxu0 %vm26_vm0, %v211_v12  ;;  %v274_v12 = vld [vmem:[%s37465_s0 + $0x245] sm:$0xff] }
  0x28   :  { %105 = vst.msk [vmem:[#allocation2 + $0x270] sm:$0xff] %vm26_vm0, %v28338_v0  ;;  %106 = vst.msk [vmem:[#allocation2 + $0x278] sm:$0xff] %vm26_vm0, %v28338_v0  ;;  %20830 = vmatprep.mubr.msk.f32.mxu0 %vm28339_vm1, %v28338_v0 }
  0x29   :  { %107 = vst.msk [vmem:[#allocation2 + $0x280] sm:$0xff] %vm26_vm0, %v28338_v0  ;;  %108 = vst.msk [vmem:[#allocation2 + $0x288] sm:$0xff] %vm26_vm0, %v28338_v0 }
  0x2a   :  { %109 = vst.msk [vmem:[#allocation2 + $0x290] sm:$0xff] %vm26_vm0, %v28338_v0  ;;  %110 = vst.msk [vmem:[#allocation2 + $0x298] sm:$0xff] %vm26_vm0, %v28338_v0 }
  0x2b   :  { %111 = vst.msk [vmem:[#allocation2 + $0x2a0] sm:$0xff] %vm26_vm0, %v28338_v0  ;;  %112 = vst.msk [vmem:[#allocation2 + $0x2a8] sm:$0xff] %vm26_vm0, %v28338_v0  ;;  %20831 = vmatmul.mubr.msk.f32.gmra.mrb[20].mxu0 %vm26_vm0, %v212_v13  ;;  %v275_v13 = vld [vmem:[%s37465_s0 + $0x24d] sm:$0xff] }
  0x2c   :  { %113 = vst.msk [vmem:[#allocation2 + $0x2b0] sm:$0xff] %vm26_vm0, %v28338_v0  ;;  %20833 = vmatprep.mubr.msk.f32.mxu0 %vm28339_vm1, %v28338_v0 }
  0x2f   :  { %20834 = vmatmul.mubr.msk.f32.gmra.mrb[22].mxu0 %vm26_vm0, %v213_v14  ;;  %v276_v14 = vld [vmem:[%s37465_s0 + $0x255] sm:$0xff] }
  0x30   :  { %20836 = vmatprep.mubr.msk.f32.mxu0 %vm28339_vm1, %v28338_v0 }
  0x33   :  { %20837 = vmatmul.mubr.msk.f32.gmra.mrb[24].mxu0 %vm26_vm0, %v214_v15  ;;  %v277_v15 = vld [vmem:[%s37465_s0 + $0x25d] sm:$0xff] }
  0x34   :  { %20839 = vmatprep.mubr.msk.f32.mxu0 %vm28339_vm1, %v28338_v0 }
  0x37   :  { %20840 = vmatmul.mubr.msk.f32.gmra.mrb[26].mxu0 %vm26_vm0, %v215_v16  ;;  %v278_v16 = vld [vmem:[%s37465_s0 + $0x265] sm:$0xff] }
  0x38   :  { %20842 = vmatprep.mubr.msk.f32.mxu0 %vm28339_vm1, %v28338_v0 }
  0x3b   :  { %20843 = vmatmul.mubr.msk.f32.gmra.mrb[28].mxu0 %vm26_vm0, %v216_v17  ;;  %v279_v17 = vld [vmem:[%s37465_s0 + $0x26d] sm:$0xff] }
  0x3c   :  { %20845 = vmatprep.mubr.msk.f32.mxu0 %vm28339_vm1, %v28338_v0 }
  0x3f   :  { %20846 = vmatmul.mubr.msk.f32.gmra.mrb[30].mxu0 %vm26_vm0, %v217_v18  ;;  %v280_v18 = vld [vmem:[%s37465_s0 + $0x275] sm:$0xff] }
  0x40   :  { %20848 = vmatprep.mubr.msk.f32.mxu0 %vm28339_vm1, %v28338_v0 }
  0x43   :  { %20849 = vmatmul.mubr.msk.f32.gmra.mrb[32].mxu0 %vm26_vm0, %v218_v19  ;;  %v281_v19 = vld [vmem:[%s37465_s0 + $0x27d] sm:$0xff] }
  0x44   :  { %20851 = vmatprep.mubr.msk.f32.mxu0 %vm28339_vm1, %v28338_v0 }
  0x47   :  { %20852 = vmatmul.mubr.msk.f32.gmra.mrb[34].mxu0 %vm26_vm0, %v219_v20  ;;  %v282_v20 = vld [vmem:[%s37465_s0 + $0x285] sm:$0xff] }
  0x48   :  { %20854 = vmatprep.mubr.msk.f32.mxu0 %vm28339_vm1, %v28338_v0 }
  0x4b   :  { %20855 = vmatmul.mubr.msk.f32.gmra.mrb[36].mxu0 %vm26_vm0, %v220_v21  ;;  %v1078_v21 = vld [vmem:[%s37465_s0 + $0x6] sm:$0xff] }
  0x4c   :  { %20857 = vmatprep.mubr.msk.f32.mxu0 %vm28339_vm1, %v28338_v0 }
  0x4f   :  { %20858 = vmatmul.mubr.msk.f32.gmra.mrb[38].mxu0 %vm26_vm0, %v221_v22  ;;  %v17847_v22 = vld [vmem:[%s37464_s2 + $0x10] sm:$0xff] }
  0x50   :  { %20860 = vmatprep.mubr.msk.f32.mxu0 %vm28339_vm1, %v28338_v0 }
  0x53   :  { %20861 = vmatmul.mubr.msk.f32.gmra.mrb[40].mxu0 %vm26_vm0, %v222_v23  ;;  %v1079_v23 = vld [vmem:[%s37465_s0 + $0xe] sm:$0xff] }
  0x54   :  { %20863 = vmatprep.mubr.msk.f32.mxu0 %vm28339_vm1, %v28338_v0 }
  0x57   :  { %20864 = vmatmul.mubr.msk.f32.gmra.mrb[42].mxu0 %vm26_vm0, %v223_v24  ;;  %v1080_v24 = vld [vmem:[%s37465_s0 + $0x16] sm:$0xff] }
  0x58   :  { %20866 = vmatprep.mubr.msk.f32.mxu0 %vm28339_vm1, %v28338_v0 }
  0x5b   :  { %20867 = vmatmul.mubr.msk.f32.gmra.mrb[44].mxu0 %vm26_vm0, %v224_v25  ;;  %v1081_v25 = vld [vmem:[%s37465_s0 + $0x1e] sm:$0xff] }
  0x5c   :  { %20869 = vmatprep.mubr.msk.f32.mxu0 %vm28339_vm1, %v28338_v0 }
  0x5f   :  { %20870 = vmatmul.mubr.msk.f32.gmra.mrb[46].mxu0 %vm26_vm0, %v225_v26  ;;  %v1082_v26 = vld [vmem:[%s37465_s0 + $0x26] sm:$0xff] }
  0x60   :  { %20872 = vmatprep.mubr.msk.f32.mxu0 %vm28339_vm1, %v28338_v0 }
  0x63   :  { %20873 = vmatmul.mubr.msk.f32.gmra.mrb[48].mxu0 %vm26_vm0, %v226_v27  ;;  %v1083_v27 = vld [vmem:[%s37465_s0 + $0x2e] sm:$0xff] }
  0x64   :  { %20875 = vmatprep.mubr.msk.f32.mxu0 %vm28339_vm1, %v28338_v0 }
  0x67   :  { %20876 = vmatmul.mubr.msk.f32.gmra.mrb[50].mxu0 %vm26_vm0, %v227_v28  ;;  %v1084_v28 = vld [vmem:[%s37465_s0 + $0x36] sm:$0xff] }
  0x68   :  { %20878 = vmatprep.mubr.msk.f32.mxu0 %vm28339_vm1, %v28338_v0 }
  0x6b   :  { %20879 = vmatmul.mubr.msk.f32.gmra.mrb[52].mxu0 %vm26_vm0, %v228_v29  ;;  %v1085_v29 = vld [vmem:[%s37465_s0 + $0x3e] sm:$0xff] }
  0x6c   :  { %20881 = vmatprep.mubr.msk.f32.mxu0 %vm28339_vm1, %v28338_v0 }
  0x6f   :  { %20882 = vmatmul.mubr.msk.f32.gmra.mrb[54].mxu0 %vm26_vm0, %v229_v30  ;;  %v1086_v30 = vld [vmem:[%s37465_s0 + $0x46] sm:$0xff] }
  0x70   :  { %20884 = vmatprep.mubr.msk.f32.mxu0 %vm28339_vm1, %v28338_v0 }
  0x73   :  { %20885 = vmatmul.mubr.msk.f32.gmra.mrb[56].mxu0 %vm26_vm0, %v230_v31  ;;  %v1087_v31 = vld [vmem:[%s37465_s0 + $0x4e] sm:$0xff] }
  0x74   :  { %20887 = vmatprep.mubr.msk.f32.mxu0 %vm28339_vm1, %v28338_v0 }
  0x77   :  { %20888 = vmatmul.mubr.msk.f32.gmra.mrb[58].mxu0 %vm26_vm0, %v231_v32  ;;  %v1088_v32 = vld [vmem:[%s37465_s0 + $0x56] sm:$0xff] }
  0x78   :  { %20890 = vmatprep.mubr.msk.f32.mxu0 %vm28339_vm1, %v28338_v0 }
  0x7b   :  { %20891 = vmatmul.mubr.msk.f32.gmra.mrb[60].mxu0 %vm26_vm0, %v232_v33  ;;  %v1089_v33 = vld [vmem:[%s37465_s0 + $0x5e] sm:$0xff] }
  0x7c   :  { %20893 = vmatprep.mubr.msk.f32.mxu0 %vm28339_vm1, %v28338_v0 }
  0x7f   :  { %20894 = vmatmul.mubr.msk.f32.gmra.mrb[62].mxu0 %vm26_vm0, %v233_v34  ;;  %v1090_v34 = vld [vmem:[%s37465_s0 + $0x66] sm:$0xff] }
  0x80   :  { %20896 = vmatprep.mubr.msk.f32.mxu0 %vm28339_vm1, %v28338_v0 }
  0x83   :  { %20897 = vmatmul.mubr.msk.f32.gmra.mrb[64].mxu0 %vm26_vm0, %v234_v35  ;;  %v1091_v35 = vld [vmem:[%s37465_s0 + $0x6e] sm:$0xff] }
  0x84   :  { %20899 = vmatprep.mubr.msk.f32.mxu0 %vm28339_vm1, %v28338_v0 }
  0x87   :  { %20900 = vmatmul.mubr.msk.f32.gmra.mrb[66].mxu0 %vm26_vm0, %v235_v36  ;;  %v1092_v36 = vld [vmem:[%s37465_s0 + $0x76] sm:$0xff] }
  0x88   :  { %20902 = vmatprep.mubr.msk.f32.mxu0 %vm28339_vm1, %v28338_v0 }
  0x8b   :  { %20903 = vmatmul.mubr.msk.f32.gmra.mrb[68].mxu0 %vm26_vm0, %v236_v37  ;;  %v1093_v37 = vld [vmem:[%s37465_s0 + $0x7e] sm:$0xff] }
  0x8c   :  { %20905 = vmatprep.mubr.msk.f32.mxu0 %vm28339_vm1, %v28338_v0 }
  0x8f   :  { %20906 = vmatmul.mubr.msk.f32.gmra.mrb[70].mxu0 %vm26_vm0, %v237_v38  ;;  %v1094_v38 = vld [vmem:[%s37465_s0 + $0x86] sm:$0xff] }
  0x90   :  { %20908 = vmatprep.mubr.msk.f32.mxu0 %vm28339_vm1, %v28338_v0 }
  0x93   :  { %20909 = vmatmul.mubr.msk.f32.gmra.mrb[72].mxu0 %vm26_vm0, %v238_v39  ;;  %v1095_v39 = vld [vmem:[%s37465_s0 + $0x8e] sm:$0xff] }
  0x94   :  { %20911 = vmatprep.mubr.msk.f32.mxu0 %vm28339_vm1, %v28338_v0 }
  0x97   :  { %20912 = vmatmul.mubr.msk.f32.gmra.mrb[74].mxu0 %vm26_vm0, %v239_v40  ;;  %v1096_v40 = vld [vmem:[%s37465_s0 + $0x96] sm:$0xff] }
  0x98   :  { %20914 = vmatprep.mubr.msk.f32.mxu0 %vm28339_vm1, %v28338_v0 }
  0x9b   :  { %20915 = vmatmul.mubr.msk.f32.gmra.mrb[76].mxu0 %vm26_vm0, %v240_v41  ;;  %v1097_v41 = vld [vmem:[%s37465_s0 + $0x9e] sm:$0xff] }
  0x9c   :  { %20917 = vmatprep.mubr.msk.f32.mxu0 %vm28339_vm1, %v28338_v0 }
  0x9f   :  { %20918 = vmatmul.mubr.msk.f32.gmra.mrb[78].mxu0 %vm26_vm0, %v241_v42  ;;  %v1098_v42 = vld [vmem:[%s37465_s0 + $0xa6] sm:$0xff] }
  0xa0   :  { %20920 = vmatprep.mubr.msk.f32.mxu0 %vm28339_vm1, %v28338_v0 }
  0xa3   :  { %20921 = vmatmul.mubr.msk.f32.gmra.mrb[80].mxu0 %vm26_vm0, %v242_v43  ;;  %v1099_v43 = vld [vmem:[%s37465_s0 + $0xae] sm:$0xff] }
  0xa4   :  { %20923 = vmatprep.mubr.msk.f32.mxu0 %vm28339_vm1, %v28338_v0 }
  0xa7   :  { %20924 = vmatmul.mubr.msk.f32.gmra.mrb[82].mxu0 %vm26_vm0, %v243_v44  ;;  %v1100_v44 = vld [vmem:[%s37465_s0 + $0xb6] sm:$0xff] }
  0xa8   :  { %20926 = vmatprep.mubr.msk.f32.mxu0 %vm28339_vm1, %v28338_v0 }
  0xab   :  { %20927 = vmatmul.mubr.msk.f32.gmra.mrb[84].mxu0 %vm26_vm0, %v244_v45  ;;  %v1101_v45 = vld [vmem:[%s37465_s0 + $0xbe] sm:$0xff] }
  0xac   :  { %20929 = vmatprep.mubr.msk.f32.mxu0 %vm28339_vm1, %v28338_v0 }
  0xaf   :  { %20930 = vmatmul.mubr.msk.f32.gmra.mrb[86].mxu0 %vm26_vm0, %v245_v46  ;;  %v1102_v46 = vld [vmem:[%s37465_s0 + $0xc6] sm:$0xff] }
  0xb0   :  { %20932 = vmatprep.mubr.msk.f32.mxu0 %vm28339_vm1, %v28338_v0 }
  0xb3   :  { %20933 = vmatmul.mubr.msk.f32.gmra.mrb[88].mxu0 %vm26_vm0, %v246_v47  ;;  %v1103_v47 = vld [vmem:[%s37465_s0 + $0xce] sm:$0xff] }
  0xb4   :  { %20935 = vmatprep.mubr.msk.f32.mxu0 %vm28339_vm1, %v28338_v0 }
  0xb7   :  { %20936 = vmatmul.mubr.msk.f32.gmra.mrb[90].mxu0 %vm26_vm0, %v247_v48  ;;  %v1104_v48 = vld [vmem:[%s37465_s0 + $0xd6] sm:$0xff] }
  0xb8   :  { %20938 = vmatprep.mubr.msk.f32.mxu0 %vm28339_vm1, %v28338_v0 }
  0xbb   :  { %20939 = vmatmul.mubr.msk.f32.gmra.mrb[92].mxu0 %vm26_vm0, %v248_v49  ;;  %v1105_v49 = vld [vmem:[%s37465_s0 + $0xde] sm:$0xff] }
  0xbc   :  { %20941 = vmatprep.mubr.msk.f32.mxu0 %vm28339_vm1, %v28338_v0 }
  0xbf   :  { %20942 = vmatmul.mubr.msk.f32.gmra.mrb[94].mxu0 %vm26_vm0, %v249_v50  ;;  %v1106_v50 = vld [vmem:[%s37465_s0 + $0xe6] sm:$0xff] }
  0xc0   :  { %20944 = vmatprep.mubr.msk.f32.mxu0 %vm28339_vm1, %v28338_v0 }
  0xc3   :  { %20945 = vmatmul.mubr.msk.f32.gmra.mrb[96].mxu0 %vm26_vm0, %v250_v51  ;;  %v1107_v51 = vld [vmem:[%s37465_s0 + $0xee] sm:$0xff] }
  0xc4   :  { %20947 = vmatprep.mubr.msk.f32.mxu0 %vm28339_vm1, %v28338_v0 }
  0xc7   :  { %20948 = vmatmul.mubr.msk.f32.gmra.mrb[98].mxu0 %vm26_vm0, %v251_v52  ;;  %v1108_v52 = vld [vmem:[%s37465_s0 + $0xf6] sm:$0xff] }
  0xc8   :  { %20950 = vmatprep.mubr.msk.f32.mxu0 %vm28339_vm1, %v28338_v0 }
  0xcb   :  { %20951 = vmatmul.mubr.msk.f32.gmra.mrb[100].mxu0 %vm26_vm0, %v252_v53  ;;  %v1109_v53 = vld [vmem:[%s37465_s0 + $0xfe] sm:$0xff] }
  0xcc   :  { %20953 = vmatprep.mubr.msk.f32.mxu0 %vm28339_vm1, %v28338_v0 }
  0xcf   :  { %20954 = vmatmul.mubr.msk.f32.gmra.mrb[102].mxu0 %vm26_vm0, %v253_v54  ;;  %v1110_v54 = vld [vmem:[%s37465_s0 + $0x106] sm:$0xff] }
  0xd0   :  { %20956 = vmatprep.mubr.msk.f32.mxu0 %vm28339_vm1, %v28338_v0 }
  0xd3   :  { %20957 = vmatmul.mubr.msk.f32.gmra.mrb[104].mxu0 %vm26_vm0, %v254_v55  ;;  %v1111_v55 = vld [vmem:[%s37465_s0 + $0x10e] sm:$0xff] }
  0xd4   :  { %20959 = vmatprep.mubr.msk.f32.mxu0 %vm28339_vm1, %v28338_v0 }
  0xd7   :  { %20960 = vmatmul.mubr.msk.f32.gmra.mrb[106].mxu0 %vm26_vm0, %v255_v56  ;;  %v1112_v56 = vld [vmem:[%s37465_s0 + $0x116] sm:$0xff] }
  0xd8   :  { %20962 = vmatprep.mubr.msk.f32.mxu0 %vm28339_vm1, %v28338_v0 }
  0xdb   :  { %20963 = vmatmul.mubr.msk.f32.gmra.mrb[108].mxu0 %vm26_vm0, %v256_v57  ;;  %v1113_v57 = vld [vmem:[%s37465_s0 + $0x11e] sm:$0xff] }
  0xdc   :  { %20965 = vmatprep.mubr.msk.f32.mxu0 %vm28339_vm1, %v28338_v0 }
  0xdf   :  { %20966 = vmatmul.mubr.msk.f32.gmra.mrb[110].mxu0 %vm26_vm0, %v257_v58  ;;  %v1114_v58 = vld [vmem:[%s37465_s0 + $0x126] sm:$0xff] }
  0xe0   :  { %20968 = vmatprep.mubr.msk.f32.mxu0 %vm28339_vm1, %v28338_v0 }
  0xe3   :  { %20969 = vmatmul.mubr.msk.f32.gmra.mrb[112].mxu0 %vm26_vm0, %v258_v59  ;;  %v1115_v59 = vld [vmem:[%s37465_s0 + $0x12e] sm:$0xff] }
  0xe4   :  { %20971 = vmatprep.mubr.msk.f32.mxu0 %vm28339_vm1, %v28338_v0 }
  0xe7   :  { %20972 = vmatmul.mubr.msk.f32.gmra.mrb[114].mxu0 %vm26_vm0, %v259_v60  ;;  %v1116_v60 = vld [vmem:[%s37465_s0 + $0x136] sm:$0xff] }
  0xe8   :  { %20974 = vmatprep.mubr.msk.f32.mxu0 %vm28339_vm1, %v28338_v0 }
  0xeb   :  { %20975 = vmatmul.mubr.msk.f32.gmra.mrb[116].mxu0 %vm26_vm0, %v260_v61  ;;  %v1117_v61 = vld [vmem:[%s37465_s0 + $0x13e] sm:$0xff] }
  0xec   :  { %20977 = vmatprep.mubr.msk.f32.mxu0 %vm28339_vm1, %v28338_v0 }
  0xef   :  { %20978 = vmatmul.mubr.msk.f32.gmra.mrb[118].mxu0 %vm26_vm0, %v261_v62  ;;  %v1118_v62 = vld [vmem:[%s37465_s0 + $0x146] sm:$0xff] }
  0xf0   :  { %20980 = vmatprep.mubr.msk.f32.mxu0 %vm28339_vm1, %v28338_v0 }
  0xf3   :  { %20981 = vmatmul.mubr.msk.f32.gmra.mrb[120].mxu0 %vm26_vm0, %v262_v63  ;;  %v1119_v63 = vld [vmem:[%s37465_s0 + $0x14e] sm:$0xff] }
  0xf4   :  { %20983 = vmatprep.mubr.msk.f32.mxu0 %vm28339_vm1, %v28338_v0 }
  0xf7   :  { %20984 = vmatmul.mubr.msk.f32.gmra.mrb[122].mxu0 %vm26_vm0, %v263_v1  ;;  %v1120_v1 = vld [vmem:[%s37465_s0 + $0x156] sm:$0xff] }
  0xf8   :  { %20986 = vmatprep.mubr.msk.f32.mxu0 %vm28339_vm1, %v28338_v0 }
  0xfb   :  { %20987 = vmatmul.mubr.msk.f32.gmra.mrb[124].mxu0 %vm26_vm0, %v264_v2  ;;  %v1121_v2 = vld [vmem:[%s37465_s0 + $0x15e] sm:$0xff] }
  0xfc   :  { %20989 = vmatprep.mubr.msk.f32.mxu0 %vm28339_vm1, %v28338_v0 }
  0xff   :  { %20990 = vmatmul.mubr.msk.f32.gmra.mrb[126].mxu0 %vm26_vm0, %v265_v3  ;;  %v1122_v3 = vld [vmem:[%s37465_s0 + $0x166] sm:$0xff] }
 0x100   :  { %20992 = vmatprep.mubr.msk.f32.mxu0 %vm28339_vm1, %v28338_v0 }
 0x103   :  { %20993 = vmatmul.mubr.msk.f32.gmra.mrb[128].mxu0 %vm26_vm0, %v266_v4  ;;  %v1123_v4 = vld [vmem:[%s37465_s0 + $0x16e] sm:$0xff] }
 0x104   :  { %20995 = vmatprep.mubr.msk.f32.mxu0 %vm28339_vm1, %v28338_v0 }
 0x107   :  { %20996 = vmatmul.mubr.msk.f32.gmra.mrb[130].mxu0 %vm26_vm0, %v267_v5  ;;  %v1124_v5 = vld [vmem:[%s37465_s0 + $0x176] sm:$0xff] }
 0x108   :  { %20998 = vmatprep.mubr.msk.f32.mxu0 %vm28339_vm1, %v28338_v0 }
 0x10b   :  { %20999 = vmatmul.mubr.msk.f32.gmra.mrb[132].mxu0 %vm26_vm0, %v268_v6  ;;  %v1125_v6 = vld [vmem:[%s37465_s0 + $0x17e] sm:$0xff] }
 0x10c   :  { %21001 = vmatprep.mubr.msk.f32.mxu0 %vm28339_vm1, %v28338_v0 }
 0x10f   :  { %21002 = vmatmul.mubr.msk.f32.gmra.mrb[134].mxu0 %vm26_vm0, %v269_v7  ;;  %v1126_v7 = vld [vmem:[%s37465_s0 + $0x186] sm:$0xff] }
 0x110   :  { %21004 = vmatprep.mubr.msk.f32.mxu0 %vm28339_vm1, %v28338_v0 }
 0x113   :  { %21005 = vmatmul.mubr.msk.f32.gmra.mrb[136].mxu0 %vm26_vm0, %v270_v8  ;;  %v1127_v8 = vld [vmem:[%s37465_s0 + $0x18e] sm:$0xff] }
 0x114   :  { %21007 = vmatprep.mubr.msk.f32.mxu0 %vm28339_vm1, %v28338_v0 }
 0x117   :  { %21008 = vmatmul.mubr.msk.f32.gmra.mrb[138].mxu0 %vm26_vm0, %v271_v9  ;;  %v1128_v9 = vld [vmem:[%s37465_s0 + $0x196] sm:$0xff] }
 0x118   :  { %21010 = vmatprep.mubr.msk.f32.mxu0 %vm28339_vm1, %v28338_v0 }
 0x11b   :  { %21011 = vmatmul.mubr.msk.f32.gmra.mrb[140].mxu0 %vm26_vm0, %v272_v10  ;;  %v1129_v10 = vld [vmem:[%s37465_s0 + $0x19e] sm:$0xff] }
 0x11c   :  { %21013 = vmatprep.mubr.msk.f32.mxu0 %vm28339_vm1, %v28338_v0 }
 0x11f   :  { %21014 = vmatmul.mubr.msk.f32.gmra.mrb[142].mxu0 %vm26_vm0, %v273_v11  ;;  %v1130_v11 = vld [vmem:[%s37465_s0 + $0x1a6] sm:$0xff] }
 0x120   :  { %21016 = vmatprep.mubr.msk.f32.mxu0 %vm28339_vm1, %v28338_v0 }
 0x123   :  { %21017 = vmatmul.mubr.msk.f32.gmra.mrb[144].mxu0 %vm26_vm0, %v274_v12  ;;  %v1131_v12 = vld [vmem:[%s37465_s0 + $0x1ae] sm:$0xff] }
 0x124   :  { %21019 = vmatprep.mubr.msk.f32.mxu0 %vm28339_vm1, %v28338_v0 }
 0x127   :  { %21020 = vmatmul.mubr.msk.f32.gmra.mrb[146].mxu0 %vm26_vm0, %v275_v13  ;;  %v1132_v13 = vld [vmem:[%s37465_s0 + $0x1b6] sm:$0xff] }
 0x128   :  { %21022 = vmatprep.mubr.msk.f32.mxu0 %vm28339_vm1, %v28338_v0 }
 0x12b   :  { %21023 = vmatmul.mubr.msk.f32.gmra.mrb[148].mxu0 %vm26_vm0, %v276_v14  ;;  %v1133_v14 = vld [vmem:[%s37465_s0 + $0x1be] sm:$0xff] }
 0x12c   :  { %21025 = vmatprep.mubr.msk.f32.mxu0 %vm28339_vm1, %v28338_v0 }
 0x12f   :  { %21026 = vmatmul.mubr.msk.f32.gmra.mrb[150].mxu0 %vm26_vm0, %v277_v15  ;;  %v1134_v15 = vld [vmem:[%s37465_s0 + $0x1c6] sm:$0xff] }
 0x130   :  { %21028 = vmatprep.mubr.msk.f32.mxu0 %vm28339_vm1, %v28338_v0 }
 0x133   :  { %21029 = vmatmul.mubr.msk.f32.gmra.mrb[152].mxu0 %vm26_vm0, %v278_v16  ;;  %v1135_v16 = vld [vmem:[%s37465_s0 + $0x1ce] sm:$0xff] }
 0x134   :  { %21031 = vmatprep.mubr.msk.f32.mxu0 %vm28339_vm1, %v28338_v0 }
 0x137   :  { %21032 = vmatmul.mubr.msk.f32.gmra.mrb[154].mxu0 %vm26_vm0, %v279_v17  ;;  %v1136_v17 = vld [vmem:[%s37465_s0 + $0x1d6] sm:$0xff] }
 0x138   :  { %21034 = vmatprep.mubr.msk.f32.mxu0 %vm28339_vm1, %v28338_v0 }
 0x13b   :  { %21035 = vmatmul.mubr.msk.f32.gmra.mrb[156].mxu0 %vm26_vm0, %v280_v18  ;;  %v1137_v18 = vld [vmem:[%s37465_s0 + $0x1de] sm:$0xff] }
 0x13c   :  { %21037 = vmatprep.mubr.msk.f32.mxu0 %vm28339_vm1, %v28338_v0 }
 0x13f   :  { %21038 = vmatmul.mubr.msk.f32.gmra.mrb[158].mxu0 %vm26_vm0, %v281_v19  ;;  %v1138_v19 = vld [vmem:[%s37465_s0 + $0x1e6] sm:$0xff] }
 0x140   :  { %21040 = vmatprep.mubr.msk.f32.mxu0 %vm28339_vm1, %v28338_v0 }
 0x143   :  { %21041 = vmatmul.mubr.msk.f32.gmra.mrb[160].mxu0 %vm26_vm0, %v282_v20  ;;  %v1139_v20 = vld [vmem:[%s37465_s0 + $0x1ee] sm:$0xff] }
 0x144   :  { %21045 = vmatprep.mubr.msk.f32.mxu0 %vm28339_vm1, %v28338_v0 }
 0x147   :  { %21046 = vmatmul.mubr.msk.f32.vlgmr.msra.gmra.mrb[0].mxu0 %vm26_vm0, %v1078_v21  ;;  %v1140_v21 = vld [vmem:[%s37465_s0 + $0x1f6] sm:$0xff] }
 0x148   :  { %21289 = vmatpush3.msra.mxu0 %v17847_v22  ;;  %21048 = vmatprep.mubr.msk.f32.mxu0 %vm28339_vm1, %v28338_v0  ;;  %v1141_v22 = vld [vmem:[%s37465_s0 + $0x1fe] sm:$0xff] }
 0x149   :  { %21533 = vmatprep.subr.mxu0 %v28338_v0 }
 0x14b   :  { %21049 = vmatmul.mubr.msk.f32.gmra.mrb[2].mxu0 %vm26_vm0, %v1079_v23  ;;  %v1142_v23 = vld [vmem:[%s37465_s0 + $0x206] sm:$0xff] }
 0x14c   :  { %21051 = vmatprep.mubr.msk.f32.mxu0 %vm28339_vm1, %v28338_v0 }
 0x14f   :  { %21052 = vmatmul.mubr.msk.f32.gmra.mrb[4].mxu0 %vm26_vm0, %v1080_v24  ;;  %v1143_v24 = vld [vmem:[%s37465_s0 + $0x20e] sm:$0xff] }
 0x150   :  { %21054 = vmatprep.mubr.msk.f32.mxu0 %vm28339_vm1, %v28338_v0 }
 0x153   :  { %21055 = vmatmul.mubr.msk.f32.gmra.mrb[6].mxu0 %vm26_vm0, %v1081_v25  ;;  %v1144_v25 = vld [vmem:[%s37465_s0 + $0x216] sm:$0xff] }
 0x154   :  { %21057 = vmatprep.mubr.msk.f32.mxu0 %vm28339_vm1, %v28338_v0 }
 0x157   :  { %21058 = vmatmul.mubr.msk.f32.gmra.mrb[8].mxu0 %vm26_vm0, %v1082_v26  ;;  %v1145_v26 = vld [vmem:[%s37465_s0 + $0x21e] sm:$0xff] }
 0x158   :  { %21060 = vmatprep.mubr.msk.f32.mxu0 %vm28339_vm1, %v28338_v0 }
 0x15b   :  { %21061 = vmatmul.mubr.msk.f32.gmra.mrb[10].mxu0 %vm26_vm0, %v1083_v27  ;;  %v1146_v27 = vld [vmem:[%s37465_s0 + $0x226] sm:$0xff] }
 0x15c   :  { %21063 = vmatprep.mubr.msk.f32.mxu0 %vm28339_vm1, %v28338_v0 }
 0x15f   :  { %21064 = vmatmul.mubr.msk.f32.gmra.mrb[12].mxu0 %vm26_vm0, %v1084_v28  ;;  %v1147_v28 = vld [vmem:[%s37465_s0 + $0x22e] sm:$0xff] }
 0x160   :  { %21066 = vmatprep.mubr.msk.f32.mxu0 %vm28339_vm1, %v28338_v0 }
 0x163   :  { %21067 = vmatmul.mubr.msk.f32.gmra.mrb[14].mxu0 %vm26_vm0, %v1085_v29  ;;  %v1148_v29 = vld [vmem:[%s37465_s0 + $0x236] sm:$0xff] }
 0x164   :  { %21069 = vmatprep.mubr.msk.f32.mxu0 %vm28339_vm1, %v28338_v0 }
 0x167   :  { %21070 = vmatmul.mubr.msk.f32.gmra.mrb[16].mxu0 %vm26_vm0, %v1086_v30  ;;  %v1149_v30 = vld [vmem:[%s37465_s0 + $0x23e] sm:$0xff] }
 0x168   :  { %21072 = vmatprep.mubr.msk.f32.mxu0 %vm28339_vm1, %v28338_v0 }
 0x16b   :  { %21073 = vmatmul.mubr.msk.f32.gmra.mrb[18].mxu0 %vm26_vm0, %v1087_v31  ;;  %v1150_v31 = vld [vmem:[%s37465_s0 + $0x246] sm:$0xff] }
 0x16c   :  { %21075 = vmatprep.mubr.msk.f32.mxu0 %vm28339_vm1, %v28338_v0 }
 0x16f   :  { %21076 = vmatmul.mubr.msk.f32.gmra.mrb[20].mxu0 %vm26_vm0, %v1088_v32  ;;  %v1151_v32 = vld [vmem:[%s37465_s0 + $0x24e] sm:$0xff] }
 0x170   :  { %21078 = vmatprep.mubr.msk.f32.mxu0 %vm28339_vm1, %v28338_v0 }
 0x173   :  { %21079 = vmatmul.mubr.msk.f32.gmra.mrb[22].mxu0 %vm26_vm0, %v1089_v33  ;;  %v1152_v33 = vld [vmem:[%s37465_s0 + $0x256] sm:$0xff] }
 0x174   :  { %21081 = vmatprep.mubr.msk.f32.mxu0 %vm28339_vm1, %v28338_v0 }
 0x177   :  { %21082 = vmatmul.mubr.msk.f32.gmra.mrb[24].mxu0 %vm26_vm0, %v1090_v34  ;;  %v1153_v34 = vld [vmem:[%s37465_s0 + $0x25e] sm:$0xff] }
 0x178   :  { %21084 = vmatprep.mubr.msk.f32.mxu0 %vm28339_vm1, %v28338_v0 }
 0x17b   :  { %21085 = vmatmul.mubr.msk.f32.gmra.mrb[26].mxu0 %vm26_vm0, %v1091_v35  ;;  %v1154_v35 = vld [vmem:[%s37465_s0 + $0x266] sm:$0xff] }
 0x17c   :  { %21087 = vmatprep.mubr.msk.f32.mxu0 %vm28339_vm1, %v28338_v0 }
 0x17f   :  { %21088 = vmatmul.mubr.msk.f32.gmra.mrb[28].mxu0 %vm26_vm0, %v1092_v36  ;;  %v1155_v36 = vld [vmem:[%s37465_s0 + $0x26e] sm:$0xff] }
 0x180   :  { %21090 = vmatprep.mubr.msk.f32.mxu0 %vm28339_vm1, %v28338_v0 }
 0x183   :  { %21091 = vmatmul.mubr.msk.f32.gmra.mrb[30].mxu0 %vm26_vm0, %v1093_v37  ;;  %v1156_v37 = vld [vmem:[%s37465_s0 + $0x276] sm:$0xff] }
 0x184   :  { %21093 = vmatprep.mubr.msk.f32.mxu0 %vm28339_vm1, %v28338_v0 }
 0x187   :  { %21094 = vmatmul.mubr.msk.f32.gmra.mrb[32].mxu0 %vm26_vm0, %v1094_v38  ;;  %v1157_v38 = vld [vmem:[%s37465_s0 + $0x27e] sm:$0xff] }
 0x188   :  { %21096 = vmatprep.mubr.msk.f32.mxu0 %vm28339_vm1, %v28338_v0 }
 0x18b   :  { %21097 = vmatmul.mubr.msk.f32.gmra.mrb[34].mxu0 %vm26_vm0, %v1095_v39  ;;  %v1158_v39 = vld [vmem:[%s37465_s0 + $0x286] sm:$0xff] }
 0x18c   :  { %21099 = vmatprep.mubr.msk.f32.mxu0 %vm28339_vm1, %v28338_v0 }
 0x18f   :  { %21100 = vmatmul.mubr.msk.f32.gmra.mrb[36].mxu0 %vm26_vm0, %v1096_v40  ;;  %v1955_v40 = vld [vmem:[%s37465_s0 + $0x7] sm:$0xff] }
 0x190   :  { %21102 = vmatprep.mubr.msk.f32.mxu0 %vm28339_vm1, %v28338_v0 }
 0x193   :  { %21103 = vmatmul.mubr.msk.f32.gmra.mrb[38].mxu0 %vm26_vm0, %v1097_v41  ;;  %v17929_v41 = vld [vmem:[%s37464_s2 + $0x18] sm:$0xff] }
 0x194   :  { %21105 = vmatprep.mubr.msk.f32.mxu0 %vm28339_vm1, %v28338_v0 }
 0x197   :  { %21106 = vmatmul.mubr.msk.f32.gmra.mrb[40].mxu0 %vm26_vm0, %v1098_v42  ;;  %v1956_v42 = vld [vmem:[%s37465_s0 + $0xf] sm:$0xff] }
 0x198   :  { %21108 = vmatprep.mubr.msk.f32.mxu0 %vm28339_vm1, %v28338_v0 }
 0x19b   :  { %21109 = vmatmul.mubr.msk.f32.gmra.mrb[42].mxu0 %vm26_vm0, %v1099_v43  ;;  %v29570_v43 = vld [vmem:[%s37465_s0 + $0x17] sm:$0xff] }
 0x19c   :  { %21111 = vmatprep.mubr.msk.f32.mxu0 %vm28339_vm1, %v28338_v0 }
 0x19f   :  { %21112 = vmatmul.mubr.msk.f32.gmra.mrb[44].mxu0 %vm26_vm0, %v1100_v44  ;;  %v29579_v44 = vld [vmem:[%s37465_s0 + $0x1f] sm:$0xff] }
 0x1a0   :  { %21114 = vmatprep.mubr.msk.f32.mxu0 %vm28339_vm1, %v28338_v0 }
 0x1a3   :  { %21115 = vmatmul.mubr.msk.f32.gmra.mrb[46].mxu0 %vm26_vm0, %v1101_v45  ;;  %v29588_v45 = vld [vmem:[%s37465_s0 + $0x27] sm:$0xff] }
 0x1a4   :  { %21117 = vmatprep.mubr.msk.f32.mxu0 %vm28339_vm1, %v28338_v0 }
 0x1a7   :  { %21118 = vmatmul.mubr.msk.f32.gmra.mrb[48].mxu0 %vm26_vm0, %v1102_v46  ;;  %v29597_v46 = vld [vmem:[%s37465_s0 + $0x2f] sm:$0xff] }
 0x1a8   :  { %21120 = vmatprep.mubr.msk.f32.mxu0 %vm28339_vm1, %v28338_v0 }
 0x1ab   :  { %21121 = vmatmul.mubr.msk.f32.gmra.mrb[50].mxu0 %vm26_vm0, %v1103_v47  ;;  %v29606_v47 = vld [vmem:[%s37465_s0 + $0x37] sm:$0xff] }
 0x1ac   :  { %21123 = vmatprep.mubr.msk.f32.mxu0 %vm28339_vm1, %v28338_v0 }
 0x1af   :  { %21124 = vmatmul.mubr.msk.f32.gmra.mrb[52].mxu0 %vm26_vm0, %v1104_v48  ;;  %v29615_v48 = vld [vmem:[%s37465_s0 + $0x3f] sm:$0xff] }
 0x1b0   :  { %21126 = vmatprep.mubr.msk.f32.mxu0 %vm28339_vm1, %v28338_v0 }
 0x1b3   :  { %21127 = vmatmul.mubr.msk.f32.gmra.mrb[54].mxu0 %vm26_vm0, %v1105_v49  ;;  %v29624_v49 = vld [vmem:[%s37465_s0 + $0x47] sm:$0xff] }
 0x1b4   :  { %21129 = vmatprep.mubr.msk.f32.mxu0 %vm28339_vm1, %v28338_v0 }
 0x1b7   :  { %21130 = vmatmul.mubr.msk.f32.gmra.mrb[56].mxu0 %vm26_vm0, %v1106_v50  ;;  %v29633_v50 = vld [vmem:[%s37465_s0 + $0x4f] sm:$0xff] }
 0x1b8   :  { %21132 = vmatprep.mubr.msk.f32.mxu0 %vm28339_vm1, %v28338_v0 }
 0x1bb   :  { %21133 = vmatmul.mubr.msk.f32.gmra.mrb[58].mxu0 %vm26_vm0, %v1107_v51  ;;  %v29642_v51 = vld [vmem:[%s37465_s0 + $0x57] sm:$0xff] }
 0x1bc   :  { %21135 = vmatprep.mubr.msk.f32.mxu0 %vm28339_vm1, %v28338_v0 }
 0x1bf   :  { %21136 = vmatmul.mubr.msk.f32.gmra.mrb[60].mxu0 %vm26_vm0, %v1108_v52  ;;  %v29651_v52 = vld [vmem:[%s37465_s0 + $0x5f] sm:$0xff] }
 0x1c0   :  { %21138 = vmatprep.mubr.msk.f32.mxu0 %vm28339_vm1, %v28338_v0 }
 0x1c3   :  { %21139 = vmatmul.mubr.msk.f32.gmra.mrb[62].mxu0 %vm26_vm0, %v1109_v53  ;;  %v29660_v53 = vld [vmem:[%s37465_s0 + $0x67] sm:$0xff] }
 0x1c4   :  { %21141 = vmatprep.mubr.msk.f32.mxu0 %vm28339_vm1, %v28338_v0 }
 0x1c7   :  { %21142 = vmatmul.mubr.msk.f32.gmra.mrb[64].mxu0 %vm26_vm0, %v1110_v54  ;;  %v29669_v54 = vld [vmem:[%s37465_s0 + $0x6f] sm:$0xff] }
 0x1c8   :  { %21144 = vmatprep.mubr.msk.f32.mxu0 %vm28339_vm1, %v28338_v0 }
 0x1cb   :  { %21145 = vmatmul.mubr.msk.f32.gmra.mrb[66].mxu0 %vm26_vm0, %v1111_v55  ;;  %v29678_v55 = vld [vmem:[%s37465_s0 + $0x77] sm:$0xff] }
 0x1cc   :  { %21147 = vmatprep.mubr.msk.f32.mxu0 %vm28339_vm1, %v28338_v0 }
 0x1cf   :  { %21148 = vmatmul.mubr.msk.f32.gmra.mrb[68].mxu0 %vm26_vm0, %v1112_v56  ;;  %v29687_v56 = vld [vmem:[%s37465_s0 + $0x7f] sm:$0xff] }
 0x1d0   :  { %21150 = vmatprep.mubr.msk.f32.mxu0 %vm28339_vm1, %v28338_v0 }
 0x1d3   :  { %21151 = vmatmul.mubr.msk.f32.gmra.mrb[70].mxu0 %vm26_vm0, %v1113_v57  ;;  %v29696_v57 = vld [vmem:[%s37465_s0 + $0x87] sm:$0xff] }
 0x1d4   :  { %21153 = vmatprep.mubr.msk.f32.mxu0 %vm28339_vm1, %v28338_v0 }
 0x1d7   :  { %21154 = vmatmul.mubr.msk.f32.gmra.mrb[72].mxu0 %vm26_vm0, %v1114_v58  ;;  %v29705_v58 = vld [vmem:[%s37465_s0 + $0x8f] sm:$0xff] }
 0x1d8   :  { %21156 = vmatprep.mubr.msk.f32.mxu0 %vm28339_vm1, %v28338_v0 }
 0x1db   :  { %21157 = vmatmul.mubr.msk.f32.gmra.mrb[74].mxu0 %vm26_vm0, %v1115_v59  ;;  %v29714_v59 = vld [vmem:[%s37465_s0 + $0x97] sm:$0xff] }
 0x1dc   :  { %21159 = vmatprep.mubr.msk.f32.mxu0 %vm28339_vm1, %v28338_v0 }
 0x1df   :  { %21160 = vmatmul.mubr.msk.f32.gmra.mrb[76].mxu0 %vm26_vm0, %v1116_v60  ;;  %v29723_v60 = vld [vmem:[%s37465_s0 + $0x9f] sm:$0xff] }
 0x1e0   :  { %21162 = vmatprep.mubr.msk.f32.mxu0 %vm28339_vm1, %v28338_v0 }
 0x1e3   :  { %21163 = vmatmul.mubr.msk.f32.gmra.mrb[78].mxu0 %vm26_vm0, %v1117_v61  ;;  %v29732_v61 = vld [vmem:[%s37465_s0 + $0xa7] sm:$0xff] }
 0x1e4   :  { %21165 = vmatprep.mubr.msk.f32.mxu0 %vm28339_vm1, %v28338_v0 }
 0x1e7   :  { %21166 = vmatmul.mubr.msk.f32.gmra.mrb[80].mxu0 %vm26_vm0, %v1118_v62  ;;  %v29741_v62 = vld [vmem:[%s37465_s0 + $0xaf] sm:$0xff] }
 0x1e8   :  { %21168 = vmatprep.mubr.msk.f32.mxu0 %vm28339_vm1, %v28338_v0 }
 0x1eb   :  { %21169 = vmatmul.mubr.msk.f32.gmra.mrb[82].mxu0 %vm26_vm0, %v1119_v63  ;;  %v29750_v63 = vld [vmem:[%s37465_s0 + $0xb7] sm:$0xff] }
 0x1ec   :  { %21171 = vmatprep.mubr.msk.f32.mxu0 %vm28339_vm1, %v28338_v0 }
 0x1ef   :  { %21172 = vmatmul.mubr.msk.f32.gmra.mrb[84].mxu0 %vm26_vm0, %v1120_v1  ;;  %v29759_v1 = vld [vmem:[%s37465_s0 + $0xbf] sm:$0xff] }
 0x1f0   :  { %21174 = vmatprep.mubr.msk.f32.mxu0 %vm28339_vm1, %v28338_v0 }
 0x1f3   :  { %21175 = vmatmul.mubr.msk.f32.gmra.mrb[86].mxu0 %vm26_vm0, %v1121_v2  ;;  %v29768_v2 = vld [vmem:[%s37465_s0 + $0xc7] sm:$0xff] }
 0x1f4   :  { %21177 = vmatprep.mubr.msk.f32.mxu0 %vm28339_vm1, %v28338_v0 }
 0x1f7   :  { %21178 = vmatmul.mubr.msk.f32.gmra.mrb[88].mxu0 %vm26_vm0, %v1122_v3  ;;  %v29777_v3 = vld [vmem:[%s37465_s0 + $0xcf] sm:$0xff] }
 0x1f8   :  { %21180 = vmatprep.mubr.msk.f32.mxu0 %vm28339_vm1, %v28338_v0 }
 0x1fb   :  { %21181 = vmatmul.mubr.msk.f32.gmra.mrb[90].mxu0 %vm26_vm0, %v1123_v4  ;;  %v29786_v4 = vld [vmem:[%s37465_s0 + $0xd7] sm:$0xff] }
 0x1fc   :  { %21183 = vmatprep.mubr.msk.f32.mxu0 %vm28339_vm1, %v28338_v0 }
 0x1ff   :  { %21184 = vmatmul.mubr.msk.f32.gmra.mrb[92].mxu0 %vm26_vm0, %v1124_v5  ;;  %v29795_v5 = vld [vmem:[%s37465_s0 + $0xdf] sm:$0xff] }
 0x200   :  { %21186 = vmatprep.mubr.msk.f32.mxu0 %vm28339_vm1, %v28338_v0 }
 0x203   :  { %21187 = vmatmul.mubr.msk.f32.gmra.mrb[94].mxu0 %vm26_vm0, %v1125_v6  ;;  %v29804_v6 = vld [vmem:[%s37465_s0 + $0xe7] sm:$0xff] }
 0x204   :  { %21189 = vmatprep.mubr.msk.f32.mxu0 %vm28339_vm1, %v28338_v0 }
 0x207   :  { %21190 = vmatmul.mubr.msk.f32.gmra.mrb[96].mxu0 %vm26_vm0, %v1126_v7  ;;  %v29813_v7 = vld [vmem:[%s37465_s0 + $0xef] sm:$0xff] }
 0x208   :  { %21192 = vmatprep.mubr.msk.f32.mxu0 %vm28339_vm1, %v28338_v0 }
 0x20b   :  { %21193 = vmatmul.mubr.msk.f32.gmra.mrb[98].mxu0 %vm26_vm0, %v1127_v8  ;;  %v29822_v8 = vld [vmem:[%s37465_s0 + $0xf7] sm:$0xff] }
 0x20c   :  { %21195 = vmatprep.mubr.msk.f32.mxu0 %vm28339_vm1, %v28338_v0 }
 0x20f   :  { %21196 = vmatmul.mubr.msk.f32.gmra.mrb[100].mxu0 %vm26_vm0, %v1128_v9  ;;  %v29831_v9 = vld [vmem:[%s37465_s0 + $0xff] sm:$0xff] }
 0x210   :  { %21198 = vmatprep.mubr.msk.f32.mxu0 %vm28339_vm1, %v28338_v0 }
 0x213   :  { %21199 = vmatmul.mubr.msk.f32.gmra.mrb[102].mxu0 %vm26_vm0, %v1129_v10  ;;  %v29840_v10 = vld [vmem:[%s37465_s0 + $0x107] sm:$0xff] }
 0x214   :  { %21201 = vmatprep.mubr.msk.f32.mxu0 %vm28339_vm1, %v28338_v0 }
 0x217   :  { %21202 = vmatmul.mubr.msk.f32.gmra.mrb[104].mxu0 %vm26_vm0, %v1130_v11  ;;  %v29849_v11 = vld [vmem:[%s37465_s0 + $0x10f] sm:$0xff] }
 0x218   :  { %21204 = vmatprep.mubr.msk.f32.mxu0 %vm28339_vm1, %v28338_v0 }
 0x21b   :  { %21205 = vmatmul.mubr.msk.f32.gmra.mrb[106].mxu0 %vm26_vm0, %v1131_v12  ;;  %v29858_v12 = vld [vmem:[%s37465_s0 + $0x117] sm:$0xff] }
 0x21c   :  { %21207 = vmatprep.mubr.msk.f32.mxu0 %vm28339_vm1, %v28338_v0 }
 0x21f   :  { %21208 = vmatmul.mubr.msk.f32.gmra.mrb[108].mxu0 %vm26_vm0, %v1132_v13  ;;  %v29867_v13 = vld [vmem:[%s37465_s0 + $0x11f] sm:$0xff] }
 0x220   :  { %21210 = vmatprep.mubr.msk.f32.mxu0 %vm28339_vm1, %v28338_v0 }
 0x223   :  { %21211 = vmatmul.mubr.msk.f32.gmra.mrb[110].mxu0 %vm26_vm0, %v1133_v14  ;;  %v29876_v14 = vld [vmem:[%s37465_s0 + $0x127] sm:$0xff] }
 0x224   :  { %21213 = vmatprep.mubr.msk.f32.mxu0 %vm28339_vm1, %v28338_v0 }
 0x227   :  { %21214 = vmatmul.mubr.msk.f32.gmra.mrb[112].mxu0 %vm26_vm0, %v1134_v15  ;;  %v29885_v15 = vld [vmem:[%s37465_s0 + $0x12f] sm:$0xff] }
 0x228   :  { %21216 = vmatprep.mubr.msk.f32.mxu0 %vm28339_vm1, %v28338_v0 }
 0x22b   :  { %21217 = vmatmul.mubr.msk.f32.gmra.mrb[114].mxu0 %vm26_vm0, %v1135_v16  ;;  %v29894_v16 = vld [vmem:[%s37465_s0 + $0x137] sm:$0xff] }
 0x22c   :  { %21219 = vmatprep.mubr.msk.f32.mxu0 %vm28339_vm1, %v28338_v0 }
 0x22f   :  { %21220 = vmatmul.mubr.msk.f32.gmra.mrb[116].mxu0 %vm26_vm0, %v1136_v17  ;;  %v29903_v17 = vld [vmem:[%s37465_s0 + $0x13f] sm:$0xff] }
 0x230   :  { %21222 = vmatprep.mubr.msk.f32.mxu0 %vm28339_vm1, %v28338_v0 }
 0x233   :  { %21223 = vmatmul.mubr.msk.f32.gmra.mrb[118].mxu0 %vm26_vm0, %v1137_v18  ;;  %v29912_v18 = vld [vmem:[%s37465_s0 + $0x147] sm:$0xff] }
 0x234   :  { %21225 = vmatprep.mubr.msk.f32.mxu0 %vm28339_vm1, %v28338_v0 }
 0x237   :  { %21226 = vmatmul.mubr.msk.f32.gmra.mrb[120].mxu0 %vm26_vm0, %v1138_v19  ;;  %v29921_v19 = vld [vmem:[%s37465_s0 + $0x14f] sm:$0xff] }
 0x238   :  { %21228 = vmatprep.mubr.msk.f32.mxu0 %vm28339_vm1, %v28338_v0 }
 0x23b   :  { %21229 = vmatmul.mubr.msk.f32.gmra.mrb[122].mxu0 %vm26_vm0, %v1139_v20  ;;  %v29930_v20 = vld [vmem:[%s37465_s0 + $0x157] sm:$0xff] }
 0x23c   :  { %21231 = vmatprep.mubr.msk.f32.mxu0 %vm28339_vm1, %v28338_v0 }
 0x23f   :  { %21232 = vmatmul.mubr.msk.f32.gmra.mrb[124].mxu0 %vm26_vm0, %v1140_v21  ;;  %v29939_v21 = vld [vmem:[%s37465_s0 + $0x15f] sm:$0xff] }
 0x240   :  { %21234 = vmatprep.mubr.msk.f32.mxu0 %vm28339_vm1, %v28338_v0 }
 0x243   :  { %21235 = vmatmul.mubr.msk.f32.gmra.mrb[126].mxu0 %vm26_vm0, %v1141_v22  ;;  %v29948_v22 = vld [vmem:[%s37465_s0 + $0x167] sm:$0xff] }
 0x244   :  { %21237 = vmatprep.mubr.msk.f32.mxu0 %vm28339_vm1, %v28338_v0 }
 0x247   :  { %21238 = vmatmul.mubr.msk.f32.gmra.mrb[128].mxu0 %vm26_vm0, %v1142_v23  ;;  %v29957_v23 = vld [vmem:[%s37465_s0 + $0x16f] sm:$0xff] }
 0x248   :  { %21240 = vmatprep.mubr.msk.f32.mxu0 %vm28339_vm1, %v28338_v0 }
 0x24b   :  { %21241 = vmatmul.mubr.msk.f32.gmra.mrb[130].mxu0 %vm26_vm0, %v1143_v24  ;;  %v29966_v24 = vld [vmem:[%s37465_s0 + $0x177] sm:$0xff] }
 0x24c   :  { %21243 = vmatprep.mubr.msk.f32.mxu0 %vm28339_vm1, %v28338_v0 }
 0x24f   :  { %21244 = vmatmul.mubr.msk.f32.gmra.mrb[132].mxu0 %vm26_vm0, %v1144_v25  ;;  %v29975_v25 = vld [vmem:[%s37465_s0 + $0x17f] sm:$0xff] }
 0x250   :  { %21246 = vmatprep.mubr.msk.f32.mxu0 %vm28339_vm1, %v28338_v0 }
 0x253   :  { %21247 = vmatmul.mubr.msk.f32.gmra.mrb[134].mxu0 %vm26_vm0, %v1145_v26  ;;  %v29984_v26 = vld [vmem:[%s37465_s0 + $0x187] sm:$0xff] }
 0x254   :  { %21249 = vmatprep.mubr.msk.f32.mxu0 %vm28339_vm1, %v28338_v0 }
 0x257   :  { %21250 = vmatmul.mubr.msk.f32.gmra.mrb[136].mxu0 %vm26_vm0, %v1146_v27  ;;  %v29993_v27 = vld [vmem:[%s37465_s0 + $0x18f] sm:$0xff] }
 0x258   :  { %21252 = vmatprep.mubr.msk.f32.mxu0 %vm28339_vm1, %v28338_v0 }
 0x25b   :  { %21253 = vmatmul.mubr.msk.f32.gmra.mrb[138].mxu0 %vm26_vm0, %v1147_v28  ;;  %v30002_v28 = vld [vmem:[%s37465_s0 + $0x197] sm:$0xff] }
 0x25c   :  { %21255 = vmatprep.mubr.msk.f32.mxu0 %vm28339_vm1, %v28338_v0 }
 0x25f   :  { %21256 = vmatmul.mubr.msk.f32.gmra.mrb[140].mxu0 %vm26_vm0, %v1148_v29  ;;  %v30011_v29 = vld [vmem:[%s37465_s0 + $0x19f] sm:$0xff] }
 0x260   :  { %21258 = vmatprep.mubr.msk.f32.mxu0 %vm28339_vm1, %v28338_v0 }
 0x263   :  { %21259 = vmatmul.mubr.msk.f32.gmra.mrb[142].mxu0 %vm26_vm0, %v1149_v30  ;;  %v30020_v30 = vld [vmem:[%s37465_s0 + $0x1a7] sm:$0xff] }
 0x264   :  { %21261 = vmatprep.mubr.msk.f32.mxu0 %vm28339_vm1, %v28338_v0 }
 0x267   :  { %21262 = vmatmul.mubr.msk.f32.gmra.mrb[144].mxu0 %vm26_vm0, %v1150_v31  ;;  %v30029_v31 = vld [vmem:[%s37465_s0 + $0x1af] sm:$0xff] }
 0x268   :  { %21264 = vmatprep.mubr.msk.f32.mxu0 %vm28339_vm1, %v28338_v0 }
 0x26b   :  { %21265 = vmatmul.mubr.msk.f32.gmra.mrb[146].mxu0 %vm26_vm0, %v1151_v32  ;;  %v30038_v32 = vld [vmem:[%s37465_s0 + $0x1b7] sm:$0xff] }
 0x26c   :  { %21267 = vmatprep.mubr.msk.f32.mxu0 %vm28339_vm1, %v28338_v0 }
 0x26f   :  { %21268 = vmatmul.mubr.msk.f32.gmra.mrb[148].mxu0 %vm26_vm0, %v1152_v33  ;;  %v30047_v33 = vld [vmem:[%s37465_s0 + $0x1bf] sm:$0xff] }
 0x270   :  { %21270 = vmatprep.mubr.msk.f32.mxu0 %vm28339_vm1, %v28338_v0 }
 0x273   :  { %21271 = vmatmul.mubr.msk.f32.gmra.mrb[150].mxu0 %vm26_vm0, %v1153_v34  ;;  %v30056_v34 = vld [vmem:[%s37465_s0 + $0x1c7] sm:$0xff] }
 0x274   :  { %21273 = vmatprep.mubr.msk.f32.mxu0 %vm28339_vm1, %v28338_v0 }
 0x277   :  { %21274 = vmatmul.mubr.msk.f32.gmra.mrb[152].mxu0 %vm26_vm0, %v1154_v35  ;;  %v30065_v35 = vld [vmem:[%s37465_s0 + $0x1cf] sm:$0xff] }
 0x278   :  { %21276 = vmatprep.mubr.msk.f32.mxu0 %vm28339_vm1, %v28338_v0 }
 0x27b   :  { %21277 = vmatmul.mubr.msk.f32.gmra.mrb[154].mxu0 %vm26_vm0, %v1155_v36  ;;  %v30074_v36 = vld [vmem:[%s37465_s0 + $0x1d7] sm:$0xff] }
 0x27c   :  { %21279 = vmatprep.mubr.msk.f32.mxu0 %vm28339_vm1, %v28338_v0 }
 0x27f   :  { %21280 = vmatmul.mubr.msk.f32.gmra.mrb[156].mxu0 %vm26_vm0, %v1156_v37  ;;  %v30083_v37 = vld [vmem:[%s37465_s0 + $0x1df] sm:$0xff] }
 0x280   :  { %21282 = vmatprep.mubr.msk.f32.mxu0 %vm28339_vm1, %v28338_v0 }
 0x283   :  { %21283 = vmatmul.mubr.msk.f32.gmra.mrb[158].mxu0 %vm26_vm0, %v1157_v38  ;;  %v30092_v38 = vld [vmem:[%s37465_s0 + $0x1e7] sm:$0xff] }
 0x284   :  { %21285 = vmatprep.mubr.msk.f32.mxu0 %vm28339_vm1, %v28338_v0 }
 0x287   :  { %21286 = vmatmul.mubr.msk.f32.gmra.mrb[160].mxu0 %vm26_vm0, %v1158_v39  ;;  %v30101_v39 = vld [vmem:[%s37465_s0 + $0x1ef] sm:$0xff] }
 0x288   :  { %21290 = vmatprep.mubr.msk.f32.mxu0 %vm28339_vm1, %v28338_v0 }
 0x28b   :  { %21291 = vmatmul.mubr.msk.f32.vlgmr.msra.gmra.mrb[0].mxu0 %vm26_vm0, %v1955_v40  ;;  %v30110_v40 = vld [vmem:[%s37465_s0 + $0x1f7] sm:$0xff] }
 0x28c   :  { %21534 = vmatpush3.msra.mxu0 %v17929_v41  ;;  %21293 = vmatprep.mubr.msk.f32.mxu0 %vm28339_vm1, %v28338_v0  ;;  %37540 = vst [vmem:[#allocation3_spill] sm:$0xff] %v30110_v40  ;;  %v30119_v41 = vld [vmem:[%s37465_s0 + $0x1ff] sm:$0xff] }
 0x28d   :  { %21778 = vmatprep.subr.mxu0 %v28338_v0  ;;  %37541 = vst [vmem:[#allocation4_spill] sm:$0xff] %v30119_v41 }
 0x28f   :  { %21294 = vmatmul.mubr.msk.f32.gmra.mrb[2].mxu0 %vm26_vm0, %v1956_v42  ;;  %v30128_v42 = vld [vmem:[%s37465_s0 + $0x207] sm:$0xff] }
 0x290   :  { %21296 = vmatprep.mubr.msk.f32.mxu0 %vm28339_vm1, %v28338_v0  ;;  %37542 = vst [vmem:[#allocation5_spill] sm:$0xff] %v30128_v42 }
 0x293   :  { %21297 = vmatmul.mubr.msk.f32.gmra.mrb[4].mxu0 %vm26_vm0, %v29570_v43 }
 0x294   :  { %21299 = vmatprep.mubr.msk.f32.mxu0 %vm28339_vm1, %v28338_v0 }
 0x297   :  { %21300 = vmatmul.mubr.msk.f32.gmra.mrb[6].mxu0 %vm26_vm0, %v29579_v44 }
 0x298   :  { %21302 = vmatprep.mubr.msk.f32.mxu0 %vm28339_vm1, %v28338_v0 }
 0x29b   :  { %21303 = vmatmul.mubr.msk.f32.gmra.mrb[8].mxu0 %vm26_vm0, %v29588_v45 }
 0x29c   :  { %21305 = vmatprep.mubr.msk.f32.mxu0 %vm28339_vm1, %v28338_v0 }
 0x29f   :  { %21306 = vmatmul.mubr.msk.f32.gmra.mrb[10].mxu0 %vm26_vm0, %v29597_v46 }
 0x2a0   :  { %21308 = vmatprep.mubr.msk.f32.mxu0 %vm28339_vm1, %v28338_v0 }
 0x2a3   :  { %21309 = vmatmul.mubr.msk.f32.gmra.mrb[12].mxu0 %vm26_vm0, %v29606_v47 }
 0x2a4   :  { %21311 = vmatprep.mubr.msk.f32.mxu0 %vm28339_vm1, %v28338_v0 }
 0x2a7   :  { %21312 = vmatmul.mubr.msk.f32.gmra.mrb[14].mxu0 %vm26_vm0, %v29615_v48 }
 0x2a8   :  { %21314 = vmatprep.mubr.msk.f32.mxu0 %vm28339_vm1, %v28338_v0 }
 0x2ab   :  { %21315 = vmatmul.mubr.msk.f32.gmra.mrb[16].mxu0 %vm26_vm0, %v29624_v49 }
 0x2ac   :  { %21317 = vmatprep.mubr.msk.f32.mxu0 %vm28339_vm1, %v28338_v0 }
 0x2af   :  { %21318 = vmatmul.mubr.msk.f32.gmra.mrb[18].mxu0 %vm26_vm0, %v29633_v50 }
 0x2b0   :  { %21320 = vmatprep.mubr.msk.f32.mxu0 %vm28339_vm1, %v28338_v0 }
 0x2b3   :  { %21321 = vmatmul.mubr.msk.f32.gmra.mrb[20].mxu0 %vm26_vm0, %v29642_v51 }
 0x2b4   :  { %21323 = vmatprep.mubr.msk.f32.mxu0 %vm28339_vm1, %v28338_v0 }
 0x2b7   :  { %21324 = vmatmul.mubr.msk.f32.gmra.mrb[22].mxu0 %vm26_vm0, %v29651_v52 }
 0x2b8   :  { %21326 = vmatprep.mubr.msk.f32.mxu0 %vm28339_vm1, %v28338_v0 }
 0x2bb   :  { %21327 = vmatmul.mubr.msk.f32.gmra.mrb[24].mxu0 %vm26_vm0, %v29660_v53 }
 0x2bc   :  { %21329 = vmatprep.mubr.msk.f32.mxu0 %vm28339_vm1, %v28338_v0 }
 0x2bf   :  { %21330 = vmatmul.mubr.msk.f32.gmra.mrb[26].mxu0 %vm26_vm0, %v29669_v54 }
 0x2c0   :  { %21332 = vmatprep.mubr.msk.f32.mxu0 %vm28339_vm1, %v28338_v0 }
 0x2c3   :  { %21333 = vmatmul.mubr.msk.f32.gmra.mrb[28].mxu0 %vm26_vm0, %v29678_v55 }
 0x2c4   :  { %21335 = vmatprep.mubr.msk.f32.mxu0 %vm28339_vm1, %v28338_v0 }
 0x2c7   :  { %21336 = vmatmul.mubr.msk.f32.gmra.mrb[30].mxu0 %vm26_vm0, %v29687_v56 }
 0x2c8   :  { %21338 = vmatprep.mubr.msk.f32.mxu0 %vm28339_vm1, %v28338_v0 }
 0x2cb   :  { %21339 = vmatmul.mubr.msk.f32.gmra.mrb[32].mxu0 %vm26_vm0, %v29696_v57 }
 0x2cc   :  { %21341 = vmatprep.mubr.msk.f32.mxu0 %vm28339_vm1, %v28338_v0 }
 0x2cf   :  { %21342 = vmatmul.mubr.msk.f32.gmra.mrb[34].mxu0 %vm26_vm0, %v29705_v58 }
 0x2d0   :  { %21344 = vmatprep.mubr.msk.f32.mxu0 %vm28339_vm1, %v28338_v0 }
 0x2d3   :  { %21345 = vmatmul.mubr.msk.f32.gmra.mrb[36].mxu0 %vm26_vm0, %v29714_v59 }
 0x2d4   :  { %21347 = vmatprep.mubr.msk.f32.mxu0 %vm28339_vm1, %v28338_v0 }
 0x2d7   :  { %21348 = vmatmul.mubr.msk.f32.gmra.mrb[38].mxu0 %vm26_vm0, %v29723_v60 }
 0x2d8   :  { %21350 = vmatprep.mubr.msk.f32.mxu0 %vm28339_vm1, %v28338_v0 }
 0x2db   :  { %21351 = vmatmul.mubr.msk.f32.gmra.mrb[40].mxu0 %vm26_vm0, %v29732_v61 }
 0x2dc   :  { %21353 = vmatprep.mubr.msk.f32.mxu0 %vm28339_vm1, %v28338_v0 }
 0x2df   :  { %21354 = vmatmul.mubr.msk.f32.gmra.mrb[42].mxu0 %vm26_vm0, %v29741_v62 }
 0x2e0   :  { %21356 = vmatprep.mubr.msk.f32.mxu0 %vm28339_vm1, %v28338_v0 }
 0x2e3   :  { %21357 = vmatmul.mubr.msk.f32.gmra.mrb[44].mxu0 %vm26_vm0, %v29750_v63 }
 0x2e4   :  { %21359 = vmatprep.mubr.msk.f32.mxu0 %vm28339_vm1, %v28338_v0 }
 0x2e7   :  { %21360 = vmatmul.mubr.msk.f32.gmra.mrb[46].mxu0 %vm26_vm0, %v29759_v1 }
 0x2e8   :  { %21362 = vmatprep.mubr.msk.f32.mxu0 %vm28339_vm1, %v28338_v0 }
 0x2eb   :  { %21363 = vmatmul.mubr.msk.f32.gmra.mrb[48].mxu0 %vm26_vm0, %v29768_v2 }
 0x2ec   :  { %21365 = vmatprep.mubr.msk.f32.mxu0 %vm28339_vm1, %v28338_v0 }
 0x2ef   :  { %21366 = vmatmul.mubr.msk.f32.gmra.mrb[50].mxu0 %vm26_vm0, %v29777_v3 }
 0x2f0   :  { %21368 = vmatprep.mubr.msk.f32.mxu0 %vm28339_vm1, %v28338_v0 }
 0x2f3   :  { %21369 = vmatmul.mubr.msk.f32.gmra.mrb[52].mxu0 %vm26_vm0, %v29786_v4 }
 0x2f4   :  { %21371 = vmatprep.mubr.msk.f32.mxu0 %vm28339_vm1, %v28338_v0 }
 0x2f7   :  { %21372 = vmatmul.mubr.msk.f32.gmra.mrb[54].mxu0 %vm26_vm0, %v29795_v5 }
 0x2f8   :  { %21374 = vmatprep.mubr.msk.f32.mxu0 %vm28339_vm1, %v28338_v0 }
 0x2fb   :  { %21375 = vmatmul.mubr.msk.f32.gmra.mrb[56].mxu0 %vm26_vm0, %v29804_v6 }
 0x2fc   :  { %21377 = vmatprep.mubr.msk.f32.mxu0 %vm28339_vm1, %v28338_v0 }
 0x2ff   :  { %21378 = vmatmul.mubr.msk.f32.gmra.mrb[58].mxu0 %vm26_vm0, %v29813_v7 }
 0x300   :  { %21380 = vmatprep.mubr.msk.f32.mxu0 %vm28339_vm1, %v28338_v0 }
 0x303   :  { %21381 = vmatmul.mubr.msk.f32.gmra.mrb[60].mxu0 %vm26_vm0, %v29822_v8 }
 0x304   :  { %21383 = vmatprep.mubr.msk.f32.mxu0 %vm28339_vm1, %v28338_v0 }
 0x307   :  { %21384 = vmatmul.mubr.msk.f32.gmra.mrb[62].mxu0 %vm26_vm0, %v29831_v9 }
 0x308   :  { %21386 = vmatprep.mubr.msk.f32.mxu0 %vm28339_vm1, %v28338_v0 }
 0x30b   :  { %21387 = vmatmul.mubr.msk.f32.gmra.mrb[64].mxu0 %vm26_vm0, %v29840_v10 }
 0x30c   :  { %21389 = vmatprep.mubr.msk.f32.mxu0 %vm28339_vm1, %v28338_v0 }
 0x30f   :  { %21390 = vmatmul.mubr.msk.f32.gmra.mrb[66].mxu0 %vm26_vm0, %v29849_v11 }
 0x310   :  { %21392 = vmatprep.mubr.msk.f32.mxu0 %vm28339_vm1, %v28338_v0 }
 0x313   :  { %21393 = vmatmul.mubr.msk.f32.gmra.mrb[68].mxu0 %vm26_vm0, %v29858_v12 }
 0x314   :  { %21395 = vmatprep.mubr.msk.f32.mxu0 %vm28339_vm1, %v28338_v0 }
 0x317   :  { %21396 = vmatmul.mubr.msk.f32.gmra.mrb[70].mxu0 %vm26_vm0, %v29867_v13 }
 0x318   :  { %21398 = vmatprep.mubr.msk.f32.mxu0 %vm28339_vm1, %v28338_v0 }
 0x31b   :  { %21399 = vmatmul.mubr.msk.f32.gmra.mrb[72].mxu0 %vm26_vm0, %v29876_v14 }
 0x31c   :  { %21401 = vmatprep.mubr.msk.f32.mxu0 %vm28339_vm1, %v28338_v0 }
 0x31f   :  { %21402 = vmatmul.mubr.msk.f32.gmra.mrb[74].mxu0 %vm26_vm0, %v29885_v15 }
 0x320   :  { %21404 = vmatprep.mubr.msk.f32.mxu0 %vm28339_vm1, %v28338_v0 }
 0x323   :  { %21405 = vmatmul.mubr.msk.f32.gmra.mrb[76].mxu0 %vm26_vm0, %v29894_v16 }
 0x324   :  { %21407 = vmatprep.mubr.msk.f32.mxu0 %vm28339_vm1, %v28338_v0 }
 0x327   :  { %21408 = vmatmul.mubr.msk.f32.gmra.mrb[78].mxu0 %vm26_vm0, %v29903_v17 }
 0x328   :  { %21410 = vmatprep.mubr.msk.f32.mxu0 %vm28339_vm1, %v28338_v0 }
 0x32b   :  { %21411 = vmatmul.mubr.msk.f32.gmra.mrb[80].mxu0 %vm26_vm0, %v29912_v18 }
 0x32c   :  { %21413 = vmatprep.mubr.msk.f32.mxu0 %vm28339_vm1, %v28338_v0 }
 0x32f   :  { %21414 = vmatmul.mubr.msk.f32.gmra.mrb[82].mxu0 %vm26_vm0, %v29921_v19 }
 0x330   :  { %21416 = vmatprep.mubr.msk.f32.mxu0 %vm28339_vm1, %v28338_v0 }
 0x333   :  { %21417 = vmatmul.mubr.msk.f32.gmra.mrb[84].mxu0 %vm26_vm0, %v29930_v20 }
 0x334   :  { %21419 = vmatprep.mubr.msk.f32.mxu0 %vm28339_vm1, %v28338_v0 }
 0x337   :  { %21420 = vmatmul.mubr.msk.f32.gmra.mrb[86].mxu0 %vm26_vm0, %v29939_v21 }
 0x338   :  { %21422 = vmatprep.mubr.msk.f32.mxu0 %vm28339_vm1, %v28338_v0 }
 0x33b   :  { %21423 = vmatmul.mubr.msk.f32.gmra.mrb[88].mxu0 %vm26_vm0, %v29948_v22 }
 0x33c   :  { %21425 = vmatprep.mubr.msk.f32.mxu0 %vm28339_vm1, %v28338_v0 }
 0x33f   :  { %21426 = vmatmul.mubr.msk.f32.gmra.mrb[90].mxu0 %vm26_vm0, %v29957_v23 }
 0x340   :  { %21428 = vmatprep.mubr.msk.f32.mxu0 %vm28339_vm1, %v28338_v0 }
 0x343   :  { %21429 = vmatmul.mubr.msk.f32.gmra.mrb[92].mxu0 %vm26_vm0, %v29966_v24 }
 0x344   :  { %21431 = vmatprep.mubr.msk.f32.mxu0 %vm28339_vm1, %v28338_v0 }
 0x347   :  { %21432 = vmatmul.mubr.msk.f32.gmra.mrb[94].mxu0 %vm26_vm0, %v29975_v25 }
 0x348   :  { %21434 = vmatprep.mubr.msk.f32.mxu0 %vm28339_vm1, %v28338_v0 }
 0x34b   :  { %21435 = vmatmul.mubr.msk.f32.gmra.mrb[96].mxu0 %vm26_vm0, %v29984_v26 }
 0x34c   :  { %21437 = vmatprep.mubr.msk.f32.mxu0 %vm28339_vm1, %v28338_v0 }
 0x34f   :  { %21438 = vmatmul.mubr.msk.f32.gmra.mrb[98].mxu0 %vm26_vm0, %v29993_v27 }
 0x350   :  { %21440 = vmatprep.mubr.msk.f32.mxu0 %vm28339_vm1, %v28338_v0 }
 0x353   :  { %21441 = vmatmul.mubr.msk.f32.gmra.mrb[100].mxu0 %vm26_vm0, %v30002_v28 }
 0x354   :  { %21443 = vmatprep.mubr.msk.f32.mxu0 %vm28339_vm1, %v28338_v0 }
 0x357   :  { %21444 = vmatmul.mubr.msk.f32.gmra.mrb[102].mxu0 %vm26_vm0, %v30011_v29 }
 0x358   :  { %21446 = vmatprep.mubr.msk.f32.mxu0 %vm28339_vm1, %v28338_v0 }
 0x35b   :  { %21447 = vmatmul.mubr.msk.f32.gmra.mrb[104].mxu0 %vm26_vm0, %v30020_v30 }
 0x35c   :  { %21449 = vmatprep.mubr.msk.f32.mxu0 %vm28339_vm1, %v28338_v0 }
 0x35f   :  { %21450 = vmatmul.mubr.msk.f32.gmra.mrb[106].mxu0 %vm26_vm0, %v30029_v31 }
 0x360   :  { %21452 = vmatprep.mubr.msk.f32.mxu0 %vm28339_vm1, %v28338_v0 }
 0x363   :  { %21453 = vmatmul.mubr.msk.f32.gmra.mrb[108].mxu0 %vm26_vm0, %v30038_v32 }
 0x364   :  { %21455 = vmatprep.mubr.msk.f32.mxu0 %vm28339_vm1, %v28338_v0 }
 0x367   :  { %21456 = vmatmul.mubr.msk.f32.gmra.mrb[110].mxu0 %vm26_vm0, %v30047_v33 }
 0x368   :  { %21458 = vmatprep.mubr.msk.f32.mxu0 %vm28339_vm1, %v28338_v0 }
 0x36b   :  { %21459 = vmatmul.mubr.msk.f32.gmra.mrb[112].mxu0 %vm26_vm0, %v30056_v34 }
 0x36c   :  { %21461 = vmatprep.mubr.msk.f32.mxu0 %vm28339_vm1, %v28338_v0 }
 0x36f   :  { %21462 = vmatmul.mubr.msk.f32.gmra.mrb[114].mxu0 %vm26_vm0, %v30065_v35 }
 0x370   :  { %21464 = vmatprep.mubr.msk.f32.mxu0 %vm28339_vm1, %v28338_v0 }
 0x373   :  { %21465 = vmatmul.mubr.msk.f32.gmra.mrb[116].mxu0 %vm26_vm0, %v30074_v36 }
 0x374   :  { %21467 = vmatprep.mubr.msk.f32.mxu0 %vm28339_vm1, %v28338_v0 }
 0x377   :  { %21468 = vmatmul.mubr.msk.f32.gmra.mrb[118].mxu0 %vm26_vm0, %v30083_v37 }
 0x378   :  { %21470 = vmatprep.mubr.msk.f32.mxu0 %vm28339_vm1, %v28338_v0 }
 0x37b   :  { %21471 = vmatmul.mubr.msk.f32.gmra.mrb[120].mxu0 %vm26_vm0, %v30092_v38 }
 0x37c   :  { %21473 = vmatprep.mubr.msk.f32.mxu0 %vm28339_vm1, %v28338_v0 }
 0x37f   :  { %21474 = vmatmul.mubr.msk.f32.gmra.mrb[122].mxu0 %vm26_vm0, %v30101_v39 }
 0x380   :  { %21476 = vmatprep.mubr.msk.f32.mxu0 %vm28339_vm1, %v28338_v0 }
 0x383   :  { %21477 = vmatmul.mubr.msk.f32.gmra.mrb[124].mxu0 %vm26_vm0, %v30110_v40  ;;  %v30137_v40 = vld [vmem:[%s37465_s0 + $0x20f] sm:$0xff] }
 0x384   :  { %21479 = vmatprep.mubr.msk.f32.mxu0 %vm28339_vm1, %v28338_v0  ;;  %37543 = vst [vmem:[#allocation6_spill] sm:$0xff] %v30137_v40 }
 0x387   :  { %21480 = vmatmul.mubr.msk.f32.gmra.mrb[126].mxu0 %vm26_vm0, %v30119_v41  ;;  %v30146_v41 = vld [vmem:[%s37465_s0 + $0x217] sm:$0xff] }
 0x388   :  { %21482 = vmatprep.mubr.msk.f32.mxu0 %vm28339_vm1, %v28338_v0  ;;  %37544 = vst [vmem:[#allocation7_spill] sm:$0xff] %v30146_v41 }
 0x38b   :  { %21483 = vmatmul.mubr.msk.f32.gmra.mrb[128].mxu0 %vm26_vm0, %v30128_v42  ;;  %v30155_v42 = vld [vmem:[%s37465_s0 + $0x21f] sm:$0xff] }
 0x38c   :  { %21485 = vmatprep.mubr.msk.f32.mxu0 %vm28339_vm1, %v28338_v0  ;;  %37545 = vst [vmem:[#allocation8_spill] sm:$0xff] %v30155_v42 }
 0x38f   :  { %21486 = vmatmul.mubr.msk.f32.gmra.mrb[130].mxu0 %vm26_vm0, %v30137_v40  ;;  %v30164_v40 = vld [vmem:[%s37465_s0 + $0x227] sm:$0xff] }
 0x390   :  { %21488 = vmatprep.mubr.msk.f32.mxu0 %vm28339_vm1, %v28338_v0  ;;  %37546 = vst [vmem:[#allocation9_spill] sm:$0xff] %v30164_v40 }
 0x393   :  { %21489 = vmatmul.mubr.msk.f32.gmra.mrb[132].mxu0 %vm26_vm0, %v30146_v41  ;;  %v30173_v41 = vld [vmem:[%s37465_s0 + $0x22f] sm:$0xff] }
 0x394   :  { %21491 = vmatprep.mubr.msk.f32.mxu0 %vm28339_vm1, %v28338_v0  ;;  %37547 = vst [vmem:[#allocation10_spill] sm:$0xff] %v30173_v41 }
 0x397   :  { %21492 = vmatmul.mubr.msk.f32.gmra.mrb[134].mxu0 %vm26_vm0, %v30155_v42  ;;  %v30182_v42 = vld [vmem:[%s37465_s0 + $0x237] sm:$0xff] }
 0x398   :  { %21494 = vmatprep.mubr.msk.f32.mxu0 %vm28339_vm1, %v28338_v0  ;;  %37548 = vst [vmem:[#allocation11_spill] sm:$0xff] %v30182_v42 }
 0x39b   :  { %21495 = vmatmul.mubr.msk.f32.gmra.mrb[136].mxu0 %vm26_vm0, %v30164_v40  ;;  %v30191_v40 = vld [vmem:[%s37465_s0 + $0x23f] sm:$0xff] }
 0x39c   :  { %21497 = vmatprep.mubr.msk.f32.mxu0 %vm28339_vm1, %v28338_v0  ;;  %37549 = vst [vmem:[#allocation12_spill] sm:$0xff] %v30191_v40 }
 0x39f   :  { %21498 = vmatmul.mubr.msk.f32.gmra.mrb[138].mxu0 %vm26_vm0, %v30173_v41  ;;  %v30200_v41 = vld [vmem:[%s37465_s0 + $0x247] sm:$0xff] }
 0x3a0   :  { %21500 = vmatprep.mubr.msk.f32.mxu0 %vm28339_vm1, %v28338_v0  ;;  %37550 = vst [vmem:[#allocation13_spill] sm:$0xff] %v30200_v41 }
 0x3a3   :  { %21501 = vmatmul.mubr.msk.f32.gmra.mrb[140].mxu0 %vm26_vm0, %v30182_v42  ;;  %v30209_v42 = vld [vmem:[%s37465_s0 + $0x24f] sm:$0xff] }
 0x3a4   :  { %21503 = vmatprep.mubr.msk.f32.mxu0 %vm28339_vm1, %v28338_v0  ;;  %37551 = vst [vmem:[#allocation14_spill] sm:$0xff] %v30209_v42 }
 0x3a7   :  { %21504 = vmatmul.mubr.msk.f32.gmra.mrb[142].mxu0 %vm26_vm0, %v30191_v40  ;;  %v30218_v40 = vld [vmem:[%s37465_s0 + $0x257] sm:$0xff] }
 0x3a8   :  { %21506 = vmatprep.mubr.msk.f32.mxu0 %vm28339_vm1, %v28338_v0  ;;  %37552 = vst [vmem:[#allocation15_spill] sm:$0xff] %v30218_v40 }
 0x3ab   :  { %21507 = vmatmul.mubr.msk.f32.gmra.mrb[144].mxu0 %vm26_vm0, %v30200_v41  ;;  %v30227_v41 = vld [vmem:[%s37465_s0 + $0x25f] sm:$0xff] }
 0x3ac   :  { %21509 = vmatprep.mubr.msk.f32.mxu0 %vm28339_vm1, %v28338_v0  ;;  %37553 = vst [vmem:[#allocation16_spill] sm:$0xff] %v30227_v41 }
 0x3af   :  { %21510 = vmatmul.mubr.msk.f32.gmra.mrb[146].mxu0 %vm26_vm0, %v30209_v42  ;;  %v30236_v42 = vld [vmem:[%s37465_s0 + $0x267] sm:$0xff] }
 0x3b0   :  { %21512 = vmatprep.mubr.msk.f32.mxu0 %vm28339_vm1, %v28338_v0  ;;  %37554 = vst [vmem:[#allocation17_spill] sm:$0xff] %v30236_v42 }
 0x3b3   :  { %21513 = vmatmul.mubr.msk.f32.gmra.mrb[148].mxu0 %vm26_vm0, %v30218_v40  ;;  %v30245_v40 = vld [vmem:[%s37465_s0 + $0x26f] sm:$0xff] }
 0x3b4   :  { %21515 = vmatprep.mubr.msk.f32.mxu0 %vm28339_vm1, %v28338_v0  ;;  %37555 = vst [vmem:[#allocation18_spill] sm:$0xff] %v30245_v40 }
 0x3b7   :  { %21516 = vmatmul.mubr.msk.f32.gmra.mrb[150].mxu0 %vm26_vm0, %v30227_v41  ;;  %v30254_v41 = vld [vmem:[%s37465_s0 + $0x277] sm:$0xff] }
 0x3b8   :  { %21518 = vmatprep.mubr.msk.f32.mxu0 %vm28339_vm1, %v28338_v0  ;;  %37556 = vst [vmem:[#allocation19_spill] sm:$0xff] %v30254_v41 }
 0x3bb   :  { %21519 = vmatmul.mubr.msk.f32.gmra.mrb[152].mxu0 %vm26_vm0, %v30236_v42  ;;  %v30263_v42 = vld [vmem:[%s37465_s0 + $0x27f] sm:$0xff] }
 0x3bc   :  { %21521 = vmatprep.mubr.msk.f32.mxu0 %vm28339_vm1, %v28338_v0 }
 0x3bf   :  { %21522 = vmatmul.mubr.msk.f32.gmra.mrb[154].mxu0 %vm26_vm0, %v30245_v40  ;;  %v30272_v40 = vld [vmem:[%s37465_s0 + $0x287] sm:$0xff] }
 0x3c0   :  { %21524 = vmatprep.mubr.msk.f32.mxu0 %vm28339_vm1, %v28338_v0 }
 0x3c3   :  { %21525 = vmatmul.mubr.msk.f32.gmra.mrb[156].mxu0 %vm26_vm0, %v30254_v41  ;;  %v18011_v41 = vld [vmem:[%s37464_s2 + $0x20] sm:$0xff] }
 0x3c4   :  { %21527 = vmatprep.mubr.msk.f32.mxu0 %vm28339_vm1, %v28338_v0 }
 0x3c7   :  { %21528 = vmatmul.mubr.msk.f32.gmra.mrb[158].mxu0 %vm26_vm0, %v30263_v42 }
 0x3c8   :  { %21530 = vmatprep.mubr.msk.f32.mxu0 %vm28339_vm1, %v28338_v0 }
 0x3cb   :  { %21531 = vmatmul.mubr.msk.f32.gmra.mrb[160].mxu0 %vm26_vm0, %v30272_v40 }
 0x3cc   :  { %21535 = vmatprep.mubr.msk.f32.mxu0 %vm28339_vm1, %v28338_v0 }
 0x3cf   :  { %21536 = vmatmul.mubr.msk.f32.vlgmr.msra.gmra.mrb[0].mxu0 %vm26_vm0, %v29570_v43  ;;  %v37557_v43 = vld [vmem:[#allocation3_spill] sm:$0xff] }
 0x3d0   :  { %21779 = vmatpush3.msra.mxu0 %v18011_v41  ;;  %21538 = vmatprep.mubr.msk.f32.mxu0 %vm28339_vm1, %v28338_v0  ;;  %v3750_v41 = vld [vmem:[%s37465_s0 + $0x160] sm:$0xff] }
 0x3d1   :  { %22023 = vmatprep.subr.mxu0 %v28338_v0 }
 0x3d3   :  { %21539 = vmatmul.mubr.msk.f32.gmra.mrb[2].mxu0 %vm26_vm0, %v29579_v44  ;;  %v37558_v44 = vld [vmem:[#allocation4_spill] sm:$0xff] }
 0x3d4   :  { %21541 = vmatprep.mubr.msk.f32.mxu0 %vm28339_vm1, %v28338_v0 }
 0x3d7   :  { %21542 = vmatmul.mubr.msk.f32.gmra.mrb[4].mxu0 %vm26_vm0, %v29588_v45  ;;  %v37559_v45 = vld [vmem:[#allocation5_spill] sm:$0xff] }
 0x3d8   :  { %21544 = vmatprep.mubr.msk.f32.mxu0 %vm28339_vm1, %v28338_v0 }
 0x3db   :  { %21545 = vmatmul.mubr.msk.f32.gmra.mrb[6].mxu0 %vm26_vm0, %v29597_v46  ;;  %v37560_v46 = vld [vmem:[#allocation6_spill] sm:$0xff] }
 0x3dc   :  { %21547 = vmatprep.mubr.msk.f32.mxu0 %vm28339_vm1, %v28338_v0 }
 0x3df   :  { %21548 = vmatmul.mubr.msk.f32.gmra.mrb[8].mxu0 %vm26_vm0, %v29606_v47  ;;  %v37561_v47 = vld [vmem:[#allocation7_spill] sm:$0xff] }
 0x3e0   :  { %21550 = vmatprep.mubr.msk.f32.mxu0 %vm28339_vm1, %v28338_v0 }
 0x3e3   :  { %21551 = vmatmul.mubr.msk.f32.gmra.mrb[10].mxu0 %vm26_vm0, %v29615_v48  ;;  %v37562_v48 = vld [vmem:[#allocation8_spill] sm:$0xff] }
 0x3e4   :  { %21553 = vmatprep.mubr.msk.f32.mxu0 %vm28339_vm1, %v28338_v0 }
 0x3e7   :  { %21554 = vmatmul.mubr.msk.f32.gmra.mrb[12].mxu0 %vm26_vm0, %v29624_v49  ;;  %v37563_v49 = vld [vmem:[#allocation9_spill] sm:$0xff] }
 0x3e8   :  { %21556 = vmatprep.mubr.msk.f32.mxu0 %vm28339_vm1, %v28338_v0 }
 0x3eb   :  { %21557 = vmatmul.mubr.msk.f32.gmra.mrb[14].mxu0 %vm26_vm0, %v29633_v50  ;;  %v37564_v50 = vld [vmem:[#allocation10_spill] sm:$0xff] }
 0x3ec   :  { %21559 = vmatprep.mubr.msk.f32.mxu0 %vm28339_vm1, %v28338_v0 }
 0x3ef   :  { %21560 = vmatmul.mubr.msk.f32.gmra.mrb[16].mxu0 %vm26_vm0, %v29642_v51  ;;  %v37565_v51 = vld [vmem:[#allocation11_spill] sm:$0xff] }
 0x3f0   :  { %21562 = vmatprep.mubr.msk.f32.mxu0 %vm28339_vm1, %v28338_v0 }
 0x3f3   :  { %21563 = vmatmul.mubr.msk.f32.gmra.mrb[18].mxu0 %vm26_vm0, %v29651_v52  ;;  %v37566_v52 = vld [vmem:[#allocation12_spill] sm:$0xff] }
 0x3f4   :  { %21565 = vmatprep.mubr.msk.f32.mxu0 %vm28339_vm1, %v28338_v0 }
 0x3f7   :  { %21566 = vmatmul.mubr.msk.f32.gmra.mrb[20].mxu0 %vm26_vm0, %v29660_v53  ;;  %v37567_v53 = vld [vmem:[#allocation13_spill] sm:$0xff] }
 0x3f8   :  { %21568 = vmatprep.mubr.msk.f32.mxu0 %vm28339_vm1, %v28338_v0 }
 0x3fb   :  { %21569 = vmatmul.mubr.msk.f32.gmra.mrb[22].mxu0 %vm26_vm0, %v29669_v54  ;;  %v37568_v54 = vld [vmem:[#allocation14_spill] sm:$0xff] }
 0x3fc   :  { %21571 = vmatprep.mubr.msk.f32.mxu0 %vm28339_vm1, %v28338_v0 }
 0x3ff   :  { %21572 = vmatmul.mubr.msk.f32.gmra.mrb[24].mxu0 %vm26_vm0, %v29678_v55  ;;  %v37569_v55 = vld [vmem:[#allocation15_spill] sm:$0xff] }
 0x400   :  { %21574 = vmatprep.mubr.msk.f32.mxu0 %vm28339_vm1, %v28338_v0 }
 0x403   :  { %21575 = vmatmul.mubr.msk.f32.gmra.mrb[26].mxu0 %vm26_vm0, %v29687_v56  ;;  %v37570_v56 = vld [vmem:[#allocation16_spill] sm:$0xff] }
 0x404   :  { %21577 = vmatprep.mubr.msk.f32.mxu0 %vm28339_vm1, %v28338_v0 }
 0x407   :  { %21578 = vmatmul.mubr.msk.f32.gmra.mrb[28].mxu0 %vm26_vm0, %v29696_v57  ;;  %v37571_v57 = vld [vmem:[#allocation17_spill] sm:$0xff] }
 0x408   :  { %21580 = vmatprep.mubr.msk.f32.mxu0 %vm28339_vm1, %v28338_v0 }
 0x40b   :  { %21581 = vmatmul.mubr.msk.f32.gmra.mrb[30].mxu0 %vm26_vm0, %v29705_v58  ;;  %v37572_v58 = vld [vmem:[#allocation18_spill] sm:$0xff] }
 0x40c   :  { %21583 = vmatprep.mubr.msk.f32.mxu0 %vm28339_vm1, %v28338_v0 }
 0x40f   :  { %21584 = vmatmul.mubr.msk.f32.gmra.mrb[32].mxu0 %vm26_vm0, %v29714_v59  ;;  %v37573_v59 = vld [vmem:[#allocation19_spill] sm:$0xff] }
 0x410   :  { %21586 = vmatprep.mubr.msk.f32.mxu0 %vm28339_vm1, %v28338_v0 }
 0x413   :  { %21587 = vmatmul.mubr.msk.f32.gmra.mrb[34].mxu0 %vm26_vm0, %v29723_v60  ;;  %v2911_v60 = vld [vmem:[%s37465_s0 + $0x28f] sm:$0xff] }
 0x414   :  { %21589 = vmatprep.mubr.msk.f32.mxu0 %vm28339_vm1, %v28338_v0 }
 0x417   :  { %21590 = vmatmul.mubr.msk.f32.gmra.mrb[36].mxu0 %vm26_vm0, %v29732_v61  ;;  %v2912_v61 = vld [vmem:[%s37465_s0 + $0x297] sm:$0xff] }
 0x418   :  { %21592 = vmatprep.mubr.msk.f32.mxu0 %vm28339_vm1, %v28338_v0 }
 0x41b   :  { %21593 = vmatmul.mubr.msk.f32.gmra.mrb[38].mxu0 %vm26_vm0, %v29741_v62  ;;  %v3709_v62 = vld [vmem:[%s37465_s0 + $0x18] sm:$0xff] }
 0x41c   :  { %21595 = vmatprep.mubr.msk.f32.mxu0 %vm28339_vm1, %v28338_v0 }
 0x41f   :  { %21596 = vmatmul.mubr.msk.f32.gmra.mrb[40].mxu0 %vm26_vm0, %v29750_v63  ;;  %v18093_v63 = vld [vmem:[%s37464_s2 + $0x28] sm:$0xff] }
 0x420   :  { %21598 = vmatprep.mubr.msk.f32.mxu0 %vm28339_vm1, %v28338_v0 }
 0x423   :  { %21599 = vmatmul.mubr.msk.f32.gmra.mrb[42].mxu0 %vm26_vm0, %v29759_v1  ;;  %v3710_v1 = vld [vmem:[%s37465_s0 + $0x20] sm:$0xff] }
 0x424   :  { %21601 = vmatprep.mubr.msk.f32.mxu0 %vm28339_vm1, %v28338_v0 }
 0x427   :  { %21602 = vmatmul.mubr.msk.f32.gmra.mrb[44].mxu0 %vm26_vm0, %v29768_v2  ;;  %v3711_v2 = vld [vmem:[%s37465_s0 + $0x28] sm:$0xff] }
 0x428   :  { %21604 = vmatprep.mubr.msk.f32.mxu0 %vm28339_vm1, %v28338_v0 }
 0x42b   :  { %21605 = vmatmul.mubr.msk.f32.gmra.mrb[46].mxu0 %vm26_vm0, %v29777_v3  ;;  %v3712_v3 = vld [vmem:[%s37465_s0 + $0x30] sm:$0xff] }
 0x42c   :  { %21607 = vmatprep.mubr.msk.f32.mxu0 %vm28339_vm1, %v28338_v0 }
 0x42f   :  { %21608 = vmatmul.mubr.msk.f32.gmra.mrb[48].mxu0 %vm26_vm0, %v29786_v4  ;;  %v3713_v4 = vld [vmem:[%s37465_s0 + $0x38] sm:$0xff] }
 0x430   :  { %21610 = vmatprep.mubr.msk.f32.mxu0 %vm28339_vm1, %v28338_v0 }
 0x433   :  { %21611 = vmatmul.mubr.msk.f32.gmra.mrb[50].mxu0 %vm26_vm0, %v29795_v5  ;;  %v3714_v5 = vld [vmem:[%s37465_s0 + $0x40] sm:$0xff] }
 0x434   :  { %21613 = vmatprep.mubr.msk.f32.mxu0 %vm28339_vm1, %v28338_v0 }
 0x437   :  { %21614 = vmatmul.mubr.msk.f32.gmra.mrb[52].mxu0 %vm26_vm0, %v29804_v6  ;;  %v3715_v6 = vld [vmem:[%s37465_s0 + $0x48] sm:$0xff] }
 0x438   :  { %21616 = vmatprep.mubr.msk.f32.mxu0 %vm28339_vm1, %v28338_v0 }
 0x43b   :  { %21617 = vmatmul.mubr.msk.f32.gmra.mrb[54].mxu0 %vm26_vm0, %v29813_v7  ;;  %v3716_v7 = vld [vmem:[%s37465_s0 + $0x50] sm:$0xff] }
 0x43c   :  { %21619 = vmatprep.mubr.msk.f32.mxu0 %vm28339_vm1, %v28338_v0 }
 0x43f   :  { %21620 = vmatmul.mubr.msk.f32.gmra.mrb[56].mxu0 %vm26_vm0, %v29822_v8  ;;  %v3717_v8 = vld [vmem:[%s37465_s0 + $0x58] sm:$0xff] }
 0x440   :  { %21622 = vmatprep.mubr.msk.f32.mxu0 %vm28339_vm1, %v28338_v0 }
 0x443   :  { %21623 = vmatmul.mubr.msk.f32.gmra.mrb[58].mxu0 %vm26_vm0, %v29831_v9  ;;  %v3718_v9 = vld [vmem:[%s37465_s0 + $0x60] sm:$0xff] }
 0x444   :  { %21625 = vmatprep.mubr.msk.f32.mxu0 %vm28339_vm1, %v28338_v0 }
 0x447   :  { %21626 = vmatmul.mubr.msk.f32.gmra.mrb[60].mxu0 %vm26_vm0, %v29840_v10  ;;  %v3719_v10 = vld [vmem:[%s37465_s0 + $0x68] sm:$0xff] }
 0x448   :  { %21628 = vmatprep.mubr.msk.f32.mxu0 %vm28339_vm1, %v28338_v0 }
 0x44b   :  { %21629 = vmatmul.mubr.msk.f32.gmra.mrb[62].mxu0 %vm26_vm0, %v29849_v11  ;;  %v3720_v11 = vld [vmem:[%s37465_s0 + $0x70] sm:$0xff] }
 0x44c   :  { %21631 = vmatprep.mubr.msk.f32.mxu0 %vm28339_vm1, %v28338_v0 }
 0x44f   :  { %21632 = vmatmul.mubr.msk.f32.gmra.mrb[64].mxu0 %vm26_vm0, %v29858_v12  ;;  %v3721_v12 = vld [vmem:[%s37465_s0 + $0x78] sm:$0xff] }
 0x450   :  { %21634 = vmatprep.mubr.msk.f32.mxu0 %vm28339_vm1, %v28338_v0 }
 0x453   :  { %21635 = vmatmul.mubr.msk.f32.gmra.mrb[66].mxu0 %vm26_vm0, %v29867_v13  ;;  %v3722_v13 = vld [vmem:[%s37465_s0 + $0x80] sm:$0xff] }
 0x454   :  { %21637 = vmatprep.mubr.msk.f32.mxu0 %vm28339_vm1, %v28338_v0 }
 0x457   :  { %21638 = vmatmul.mubr.msk.f32.gmra.mrb[68].mxu0 %vm26_vm0, %v29876_v14  ;;  %v3723_v14 = vld [vmem:[%s37465_s0 + $0x88] sm:$0xff] }
 0x458   :  { %21640 = vmatprep.mubr.msk.f32.mxu0 %vm28339_vm1, %v28338_v0 }
 0x45b   :  { %21641 = vmatmul.mubr.msk.f32.gmra.mrb[70].mxu0 %vm26_vm0, %v29885_v15  ;;  %v3724_v15 = vld [vmem:[%s37465_s0 + $0x90] sm:$0xff] }
 0x45c   :  { %21643 = vmatprep.mubr.msk.f32.mxu0 %vm28339_vm1, %v28338_v0 }
 0x45f   :  { %21644 = vmatmul.mubr.msk.f32.gmra.mrb[72].mxu0 %vm26_vm0, %v29894_v16  ;;  %v3725_v16 = vld [vmem:[%s37465_s0 + $0x98] sm:$0xff] }
 0x460   :  { %21646 = vmatprep.mubr.msk.f32.mxu0 %vm28339_vm1, %v28338_v0 }
 0x463   :  { %21647 = vmatmul.mubr.msk.f32.gmra.mrb[74].mxu0 %vm26_vm0, %v29903_v17  ;;  %v3726_v17 = vld [vmem:[%s37465_s0 + $0xa0] sm:$0xff] }
 0x464   :  { %21649 = vmatprep.mubr.msk.f32.mxu0 %vm28339_vm1, %v28338_v0 }
 0x467   :  { %21650 = vmatmul.mubr.msk.f32.gmra.mrb[76].mxu0 %vm26_vm0, %v29912_v18  ;;  %v3727_v18 = vld [vmem:[%s37465_s0 + $0xa8] sm:$0xff] }
 0x468   :  { %21652 = vmatprep.mubr.msk.f32.mxu0 %vm28339_vm1, %v28338_v0 }
 0x46b   :  { %21653 = vmatmul.mubr.msk.f32.gmra.mrb[78].mxu0 %vm26_vm0, %v29921_v19  ;;  %v3728_v19 = vld [vmem:[%s37465_s0 + $0xb0] sm:$0xff] }
 0x46c   :  { %21655 = vmatprep.mubr.msk.f32.mxu0 %vm28339_vm1, %v28338_v0 }
 0x46f   :  { %21656 = vmatmul.mubr.msk.f32.gmra.mrb[80].mxu0 %vm26_vm0, %v29930_v20  ;;  %v3729_v20 = vld [vmem:[%s37465_s0 + $0xb8] sm:$0xff] }
 0x470   :  { %21658 = vmatprep.mubr.msk.f32.mxu0 %vm28339_vm1, %v28338_v0 }
 0x473   :  { %21659 = vmatmul.mubr.msk.f32.gmra.mrb[82].mxu0 %vm26_vm0, %v29939_v21  ;;  %v3730_v21 = vld [vmem:[%s37465_s0 + $0xc0] sm:$0xff] }
 0x474   :  { %21661 = vmatprep.mubr.msk.f32.mxu0 %vm28339_vm1, %v28338_v0 }
 0x477   :  { %21662 = vmatmul.mubr.msk.f32.gmra.mrb[84].mxu0 %vm26_vm0, %v29948_v22  ;;  %v3731_v22 = vld [vmem:[%s37465_s0 + $0xc8] sm:$0xff] }
 0x478   :  { %21664 = vmatprep.mubr.msk.f32.mxu0 %vm28339_vm1, %v28338_v0 }
 0x47b   :  { %21665 = vmatmul.mubr.msk.f32.gmra.mrb[86].mxu0 %vm26_vm0, %v29957_v23  ;;  %v3732_v23 = vld [vmem:[%s37465_s0 + $0xd0] sm:$0xff] }
 0x47c   :  { %21667 = vmatprep.mubr.msk.f32.mxu0 %vm28339_vm1, %v28338_v0 }
 0x47f   :  { %21668 = vmatmul.mubr.msk.f32.gmra.mrb[88].mxu0 %vm26_vm0, %v29966_v24  ;;  %v3733_v24 = vld [vmem:[%s37465_s0 + $0xd8] sm:$0xff] }
 0x480   :  { %21670 = vmatprep.mubr.msk.f32.mxu0 %vm28339_vm1, %v28338_v0 }
 0x483   :  { %21671 = vmatmul.mubr.msk.f32.gmra.mrb[90].mxu0 %vm26_vm0, %v29975_v25  ;;  %v3734_v25 = vld [vmem:[%s37465_s0 + $0xe0] sm:$0xff] }
 0x484   :  { %21673 = vmatprep.mubr.msk.f32.mxu0 %vm28339_vm1, %v28338_v0 }
 0x487   :  { %21674 = vmatmul.mubr.msk.f32.gmra.mrb[92].mxu0 %vm26_vm0, %v29984_v26  ;;  %v3735_v26 = vld [vmem:[%s37465_s0 + $0xe8] sm:$0xff] }
 0x488   :  { %21676 = vmatprep.mubr.msk.f32.mxu0 %vm28339_vm1, %v28338_v0 }
 0x48b   :  { %21677 = vmatmul.mubr.msk.f32.gmra.mrb[94].mxu0 %vm26_vm0, %v29993_v27  ;;  %v3736_v27 = vld [vmem:[%s37465_s0 + $0xf0] sm:$0xff] }
 0x48c   :  { %21679 = vmatprep.mubr.msk.f32.mxu0 %vm28339_vm1, %v28338_v0 }
 0x48f   :  { %21680 = vmatmul.mubr.msk.f32.gmra.mrb[96].mxu0 %vm26_vm0, %v30002_v28  ;;  %v3737_v28 = vld [vmem:[%s37465_s0 + $0xf8] sm:$0xff] }
 0x490   :  { %21682 = vmatprep.mubr.msk.f32.mxu0 %vm28339_vm1, %v28338_v0 }
 0x493   :  { %21683 = vmatmul.mubr.msk.f32.gmra.mrb[98].mxu0 %vm26_vm0, %v30011_v29  ;;  %v3738_v29 = vld [vmem:[%s37465_s0 + $0x100] sm:$0xff] }
 0x494   :  { %21685 = vmatprep.mubr.msk.f32.mxu0 %vm28339_vm1, %v28338_v0 }
 0x497   :  { %21686 = vmatmul.mubr.msk.f32.gmra.mrb[100].mxu0 %vm26_vm0, %v30020_v30  ;;  %v3739_v30 = vld [vmem:[%s37465_s0 + $0x108] sm:$0xff] }
 0x498   :  { %21688 = vmatprep.mubr.msk.f32.mxu0 %vm28339_vm1, %v28338_v0 }
 0x49b   :  { %21689 = vmatmul.mubr.msk.f32.gmra.mrb[102].mxu0 %vm26_vm0, %v30029_v31  ;;  %v3740_v31 = vld [vmem:[%s37465_s0 + $0x110] sm:$0xff] }
 0x49c   :  { %21691 = vmatprep.mubr.msk.f32.mxu0 %vm28339_vm1, %v28338_v0 }
 0x49f   :  { %21692 = vmatmul.mubr.msk.f32.gmra.mrb[104].mxu0 %vm26_vm0, %v30038_v32  ;;  %v3741_v32 = vld [vmem:[%s37465_s0 + $0x118] sm:$0xff] }
 0x4a0   :  { %21694 = vmatprep.mubr.msk.f32.mxu0 %vm28339_vm1, %v28338_v0 }
 0x4a3   :  { %21695 = vmatmul.mubr.msk.f32.gmra.mrb[106].mxu0 %vm26_vm0, %v30047_v33  ;;  %v3742_v33 = vld [vmem:[%s37465_s0 + $0x120] sm:$0xff] }
 0x4a4   :  { %21697 = vmatprep.mubr.msk.f32.mxu0 %vm28339_vm1, %v28338_v0 }
 0x4a7   :  { %21698 = vmatmul.mubr.msk.f32.gmra.mrb[108].mxu0 %vm26_vm0, %v30056_v34  ;;  %v3743_v34 = vld [vmem:[%s37465_s0 + $0x128] sm:$0xff] }
 0x4a8   :  { %21700 = vmatprep.mubr.msk.f32.mxu0 %vm28339_vm1, %v28338_v0 }
 0x4ab   :  { %21701 = vmatmul.mubr.msk.f32.gmra.mrb[110].mxu0 %vm26_vm0, %v30065_v35  ;;  %v3744_v35 = vld [vmem:[%s37465_s0 + $0x130] sm:$0xff] }
 0x4ac   :  { %21703 = vmatprep.mubr.msk.f32.mxu0 %vm28339_vm1, %v28338_v0 }
 0x4af   :  { %21704 = vmatmul.mubr.msk.f32.gmra.mrb[112].mxu0 %vm26_vm0, %v30074_v36  ;;  %v3745_v36 = vld [vmem:[%s37465_s0 + $0x138] sm:$0xff] }
 0x4b0   :  { %21706 = vmatprep.mubr.msk.f32.mxu0 %vm28339_vm1, %v28338_v0 }
 0x4b3   :  { %21707 = vmatmul.mubr.msk.f32.gmra.mrb[114].mxu0 %vm26_vm0, %v30083_v37  ;;  %v3746_v37 = vld [vmem:[%s37465_s0 + $0x140] sm:$0xff] }
 0x4b4   :  { %21709 = vmatprep.mubr.msk.f32.mxu0 %vm28339_vm1, %v28338_v0 }
 0x4b7   :  { %21710 = vmatmul.mubr.msk.f32.gmra.mrb[116].mxu0 %vm26_vm0, %v30092_v38  ;;  %v3747_v38 = vld [vmem:[%s37465_s0 + $0x148] sm:$0xff] }
 0x4b8   :  { %21712 = vmatprep.mubr.msk.f32.mxu0 %vm28339_vm1, %v28338_v0 }
 0x4bb   :  { %21713 = vmatmul.mubr.msk.f32.gmra.mrb[118].mxu0 %vm26_vm0, %v30101_v39  ;;  %v3748_v39 = vld [vmem:[%s37465_s0 + $0x150] sm:$0xff] }
 0x4bc   :  { %21715 = vmatprep.mubr.msk.f32.mxu0 %vm28339_vm1, %v28338_v0 }
 0x4bf   :  { %21716 = vmatmul.mubr.msk.f32.gmra.mrb[120].mxu0 %vm26_vm0, %v37557_v43  ;;  %v3752_v43 = vld [vmem:[%s37465_s0 + $0x170] sm:$0xff] }
 0x4c0   :  { %21718 = vmatprep.mubr.msk.f32.mxu0 %vm28339_vm1, %v28338_v0 }
 0x4c3   :  { %21719 = vmatmul.mubr.msk.f32.gmra.mrb[122].mxu0 %vm26_vm0, %v37558_v44  ;;  %v3753_v44 = vld [vmem:[%s37465_s0 + $0x178] sm:$0xff] }
 0x4c4   :  { %21721 = vmatprep.mubr.msk.f32.mxu0 %vm28339_vm1, %v28338_v0 }
 0x4c7   :  { %21722 = vmatmul.mubr.msk.f32.gmra.mrb[124].mxu0 %vm26_vm0, %v37559_v45  ;;  %v3754_v45 = vld [vmem:[%s37465_s0 + $0x180] sm:$0xff] }
 0x4c8   :  { %21724 = vmatprep.mubr.msk.f32.mxu0 %vm28339_vm1, %v28338_v0 }
 0x4cb   :  { %21725 = vmatmul.mubr.msk.f32.gmra.mrb[126].mxu0 %vm26_vm0, %v37560_v46  ;;  %v3755_v46 = vld [vmem:[%s37465_s0 + $0x188] sm:$0xff] }
 0x4cc   :  { %21727 = vmatprep.mubr.msk.f32.mxu0 %vm28339_vm1, %v28338_v0 }
 0x4cf   :  { %21728 = vmatmul.mubr.msk.f32.gmra.mrb[128].mxu0 %vm26_vm0, %v37561_v47  ;;  %v3756_v47 = vld [vmem:[%s37465_s0 + $0x190] sm:$0xff] }
 0x4d0   :  { %21730 = vmatprep.mubr.msk.f32.mxu0 %vm28339_vm1, %v28338_v0 }
 0x4d3   :  { %21731 = vmatmul.mubr.msk.f32.gmra.mrb[130].mxu0 %vm26_vm0, %v37562_v48  ;;  %v3757_v48 = vld [vmem:[%s37465_s0 + $0x198] sm:$0xff] }
 0x4d4   :  { %21733 = vmatprep.mubr.msk.f32.mxu0 %vm28339_vm1, %v28338_v0 }
 0x4d7   :  { %21734 = vmatmul.mubr.msk.f32.gmra.mrb[132].mxu0 %vm26_vm0, %v37563_v49  ;;  %v3758_v49 = vld [vmem:[%s37465_s0 + $0x1a0] sm:$0xff] }
 0x4d8   :  { %21736 = vmatprep.mubr.msk.f32.mxu0 %vm28339_vm1, %v28338_v0 }
 0x4db   :  { %21737 = vmatmul.mubr.msk.f32.gmra.mrb[134].mxu0 %vm26_vm0, %v37564_v50  ;;  %v3759_v50 = vld [vmem:[%s37465_s0 + $0x1a8] sm:$0xff] }
 0x4dc   :  { %21739 = vmatprep.mubr.msk.f32.mxu0 %vm28339_vm1, %v28338_v0 }
 0x4df   :  { %21740 = vmatmul.mubr.msk.f32.gmra.mrb[136].mxu0 %vm26_vm0, %v37565_v51  ;;  %v3760_v51 = vld [vmem:[%s37465_s0 + $0x1b0] sm:$0xff] }
 0x4e0   :  { %21742 = vmatprep.mubr.msk.f32.mxu0 %vm28339_vm1, %v28338_v0 }
 0x4e3   :  { %21743 = vmatmul.mubr.msk.f32.gmra.mrb[138].mxu0 %vm26_vm0, %v37566_v52  ;;  %v3761_v52 = vld [vmem:[%s37465_s0 + $0x1b8] sm:$0xff] }
 0x4e4   :  { %21745 = vmatprep.mubr.msk.f32.mxu0 %vm28339_vm1, %v28338_v0 }
 0x4e7   :  { %21746 = vmatmul.mubr.msk.f32.gmra.mrb[140].mxu0 %vm26_vm0, %v37567_v53  ;;  %v3762_v53 = vld [vmem:[%s37465_s0 + $0x1c0] sm:$0xff] }
 0x4e8   :  { %21748 = vmatprep.mubr.msk.f32.mxu0 %vm28339_vm1, %v28338_v0 }
 0x4eb   :  { %21749 = vmatmul.mubr.msk.f32.gmra.mrb[142].mxu0 %vm26_vm0, %v37568_v54  ;;  %v3763_v54 = vld [vmem:[%s37465_s0 + $0x1c8] sm:$0xff] }
 0x4ec   :  { %21751 = vmatprep.mubr.msk.f32.mxu0 %vm28339_vm1, %v28338_v0 }
 0x4ef   :  { %21752 = vmatmul.mubr.msk.f32.gmra.mrb[144].mxu0 %vm26_vm0, %v37569_v55  ;;  %v3764_v55 = vld [vmem:[%s37465_s0 + $0x1d0] sm:$0xff] }
 0x4f0   :  { %21754 = vmatprep.mubr.msk.f32.mxu0 %vm28339_vm1, %v28338_v0 }
 0x4f3   :  { %21755 = vmatmul.mubr.msk.f32.gmra.mrb[146].mxu0 %vm26_vm0, %v37570_v56  ;;  %v3765_v56 = vld [vmem:[%s37465_s0 + $0x1d8] sm:$0xff] }
 0x4f4   :  { %21757 = vmatprep.mubr.msk.f32.mxu0 %vm28339_vm1, %v28338_v0 }
 0x4f7   :  { %21758 = vmatmul.mubr.msk.f32.gmra.mrb[148].mxu0 %vm26_vm0, %v37571_v57  ;;  %v3766_v57 = vld [vmem:[%s37465_s0 + $0x1e0] sm:$0xff] }
 0x4f8   :  { %21760 = vmatprep.mubr.msk.f32.mxu0 %vm28339_vm1, %v28338_v0 }
 0x4fb   :  { %21761 = vmatmul.mubr.msk.f32.gmra.mrb[150].mxu0 %vm26_vm0, %v37572_v58  ;;  %v3767_v58 = vld [vmem:[%s37465_s0 + $0x1e8] sm:$0xff] }
 0x4fc   :  { %21763 = vmatprep.mubr.msk.f32.mxu0 %vm28339_vm1, %v28338_v0 }
 0x4ff   :  { %21764 = vmatmul.mubr.msk.f32.gmra.mrb[152].mxu0 %vm26_vm0, %v37573_v59  ;;  %v3768_v59 = vld [vmem:[%s37465_s0 + $0x1f0] sm:$0xff] }
 0x500   :  { %21766 = vmatprep.mubr.msk.f32.mxu0 %vm28339_vm1, %v28338_v0 }
 0x503   :  { %21767 = vmatmul.mubr.msk.f32.gmra.mrb[154].mxu0 %vm26_vm0, %v30263_v42  ;;  %v3751_v42 = vld [vmem:[%s37465_s0 + $0x168] sm:$0xff] }
 0x504   :  { %21769 = vmatprep.mubr.msk.f32.mxu0 %vm28339_vm1, %v28338_v0 }
 0x507   :  { %21770 = vmatmul.mubr.msk.f32.gmra.mrb[156].mxu0 %vm26_vm0, %v30272_v40  ;;  %v3749_v40 = vld [vmem:[%s37465_s0 + $0x158] sm:$0xff] }
 0x508   :  { %21772 = vmatprep.mubr.msk.f32.mxu0 %vm28339_vm1, %v28338_v0 }
 0x50b   :  { %21773 = vmatmul.mubr.msk.f32.gmra.mrb[158].mxu0 %vm26_vm0, %v2911_v60  ;;  %v3769_v60 = vld [vmem:[%s37465_s0 + $0x1f8] sm:$0xff] }
 0x50c   :  { %21775 = vmatprep.mubr.msk.f32.mxu0 %vm28339_vm1, %v28338_v0 }
 0x50f   :  { %21776 = vmatmul.mubr.msk.f32.gmra.mrb[160].mxu0 %vm26_vm0, %v2912_v61  ;;  %v3770_v61 = vld [vmem:[%s37465_s0 + $0x200] sm:$0xff] }
 0x510   :  { %21780 = vmatprep.mubr.msk.f32.mxu0 %vm28339_vm1, %v28338_v0 }
 0x513   :  { %21781 = vmatmul.mubr.msk.f32.vlgmr.msra.gmra.mrb[0].mxu0 %vm26_vm0, %v3709_v62  ;;  %v3771_v62 = vld [vmem:[%s37465_s0 + $0x208] sm:$0xff] }
 0x514   :  { %22024 = vmatpush3.msra.mxu0 %v18093_v63  ;;  %21783 = vmatprep.mubr.msk.f32.mxu0 %vm28339_vm1, %v28338_v0  ;;  %v3772_v63 = vld [vmem:[%s37465_s0 + $0x210] sm:$0xff] }
 0x515   :  { %22268 = vmatprep.subr.mxu0 %v28338_v0 }
 0x517   :  { %21784 = vmatmul.mubr.msk.f32.gmra.mrb[2].mxu0 %vm26_vm0, %v3710_v1  ;;  %v3773_v1 = vld [vmem:[%s37465_s0 + $0x218] sm:$0xff] }
 0x518   :  { %21786 = vmatprep.mubr.msk.f32.mxu0 %vm28339_vm1, %v28338_v0 }
 0x51b   :  { %21787 = vmatmul.mubr.msk.f32.gmra.mrb[4].mxu0 %vm26_vm0, %v3711_v2  ;;  %v3774_v2 = vld [vmem:[%s37465_s0 + $0x220] sm:$0xff] }
 0x51c   :  { %21789 = vmatprep.mubr.msk.f32.mxu0 %vm28339_vm1, %v28338_v0 }
 0x51f   :  { %21790 = vmatmul.mubr.msk.f32.gmra.mrb[6].mxu0 %vm26_vm0, %v3712_v3  ;;  %v3775_v3 = vld [vmem:[%s37465_s0 + $0x228] sm:$0xff] }
 0x520   :  { %21792 = vmatprep.mubr.msk.f32.mxu0 %vm28339_vm1, %v28338_v0 }
 0x523   :  { %21793 = vmatmul.mubr.msk.f32.gmra.mrb[8].mxu0 %vm26_vm0, %v3713_v4  ;;  %v3776_v4 = vld [vmem:[%s37465_s0 + $0x230] sm:$0xff] }
 0x524   :  { %21795 = vmatprep.mubr.msk.f32.mxu0 %vm28339_vm1, %v28338_v0 }
 0x527   :  { %21796 = vmatmul.mubr.msk.f32.gmra.mrb[10].mxu0 %vm26_vm0, %v3714_v5  ;;  %v3777_v5 = vld [vmem:[%s37465_s0 + $0x238] sm:$0xff] }
 0x528   :  { %21798 = vmatprep.mubr.msk.f32.mxu0 %vm28339_vm1, %v28338_v0 }
 0x52b   :  { %21799 = vmatmul.mubr.msk.f32.gmra.mrb[12].mxu0 %vm26_vm0, %v3715_v6  ;;  %v3778_v6 = vld [vmem:[%s37465_s0 + $0x240] sm:$0xff] }
 0x52c   :  { %21801 = vmatprep.mubr.msk.f32.mxu0 %vm28339_vm1, %v28338_v0 }
 0x52f   :  { %21802 = vmatmul.mubr.msk.f32.gmra.mrb[14].mxu0 %vm26_vm0, %v3716_v7  ;;  %v3779_v7 = vld [vmem:[%s37465_s0 + $0x248] sm:$0xff] }
 0x530   :  { %21804 = vmatprep.mubr.msk.f32.mxu0 %vm28339_vm1, %v28338_v0 }
 0x533   :  { %21805 = vmatmul.mubr.msk.f32.gmra.mrb[16].mxu0 %vm26_vm0, %v3717_v8  ;;  %v3780_v8 = vld [vmem:[%s37465_s0 + $0x250] sm:$0xff] }
 0x534   :  { %21807 = vmatprep.mubr.msk.f32.mxu0 %vm28339_vm1, %v28338_v0 }
 0x537   :  { %21808 = vmatmul.mubr.msk.f32.gmra.mrb[18].mxu0 %vm26_vm0, %v3718_v9  ;;  %v3781_v9 = vld [vmem:[%s37465_s0 + $0x258] sm:$0xff] }
 0x538   :  { %21810 = vmatprep.mubr.msk.f32.mxu0 %vm28339_vm1, %v28338_v0 }
 0x53b   :  { %21811 = vmatmul.mubr.msk.f32.gmra.mrb[20].mxu0 %vm26_vm0, %v3719_v10  ;;  %v3782_v10 = vld [vmem:[%s37465_s0 + $0x260] sm:$0xff] }
 0x53c   :  { %21813 = vmatprep.mubr.msk.f32.mxu0 %vm28339_vm1, %v28338_v0 }
 0x53f   :  { %21814 = vmatmul.mubr.msk.f32.gmra.mrb[22].mxu0 %vm26_vm0, %v3720_v11  ;;  %v3783_v11 = vld [vmem:[%s37465_s0 + $0x268] sm:$0xff] }
 0x540   :  { %21816 = vmatprep.mubr.msk.f32.mxu0 %vm28339_vm1, %v28338_v0 }
 0x543   :  { %21817 = vmatmul.mubr.msk.f32.gmra.mrb[24].mxu0 %vm26_vm0, %v3721_v12  ;;  %v3784_v12 = vld [vmem:[%s37465_s0 + $0x270] sm:$0xff] }
 0x544   :  { %21819 = vmatprep.mubr.msk.f32.mxu0 %vm28339_vm1, %v28338_v0 }
 0x547   :  { %21820 = vmatmul.mubr.msk.f32.gmra.mrb[26].mxu0 %vm26_vm0, %v3722_v13  ;;  %v3785_v13 = vld [vmem:[%s37465_s0 + $0x278] sm:$0xff] }
 0x548   :  { %21822 = vmatprep.mubr.msk.f32.mxu0 %vm28339_vm1, %v28338_v0 }
 0x54b   :  { %21823 = vmatmul.mubr.msk.f32.gmra.mrb[28].mxu0 %vm26_vm0, %v3723_v14  ;;  %v3786_v14 = vld [vmem:[%s37465_s0 + $0x280] sm:$0xff] }
 0x54c   :  { %21825 = vmatprep.mubr.msk.f32.mxu0 %vm28339_vm1, %v28338_v0 }
 0x54f   :  { %21826 = vmatmul.mubr.msk.f32.gmra.mrb[30].mxu0 %vm26_vm0, %v3724_v15  ;;  %v3787_v15 = vld [vmem:[%s37465_s0 + $0x288] sm:$0xff] }
 0x550   :  { %21828 = vmatprep.mubr.msk.f32.mxu0 %vm28339_vm1, %v28338_v0 }
 0x553   :  { %21829 = vmatmul.mubr.msk.f32.gmra.mrb[32].mxu0 %vm26_vm0, %v3725_v16  ;;  %v3788_v16 = vld [vmem:[%s37465_s0 + $0x290] sm:$0xff] }
 0x554   :  { %21831 = vmatprep.mubr.msk.f32.mxu0 %vm28339_vm1, %v28338_v0 }
 0x557   :  { %21832 = vmatmul.mubr.msk.f32.gmra.mrb[34].mxu0 %vm26_vm0, %v3726_v17  ;;  %v3789_v17 = vld [vmem:[%s37465_s0 + $0x298] sm:$0xff] }
 0x558   :  { %21834 = vmatprep.mubr.msk.f32.mxu0 %vm28339_vm1, %v28338_v0 }
 0x55b   :  { %21835 = vmatmul.mubr.msk.f32.gmra.mrb[36].mxu0 %vm26_vm0, %v3727_v18  ;;  %v4586_v18 = vld [vmem:[%s37465_s0 + $0x19] sm:$0xff] }
 0x55c   :  { %21837 = vmatprep.mubr.msk.f32.mxu0 %vm28339_vm1, %v28338_v0 }
 0x55f   :  { %21838 = vmatmul.mubr.msk.f32.gmra.mrb[38].mxu0 %vm26_vm0, %v3728_v19  ;;  %v18175_v19 = vld [vmem:[%s37464_s2 + $0x30] sm:$0xff] }
 0x560   :  { %21840 = vmatprep.mubr.msk.f32.mxu0 %vm28339_vm1, %v28338_v0 }
 0x563   :  { %21841 = vmatmul.mubr.msk.f32.gmra.mrb[40].mxu0 %vm26_vm0, %v3729_v20  ;;  %v4587_v20 = vld [vmem:[%s37465_s0 + $0x21] sm:$0xff] }
 0x564   :  { %21843 = vmatprep.mubr.msk.f32.mxu0 %vm28339_vm1, %v28338_v0 }
 0x567   :  { %21844 = vmatmul.mubr.msk.f32.gmra.mrb[42].mxu0 %vm26_vm0, %v3730_v21  ;;  %v31119_v21 = vld [vmem:[%s37465_s0 + $0x29] sm:$0xff] }
 0x568   :  { %21846 = vmatprep.mubr.msk.f32.mxu0 %vm28339_vm1, %v28338_v0 }
 0x56b   :  { %21847 = vmatmul.mubr.msk.f32.gmra.mrb[44].mxu0 %vm26_vm0, %v3731_v22  ;;  %v31128_v22 = vld [vmem:[%s37465_s0 + $0x31] sm:$0xff] }
 0x56c   :  { %21849 = vmatprep.mubr.msk.f32.mxu0 %vm28339_vm1, %v28338_v0 }
 0x56f   :  { %21850 = vmatmul.mubr.msk.f32.gmra.mrb[46].mxu0 %vm26_vm0, %v3732_v23  ;;  %v31137_v23 = vld [vmem:[%s37465_s0 + $0x39] sm:$0xff] }
 0x570   :  { %21852 = vmatprep.mubr.msk.f32.mxu0 %vm28339_vm1, %v28338_v0 }
 0x573   :  { %21853 = vmatmul.mubr.msk.f32.gmra.mrb[48].mxu0 %vm26_vm0, %v3733_v24  ;;  %v31146_v24 = vld [vmem:[%s37465_s0 + $0x41] sm:$0xff] }
 0x574   :  { %21855 = vmatprep.mubr.msk.f32.mxu0 %vm28339_vm1, %v28338_v0 }
 0x577   :  { %21856 = vmatmul.mubr.msk.f32.gmra.mrb[50].mxu0 %vm26_vm0, %v3734_v25  ;;  %v31155_v25 = vld [vmem:[%s37465_s0 + $0x49] sm:$0xff] }
 0x578   :  { %21858 = vmatprep.mubr.msk.f32.mxu0 %vm28339_vm1, %v28338_v0 }
 0x57b   :  { %21859 = vmatmul.mubr.msk.f32.gmra.mrb[52].mxu0 %vm26_vm0, %v3735_v26  ;;  %v31164_v26 = vld [vmem:[%s37465_s0 + $0x51] sm:$0xff] }
 0x57c   :  { %21861 = vmatprep.mubr.msk.f32.mxu0 %vm28339_vm1, %v28338_v0 }
 0x57f   :  { %21862 = vmatmul.mubr.msk.f32.gmra.mrb[54].mxu0 %vm26_vm0, %v3736_v27  ;;  %v31173_v27 = vld [vmem:[%s37465_s0 + $0x59] sm:$0xff] }
 0x580   :  { %21864 = vmatprep.mubr.msk.f32.mxu0 %vm28339_vm1, %v28338_v0 }
 0x583   :  { %21865 = vmatmul.mubr.msk.f32.gmra.mrb[56].mxu0 %vm26_vm0, %v3737_v28  ;;  %v31182_v28 = vld [vmem:[%s37465_s0 + $0x61] sm:$0xff] }
 0x584   :  { %21867 = vmatprep.mubr.msk.f32.mxu0 %vm28339_vm1, %v28338_v0 }
 0x587   :  { %21868 = vmatmul.mubr.msk.f32.gmra.mrb[58].mxu0 %vm26_vm0, %v3738_v29  ;;  %v31191_v29 = vld [vmem:[%s37465_s0 + $0x69] sm:$0xff] }
 0x588   :  { %21870 = vmatprep.mubr.msk.f32.mxu0 %vm28339_vm1, %v28338_v0 }
 0x58b   :  { %21871 = vmatmul.mubr.msk.f32.gmra.mrb[60].mxu0 %vm26_vm0, %v3739_v30  ;;  %v31200_v30 = vld [vmem:[%s37465_s0 + $0x71] sm:$0xff] }
 0x58c   :  { %21873 = vmatprep.mubr.msk.f32.mxu0 %vm28339_vm1, %v28338_v0 }
 0x58f   :  { %21874 = vmatmul.mubr.msk.f32.gmra.mrb[62].mxu0 %vm26_vm0, %v3740_v31  ;;  %v31209_v31 = vld [vmem:[%s37465_s0 + $0x79] sm:$0xff] }
 0x590   :  { %21876 = vmatprep.mubr.msk.f32.mxu0 %vm28339_vm1, %v28338_v0 }
 0x593   :  { %21877 = vmatmul.mubr.msk.f32.gmra.mrb[64].mxu0 %vm26_vm0, %v3741_v32  ;;  %v31218_v32 = vld [vmem:[%s37465_s0 + $0x81] sm:$0xff] }
 0x594   :  { %21879 = vmatprep.mubr.msk.f32.mxu0 %vm28339_vm1, %v28338_v0 }
 0x597   :  { %21880 = vmatmul.mubr.msk.f32.gmra.mrb[66].mxu0 %vm26_vm0, %v3742_v33  ;;  %v31227_v33 = vld [vmem:[%s37465_s0 + $0x89] sm:$0xff] }
 0x598   :  { %21882 = vmatprep.mubr.msk.f32.mxu0 %vm28339_vm1, %v28338_v0 }
 0x59b   :  { %21883 = vmatmul.mubr.msk.f32.gmra.mrb[68].mxu0 %vm26_vm0, %v3743_v34  ;;  %v31236_v34 = vld [vmem:[%s37465_s0 + $0x91] sm:$0xff] }
 0x59c   :  { %21885 = vmatprep.mubr.msk.f32.mxu0 %vm28339_vm1, %v28338_v0 }
 0x59f   :  { %21886 = vmatmul.mubr.msk.f32.gmra.mrb[70].mxu0 %vm26_vm0, %v3744_v35  ;;  %v31245_v35 = vld [vmem:[%s37465_s0 + $0x99] sm:$0xff] }
 0x5a0   :  { %21888 = vmatprep.mubr.msk.f32.mxu0 %vm28339_vm1, %v28338_v0 }
 0x5a3   :  { %21889 = vmatmul.mubr.msk.f32.gmra.mrb[72].mxu0 %vm26_vm0, %v3745_v36  ;;  %v31254_v36 = vld [vmem:[%s37465_s0 + $0xa1] sm:$0xff] }
 0x5a4   :  { %21891 = vmatprep.mubr.msk.f32.mxu0 %vm28339_vm1, %v28338_v0 }
 0x5a7   :  { %21892 = vmatmul.mubr.msk.f32.gmra.mrb[74].mxu0 %vm26_vm0, %v3746_v37  ;;  %v31263_v37 = vld [vmem:[%s37465_s0 + $0xa9] sm:$0xff] }
 0x5a8   :  { %21894 = vmatprep.mubr.msk.f32.mxu0 %vm28339_vm1, %v28338_v0 }
 0x5ab   :  { %21895 = vmatmul.mubr.msk.f32.gmra.mrb[76].mxu0 %vm26_vm0, %v3747_v38  ;;  %v31272_v38 = vld [vmem:[%s37465_s0 + $0xb1] sm:$0xff] }
 0x5ac   :  { %21897 = vmatprep.mubr.msk.f32.mxu0 %vm28339_vm1, %v28338_v0 }
 0x5af   :  { %21898 = vmatmul.mubr.msk.f32.gmra.mrb[78].mxu0 %vm26_vm0, %v3748_v39  ;;  %v31281_v39 = vld [vmem:[%s37465_s0 + $0xb9] sm:$0xff] }
 0x5b0   :  { %21900 = vmatprep.mubr.msk.f32.mxu0 %vm28339_vm1, %v28338_v0 }
 0x5b3   :  { %21901 = vmatmul.mubr.msk.f32.gmra.mrb[80].mxu0 %vm26_vm0, %v3749_v40  ;;  %v31290_v40 = vld [vmem:[%s37465_s0 + $0xc1] sm:$0xff] }
 0x5b4   :  { %21903 = vmatprep.mubr.msk.f32.mxu0 %vm28339_vm1, %v28338_v0 }
 0x5b7   :  { %21904 = vmatmul.mubr.msk.f32.gmra.mrb[82].mxu0 %vm26_vm0, %v3750_v41  ;;  %v31299_v41 = vld [vmem:[%s37465_s0 + $0xc9] sm:$0xff] }
 0x5b8   :  { %21906 = vmatprep.mubr.msk.f32.mxu0 %vm28339_vm1, %v28338_v0 }
 0x5bb   :  { %21907 = vmatmul.mubr.msk.f32.gmra.mrb[84].mxu0 %vm26_vm0, %v3751_v42  ;;  %v31308_v42 = vld [vmem:[%s37465_s0 + $0xd1] sm:$0xff] }
 0x5bc   :  { %21909 = vmatprep.mubr.msk.f32.mxu0 %vm28339_vm1, %v28338_v0 }
 0x5bf   :  { %21910 = vmatmul.mubr.msk.f32.gmra.mrb[86].mxu0 %vm26_vm0, %v3752_v43  ;;  %v31317_v43 = vld [vmem:[%s37465_s0 + $0xd9] sm:$0xff] }
 0x5c0   :  { %21912 = vmatprep.mubr.msk.f32.mxu0 %vm28339_vm1, %v28338_v0 }
 0x5c3   :  { %21913 = vmatmul.mubr.msk.f32.gmra.mrb[88].mxu0 %vm26_vm0, %v3753_v44  ;;  %v31326_v44 = vld [vmem:[%s37465_s0 + $0xe1] sm:$0xff] }
 0x5c4   :  { %21915 = vmatprep.mubr.msk.f32.mxu0 %vm28339_vm1, %v28338_v0 }
 0x5c7   :  { %21916 = vmatmul.mubr.msk.f32.gmra.mrb[90].mxu0 %vm26_vm0, %v3754_v45  ;;  %v31335_v45 = vld [vmem:[%s37465_s0 + $0xe9] sm:$0xff] }
 0x5c8   :  { %21918 = vmatprep.mubr.msk.f32.mxu0 %vm28339_vm1, %v28338_v0 }
 0x5cb   :  { %21919 = vmatmul.mubr.msk.f32.gmra.mrb[92].mxu0 %vm26_vm0, %v3755_v46  ;;  %v31344_v46 = vld [vmem:[%s37465_s0 + $0xf1] sm:$0xff] }
 0x5cc   :  { %21921 = vmatprep.mubr.msk.f32.mxu0 %vm28339_vm1, %v28338_v0 }
 0x5cf   :  { %21922 = vmatmul.mubr.msk.f32.gmra.mrb[94].mxu0 %vm26_vm0, %v3756_v47  ;;  %v31353_v47 = vld [vmem:[%s37465_s0 + $0xf9] sm:$0xff] }
 0x5d0   :  { %21924 = vmatprep.mubr.msk.f32.mxu0 %vm28339_vm1, %v28338_v0 }
 0x5d3   :  { %21925 = vmatmul.mubr.msk.f32.gmra.mrb[96].mxu0 %vm26_vm0, %v3757_v48  ;;  %v31362_v48 = vld [vmem:[%s37465_s0 + $0x101] sm:$0xff] }
 0x5d4   :  { %21927 = vmatprep.mubr.msk.f32.mxu0 %vm28339_vm1, %v28338_v0 }
 0x5d7   :  { %21928 = vmatmul.mubr.msk.f32.gmra.mrb[98].mxu0 %vm26_vm0, %v3758_v49  ;;  %v31371_v49 = vld [vmem:[%s37465_s0 + $0x109] sm:$0xff] }
 0x5d8   :  { %21930 = vmatprep.mubr.msk.f32.mxu0 %vm28339_vm1, %v28338_v0 }
 0x5db   :  { %21931 = vmatmul.mubr.msk.f32.gmra.mrb[100].mxu0 %vm26_vm0, %v3759_v50  ;;  %v31380_v50 = vld [vmem:[%s37465_s0 + $0x111] sm:$0xff] }
 0x5dc   :  { %21933 = vmatprep.mubr.msk.f32.mxu0 %vm28339_vm1, %v28338_v0 }
 0x5df   :  { %21934 = vmatmul.mubr.msk.f32.gmra.mrb[102].mxu0 %vm26_vm0, %v3760_v51  ;;  %v31389_v51 = vld [vmem:[%s37465_s0 + $0x119] sm:$0xff] }
 0x5e0   :  { %21936 = vmatprep.mubr.msk.f32.mxu0 %vm28339_vm1, %v28338_v0 }
 0x5e3   :  { %21937 = vmatmul.mubr.msk.f32.gmra.mrb[104].mxu0 %vm26_vm0, %v3761_v52  ;;  %v31398_v52 = vld [vmem:[%s37465_s0 + $0x121] sm:$0xff] }
 0x5e4   :  { %21939 = vmatprep.mubr.msk.f32.mxu0 %vm28339_vm1, %v28338_v0 }
 0x5e7   :  { %21940 = vmatmul.mubr.msk.f32.gmra.mrb[106].mxu0 %vm26_vm0, %v3762_v53  ;;  %v31407_v53 = vld [vmem:[%s37465_s0 + $0x129] sm:$0xff] }
 0x5e8   :  { %21942 = vmatprep.mubr.msk.f32.mxu0 %vm28339_vm1, %v28338_v0 }
 0x5eb   :  { %21943 = vmatmul.mubr.msk.f32.gmra.mrb[108].mxu0 %vm26_vm0, %v3763_v54  ;;  %v31416_v54 = vld [vmem:[%s37465_s0 + $0x131] sm:$0xff] }
 0x5ec   :  { %21945 = vmatprep.mubr.msk.f32.mxu0 %vm28339_vm1, %v28338_v0 }
 0x5ef   :  { %21946 = vmatmul.mubr.msk.f32.gmra.mrb[110].mxu0 %vm26_vm0, %v3764_v55  ;;  %v31425_v55 = vld [vmem:[%s37465_s0 + $0x139] sm:$0xff] }
 0x5f0   :  { %21948 = vmatprep.mubr.msk.f32.mxu0 %vm28339_vm1, %v28338_v0 }
 0x5f3   :  { %21949 = vmatmul.mubr.msk.f32.gmra.mrb[112].mxu0 %vm26_vm0, %v3765_v56  ;;  %v31434_v56 = vld [vmem:[%s37465_s0 + $0x141] sm:$0xff] }
 0x5f4   :  { %21951 = vmatprep.mubr.msk.f32.mxu0 %vm28339_vm1, %v28338_v0 }
 0x5f7   :  { %21952 = vmatmul.mubr.msk.f32.gmra.mrb[114].mxu0 %vm26_vm0, %v3766_v57  ;;  %v31443_v57 = vld [vmem:[%s37465_s0 + $0x149] sm:$0xff] }
 0x5f8   :  { %21954 = vmatprep.mubr.msk.f32.mxu0 %vm28339_vm1, %v28338_v0 }
 0x5fb   :  { %21955 = vmatmul.mubr.msk.f32.gmra.mrb[116].mxu0 %vm26_vm0, %v3767_v58  ;;  %v31452_v58 = vld [vmem:[%s37465_s0 + $0x151] sm:$0xff] }
 0x5fc   :  { %21957 = vmatprep.mubr.msk.f32.mxu0 %vm28339_vm1, %v28338_v0 }
 0x5ff   :  { %21958 = vmatmul.mubr.msk.f32.gmra.mrb[118].mxu0 %vm26_vm0, %v3768_v59  ;;  %v31461_v59 = vld [vmem:[%s37465_s0 + $0x159] sm:$0xff] }
 0x600   :  { %21960 = vmatprep.mubr.msk.f32.mxu0 %vm28339_vm1, %v28338_v0 }
 0x603   :  { %21961 = vmatmul.mubr.msk.f32.gmra.mrb[120].mxu0 %vm26_vm0, %v3769_v60  ;;  %v31470_v60 = vld [vmem:[%s37465_s0 + $0x161] sm:$0xff] }
 0x604   :  { %21963 = vmatprep.mubr.msk.f32.mxu0 %vm28339_vm1, %v28338_v0 }
 0x607   :  { %21964 = vmatmul.mubr.msk.f32.gmra.mrb[122].mxu0 %vm26_vm0, %v3770_v61  ;;  %v31479_v61 = vld [vmem:[%s37465_s0 + $0x169] sm:$0xff] }
 0x608   :  { %21966 = vmatprep.mubr.msk.f32.mxu0 %vm28339_vm1, %v28338_v0 }
 0x60b   :  { %21967 = vmatmul.mubr.msk.f32.gmra.mrb[124].mxu0 %vm26_vm0, %v3771_v62  ;;  %v31488_v62 = vld [vmem:[%s37465_s0 + $0x171] sm:$0xff] }
 0x60c   :  { %21969 = vmatprep.mubr.msk.f32.mxu0 %vm28339_vm1, %v28338_v0 }
 0x60f   :  { %21970 = vmatmul.mubr.msk.f32.gmra.mrb[126].mxu0 %vm26_vm0, %v3772_v63  ;;  %v31497_v63 = vld [vmem:[%s37465_s0 + $0x179] sm:$0xff] }
 0x610   :  { %21972 = vmatprep.mubr.msk.f32.mxu0 %vm28339_vm1, %v28338_v0 }
 0x613   :  { %21973 = vmatmul.mubr.msk.f32.gmra.mrb[128].mxu0 %vm26_vm0, %v3773_v1  ;;  %v31506_v1 = vld [vmem:[%s37465_s0 + $0x181] sm:$0xff] }
 0x614   :  { %21975 = vmatprep.mubr.msk.f32.mxu0 %vm28339_vm1, %v28338_v0 }
 0x617   :  { %21976 = vmatmul.mubr.msk.f32.gmra.mrb[130].mxu0 %vm26_vm0, %v3774_v2  ;;  %v31515_v2 = vld [vmem:[%s37465_s0 + $0x189] sm:$0xff] }
 0x618   :  { %21978 = vmatprep.mubr.msk.f32.mxu0 %vm28339_vm1, %v28338_v0 }
 0x61b   :  { %21979 = vmatmul.mubr.msk.f32.gmra.mrb[132].mxu0 %vm26_vm0, %v3775_v3  ;;  %v31524_v3 = vld [vmem:[%s37465_s0 + $0x191] sm:$0xff] }
 0x61c   :  { %21981 = vmatprep.mubr.msk.f32.mxu0 %vm28339_vm1, %v28338_v0 }
 0x61f   :  { %21982 = vmatmul.mubr.msk.f32.gmra.mrb[134].mxu0 %vm26_vm0, %v3776_v4  ;;  %v31533_v4 = vld [vmem:[%s37465_s0 + $0x199] sm:$0xff] }
 0x620   :  { %21984 = vmatprep.mubr.msk.f32.mxu0 %vm28339_vm1, %v28338_v0 }
 0x623   :  { %21985 = vmatmul.mubr.msk.f32.gmra.mrb[136].mxu0 %vm26_vm0, %v3777_v5  ;;  %v31542_v5 = vld [vmem:[%s37465_s0 + $0x1a1] sm:$0xff] }
 0x624   :  { %21987 = vmatprep.mubr.msk.f32.mxu0 %vm28339_vm1, %v28338_v0 }
 0x627   :  { %21988 = vmatmul.mubr.msk.f32.gmra.mrb[138].mxu0 %vm26_vm0, %v3778_v6  ;;  %v31551_v6 = vld [vmem:[%s37465_s0 + $0x1a9] sm:$0xff] }
 0x628   :  { %21990 = vmatprep.mubr.msk.f32.mxu0 %vm28339_vm1, %v28338_v0 }
 0x62b   :  { %21991 = vmatmul.mubr.msk.f32.gmra.mrb[140].mxu0 %vm26_vm0, %v3779_v7  ;;  %v31560_v7 = vld [vmem:[%s37465_s0 + $0x1b1] sm:$0xff] }
 0x62c   :  { %21993 = vmatprep.mubr.msk.f32.mxu0 %vm28339_vm1, %v28338_v0 }
 0x62f   :  { %21994 = vmatmul.mubr.msk.f32.gmra.mrb[142].mxu0 %vm26_vm0, %v3780_v8  ;;  %v31569_v8 = vld [vmem:[%s37465_s0 + $0x1b9] sm:$0xff] }
 0x630   :  { %21996 = vmatprep.mubr.msk.f32.mxu0 %vm28339_vm1, %v28338_v0 }
 0x633   :  { %21997 = vmatmul.mubr.msk.f32.gmra.mrb[144].mxu0 %vm26_vm0, %v3781_v9  ;;  %v31578_v9 = vld [vmem:[%s37465_s0 + $0x1c1] sm:$0xff] }
 0x634   :  { %21999 = vmatprep.mubr.msk.f32.mxu0 %vm28339_vm1, %v28338_v0 }
 0x637   :  { %22000 = vmatmul.mubr.msk.f32.gmra.mrb[146].mxu0 %vm26_vm0, %v3782_v10  ;;  %v31587_v10 = vld [vmem:[%s37465_s0 + $0x1c9] sm:$0xff] }
 0x638   :  { %22002 = vmatprep.mubr.msk.f32.mxu0 %vm28339_vm1, %v28338_v0 }
 0x63b   :  { %22003 = vmatmul.mubr.msk.f32.gmra.mrb[148].mxu0 %vm26_vm0, %v3783_v11  ;;  %v31596_v11 = vld [vmem:[%s37465_s0 + $0x1d1] sm:$0xff] }
 0x63c   :  { %22005 = vmatprep.mubr.msk.f32.mxu0 %vm28339_vm1, %v28338_v0 }
 0x63f   :  { %22006 = vmatmul.mubr.msk.f32.gmra.mrb[150].mxu0 %vm26_vm0, %v3784_v12  ;;  %v31605_v12 = vld [vmem:[%s37465_s0 + $0x1d9] sm:$0xff] }
 0x640   :  { %22008 = vmatprep.mubr.msk.f32.mxu0 %vm28339_vm1, %v28338_v0 }
 0x643   :  { %22009 = vmatmul.mubr.msk.f32.gmra.mrb[152].mxu0 %vm26_vm0, %v3785_v13  ;;  %v31614_v13 = vld [vmem:[%s37465_s0 + $0x1e1] sm:$0xff] }
 0x644   :  { %22011 = vmatprep.mubr.msk.f32.mxu0 %vm28339_vm1, %v28338_v0 }
 0x647   :  { %22012 = vmatmul.mubr.msk.f32.gmra.mrb[154].mxu0 %vm26_vm0, %v3786_v14  ;;  %v31623_v14 = vld [vmem:[%s37465_s0 + $0x1e9] sm:$0xff] }
 0x648   :  { %22014 = vmatprep.mubr.msk.f32.mxu0 %vm28339_vm1, %v28338_v0 }
 0x64b   :  { %22015 = vmatmul.mubr.msk.f32.gmra.mrb[156].mxu0 %vm26_vm0, %v3787_v15  ;;  %v31632_v15 = vld [vmem:[%s37465_s0 + $0x1f1] sm:$0xff] }
 0x64c   :  { %22017 = vmatprep.mubr.msk.f32.mxu0 %vm28339_vm1, %v28338_v0 }
 0x64f   :  { %22018 = vmatmul.mubr.msk.f32.gmra.mrb[158].mxu0 %vm26_vm0, %v3788_v16  ;;  %v31641_v16 = vld [vmem:[%s37465_s0 + $0x1f9] sm:$0xff] }
 0x650   :  { %22020 = vmatprep.mubr.msk.f32.mxu0 %vm28339_vm1, %v28338_v0 }
 0x653   :  { %22021 = vmatmul.mubr.msk.f32.gmra.mrb[160].mxu0 %vm26_vm0, %v3789_v17  ;;  %v31650_v17 = vld [vmem:[%s37465_s0 + $0x201] sm:$0xff] }
 0x654   :  { %22025 = vmatprep.mubr.msk.f32.mxu0 %vm28339_vm1, %v28338_v0 }
 0x657   :  { %22026 = vmatmul.mubr.msk.f32.vlgmr.msra.gmra.mrb[0].mxu0 %vm26_vm0, %v4586_v18  ;;  %v31659_v18 = vld [vmem:[%s37465_s0 + $0x209] sm:$0xff] }
 0x658   :  { %22269 = vmatpush3.msra.mxu0 %v18175_v19  ;;  %22028 = vmatprep.mubr.msk.f32.mxu0 %vm28339_vm1, %v28338_v0  ;;  %37574 = vst [vmem:[#allocation3_spill] sm:$0xff] %v31659_v18  ;;  %v31668_v19 = vld [vmem:[%s37465_s0 + $0x211] sm:$0xff] }
 0x659   :  { %22513 = vmatprep.subr.mxu0 %v28338_v0  ;;  %37575 = vst [vmem:[#allocation4_spill] sm:$0xff] %v31668_v19 }
 0x65b   :  { %22029 = vmatmul.mubr.msk.f32.gmra.mrb[2].mxu0 %vm26_vm0, %v4587_v20  ;;  %v31677_v20 = vld [vmem:[%s37465_s0 + $0x219] sm:$0xff] }
 0x65c   :  { %22031 = vmatprep.mubr.msk.f32.mxu0 %vm28339_vm1, %v28338_v0  ;;  %37576 = vst [vmem:[#allocation5_spill] sm:$0xff] %v31677_v20 }
 0x65f   :  { %22032 = vmatmul.mubr.msk.f32.gmra.mrb[4].mxu0 %vm26_vm0, %v31119_v21 }
 0x660   :  { %22034 = vmatprep.mubr.msk.f32.mxu0 %vm28339_vm1, %v28338_v0 }
 0x663   :  { %22035 = vmatmul.mubr.msk.f32.gmra.mrb[6].mxu0 %vm26_vm0, %v31128_v22 }
 0x664   :  { %22037 = vmatprep.mubr.msk.f32.mxu0 %vm28339_vm1, %v28338_v0 }
 0x667   :  { %22038 = vmatmul.mubr.msk.f32.gmra.mrb[8].mxu0 %vm26_vm0, %v31137_v23 }
 0x668   :  { %22040 = vmatprep.mubr.msk.f32.mxu0 %vm28339_vm1, %v28338_v0 }
 0x66b   :  { %22041 = vmatmul.mubr.msk.f32.gmra.mrb[10].mxu0 %vm26_vm0, %v31146_v24 }
 0x66c   :  { %22043 = vmatprep.mubr.msk.f32.mxu0 %vm28339_vm1, %v28338_v0 }
 0x66f   :  { %22044 = vmatmul.mubr.msk.f32.gmra.mrb[12].mxu0 %vm26_vm0, %v31155_v25 }
 0x670   :  { %22046 = vmatprep.mubr.msk.f32.mxu0 %vm28339_vm1, %v28338_v0 }
 0x673   :  { %22047 = vmatmul.mubr.msk.f32.gmra.mrb[14].mxu0 %vm26_vm0, %v31164_v26 }
 0x674   :  { %22049 = vmatprep.mubr.msk.f32.mxu0 %vm28339_vm1, %v28338_v0 }
 0x677   :  { %22050 = vmatmul.mubr.msk.f32.gmra.mrb[16].mxu0 %vm26_vm0, %v31173_v27 }
 0x678   :  { %22052 = vmatprep.mubr.msk.f32.mxu0 %vm28339_vm1, %v28338_v0 }
 0x67b   :  { %22053 = vmatmul.mubr.msk.f32.gmra.mrb[18].mxu0 %vm26_vm0, %v31182_v28 }
 0x67c   :  { %22055 = vmatprep.mubr.msk.f32.mxu0 %vm28339_vm1, %v28338_v0 }
 0x67f   :  { %22056 = vmatmul.mubr.msk.f32.gmra.mrb[20].mxu0 %vm26_vm0, %v31191_v29 }
 0x680   :  { %22058 = vmatprep.mubr.msk.f32.mxu0 %vm28339_vm1, %v28338_v0 }
 0x683   :  { %22059 = vmatmul.mubr.msk.f32.gmra.mrb[22].mxu0 %vm26_vm0, %v31200_v30 }
 0x684   :  { %22061 = vmatprep.mubr.msk.f32.mxu0 %vm28339_vm1, %v28338_v0 }
 0x687   :  { %22062 = vmatmul.mubr.msk.f32.gmra.mrb[24].mxu0 %vm26_vm0, %v31209_v31 }
 0x688   :  { %22064 = vmatprep.mubr.msk.f32.mxu0 %vm28339_vm1, %v28338_v0 }
 0x68b   :  { %22065 = vmatmul.mubr.msk.f32.gmra.mrb[26].mxu0 %vm26_vm0, %v31218_v32 }
 0x68c   :  { %22067 = vmatprep.mubr.msk.f32.mxu0 %vm28339_vm1, %v28338_v0 }
 0x68f   :  { %22068 = vmatmul.mubr.msk.f32.gmra.mrb[28].mxu0 %vm26_vm0, %v31227_v33 }
 0x690   :  { %22070 = vmatprep.mubr.msk.f32.mxu0 %vm28339_vm1, %v28338_v0 }
 0x693   :  { %22071 = vmatmul.mubr.msk.f32.gmra.mrb[30].mxu0 %vm26_vm0, %v31236_v34 }
 0x694   :  { %22073 = vmatprep.mubr.msk.f32.mxu0 %vm28339_vm1, %v28338_v0 }
 0x697   :  { %22074 = vmatmul.mubr.msk.f32.gmra.mrb[32].mxu0 %vm26_vm0, %v31245_v35 }
 0x698   :  { %22076 = vmatprep.mubr.msk.f32.mxu0 %vm28339_vm1, %v28338_v0 }
 0x69b   :  { %22077 = vmatmul.mubr.msk.f32.gmra.mrb[34].mxu0 %vm26_vm0, %v31254_v36 }
 0x69c   :  { %22079 = vmatprep.mubr.msk.f32.mxu0 %vm28339_vm1, %v28338_v0 }
 0x69f   :  { %22080 = vmatmul.mubr.msk.f32.gmra.mrb[36].mxu0 %vm26_vm0, %v31263_v37 }
 0x6a0   :  { %22082 = vmatprep.mubr.msk.f32.mxu0 %vm28339_vm1, %v28338_v0 }
 0x6a3   :  { %22083 = vmatmul.mubr.msk.f32.gmra.mrb[38].mxu0 %vm26_vm0, %v31272_v38 }
 0x6a4   :  { %22085 = vmatprep.mubr.msk.f32.mxu0 %vm28339_vm1, %v28338_v0 }
 0x6a7   :  { %22086 = vmatmul.mubr.msk.f32.gmra.mrb[40].mxu0 %vm26_vm0, %v31281_v39 }
 0x6a8   :  { %22088 = vmatprep.mubr.msk.f32.mxu0 %vm28339_vm1, %v28338_v0 }
 0x6ab   :  { %22089 = vmatmul.mubr.msk.f32.gmra.mrb[42].mxu0 %vm26_vm0, %v31290_v40 }
 0x6ac   :  { %22091 = vmatprep.mubr.msk.f32.mxu0 %vm28339_vm1, %v28338_v0 }
 0x6af   :  { %22092 = vmatmul.mubr.msk.f32.gmra.mrb[44].mxu0 %vm26_vm0, %v31299_v41 }
 0x6b0   :  { %22094 = vmatprep.mubr.msk.f32.mxu0 %vm28339_vm1, %v28338_v0 }
 0x6b3   :  { %22095 = vmatmul.mubr.msk.f32.gmra.mrb[46].mxu0 %vm26_vm0, %v31308_v42 }
 0x6b4   :  { %22097 = vmatprep.mubr.msk.f32.mxu0 %vm28339_vm1, %v28338_v0 }
 0x6b7   :  { %22098 = vmatmul.mubr.msk.f32.gmra.mrb[48].mxu0 %vm26_vm0, %v31317_v43 }
 0x6b8   :  { %22100 = vmatprep.mubr.msk.f32.mxu0 %vm28339_vm1, %v28338_v0 }
 0x6bb   :  { %22101 = vmatmul.mubr.msk.f32.gmra.mrb[50].mxu0 %vm26_vm0, %v31326_v44 }
 0x6bc   :  { %22103 = vmatprep.mubr.msk.f32.mxu0 %vm28339_vm1, %v28338_v0 }
 0x6bf   :  { %22104 = vmatmul.mubr.msk.f32.gmra.mrb[52].mxu0 %vm26_vm0, %v31335_v45 }
 0x6c0   :  { %22106 = vmatprep.mubr.msk.f32.mxu0 %vm28339_vm1, %v28338_v0 }
 0x6c3   :  { %22107 = vmatmul.mubr.msk.f32.gmra.mrb[54].mxu0 %vm26_vm0, %v31344_v46 }
 0x6c4   :  { %22109 = vmatprep.mubr.msk.f32.mxu0 %vm28339_vm1, %v28338_v0 }
 0x6c7   :  { %22110 = vmatmul.mubr.msk.f32.gmra.mrb[56].mxu0 %vm26_vm0, %v31353_v47 }
 0x6c8   :  { %22112 = vmatprep.mubr.msk.f32.mxu0 %vm28339_vm1, %v28338_v0 }
 0x6cb   :  { %22113 = vmatmul.mubr.msk.f32.gmra.mrb[58].mxu0 %vm26_vm0, %v31362_v48 }
 0x6cc   :  { %22115 = vmatprep.mubr.msk.f32.mxu0 %vm28339_vm1, %v28338_v0 }
 0x6cf   :  { %22116 = vmatmul.mubr.msk.f32.gmra.mrb[60].mxu0 %vm26_vm0, %v31371_v49 }
 0x6d0   :  { %22118 = vmatprep.mubr.msk.f32.mxu0 %vm28339_vm1, %v28338_v0 }
 0x6d3   :  { %22119 = vmatmul.mubr.msk.f32.gmra.mrb[62].mxu0 %vm26_vm0, %v31380_v50 }
 0x6d4   :  { %22121 = vmatprep.mubr.msk.f32.mxu0 %vm28339_vm1, %v28338_v0 }
 0x6d7   :  { %22122 = vmatmul.mubr.msk.f32.gmra.mrb[64].mxu0 %vm26_vm0, %v31389_v51 }
 0x6d8   :  { %22124 = vmatprep.mubr.msk.f32.mxu0 %vm28339_vm1, %v28338_v0 }
 0x6db   :  { %22125 = vmatmul.mubr.msk.f32.gmra.mrb[66].mxu0 %vm26_vm0, %v31398_v52 }
 0x6dc   :  { %22127 = vmatprep.mubr.msk.f32.mxu0 %vm28339_vm1, %v28338_v0 }
 0x6df   :  { %22128 = vmatmul.mubr.msk.f32.gmra.mrb[68].mxu0 %vm26_vm0, %v31407_v53 }
 0x6e0   :  { %22130 = vmatprep.mubr.msk.f32.mxu0 %vm28339_vm1, %v28338_v0 }
 0x6e3   :  { %22131 = vmatmul.mubr.msk.f32.gmra.mrb[70].mxu0 %vm26_vm0, %v31416_v54 }
 0x6e4   :  { %22133 = vmatprep.mubr.msk.f32.mxu0 %vm28339_vm1, %v28338_v0 }
 0x6e7   :  { %22134 = vmatmul.mubr.msk.f32.gmra.mrb[72].mxu0 %vm26_vm0, %v31425_v55 }
 0x6e8   :  { %22136 = vmatprep.mubr.msk.f32.mxu0 %vm28339_vm1, %v28338_v0 }
 0x6eb   :  { %22137 = vmatmul.mubr.msk.f32.gmra.mrb[74].mxu0 %vm26_vm0, %v31434_v56 }
 0x6ec   :  { %22139 = vmatprep.mubr.msk.f32.mxu0 %vm28339_vm1, %v28338_v0 }
 0x6ef   :  { %22140 = vmatmul.mubr.msk.f32.gmra.mrb[76].mxu0 %vm26_vm0, %v31443_v57 }
 0x6f0   :  { %22142 = vmatprep.mubr.msk.f32.mxu0 %vm28339_vm1, %v28338_v0 }
 0x6f3   :  { %22143 = vmatmul.mubr.msk.f32.gmra.mrb[78].mxu0 %vm26_vm0, %v31452_v58 }
 0x6f4   :  { %22145 = vmatprep.mubr.msk.f32.mxu0 %vm28339_vm1, %v28338_v0 }
 0x6f7   :  { %22146 = vmatmul.mubr.msk.f32.gmra.mrb[80].mxu0 %vm26_vm0, %v31461_v59 }
 0x6f8   :  { %22148 = vmatprep.mubr.msk.f32.mxu0 %vm28339_vm1, %v28338_v0 }
 0x6fb   :  { %22149 = vmatmul.mubr.msk.f32.gmra.mrb[82].mxu0 %vm26_vm0, %v31470_v60 }
 0x6fc   :  { %22151 = vmatprep.mubr.msk.f32.mxu0 %vm28339_vm1, %v28338_v0 }
 0x6ff   :  { %22152 = vmatmul.mubr.msk.f32.gmra.mrb[84].mxu0 %vm26_vm0, %v31479_v61 }
 0x700   :  { %22154 = vmatprep.mubr.msk.f32.mxu0 %vm28339_vm1, %v28338_v0 }
 0x703   :  { %22155 = vmatmul.mubr.msk.f32.gmra.mrb[86].mxu0 %vm26_vm0, %v31488_v62 }
 0x704   :  { %22157 = vmatprep.mubr.msk.f32.mxu0 %vm28339_vm1, %v28338_v0 }
 0x707   :  { %22158 = vmatmul.mubr.msk.f32.gmra.mrb[88].mxu0 %vm26_vm0, %v31497_v63 }
 0x708   :  { %22160 = vmatprep.mubr.msk.f32.mxu0 %vm28339_vm1, %v28338_v0 }
 0x70b   :  { %22161 = vmatmul.mubr.msk.f32.gmra.mrb[90].mxu0 %vm26_vm0, %v31506_v1 }
 0x70c   :  { %22163 = vmatprep.mubr.msk.f32.mxu0 %vm28339_vm1, %v28338_v0 }
 0x70f   :  { %22164 = vmatmul.mubr.msk.f32.gmra.mrb[92].mxu0 %vm26_vm0, %v31515_v2 }
 0x710   :  { %22166 = vmatprep.mubr.msk.f32.mxu0 %vm28339_vm1, %v28338_v0 }
 0x713   :  { %22167 = vmatmul.mubr.msk.f32.gmra.mrb[94].mxu0 %vm26_vm0, %v31524_v3 }
 0x714   :  { %22169 = vmatprep.mubr.msk.f32.mxu0 %vm28339_vm1, %v28338_v0 }
 0x717   :  { %22170 = vmatmul.mubr.msk.f32.gmra.mrb[96].mxu0 %vm26_vm0, %v31533_v4 }
 0x718   :  { %22172 = vmatprep.mubr.msk.f32.mxu0 %vm28339_vm1, %v28338_v0 }
 0x71b   :  { %22173 = vmatmul.mubr.msk.f32.gmra.mrb[98].mxu0 %vm26_vm0, %v31542_v5 }
 0x71c   :  { %22175 = vmatprep.mubr.msk.f32.mxu0 %vm28339_vm1, %v28338_v0 }
 0x71f   :  { %22176 = vmatmul.mubr.msk.f32.gmra.mrb[100].mxu0 %vm26_vm0, %v31551_v6 }
 0x720   :  { %22178 = vmatprep.mubr.msk.f32.mxu0 %vm28339_vm1, %v28338_v0 }
 0x723   :  { %22179 = vmatmul.mubr.msk.f32.gmra.mrb[102].mxu0 %vm26_vm0, %v31560_v7 }
 0x724   :  { %22181 = vmatprep.mubr.msk.f32.mxu0 %vm28339_vm1, %v28338_v0 }
 0x727   :  { %22182 = vmatmul.mubr.msk.f32.gmra.mrb[104].mxu0 %vm26_vm0, %v31569_v8 }
 0x728   :  { %22184 = vmatprep.mubr.msk.f32.mxu0 %vm28339_vm1, %v28338_v0 }
 0x72b   :  { %22185 = vmatmul.mubr.msk.f32.gmra.mrb[106].mxu0 %vm26_vm0, %v31578_v9 }
 0x72c   :  { %22187 = vmatprep.mubr.msk.f32.mxu0 %vm28339_vm1, %v28338_v0 }
 0x72f   :  { %22188 = vmatmul.mubr.msk.f32.gmra.mrb[108].mxu0 %vm26_vm0, %v31587_v10 }
 0x730   :  { %22190 = vmatprep.mubr.msk.f32.mxu0 %vm28339_vm1, %v28338_v0 }
 0x733   :  { %22191 = vmatmul.mubr.msk.f32.gmra.mrb[110].mxu0 %vm26_vm0, %v31596_v11 }
 0x734   :  { %22193 = vmatprep.mubr.msk.f32.mxu0 %vm28339_vm1, %v28338_v0 }
 0x737   :  { %22194 = vmatmul.mubr.msk.f32.gmra.mrb[112].mxu0 %vm26_vm0, %v31605_v12 }
 0x738   :  { %22196 = vmatprep.mubr.msk.f32.mxu0 %vm28339_vm1, %v28338_v0 }
 0x73b   :  { %22197 = vmatmul.mubr.msk.f32.gmra.mrb[114].mxu0 %vm26_vm0, %v31614_v13 }
 0x73c   :  { %22199 = vmatprep.mubr.msk.f32.mxu0 %vm28339_vm1, %v28338_v0 }
 0x73f   :  { %22200 = vmatmul.mubr.msk.f32.gmra.mrb[116].mxu0 %vm26_vm0, %v31623_v14 }
 0x740   :  { %22202 = vmatprep.mubr.msk.f32.mxu0 %vm28339_vm1, %v28338_v0 }
 0x743   :  { %22203 = vmatmul.mubr.msk.f32.gmra.mrb[118].mxu0 %vm26_vm0, %v31632_v15 }
 0x744   :  { %22205 = vmatprep.mubr.msk.f32.mxu0 %vm28339_vm1, %v28338_v0 }
 0x747   :  { %22206 = vmatmul.mubr.msk.f32.gmra.mrb[120].mxu0 %vm26_vm0, %v31641_v16 }
 0x748   :  { %22208 = vmatprep.mubr.msk.f32.mxu0 %vm28339_vm1, %v28338_v0 }
 0x74b   :  { %22209 = vmatmul.mubr.msk.f32.gmra.mrb[122].mxu0 %vm26_vm0, %v31650_v17 }
 0x74c   :  { %22211 = vmatprep.mubr.msk.f32.mxu0 %vm28339_vm1, %v28338_v0 }
 0x74f   :  { %22212 = vmatmul.mubr.msk.f32.gmra.mrb[124].mxu0 %vm26_vm0, %v31659_v18  ;;  %v31686_v18 = vld [vmem:[%s37465_s0 + $0x221] sm:$0xff] }
 0x750   :  { %22214 = vmatprep.mubr.msk.f32.mxu0 %vm28339_vm1, %v28338_v0  ;;  %37577 = vst [vmem:[#allocation6_spill] sm:$0xff] %v31686_v18 }
 0x753   :  { %22215 = vmatmul.mubr.msk.f32.gmra.mrb[126].mxu0 %vm26_vm0, %v31668_v19  ;;  %v31695_v19 = vld [vmem:[%s37465_s0 + $0x229] sm:$0xff] }
 0x754   :  { %22217 = vmatprep.mubr.msk.f32.mxu0 %vm28339_vm1, %v28338_v0  ;;  %37578 = vst [vmem:[#allocation7_spill] sm:$0xff] %v31695_v19 }
 0x757   :  { %22218 = vmatmul.mubr.msk.f32.gmra.mrb[128].mxu0 %vm26_vm0, %v31677_v20  ;;  %v31704_v20 = vld [vmem:[%s37465_s0 + $0x231] sm:$0xff] }
 0x758   :  { %22220 = vmatprep.mubr.msk.f32.mxu0 %vm28339_vm1, %v28338_v0  ;;  %37579 = vst [vmem:[#allocation8_spill] sm:$0xff] %v31704_v20 }
 0x75b   :  { %22221 = vmatmul.mubr.msk.f32.gmra.mrb[130].mxu0 %vm26_vm0, %v31686_v18  ;;  %v31713_v18 = vld [vmem:[%s37465_s0 + $0x239] sm:$0xff] }
 0x75c   :  { %22223 = vmatprep.mubr.msk.f32.mxu0 %vm28339_vm1, %v28338_v0  ;;  %37580 = vst [vmem:[#allocation9_spill] sm:$0xff] %v31713_v18 }
 0x75f   :  { %22224 = vmatmul.mubr.msk.f32.gmra.mrb[132].mxu0 %vm26_vm0, %v31695_v19  ;;  %v31722_v19 = vld [vmem:[%s37465_s0 + $0x241] sm:$0xff] }
 0x760   :  { %22226 = vmatprep.mubr.msk.f32.mxu0 %vm28339_vm1, %v28338_v0  ;;  %37581 = vst [vmem:[#allocation10_spill] sm:$0xff] %v31722_v19 }
 0x763   :  { %22227 = vmatmul.mubr.msk.f32.gmra.mrb[134].mxu0 %vm26_vm0, %v31704_v20  ;;  %v31731_v20 = vld [vmem:[%s37465_s0 + $0x249] sm:$0xff] }
 0x764   :  { %22229 = vmatprep.mubr.msk.f32.mxu0 %vm28339_vm1, %v28338_v0  ;;  %37582 = vst [vmem:[#allocation11_spill] sm:$0xff] %v31731_v20 }
 0x767   :  { %22230 = vmatmul.mubr.msk.f32.gmra.mrb[136].mxu0 %vm26_vm0, %v31713_v18  ;;  %v31740_v18 = vld [vmem:[%s37465_s0 + $0x251] sm:$0xff] }
 0x768   :  { %22232 = vmatprep.mubr.msk.f32.mxu0 %vm28339_vm1, %v28338_v0  ;;  %37583 = vst [vmem:[#allocation12_spill] sm:$0xff] %v31740_v18 }
 0x76b   :  { %22233 = vmatmul.mubr.msk.f32.gmra.mrb[138].mxu0 %vm26_vm0, %v31722_v19  ;;  %v31749_v19 = vld [vmem:[%s37465_s0 + $0x259] sm:$0xff] }
 0x76c   :  { %22235 = vmatprep.mubr.msk.f32.mxu0 %vm28339_vm1, %v28338_v0  ;;  %37584 = vst [vmem:[#allocation13_spill] sm:$0xff] %v31749_v19 }
 0x76f   :  { %22236 = vmatmul.mubr.msk.f32.gmra.mrb[140].mxu0 %vm26_vm0, %v31731_v20  ;;  %v31758_v20 = vld [vmem:[%s37465_s0 + $0x261] sm:$0xff] }
 0x770   :  { %22238 = vmatprep.mubr.msk.f32.mxu0 %vm28339_vm1, %v28338_v0  ;;  %37585 = vst [vmem:[#allocation14_spill] sm:$0xff] %v31758_v20 }
 0x773   :  { %22239 = vmatmul.mubr.msk.f32.gmra.mrb[142].mxu0 %vm26_vm0, %v31740_v18  ;;  %v31767_v18 = vld [vmem:[%s37465_s0 + $0x269] sm:$0xff] }
 0x774   :  { %22241 = vmatprep.mubr.msk.f32.mxu0 %vm28339_vm1, %v28338_v0  ;;  %37586 = vst [vmem:[#allocation15_spill] sm:$0xff] %v31767_v18 }
 0x777   :  { %22242 = vmatmul.mubr.msk.f32.gmra.mrb[144].mxu0 %vm26_vm0, %v31749_v19  ;;  %v31776_v19 = vld [vmem:[%s37465_s0 + $0x271] sm:$0xff] }
 0x778   :  { %22244 = vmatprep.mubr.msk.f32.mxu0 %vm28339_vm1, %v28338_v0  ;;  %37587 = vst [vmem:[#allocation16_spill] sm:$0xff] %v31776_v19 }
 0x77b   :  { %22245 = vmatmul.mubr.msk.f32.gmra.mrb[146].mxu0 %vm26_vm0, %v31758_v20  ;;  %v31785_v20 = vld [vmem:[%s37465_s0 + $0x279] sm:$0xff] }
 0x77c   :  { %22247 = vmatprep.mubr.msk.f32.mxu0 %vm28339_vm1, %v28338_v0  ;;  %37588 = vst [vmem:[#allocation17_spill] sm:$0xff] %v31785_v20 }
 0x77f   :  { %22248 = vmatmul.mubr.msk.f32.gmra.mrb[148].mxu0 %vm26_vm0, %v31767_v18  ;;  %v31794_v18 = vld [vmem:[%s37465_s0 + $0x281] sm:$0xff] }
 0x780   :  { %22250 = vmatprep.mubr.msk.f32.mxu0 %vm28339_vm1, %v28338_v0  ;;  %37589 = vst [vmem:[#allocation18_spill] sm:$0xff] %v31794_v18 }
 0x783   :  { %22251 = vmatmul.mubr.msk.f32.gmra.mrb[150].mxu0 %vm26_vm0, %v31776_v19  ;;  %v31803_v19 = vld [vmem:[%s37465_s0 + $0x289] sm:$0xff] }
 0x784   :  { %22253 = vmatprep.mubr.msk.f32.mxu0 %vm28339_vm1, %v28338_v0  ;;  %37590 = vst [vmem:[#allocation19_spill] sm:$0xff] %v31803_v19 }
 0x787   :  { %22254 = vmatmul.mubr.msk.f32.gmra.mrb[152].mxu0 %vm26_vm0, %v31785_v20  ;;  %v31812_v20 = vld [vmem:[%s37465_s0 + $0x291] sm:$0xff] }
 0x788   :  { %22256 = vmatprep.mubr.msk.f32.mxu0 %vm28339_vm1, %v28338_v0 }
 0x78b   :  { %22257 = vmatmul.mubr.msk.f32.gmra.mrb[154].mxu0 %vm26_vm0, %v31794_v18  ;;  %v31821_v18 = vld [vmem:[%s37465_s0 + $0x299] sm:$0xff] }
 0x78c   :  { %22259 = vmatprep.mubr.msk.f32.mxu0 %vm28339_vm1, %v28338_v0 }
 0x78f   :  { %22260 = vmatmul.mubr.msk.f32.gmra.mrb[156].mxu0 %vm26_vm0, %v31803_v19  ;;  %v18257_v19 = vld [vmem:[%s37464_s2 + $0x38] sm:$0xff] }
 0x790   :  { %22262 = vmatprep.mubr.msk.f32.mxu0 %vm28339_vm1, %v28338_v0 }
 0x793   :  { %22263 = vmatmul.mubr.msk.f32.gmra.mrb[158].mxu0 %vm26_vm0, %v31812_v20 }
 0x794   :  { %22265 = vmatprep.mubr.msk.f32.mxu0 %vm28339_vm1, %v28338_v0 }
 0x797   :  { %22266 = vmatmul.mubr.msk.f32.gmra.mrb[160].mxu0 %vm26_vm0, %v31821_v18 }
 0x798   :  { %22270 = vmatprep.mubr.msk.f32.mxu0 %vm28339_vm1, %v28338_v0 }
 0x79b   :  { %22271 = vmatmul.mubr.msk.f32.vlgmr.msra.gmra.mrb[0].mxu0 %vm26_vm0, %v31119_v21  ;;  %v37591_v21 = vld [vmem:[#allocation3_spill] sm:$0xff] }
 0x79c   :  { %22514 = vmatpush3.msra.mxu0 %v18257_v19  ;;  %22273 = vmatprep.mubr.msk.f32.mxu0 %vm28339_vm1, %v28338_v0  ;;  %v6381_v19 = vld [vmem:[%s37465_s0 + $0x172] sm:$0xff] }
 0x79d   :  { %22758 = vmatprep.subr.mxu0 %v28338_v0 }
 0x79f   :  { %22274 = vmatmul.mubr.msk.f32.gmra.mrb[2].mxu0 %vm26_vm0, %v31128_v22  ;;  %v37592_v22 = vld [vmem:[#allocation4_spill] sm:$0xff] }
 0x7a0   :  { %22276 = vmatprep.mubr.msk.f32.mxu0 %vm28339_vm1, %v28338_v0 }
 0x7a3   :  { %22277 = vmatmul.mubr.msk.f32.gmra.mrb[4].mxu0 %vm26_vm0, %v31137_v23  ;;  %v37593_v23 = vld [vmem:[#allocation5_spill] sm:$0xff] }
 0x7a4   :  { %22279 = vmatprep.mubr.msk.f32.mxu0 %vm28339_vm1, %v28338_v0 }
 0x7a7   :  { %22280 = vmatmul.mubr.msk.f32.gmra.mrb[6].mxu0 %vm26_vm0, %v31146_v24  ;;  %v37594_v24 = vld [vmem:[#allocation6_spill] sm:$0xff] }
 0x7a8   :  { %22282 = vmatprep.mubr.msk.f32.mxu0 %vm28339_vm1, %v28338_v0 }
 0x7ab   :  { %22283 = vmatmul.mubr.msk.f32.gmra.mrb[8].mxu0 %vm26_vm0, %v31155_v25  ;;  %v37595_v25 = vld [vmem:[#allocation7_spill] sm:$0xff] }
 0x7ac   :  { %22285 = vmatprep.mubr.msk.f32.mxu0 %vm28339_vm1, %v28338_v0 }
 0x7af   :  { %22286 = vmatmul.mubr.msk.f32.gmra.mrb[10].mxu0 %vm26_vm0, %v31164_v26  ;;  %v37596_v26 = vld [vmem:[#allocation8_spill] sm:$0xff] }
 0x7b0   :  { %22288 = vmatprep.mubr.msk.f32.mxu0 %vm28339_vm1, %v28338_v0 }
 0x7b3   :  { %22289 = vmatmul.mubr.msk.f32.gmra.mrb[12].mxu0 %vm26_vm0, %v31173_v27  ;;  %v37597_v27 = vld [vmem:[#allocation9_spill] sm:$0xff] }
 0x7b4   :  { %22291 = vmatprep.mubr.msk.f32.mxu0 %vm28339_vm1, %v28338_v0 }
 0x7b7   :  { %22292 = vmatmul.mubr.msk.f32.gmra.mrb[14].mxu0 %vm26_vm0, %v31182_v28  ;;  %v37598_v28 = vld [vmem:[#allocation10_spill] sm:$0xff] }
 0x7b8   :  { %22294 = vmatprep.mubr.msk.f32.mxu0 %vm28339_vm1, %v28338_v0 }
 0x7bb   :  { %22295 = vmatmul.mubr.msk.f32.gmra.mrb[16].mxu0 %vm26_vm0, %v31191_v29  ;;  %v37599_v29 = vld [vmem:[#allocation11_spill] sm:$0xff] }
 0x7bc   :  { %22297 = vmatprep.mubr.msk.f32.mxu0 %vm28339_vm1, %v28338_v0 }
 0x7bf   :  { %22298 = vmatmul.mubr.msk.f32.gmra.mrb[18].mxu0 %vm26_vm0, %v31200_v30  ;;  %v37600_v30 = vld [vmem:[#allocation12_spill] sm:$0xff] }
 0x7c0   :  { %22300 = vmatprep.mubr.msk.f32.mxu0 %vm28339_vm1, %v28338_v0 }
 0x7c3   :  { %22301 = vmatmul.mubr.msk.f32.gmra.mrb[20].mxu0 %vm26_vm0, %v31209_v31  ;;  %v37601_v31 = vld [vmem:[#allocation13_spill] sm:$0xff] }
 0x7c4   :  { %22303 = vmatprep.mubr.msk.f32.mxu0 %vm28339_vm1, %v28338_v0 }
 0x7c7   :  { %22304 = vmatmul.mubr.msk.f32.gmra.mrb[22].mxu0 %vm26_vm0, %v31218_v32  ;;  %v37602_v32 = vld [vmem:[#allocation14_spill] sm:$0xff] }
 0x7c8   :  { %22306 = vmatprep.mubr.msk.f32.mxu0 %vm28339_vm1, %v28338_v0 }
 0x7cb   :  { %22307 = vmatmul.mubr.msk.f32.gmra.mrb[24].mxu0 %vm26_vm0, %v31227_v33  ;;  %v37603_v33 = vld [vmem:[#allocation15_spill] sm:$0xff] }
 0x7cc   :  { %22309 = vmatprep.mubr.msk.f32.mxu0 %vm28339_vm1, %v28338_v0 }
 0x7cf   :  { %22310 = vmatmul.mubr.msk.f32.gmra.mrb[26].mxu0 %vm26_vm0, %v31236_v34  ;;  %v37604_v34 = vld [vmem:[#allocation16_spill] sm:$0xff] }
 0x7d0   :  { %22312 = vmatprep.mubr.msk.f32.mxu0 %vm28339_vm1, %v28338_v0 }
 0x7d3   :  { %22313 = vmatmul.mubr.msk.f32.gmra.mrb[28].mxu0 %vm26_vm0, %v31245_v35  ;;  %v37605_v35 = vld [vmem:[#allocation17_spill] sm:$0xff] }
 0x7d4   :  { %22315 = vmatprep.mubr.msk.f32.mxu0 %vm28339_vm1, %v28338_v0 }
 0x7d7   :  { %22316 = vmatmul.mubr.msk.f32.gmra.mrb[30].mxu0 %vm26_vm0, %v31254_v36  ;;  %v37606_v36 = vld [vmem:[#allocation18_spill] sm:$0xff] }
 0x7d8   :  { %22318 = vmatprep.mubr.msk.f32.mxu0 %vm28339_vm1, %v28338_v0 }
 0x7db   :  { %22319 = vmatmul.mubr.msk.f32.gmra.mrb[32].mxu0 %vm26_vm0, %v31263_v37  ;;  %v37607_v37 = vld [vmem:[#allocation19_spill] sm:$0xff] }
 0x7dc   :  { %22321 = vmatprep.mubr.msk.f32.mxu0 %vm28339_vm1, %v28338_v0 }
 0x7df   :  { %22322 = vmatmul.mubr.msk.f32.gmra.mrb[34].mxu0 %vm26_vm0, %v31272_v38  ;;  %v5542_v38 = vld [vmem:[%s37465_s0 + $0x2a1] sm:$0xff] }
 0x7e0   :  { %22324 = vmatprep.mubr.msk.f32.mxu0 %vm28339_vm1, %v28338_v0 }
 0x7e3   :  { %22325 = vmatmul.mubr.msk.f32.gmra.mrb[36].mxu0 %vm26_vm0, %v31281_v39  ;;  %v5543_v39 = vld [vmem:[%s37465_s0 + $0x2a9] sm:$0xff] }
 0x7e4   :  { %22327 = vmatprep.mubr.msk.f32.mxu0 %vm28339_vm1, %v28338_v0 }
 0x7e7   :  { %22328 = vmatmul.mubr.msk.f32.gmra.mrb[38].mxu0 %vm26_vm0, %v31290_v40  ;;  %v6340_v40 = vld [vmem:[%s37465_s0 + $0x2a] sm:$0xff] }
 0x7e8   :  { %22330 = vmatprep.mubr.msk.f32.mxu0 %vm28339_vm1, %v28338_v0 }
 0x7eb   :  { %22331 = vmatmul.mubr.msk.f32.gmra.mrb[40].mxu0 %vm26_vm0, %v31299_v41  ;;  %v18339_v41 = vld [vmem:[%s37464_s2 + $0x40] sm:$0xff] }
 0x7ec   :  { %22333 = vmatprep.mubr.msk.f32.mxu0 %vm28339_vm1, %v28338_v0 }
 0x7ef   :  { %22334 = vmatmul.mubr.msk.f32.gmra.mrb[42].mxu0 %vm26_vm0, %v31308_v42  ;;  %v6341_v42 = vld [vmem:[%s37465_s0 + $0x32] sm:$0xff] }
 0x7f0   :  { %22336 = vmatprep.mubr.msk.f32.mxu0 %vm28339_vm1, %v28338_v0 }
 0x7f3   :  { %22337 = vmatmul.mubr.msk.f32.gmra.mrb[44].mxu0 %vm26_vm0, %v31317_v43  ;;  %v6342_v43 = vld [vmem:[%s37465_s0 + $0x3a] sm:$0xff] }
 0x7f4   :  { %22339 = vmatprep.mubr.msk.f32.mxu0 %vm28339_vm1, %v28338_v0 }
 0x7f7   :  { %22340 = vmatmul.mubr.msk.f32.gmra.mrb[46].mxu0 %vm26_vm0, %v31326_v44  ;;  %v6343_v44 = vld [vmem:[%s37465_s0 + $0x42] sm:$0xff] }
 0x7f8   :  { %22342 = vmatprep.mubr.msk.f32.mxu0 %vm28339_vm1, %v28338_v0 }
 0x7fb   :  { %22343 = vmatmul.mubr.msk.f32.gmra.mrb[48].mxu0 %vm26_vm0, %v31335_v45  ;;  %v6344_v45 = vld [vmem:[%s37465_s0 + $0x4a] sm:$0xff] }
 0x7fc   :  { %22345 = vmatprep.mubr.msk.f32.mxu0 %vm28339_vm1, %v28338_v0 }
 0x7ff   :  { %22346 = vmatmul.mubr.msk.f32.gmra.mrb[50].mxu0 %vm26_vm0, %v31344_v46  ;;  %v6345_v46 = vld [vmem:[%s37465_s0 + $0x52] sm:$0xff] }
 0x800   :  { %22348 = vmatprep.mubr.msk.f32.mxu0 %vm28339_vm1, %v28338_v0 }
 0x803   :  { %22349 = vmatmul.mubr.msk.f32.gmra.mrb[52].mxu0 %vm26_vm0, %v31353_v47  ;;  %v6346_v47 = vld [vmem:[%s37465_s0 + $0x5a] sm:$0xff] }
 0x804   :  { %22351 = vmatprep.mubr.msk.f32.mxu0 %vm28339_vm1, %v28338_v0 }
 0x807   :  { %22352 = vmatmul.mubr.msk.f32.gmra.mrb[54].mxu0 %vm26_vm0, %v31362_v48  ;;  %v6347_v48 = vld [vmem:[%s37465_s0 + $0x62] sm:$0xff] }
 0x808   :  { %22354 = vmatprep.mubr.msk.f32.mxu0 %vm28339_vm1, %v28338_v0 }
 0x80b   :  { %22355 = vmatmul.mubr.msk.f32.gmra.mrb[56].mxu0 %vm26_vm0, %v31371_v49  ;;  %v6348_v49 = vld [vmem:[%s37465_s0 + $0x6a] sm:$0xff] }
 0x80c   :  { %22357 = vmatprep.mubr.msk.f32.mxu0 %vm28339_vm1, %v28338_v0 }
 0x80f   :  { %22358 = vmatmul.mubr.msk.f32.gmra.mrb[58].mxu0 %vm26_vm0, %v31380_v50  ;;  %v6349_v50 = vld [vmem:[%s37465_s0 + $0x72] sm:$0xff] }
 0x810   :  { %22360 = vmatprep.mubr.msk.f32.mxu0 %vm28339_vm1, %v28338_v0 }
 0x813   :  { %22361 = vmatmul.mubr.msk.f32.gmra.mrb[60].mxu0 %vm26_vm0, %v31389_v51  ;;  %v6350_v51 = vld [vmem:[%s37465_s0 + $0x7a] sm:$0xff] }
 0x814   :  { %22363 = vmatprep.mubr.msk.f32.mxu0 %vm28339_vm1, %v28338_v0 }
 0x817   :  { %22364 = vmatmul.mubr.msk.f32.gmra.mrb[62].mxu0 %vm26_vm0, %v31398_v52  ;;  %v6351_v52 = vld [vmem:[%s37465_s0 + $0x82] sm:$0xff] }
 0x818   :  { %22366 = vmatprep.mubr.msk.f32.mxu0 %vm28339_vm1, %v28338_v0 }
 0x81b   :  { %22367 = vmatmul.mubr.msk.f32.gmra.mrb[64].mxu0 %vm26_vm0, %v31407_v53  ;;  %v6352_v53 = vld [vmem:[%s37465_s0 + $0x8a] sm:$0xff] }
 0x81c   :  { %22369 = vmatprep.mubr.msk.f32.mxu0 %vm28339_vm1, %v28338_v0 }
 0x81f   :  { %22370 = vmatmul.mubr.msk.f32.gmra.mrb[66].mxu0 %vm26_vm0, %v31416_v54  ;;  %v6353_v54 = vld [vmem:[%s37465_s0 + $0x92] sm:$0xff] }
 0x820   :  { %22372 = vmatprep.mubr.msk.f32.mxu0 %vm28339_vm1, %v28338_v0 }
 0x823   :  { %22373 = vmatmul.mubr.msk.f32.gmra.mrb[68].mxu0 %vm26_vm0, %v31425_v55  ;;  %v6354_v55 = vld [vmem:[%s37465_s0 + $0x9a] sm:$0xff] }
 0x824   :  { %22375 = vmatprep.mubr.msk.f32.mxu0 %vm28339_vm1, %v28338_v0 }
 0x827   :  { %22376 = vmatmul.mubr.msk.f32.gmra.mrb[70].mxu0 %vm26_vm0, %v31434_v56  ;;  %v6355_v56 = vld [vmem:[%s37465_s0 + $0xa2] sm:$0xff] }
 0x828   :  { %22378 = vmatprep.mubr.msk.f32.mxu0 %vm28339_vm1, %v28338_v0 }
 0x82b   :  { %22379 = vmatmul.mubr.msk.f32.gmra.mrb[72].mxu0 %vm26_vm0, %v31443_v57  ;;  %v6356_v57 = vld [vmem:[%s37465_s0 + $0xaa] sm:$0xff] }
 0x82c   :  { %22381 = vmatprep.mubr.msk.f32.mxu0 %vm28339_vm1, %v28338_v0 }
 0x82f   :  { %22382 = vmatmul.mubr.msk.f32.gmra.mrb[74].mxu0 %vm26_vm0, %v31452_v58  ;;  %v6357_v58 = vld [vmem:[%s37465_s0 + $0xb2] sm:$0xff] }
 0x830   :  { %22384 = vmatprep.mubr.msk.f32.mxu0 %vm28339_vm1, %v28338_v0 }
 0x833   :  { %22385 = vmatmul.mubr.msk.f32.gmra.mrb[76].mxu0 %vm26_vm0, %v31461_v59  ;;  %v6358_v59 = vld [vmem:[%s37465_s0 + $0xba] sm:$0xff] }
 0x834   :  { %22387 = vmatprep.mubr.msk.f32.mxu0 %vm28339_vm1, %v28338_v0 }
 0x837   :  { %22388 = vmatmul.mubr.msk.f32.gmra.mrb[78].mxu0 %vm26_vm0, %v31470_v60  ;;  %v6359_v60 = vld [vmem:[%s37465_s0 + $0xc2] sm:$0xff] }
 0x838   :  { %22390 = vmatprep.mubr.msk.f32.mxu0 %vm28339_vm1, %v28338_v0 }
 0x83b   :  { %22391 = vmatmul.mubr.msk.f32.gmra.mrb[80].mxu0 %vm26_vm0, %v31479_v61  ;;  %v6360_v61 = vld [vmem:[%s37465_s0 + $0xca] sm:$0xff] }
 0x83c   :  { %22393 = vmatprep.mubr.msk.f32.mxu0 %vm28339_vm1, %v28338_v0 }
 0x83f   :  { %22394 = vmatmul.mubr.msk.f32.gmra.mrb[82].mxu0 %vm26_vm0, %v31488_v62  ;;  %v6361_v62 = vld [vmem:[%s37465_s0 + $0xd2] sm:$0xff] }
 0x840   :  { %22396 = vmatprep.mubr.msk.f32.mxu0 %vm28339_vm1, %v28338_v0 }
 0x843   :  { %22397 = vmatmul.mubr.msk.f32.gmra.mrb[84].mxu0 %vm26_vm0, %v31497_v63  ;;  %v6362_v63 = vld [vmem:[%s37465_s0 + $0xda] sm:$0xff] }
 0x844   :  { %22399 = vmatprep.mubr.msk.f32.mxu0 %vm28339_vm1, %v28338_v0 }
 0x847   :  { %22400 = vmatmul.mubr.msk.f32.gmra.mrb[86].mxu0 %vm26_vm0, %v31506_v1  ;;  %v6363_v1 = vld [vmem:[%s37465_s0 + $0xe2] sm:$0xff] }
 0x848   :  { %22402 = vmatprep.mubr.msk.f32.mxu0 %vm28339_vm1, %v28338_v0 }
 0x84b   :  { %22403 = vmatmul.mubr.msk.f32.gmra.mrb[88].mxu0 %vm26_vm0, %v31515_v2  ;;  %v6364_v2 = vld [vmem:[%s37465_s0 + $0xea] sm:$0xff] }
 0x84c   :  { %22405 = vmatprep.mubr.msk.f32.mxu0 %vm28339_vm1, %v28338_v0 }
 0x84f   :  { %22406 = vmatmul.mubr.msk.f32.gmra.mrb[90].mxu0 %vm26_vm0, %v31524_v3  ;;  %v6365_v3 = vld [vmem:[%s37465_s0 + $0xf2] sm:$0xff] }
 0x850   :  { %22408 = vmatprep.mubr.msk.f32.mxu0 %vm28339_vm1, %v28338_v0 }
 0x853   :  { %22409 = vmatmul.mubr.msk.f32.gmra.mrb[92].mxu0 %vm26_vm0, %v31533_v4  ;;  %v6366_v4 = vld [vmem:[%s37465_s0 + $0xfa] sm:$0xff] }
 0x854   :  { %22411 = vmatprep.mubr.msk.f32.mxu0 %vm28339_vm1, %v28338_v0 }
 0x857   :  { %22412 = vmatmul.mubr.msk.f32.gmra.mrb[94].mxu0 %vm26_vm0, %v31542_v5  ;;  %v6367_v5 = vld [vmem:[%s37465_s0 + $0x102] sm:$0xff] }
 0x858   :  { %22414 = vmatprep.mubr.msk.f32.mxu0 %vm28339_vm1, %v28338_v0 }
 0x85b   :  { %22415 = vmatmul.mubr.msk.f32.gmra.mrb[96].mxu0 %vm26_vm0, %v31551_v6  ;;  %v6368_v6 = vld [vmem:[%s37465_s0 + $0x10a] sm:$0xff] }
 0x85c   :  { %22417 = vmatprep.mubr.msk.f32.mxu0 %vm28339_vm1, %v28338_v0 }
 0x85f   :  { %22418 = vmatmul.mubr.msk.f32.gmra.mrb[98].mxu0 %vm26_vm0, %v31560_v7  ;;  %v6369_v7 = vld [vmem:[%s37465_s0 + $0x112] sm:$0xff] }
 0x860   :  { %22420 = vmatprep.mubr.msk.f32.mxu0 %vm28339_vm1, %v28338_v0 }
 0x863   :  { %22421 = vmatmul.mubr.msk.f32.gmra.mrb[100].mxu0 %vm26_vm0, %v31569_v8  ;;  %v6370_v8 = vld [vmem:[%s37465_s0 + $0x11a] sm:$0xff] }
 0x864   :  { %22423 = vmatprep.mubr.msk.f32.mxu0 %vm28339_vm1, %v28338_v0 }
 0x867   :  { %22424 = vmatmul.mubr.msk.f32.gmra.mrb[102].mxu0 %vm26_vm0, %v31578_v9  ;;  %v6371_v9 = vld [vmem:[%s37465_s0 + $0x122] sm:$0xff] }
 0x868   :  { %22426 = vmatprep.mubr.msk.f32.mxu0 %vm28339_vm1, %v28338_v0 }
 0x86b   :  { %22427 = vmatmul.mubr.msk.f32.gmra.mrb[104].mxu0 %vm26_vm0, %v31587_v10  ;;  %v6372_v10 = vld [vmem:[%s37465_s0 + $0x12a] sm:$0xff] }
 0x86c   :  { %22429 = vmatprep.mubr.msk.f32.mxu0 %vm28339_vm1, %v28338_v0 }
 0x86f   :  { %22430 = vmatmul.mubr.msk.f32.gmra.mrb[106].mxu0 %vm26_vm0, %v31596_v11  ;;  %v6373_v11 = vld [vmem:[%s37465_s0 + $0x132] sm:$0xff] }
 0x870   :  { %22432 = vmatprep.mubr.msk.f32.mxu0 %vm28339_vm1, %v28338_v0 }
 0x873   :  { %22433 = vmatmul.mubr.msk.f32.gmra.mrb[108].mxu0 %vm26_vm0, %v31605_v12  ;;  %v6374_v12 = vld [vmem:[%s37465_s0 + $0x13a] sm:$0xff] }
 0x874   :  { %22435 = vmatprep.mubr.msk.f32.mxu0 %vm28339_vm1, %v28338_v0 }
 0x877   :  { %22436 = vmatmul.mubr.msk.f32.gmra.mrb[110].mxu0 %vm26_vm0, %v31614_v13  ;;  %v6375_v13 = vld [vmem:[%s37465_s0 + $0x142] sm:$0xff] }
 0x878   :  { %22438 = vmatprep.mubr.msk.f32.mxu0 %vm28339_vm1, %v28338_v0 }
 0x87b   :  { %22439 = vmatmul.mubr.msk.f32.gmra.mrb[112].mxu0 %vm26_vm0, %v31623_v14  ;;  %v6376_v14 = vld [vmem:[%s37465_s0 + $0x14a] sm:$0xff] }
 0x87c   :  { %22441 = vmatprep.mubr.msk.f32.mxu0 %vm28339_vm1, %v28338_v0 }
 0x87f   :  { %22442 = vmatmul.mubr.msk.f32.gmra.mrb[114].mxu0 %vm26_vm0, %v31632_v15  ;;  %v6377_v15 = vld [vmem:[%s37465_s0 + $0x152] sm:$0xff] }
 0x880   :  { %22444 = vmatprep.mubr.msk.f32.mxu0 %vm28339_vm1, %v28338_v0 }
 0x883   :  { %22445 = vmatmul.mubr.msk.f32.gmra.mrb[116].mxu0 %vm26_vm0, %v31641_v16  ;;  %v6378_v16 = vld [vmem:[%s37465_s0 + $0x15a] sm:$0xff] }
 0x884   :  { %22447 = vmatprep.mubr.msk.f32.mxu0 %vm28339_vm1, %v28338_v0 }
 0x887   :  { %22448 = vmatmul.mubr.msk.f32.gmra.mrb[118].mxu0 %vm26_vm0, %v31650_v17  ;;  %v6379_v17 = vld [vmem:[%s37465_s0 + $0x162] sm:$0xff] }
 0x888   :  { %22450 = vmatprep.mubr.msk.f32.mxu0 %vm28339_vm1, %v28338_v0 }
 0x88b   :  { %22451 = vmatmul.mubr.msk.f32.gmra.mrb[120].mxu0 %vm26_vm0, %v37591_v21  ;;  %v6383_v21 = vld [vmem:[%s37465_s0 + $0x182] sm:$0xff] }
 0x88c   :  { %22453 = vmatprep.mubr.msk.f32.mxu0 %vm28339_vm1, %v28338_v0 }
 0x88f   :  { %22454 = vmatmul.mubr.msk.f32.gmra.mrb[122].mxu0 %vm26_vm0, %v37592_v22  ;;  %v6384_v22 = vld [vmem:[%s37465_s0 + $0x18a] sm:$0xff] }
 0x890   :  { %22456 = vmatprep.mubr.msk.f32.mxu0 %vm28339_vm1, %v28338_v0 }
 0x893   :  { %22457 = vmatmul.mubr.msk.f32.gmra.mrb[124].mxu0 %vm26_vm0, %v37593_v23  ;;  %v6385_v23 = vld [vmem:[%s37465_s0 + $0x192] sm:$0xff] }
 0x894   :  { %22459 = vmatprep.mubr.msk.f32.mxu0 %vm28339_vm1, %v28338_v0 }
 0x897   :  { %22460 = vmatmul.mubr.msk.f32.gmra.mrb[126].mxu0 %vm26_vm0, %v37594_v24  ;;  %v6386_v24 = vld [vmem:[%s37465_s0 + $0x19a] sm:$0xff] }
 0x898   :  { %22462 = vmatprep.mubr.msk.f32.mxu0 %vm28339_vm1, %v28338_v0 }
 0x89b   :  { %22463 = vmatmul.mubr.msk.f32.gmra.mrb[128].mxu0 %vm26_vm0, %v37595_v25  ;;  %v6387_v25 = vld [vmem:[%s37465_s0 + $0x1a2] sm:$0xff] }
 0x89c   :  { %22465 = vmatprep.mubr.msk.f32.mxu0 %vm28339_vm1, %v28338_v0 }
 0x89f   :  { %22466 = vmatmul.mubr.msk.f32.gmra.mrb[130].mxu0 %vm26_vm0, %v37596_v26  ;;  %v6388_v26 = vld [vmem:[%s37465_s0 + $0x1aa] sm:$0xff] }
 0x8a0   :  { %22468 = vmatprep.mubr.msk.f32.mxu0 %vm28339_vm1, %v28338_v0 }
 0x8a3   :  { %22469 = vmatmul.mubr.msk.f32.gmra.mrb[132].mxu0 %vm26_vm0, %v37597_v27  ;;  %v6389_v27 = vld [vmem:[%s37465_s0 + $0x1b2] sm:$0xff] }
 0x8a4   :  { %22471 = vmatprep.mubr.msk.f32.mxu0 %vm28339_vm1, %v28338_v0 }
 0x8a7   :  { %22472 = vmatmul.mubr.msk.f32.gmra.mrb[134].mxu0 %vm26_vm0, %v37598_v28  ;;  %v6390_v28 = vld [vmem:[%s37465_s0 + $0x1ba] sm:$0xff] }
 0x8a8   :  { %22474 = vmatprep.mubr.msk.f32.mxu0 %vm28339_vm1, %v28338_v0 }
 0x8ab   :  { %22475 = vmatmul.mubr.msk.f32.gmra.mrb[136].mxu0 %vm26_vm0, %v37599_v29  ;;  %v28340_v29 = vmov 0  }
 0x8ac   :  { %22477 = vmatprep.mubr.msk.f32.mxu0 %vm28339_vm1, %v28338_v0  ;;  %28334 = vset.pattern.permute.xlu0 %v28340_v29 }
 0x8ad   :  { %28335 = vset.pattern.permute.xlu1 %v28340_v29  ;;  %v192_v29 = vld [vmem:[%s37466_s1 + $0x270] sm:$0xff] }
 0x8af   :  { %22478 = vmatmul.mubr.msk.f32.gmra.mrb[138].mxu0 %vm26_vm0, %v37600_v30  ;;  %v151_v30 = vld [vmem:[%s37466_s1 + $0x128] sm:$0xff] }
 0x8b0   :  { %22480 = vmatprep.mubr.msk.f32.mxu0 %vm28339_vm1, %v28338_v0  ;;  %8362 = vperm.xlu0 %28334, %v151_v30   ;;  %v114_v30 = vld [vmem:[%s37466_s1] sm:$0xff] }
 0x8b3   :  { %22481 = vmatmul.mubr.msk.f32.gmra.mrb[140].mxu0 %vm26_vm0, %v37601_v31  ;;  %v6391_v31 = vld [vmem:[%s37465_s0 + $0x1c2] sm:$0xff] }
 0x8b4   :  { %22483 = vmatprep.mubr.msk.f32.mxu0 %vm28339_vm1, %v28338_v0 }
 0x8b7   :  { %22484 = vmatmul.mubr.msk.f32.gmra.mrb[142].mxu0 %vm26_vm0, %v37602_v32  ;;  %v153_v32 = vld [vmem:[%s37466_s1 + $0x138] sm:$0xff] }
 0x8b8   :  { %22486 = vmatprep.mubr.msk.f32.mxu0 %vm28339_vm1, %v28338_v0  ;;  %8372 = vperm.xlu1 %28335, %v153_v32   ;;  %v115_v32 = vld [vmem:[%s37466_s1 + $0x8] sm:$0xff] }
 0x8bb   :  { %22487 = vmatmul.mubr.msk.f32.gmra.mrb[144].mxu0 %vm26_vm0, %v37603_v33  ;;  %v152_v33 = vld [vmem:[%s37466_s1 + $0x130] sm:$0xff] }
 0x8bc   :  { %22489 = vmatprep.mubr.msk.f32.mxu0 %vm28339_vm1, %v28338_v0  ;;  %8367 = vperm.xlu0 %28334, %v152_v33   ;;  %v6413_v33 = vld [vmem:[%s37465_s0 + $0x272] sm:$0xff] }
 0x8bf   :  { %22490 = vmatmul.mubr.msk.f32.gmra.mrb[146].mxu0 %vm26_vm0, %v37604_v34  ;;  %v6392_v34 = vld [vmem:[%s37465_s0 + $0x1ca] sm:$0xff] }
 0x8c0   :  { %22492 = vmatprep.mubr.msk.f32.mxu0 %vm28339_vm1, %v28338_v0 }
 0x8c3   :  { %22493 = vmatmul.mubr.msk.f32.gmra.mrb[148].mxu0 %vm26_vm0, %v37605_v35  ;;  %v154_v35 = vld [vmem:[%s37466_s1 + $0x140] sm:$0xff] }
 0x8c4   :  { %22495 = vmatprep.mubr.msk.f32.mxu0 %vm28339_vm1, %v28338_v0  ;;  %8377 = vperm.xlu1 %28335, %v154_v35   ;;  %v6414_v35 = vld [vmem:[%s37465_s0 + $0x27a] sm:$0xff] }
 0x8c7   :  { %22496 = vmatmul.mubr.msk.f32.gmra.mrb[150].mxu0 %vm26_vm0, %v37606_v36  ;;  %v155_v36 = vld [vmem:[%s37466_s1 + $0x148] sm:$0xff] }
 0x8c8   :  { %22498 = vmatprep.mubr.msk.f32.mxu0 %vm28339_vm1, %v28338_v0  ;;  %8382 = vperm.xlu0 %28334, %v155_v36   ;;  %v117_v36 = vld [vmem:[%s37466_s1 + $0x18] sm:$0xff] }
 0x8cb   :  { %22499 = vmatmul.mubr.msk.f32.gmra.mrb[152].mxu0 %vm26_vm0, %v37607_v37  ;;  %v6393_v37 = vld [vmem:[%s37465_s0 + $0x1d2] sm:$0xff] }
 0x8cc   :  { %22501 = vmatprep.mubr.msk.f32.mxu0 %vm28339_vm1, %v28338_v0 }
 0x8cf   :  { %22502 = vmatmul.mubr.msk.f32.gmra.mrb[154].mxu0 %vm26_vm0, %v31812_v20  ;;  %v6382_v20 = vld [vmem:[%s37465_s0 + $0x17a] sm:$0xff] }
 0x8d0   :  { %22504 = vmatprep.mubr.msk.f32.mxu0 %vm28339_vm1, %v28338_v0 }
 0x8d3   :  { %22505 = vmatmul.mubr.msk.f32.gmra.mrb[156].mxu0 %vm26_vm0, %v31821_v18  ;;  %v6380_v18 = vld [vmem:[%s37465_s0 + $0x16a] sm:$0xff] }
 0x8d4   :  { %22507 = vmatprep.mubr.msk.f32.mxu0 %vm28339_vm1, %v28338_v0 }
 0x8d7   :  { %22508 = vmatmul.mubr.msk.f32.gmra.mrb[158].mxu0 %vm26_vm0, %v5542_v38  ;;  %v156_v38 = vld [vmem:[%s37466_s1 + $0x150] sm:$0xff] }
 0x8d8   :  { %22510 = vmatprep.mubr.msk.f32.mxu0 %vm28339_vm1, %v28338_v0  ;;  %8387 = vperm.xlu1 %28335, %v156_v38   ;;  %v118_v38 = vld [vmem:[%s37466_s1 + $0x20] sm:$0xff] }
 0x8db   :  { %22511 = vmatmul.mubr.msk.f32.gmra.mrb[160].mxu0 %vm26_vm0, %v5543_v39  ;;  %v157_v39 = vld [vmem:[%s37466_s1 + $0x158] sm:$0xff] }
 0x8dc   :  { %22515 = vmatprep.mubr.msk.f32.mxu0 %vm28339_vm1, %v28338_v0  ;;  %8392 = vperm.xlu0 %28334, %v157_v39   ;;  %v6416_v39 = vld [vmem:[%s37465_s0 + $0x28a] sm:$0xff] }
 0x8df   :  { %22516 = vmatmul.mubr.msk.f32.vlgmr.msra.gmra.mrb[0].mxu0 %vm26_vm0, %v6340_v40  ;;  %v6394_v40 = vld [vmem:[%s37465_s0 + $0x1da] sm:$0xff] }
 0x8e0   :  { %22759 = vmatpush3.msra.mxu0 %v18339_v41  ;;  %22518 = vmatprep.mubr.msk.f32.mxu0 %vm28339_vm1, %v28338_v0  ;;  %v158_v41 = vld [vmem:[%s37466_s1 + $0x160] sm:$0xff] }
 0x8e1   :  { %23003 = vmatprep.subr.mxu0 %v28338_v0  ;;  %8397 = vperm.xlu1 %28335, %v158_v41   ;;  %v6417_v41 = vld [vmem:[%s37465_s0 + $0x292] sm:$0xff] }
 0x8e3   :  { %22519 = vmatmul.mubr.msk.f32.gmra.mrb[2].mxu0 %vm26_vm0, %v6341_v42  ;;  %v159_v42 = vld [vmem:[%s37466_s1 + $0x168] sm:$0xff] }
 0x8e4   :  { %22521 = vmatprep.mubr.msk.f32.mxu0 %vm28339_vm1, %v28338_v0  ;;  %8402 = vperm.xlu0 %28334, %v159_v42   ;;  %v120_v42 = vld [vmem:[%s37466_s1 + $0x30] sm:$0xff] }
 0x8e7   :  { %22522 = vmatmul.mubr.msk.f32.gmra.mrb[4].mxu0 %vm26_vm0, %v6342_v43  ;;  %v6395_v43 = vld [vmem:[%s37465_s0 + $0x1e2] sm:$0xff] }
 0x8e8   :  { %22524 = vmatprep.mubr.msk.f32.mxu0 %vm28339_vm1, %v28338_v0 }
 0x8eb   :  { %22525 = vmatmul.mubr.msk.f32.gmra.mrb[6].mxu0 %vm26_vm0, %v6343_v44  ;;  %v160_v44 = vld [vmem:[%s37466_s1 + $0x170] sm:$0xff] }
 0x8ec   :  { %22527 = vmatprep.mubr.msk.f32.mxu0 %vm28339_vm1, %v28338_v0  ;;  %8407 = vperm.xlu1 %28335, %v160_v44   ;;  %v121_v44 = vld [vmem:[%s37466_s1 + $0x38] sm:$0xff] }
 0x8ef   :  { %22528 = vmatmul.mubr.msk.f32.gmra.mrb[8].mxu0 %vm26_vm0, %v6344_v45  ;;  %v161_v45 = vld [vmem:[%s37466_s1 + $0x178] sm:$0xff] }
 0x8f0   :  { %22530 = vmatprep.mubr.msk.f32.mxu0 %vm28339_vm1, %v28338_v0  ;;  %8412 = vperm.xlu0 %28334, %v161_v45   ;;  %v6419_v45 = vld [vmem:[%s37465_s0 + $0x2a2] sm:$0xff] }
 0x8f3   :  { %22531 = vmatmul.mubr.msk.f32.gmra.mrb[10].mxu0 %vm26_vm0, %v6345_v46  ;;  %v6396_v46 = vld [vmem:[%s37465_s0 + $0x1ea] sm:$0xff] }
 0x8f4   :  { %22533 = vmatprep.mubr.msk.f32.mxu0 %vm28339_vm1, %v28338_v0 }
 0x8f7   :  { %22534 = vmatmul.mubr.msk.f32.gmra.mrb[12].mxu0 %vm26_vm0, %v6346_v47  ;;  %v162_v47 = vld [vmem:[%s37466_s1 + $0x180] sm:$0xff] }
 0x8f8   :  { %22536 = vmatprep.mubr.msk.f32.mxu0 %vm28339_vm1, %v28338_v0  ;;  %8417 = vperm.xlu1 %28335, %v162_v47   ;;  %v6420_v47 = vld [vmem:[%s37465_s0 + $0x2aa] sm:$0xff] }
 0x8fb   :  { %22537 = vmatmul.mubr.msk.f32.gmra.mrb[14].mxu0 %vm26_vm0, %v6347_v48  ;;  %v163_v48 = vld [vmem:[%s37466_s1 + $0x188] sm:$0xff] }
 0x8fc   :  { %22539 = vmatprep.mubr.msk.f32.mxu0 %vm28339_vm1, %v28338_v0  ;;  %8422 = vperm.xlu0 %28334, %v163_v48   ;;  %v123_v48 = vld [vmem:[%s37466_s1 + $0x48] sm:$0xff] }
 0x8ff   :  { %22540 = vmatmul.mubr.msk.f32.gmra.mrb[16].mxu0 %vm26_vm0, %v6348_v49  ;;  %v6397_v49 = vld [vmem:[%s37465_s0 + $0x1f2] sm:$0xff] }
 0x900   :  { %22542 = vmatprep.mubr.msk.f32.mxu0 %vm28339_vm1, %v28338_v0 }
 0x903   :  { %22543 = vmatmul.mubr.msk.f32.gmra.mrb[18].mxu0 %vm26_vm0, %v6349_v50  ;;  %v164_v50 = vld [vmem:[%s37466_s1 + $0x190] sm:$0xff] }
 0x904   :  { %22545 = vmatprep.mubr.msk.f32.mxu0 %vm28339_vm1, %v28338_v0  ;;  %8427 = vperm.xlu1 %28335, %v164_v50   ;;  %v124_v50 = vld [vmem:[%s37466_s1 + $0x50] sm:$0xff] }
 0x907   :  { %22546 = vmatmul.mubr.msk.f32.gmra.mrb[20].mxu0 %vm26_vm0, %v6350_v51  ;;  %v165_v51 = vld [vmem:[%s37466_s1 + $0x198] sm:$0xff] }
 0x908   :  { %22548 = vmatprep.mubr.msk.f32.mxu0 %vm28339_vm1, %v28338_v0  ;;  %8432 = vperm.xlu0 %28334, %v165_v51   ;;  %v7218_v51 = vld [vmem:[%s37465_s0 + $0x33] sm:$0xff] }
 0x90b   :  { %22549 = vmatmul.mubr.msk.f32.gmra.mrb[22].mxu0 %vm26_vm0, %v6351_v52  ;;  %v6398_v52 = vld [vmem:[%s37465_s0 + $0x1fa] sm:$0xff] }
 0x90c   :  { %22551 = vmatprep.mubr.msk.f32.mxu0 %vm28339_vm1, %v28338_v0 }
 0x90f   :  { %22552 = vmatmul.mubr.msk.f32.gmra.mrb[24].mxu0 %vm26_vm0, %v6352_v53  ;;  %v166_v53 = vld [vmem:[%s37466_s1 + $0x1a0] sm:$0xff] }
 0x910   :  { %22554 = vmatprep.mubr.msk.f32.mxu0 %vm28339_vm1, %v28338_v0  ;;  %8437 = vperm.xlu1 %28335, %v166_v53   ;;  %v7219_v53 = vld [vmem:[%s37465_s0 + $0x3b] sm:$0xff] }
 0x913   :  { %22555 = vmatmul.mubr.msk.f32.gmra.mrb[26].mxu0 %vm26_vm0, %v6353_v54  ;;  %v167_v54 = vld [vmem:[%s37466_s1 + $0x1a8] sm:$0xff] }
 0x914   :  { %22557 = vmatprep.mubr.msk.f32.mxu0 %vm28339_vm1, %v28338_v0  ;;  %8442 = vperm.xlu0 %28334, %v167_v54   ;;  %v126_v54 = vld [vmem:[%s37466_s1 + $0x60] sm:$0xff] }
 0x917   :  { %22558 = vmatmul.mubr.msk.f32.gmra.mrb[28].mxu0 %vm26_vm0, %v6354_v55  ;;  %v6399_v55 = vld [vmem:[%s37465_s0 + $0x202] sm:$0xff] }
 0x918   :  { %22560 = vmatprep.mubr.msk.f32.mxu0 %vm28339_vm1, %v28338_v0 }
 0x91b   :  { %22561 = vmatmul.mubr.msk.f32.gmra.mrb[30].mxu0 %vm26_vm0, %v6355_v56  ;;  %v168_v56 = vld [vmem:[%s37466_s1 + $0x1b0] sm:$0xff] }
 0x91c   :  { %22563 = vmatprep.mubr.msk.f32.mxu0 %vm28339_vm1, %v28338_v0  ;;  %8447 = vperm.xlu1 %28335, %v168_v56   ;;  %v127_v56 = vld [vmem:[%s37466_s1 + $0x68] sm:$0xff] }
 0x91f   :  { %22564 = vmatmul.mubr.msk.f32.gmra.mrb[32].mxu0 %vm26_vm0, %v6356_v57  ;;  %v169_v57 = vld [vmem:[%s37466_s1 + $0x1b8] sm:$0xff] }
 0x920   :  { %22566 = vmatprep.mubr.msk.f32.mxu0 %vm28339_vm1, %v28338_v0  ;;  %8452 = vperm.xlu0 %28334, %v169_v57   ;;  %v7221_v57 = vld [vmem:[%s37465_s0 + $0x4b] sm:$0xff] }
 0x923   :  { %22567 = vmatmul.mubr.msk.f32.gmra.mrb[34].mxu0 %vm26_vm0, %v6357_v58  ;;  %v6400_v58 = vld [vmem:[%s37465_s0 + $0x20a] sm:$0xff] }
 0x924   :  { %22569 = vmatprep.mubr.msk.f32.mxu0 %vm28339_vm1, %v28338_v0 }
 0x927   :  { %22570 = vmatmul.mubr.msk.f32.gmra.mrb[36].mxu0 %vm26_vm0, %v6358_v59  ;;  %v170_v59 = vld [vmem:[%s37466_s1 + $0x1c0] sm:$0xff] }
 0x928   :  { %22572 = vmatprep.mubr.msk.f32.mxu0 %vm28339_vm1, %v28338_v0  ;;  %8457 = vperm.xlu1 %28335, %v170_v59   ;;  %v7222_v59 = vld [vmem:[%s37465_s0 + $0x53] sm:$0xff] }
 0x92b   :  { %22573 = vmatmul.mubr.msk.f32.gmra.mrb[38].mxu0 %vm26_vm0, %v6359_v60  ;;  %v171_v60 = vld [vmem:[%s37466_s1 + $0x1c8] sm:$0xff] }
 0x92c   :  { %22575 = vmatprep.mubr.msk.f32.mxu0 %vm28339_vm1, %v28338_v0  ;;  %8462 = vperm.xlu0 %28334, %v171_v60   ;;  %v129_v60 = vld [vmem:[%s37466_s1 + $0x78] sm:$0xff] }
 0x92f   :  { %22576 = vmatmul.mubr.msk.f32.gmra.mrb[40].mxu0 %vm26_vm0, %v6360_v61  ;;  %v6401_v61 = vld [vmem:[%s37465_s0 + $0x212] sm:$0xff] }
 0x930   :  { %22578 = vmatprep.mubr.msk.f32.mxu0 %vm28339_vm1, %v28338_v0 }
 0x933   :  { %22579 = vmatmul.mubr.msk.f32.gmra.mrb[42].mxu0 %vm26_vm0, %v6361_v62  ;;  %v172_v62 = vld [vmem:[%s37466_s1 + $0x1d0] sm:$0xff] }
 0x934   :  { %22581 = vmatprep.mubr.msk.f32.mxu0 %vm28339_vm1, %v28338_v0  ;;  %8467 = vperm.xlu1 %28335, %v172_v62   ;;  %v130_v62 = vld [vmem:[%s37466_s1 + $0x80] sm:$0xff] }
 0x937   :  { %22582 = vmatmul.mubr.msk.f32.gmra.mrb[44].mxu0 %vm26_vm0, %v6362_v63  ;;  %v173_v63 = vld [vmem:[%s37466_s1 + $0x1d8] sm:$0xff] }
 0x938   :  { %22584 = vmatprep.mubr.msk.f32.mxu0 %vm28339_vm1, %v28338_v0  ;;  %8472 = vperm.xlu0 %28334, %v173_v63   ;;  %v7224_v63 = vld [vmem:[%s37465_s0 + $0x63] sm:$0xff] }
 0x93b   :  { %22585 = vmatmul.mubr.msk.f32.gmra.mrb[46].mxu0 %vm26_vm0, %v6363_v1  ;;  %v6402_v1 = vld [vmem:[%s37465_s0 + $0x21a] sm:$0xff] }
 0x93c   :  { %22587 = vmatprep.mubr.msk.f32.mxu0 %vm28339_vm1, %v28338_v0 }
 0x93f   :  { %22588 = vmatmul.mubr.msk.f32.gmra.mrb[48].mxu0 %vm26_vm0, %v6364_v2  ;;  %v174_v2 = vld [vmem:[%s37466_s1 + $0x1e0] sm:$0xff] }
 0x940   :  { %22590 = vmatprep.mubr.msk.f32.mxu0 %vm28339_vm1, %v28338_v0  ;;  %8477 = vperm.xlu1 %28335, %v174_v2   ;;  %v7225_v2 = vld [vmem:[%s37465_s0 + $0x6b] sm:$0xff] }
 0x943   :  { %22591 = vmatmul.mubr.msk.f32.gmra.mrb[50].mxu0 %vm26_vm0, %v6365_v3  ;;  %v175_v3 = vld [vmem:[%s37466_s1 + $0x1e8] sm:$0xff] }
 0x944   :  { %22593 = vmatprep.mubr.msk.f32.mxu0 %vm28339_vm1, %v28338_v0  ;;  %8482 = vperm.xlu0 %28334, %v175_v3   ;;  %v132_v3 = vld [vmem:[%s37466_s1 + $0x90] sm:$0xff] }
 0x947   :  { %22594 = vmatmul.mubr.msk.f32.gmra.mrb[52].mxu0 %vm26_vm0, %v6366_v4  ;;  %v6403_v4 = vld [vmem:[%s37465_s0 + $0x222] sm:$0xff] }
 0x948   :  { %22596 = vmatprep.mubr.msk.f32.mxu0 %vm28339_vm1, %v28338_v0 }
 0x94b   :  { %22597 = vmatmul.mubr.msk.f32.gmra.mrb[54].mxu0 %vm26_vm0, %v6367_v5  ;;  %v176_v5 = vld [vmem:[%s37466_s1 + $0x1f0] sm:$0xff] }
 0x94c   :  { %22599 = vmatprep.mubr.msk.f32.mxu0 %vm28339_vm1, %v28338_v0  ;;  %8487 = vperm.xlu1 %28335, %v176_v5   ;;  %v133_v5 = vld [vmem:[%s37466_s1 + $0x98] sm:$0xff] }
 0x94f   :  { %22600 = vmatmul.mubr.msk.f32.gmra.mrb[56].mxu0 %vm26_vm0, %v6368_v6  ;;  %v177_v6 = vld [vmem:[%s37466_s1 + $0x1f8] sm:$0xff] }
 0x950   :  { %22602 = vmatprep.mubr.msk.f32.mxu0 %vm28339_vm1, %v28338_v0  ;;  %8492 = vperm.xlu0 %28334, %v177_v6   ;;  %v7227_v6 = vld [vmem:[%s37465_s0 + $0x7b] sm:$0xff] }
 0x953   :  { %22603 = vmatmul.mubr.msk.f32.gmra.mrb[58].mxu0 %vm26_vm0, %v6369_v7  ;;  %v6404_v7 = vld [vmem:[%s37465_s0 + $0x22a] sm:$0xff] }
 0x954   :  { %22605 = vmatprep.mubr.msk.f32.mxu0 %vm28339_vm1, %v28338_v0 }
 0x957   :  { %22606 = vmatmul.mubr.msk.f32.gmra.mrb[60].mxu0 %vm26_vm0, %v6370_v8  ;;  %v178_v8 = vld [vmem:[%s37466_s1 + $0x200] sm:$0xff] }
 0x958   :  { %22608 = vmatprep.mubr.msk.f32.mxu0 %vm28339_vm1, %v28338_v0  ;;  %8497 = vperm.xlu1 %28335, %v178_v8   ;;  %v7228_v8 = vld [vmem:[%s37465_s0 + $0x83] sm:$0xff] }
 0x95b   :  { %22609 = vmatmul.mubr.msk.f32.gmra.mrb[62].mxu0 %vm26_vm0, %v6371_v9  ;;  %v179_v9 = vld [vmem:[%s37466_s1 + $0x208] sm:$0xff] }
 0x95c   :  { %22611 = vmatprep.mubr.msk.f32.mxu0 %vm28339_vm1, %v28338_v0  ;;  %8502 = vperm.xlu0 %28334, %v179_v9   ;;  %v135_v9 = vld [vmem:[%s37466_s1 + $0xa8] sm:$0xff] }
 0x95f   :  { %22612 = vmatmul.mubr.msk.f32.gmra.mrb[64].mxu0 %vm26_vm0, %v6372_v10  ;;  %v6405_v10 = vld [vmem:[%s37465_s0 + $0x232] sm:$0xff] }
 0x960   :  { %22614 = vmatprep.mubr.msk.f32.mxu0 %vm28339_vm1, %v28338_v0 }
 0x963   :  { %22615 = vmatmul.mubr.msk.f32.gmra.mrb[66].mxu0 %vm26_vm0, %v6373_v11  ;;  %v180_v11 = vld [vmem:[%s37466_s1 + $0x210] sm:$0xff] }
 0x964   :  { %22617 = vmatprep.mubr.msk.f32.mxu0 %vm28339_vm1, %v28338_v0  ;;  %8507 = vperm.xlu1 %28335, %v180_v11   ;;  %v136_v11 = vld [vmem:[%s37466_s1 + $0xb0] sm:$0xff] }
 0x967   :  { %22618 = vmatmul.mubr.msk.f32.gmra.mrb[68].mxu0 %vm26_vm0, %v6374_v12  ;;  %v181_v12 = vld [vmem:[%s37466_s1 + $0x218] sm:$0xff] }
 0x968   :  { %22620 = vmatprep.mubr.msk.f32.mxu0 %vm28339_vm1, %v28338_v0  ;;  %8512 = vperm.xlu0 %28334, %v181_v12   ;;  %v7230_v12 = vld [vmem:[%s37465_s0 + $0x93] sm:$0xff] }
 0x96b   :  { %22621 = vmatmul.mubr.msk.f32.gmra.mrb[70].mxu0 %vm26_vm0, %v6375_v13  ;;  %v6406_v13 = vld [vmem:[%s37465_s0 + $0x23a] sm:$0xff] }
 0x96c   :  { %22623 = vmatprep.mubr.msk.f32.mxu0 %vm28339_vm1, %v28338_v0 }
 0x96f   :  { %22624 = vmatmul.mubr.msk.f32.gmra.mrb[72].mxu0 %vm26_vm0, %v6376_v14  ;;  %v182_v14 = vld [vmem:[%s37466_s1 + $0x220] sm:$0xff] }
 0x970   :  { %22626 = vmatprep.mubr.msk.f32.mxu0 %vm28339_vm1, %v28338_v0  ;;  %8517 = vperm.xlu1 %28335, %v182_v14   ;;  %v7231_v14 = vld [vmem:[%s37465_s0 + $0x9b] sm:$0xff] }
 0x973   :  { %22627 = vmatmul.mubr.msk.f32.gmra.mrb[74].mxu0 %vm26_vm0, %v6377_v15  ;;  %v183_v15 = vld [vmem:[%s37466_s1 + $0x228] sm:$0xff] }
 0x974   :  { %22629 = vmatprep.mubr.msk.f32.mxu0 %vm28339_vm1, %v28338_v0  ;;  %8522 = vperm.xlu0 %28334, %v183_v15   ;;  %v138_v15 = vld [vmem:[%s37466_s1 + $0xc0] sm:$0xff] }
 0x977   :  { %22630 = vmatmul.mubr.msk.f32.gmra.mrb[76].mxu0 %vm26_vm0, %v6378_v16  ;;  %v6407_v16 = vld [vmem:[%s37465_s0 + $0x242] sm:$0xff] }
 0x978   :  { %22632 = vmatprep.mubr.msk.f32.mxu0 %vm28339_vm1, %v28338_v0 }
 0x97b   :  { %22633 = vmatmul.mubr.msk.f32.gmra.mrb[78].mxu0 %vm26_vm0, %v6379_v17  ;;  %v184_v17 = vld [vmem:[%s37466_s1 + $0x230] sm:$0xff] }
 0x97c   :  { %22635 = vmatprep.mubr.msk.f32.mxu0 %vm28339_vm1, %v28338_v0  ;;  %8527 = vperm.xlu1 %28335, %v184_v17   ;;  %v139_v17 = vld [vmem:[%s37466_s1 + $0xc8] sm:$0xff] }
 0x97f   :  { %22636 = vmatmul.mubr.msk.f32.gmra.mrb[80].mxu0 %vm26_vm0, %v6380_v18  ;;  %v185_v18 = vld [vmem:[%s37466_s1 + $0x238] sm:$0xff] }
 0x980   :  { %22638 = vmatprep.mubr.msk.f32.mxu0 %vm28339_vm1, %v28338_v0  ;;  %8532 = vperm.xlu0 %28334, %v185_v18   ;;  %v7233_v18 = vld [vmem:[%s37465_s0 + $0xab] sm:$0xff] }
 0x983   :  { %22639 = vmatmul.mubr.msk.f32.gmra.mrb[82].mxu0 %vm26_vm0, %v6381_v19  ;;  %v6408_v19 = vld [vmem:[%s37465_s0 + $0x24a] sm:$0xff] }
 0x984   :  { %22641 = vmatprep.mubr.msk.f32.mxu0 %vm28339_vm1, %v28338_v0 }
 0x987   :  { %22642 = vmatmul.mubr.msk.f32.gmra.mrb[84].mxu0 %vm26_vm0, %v6382_v20  ;;  %v186_v20 = vld [vmem:[%s37466_s1 + $0x240] sm:$0xff] }
 0x988   :  { %22644 = vmatprep.mubr.msk.f32.mxu0 %vm28339_vm1, %v28338_v0  ;;  %8537 = vperm.xlu1 %28335, %v186_v20   ;;  %v7234_v20 = vld [vmem:[%s37465_s0 + $0xb3] sm:$0xff] }
 0x98b   :  { %22645 = vmatmul.mubr.msk.f32.gmra.mrb[86].mxu0 %vm26_vm0, %v6383_v21  ;;  %v187_v21 = vld [vmem:[%s37466_s1 + $0x248] sm:$0xff] }
 0x98c   :  { %22647 = vmatprep.mubr.msk.f32.mxu0 %vm28339_vm1, %v28338_v0  ;;  %8542 = vperm.xlu0 %28334, %v187_v21   ;;  %v141_v21 = vld [vmem:[%s37466_s1 + $0xd8] sm:$0xff] }
 0x98f   :  { %22648 = vmatmul.mubr.msk.f32.gmra.mrb[88].mxu0 %vm26_vm0, %v6384_v22  ;;  %v6409_v22 = vld [vmem:[%s37465_s0 + $0x252] sm:$0xff] }
 0x990   :  { %22650 = vmatprep.mubr.msk.f32.mxu0 %vm28339_vm1, %v28338_v0 }
 0x993   :  { %22651 = vmatmul.mubr.msk.f32.gmra.mrb[90].mxu0 %vm26_vm0, %v6385_v23  ;;  %v188_v23 = vld [vmem:[%s37466_s1 + $0x250] sm:$0xff] }
 0x994   :  { %22653 = vmatprep.mubr.msk.f32.mxu0 %vm28339_vm1, %v28338_v0  ;;  %8547 = vperm.xlu1 %28335, %v188_v23   ;;  %v142_v23 = vld [vmem:[%s37466_s1 + $0xe0] sm:$0xff] }
 0x997   :  { %22654 = vmatmul.mubr.msk.f32.gmra.mrb[92].mxu0 %vm26_vm0, %v6386_v24  ;;  %v189_v24 = vld [vmem:[%s37466_s1 + $0x258] sm:$0xff] }
 0x998   :  { %22656 = vmatprep.mubr.msk.f32.mxu0 %vm28339_vm1, %v28338_v0  ;;  %8552 = vperm.xlu0 %28334, %v189_v24   ;;  %v7236_v24 = vld [vmem:[%s37465_s0 + $0xc3] sm:$0xff] }
 0x99b   :  { %22657 = vmatmul.mubr.msk.f32.gmra.mrb[94].mxu0 %vm26_vm0, %v6387_v25  ;;  %v6410_v25 = vld [vmem:[%s37465_s0 + $0x25a] sm:$0xff] }
 0x99c   :  { %22659 = vmatprep.mubr.msk.f32.mxu0 %vm28339_vm1, %v28338_v0 }
 0x99f   :  { %22660 = vmatmul.mubr.msk.f32.gmra.mrb[96].mxu0 %vm26_vm0, %v6388_v26  ;;  %v190_v26 = vld [vmem:[%s37466_s1 + $0x260] sm:$0xff] }
 0x9a0   :  { %22662 = vmatprep.mubr.msk.f32.mxu0 %vm28339_vm1, %v28338_v0  ;;  %8557 = vperm.xlu1 %28335, %v190_v26   ;;  %v7237_v26 = vld [vmem:[%s37465_s0 + $0xcb] sm:$0xff] }
 0x9a3   :  { %22663 = vmatmul.mubr.msk.f32.gmra.mrb[98].mxu0 %vm26_vm0, %v6389_v27  ;;  %v191_v27 = vld [vmem:[%s37466_s1 + $0x268] sm:$0xff] }
 0x9a4   :  { %22665 = vmatprep.mubr.msk.f32.mxu0 %vm28339_vm1, %v28338_v0  ;;  %8562 = vperm.xlu0 %28334, %v191_v27   ;;  %v144_v27 = vld [vmem:[%s37466_s1 + $0xf0] sm:$0xff] }
 0x9a5   :  { %8567 = vperm.xlu1 %28335, %v192_v29   ;;  %v145_v29 = vld [vmem:[%s37466_s1 + $0xf8] sm:$0xff] }
 0x9a7   :  { %22666 = vmatmul.mubr.msk.f32.gmra.mrb[100].mxu0 %vm26_vm0, %v6390_v28  ;;  %v6411_v28 = vld [vmem:[%s37465_s0 + $0x262] sm:$0xff] }
 0x9a8   :  { %22668 = vmatprep.mubr.msk.f32.mxu0 %vm28339_vm1, %v28338_v0  ;;  %8177 = vperm.xlu0 %28334, %v114_v30   ;;  %v7239_v30 = vld [vmem:[%s37465_s0 + $0xdb] sm:$0xff] }
 0x9a9   :  { %8182 = vperm.xlu1 %28335, %v115_v32   ;;  %v146_v32 = vld [vmem:[%s37466_s1 + $0x100] sm:$0xff] }
 0x9ab   :  { %22669 = vmatmul.mubr.msk.f32.gmra.mrb[102].mxu0 %vm26_vm0, %v6391_v31  ;;  %v6412_v31 = vld [vmem:[%s37465_s0 + $0x26a] sm:$0xff] }
 0x9ac   :  { %22671 = vmatprep.mubr.msk.f32.mxu0 %vm28339_vm1, %v28338_v0 }
 0x9ad   :  { %8192 = vperm.xlu1 %28335, %v117_v36   ;;  %v7241_v36 = vld [vmem:[%s37465_s0 + $0xeb] sm:$0xff] }
 0x9af   :  { %22672 = vmatmul.mubr.msk.f32.gmra.mrb[104].mxu0 %vm26_vm0, %v6392_v34  ;;  %v116_v34 = vld [vmem:[%s37466_s1 + $0x10] sm:$0xff] }
 0x9b0   :  { %22674 = vmatprep.mubr.msk.f32.mxu0 %vm28339_vm1, %v28338_v0  ;;  %8187 = vperm.xlu0 %28334, %v116_v34   ;;  %v33017_v34 = vpop.permute.xlu1 %8372 }
 0x9b3   :  { %22675 = vmatmul.mubr.msk.f32.gmra.mrb[106].mxu0 %vm26_vm0, %v6393_v37  ;;  %v6415_v37 = vld [vmem:[%s37465_s0 + $0x282] sm:$0xff] }
 0x9b4   :  { %22677 = vmatprep.mubr.msk.f32.mxu0 %vm28339_vm1, %v28338_v0  ;;  %8197 = vperm.xlu0 %28334, %v118_v38   ;;  %v148_v38 = vld [vmem:[%s37466_s1 + $0x110] sm:$0xff] }
 0x9b7   :  { %22678 = vmatmul.mubr.msk.f32.gmra.mrb[108].mxu0 %vm26_vm0, %v6394_v40  ;;  %v119_v40 = vld [vmem:[%s37466_s1 + $0x28] sm:$0xff] }
 0x9b8   :  { %22680 = vmatprep.mubr.msk.f32.mxu0 %vm28339_vm1, %v28338_v0  ;;  %8202 = vperm.xlu1 %28335, %v119_v40   ;;  %v33039_v40 = vpop.permute.xlu1 %8377 }
 0x9b9   :  { %8207 = vperm.xlu0 %28334, %v120_v42   ;;  %v149_v42 = vld [vmem:[%s37466_s1 + $0x118] sm:$0xff] }
 0x9bb   :  { %22681 = vmatmul.mubr.msk.f32.gmra.mrb[110].mxu0 %vm26_vm0, %v6395_v43  ;;  %v6418_v43 = vld [vmem:[%s37465_s0 + $0x29a] sm:$0xff] }
 0x9bc   :  { %22683 = vmatprep.mubr.msk.f32.mxu0 %vm28339_vm1, %v28338_v0  ;;  %8212 = vperm.xlu1 %28335, %v121_v44   ;;  %v33052_v44 = vpop.permute.xlu1 %8387 }
 0x9bf   :  { %22684 = vmatmul.mubr.msk.f32.gmra.mrb[112].mxu0 %vm26_vm0, %v6396_v46  ;;  %v122_v46 = vld [vmem:[%s37466_s1 + $0x40] sm:$0xff] }
 0x9c0   :  { %22686 = vmatprep.mubr.msk.f32.mxu0 %vm28339_vm1, %v28338_v0  ;;  %8217 = vperm.xlu0 %28334, %v122_v46   ;;  %v7244_v46 = vld [vmem:[%s37465_s0 + $0x103] sm:$0xff] }
 0x9c1   :  { %8222 = vperm.xlu1 %28335, %v123_v48   ;;  %v194_v48 = vld [vmem:[%s37466_s1 + $0x280] sm:$0xff] }
 0x9c3   :  { %22687 = vmatmul.mubr.msk.f32.gmra.mrb[114].mxu0 %vm26_vm0, %v6397_v49  ;;  %v7217_v49 = vld [vmem:[%s37465_s0 + $0x2b] sm:$0xff] }
 0x9c4   :  { %22689 = vmatprep.mubr.msk.f32.mxu0 %vm28339_vm1, %v28338_v0  ;;  %8227 = vperm.xlu0 %28334, %v124_v50   ;;  %v33074_v50 = vpop.permute.xlu1 %8397 }
 0x9c7   :  { %22690 = vmatmul.mubr.msk.f32.gmra.mrb[116].mxu0 %vm26_vm0, %v6398_v52  ;;  %v125_v52 = vld [vmem:[%s37466_s1 + $0x58] sm:$0xff] }
 0x9c8   :  { %22692 = vmatprep.mubr.msk.f32.mxu0 %vm28339_vm1, %v28338_v0  ;;  %8232 = vperm.xlu1 %28335, %v125_v52   ;;  %v7246_v52 = vld [vmem:[%s37465_s0 + $0x113] sm:$0xff] }
 0x9c9   :  { %8237 = vperm.xlu0 %28334, %v126_v54   ;;  %v193_v54 = vld [vmem:[%s37466_s1 + $0x278] sm:$0xff] }
 0x9cb   :  { %22693 = vmatmul.mubr.msk.f32.gmra.mrb[118].mxu0 %vm26_vm0, %v6399_v55  ;;  %v7220_v55 = vld [vmem:[%s37465_s0 + $0x43] sm:$0xff] }
 0x9cc   :  { %22695 = vmatprep.mubr.msk.f32.mxu0 %vm28339_vm1, %v28338_v0  ;;  %8242 = vperm.xlu1 %28335, %v127_v56  }
 0x9cf   :  { %22696 = vmatmul.mubr.msk.f32.gmra.mrb[120].mxu0 %vm26_vm0, %v6400_v58  ;;  %v128_v58 = vld [vmem:[%s37466_s1 + $0x70] sm:$0xff] }
 0x9d0   :  { %22698 = vmatprep.mubr.msk.f32.mxu0 %vm28339_vm1, %v28338_v0  ;;  %8247 = vperm.xlu0 %28334, %v128_v58  }
 0x9d1   :  { %8252 = vperm.xlu1 %28335, %v129_v60   ;;  %v7249_v60 = vld [vmem:[%s37465_s0 + $0x12b] sm:$0xff] }
 0x9d3   :  { %22699 = vmatmul.mubr.msk.f32.gmra.mrb[122].mxu0 %vm26_vm0, %v6401_v61  ;;  %v7223_v61 = vld [vmem:[%s37465_s0 + $0x5b] sm:$0xff] }
 0x9d4   :  { %22701 = vmatprep.mubr.msk.f32.mxu0 %vm28339_vm1, %v28338_v0  ;;  %8257 = vperm.xlu0 %28334, %v130_v62   ;;  %v7250_v62 = vld [vmem:[%s37465_s0 + $0x133] sm:$0xff] }
 0x9d7   :  { %22702 = vmatmul.mubr.msk.f32.gmra.mrb[124].mxu0 %vm26_vm0, %v6402_v1  ;;  %v131_v1 = vld [vmem:[%s37466_s1 + $0x88] sm:$0xff] }
 0x9d8   :  { %22704 = vmatprep.mubr.msk.f32.mxu0 %vm28339_vm1, %v28338_v0  ;;  %8262 = vperm.xlu1 %28335, %v131_v1   ;;  %v7251_v1 = vld [vmem:[%s37465_s0 + $0x13b] sm:$0xff] }
 0x9d9   :  { %8267 = vperm.xlu0 %28334, %v132_v3  }
 0x9db   :  { %22705 = vmatmul.mubr.msk.f32.gmra.mrb[126].mxu0 %vm26_vm0, %v6403_v4  ;;  %v7226_v4 = vld [vmem:[%s37465_s0 + $0x73] sm:$0xff] }
 0x9dc   :  { %22707 = vmatprep.mubr.msk.f32.mxu0 %vm28339_vm1, %v28338_v0  ;;  %8272 = vperm.xlu1 %28335, %v133_v5  }
 0x9df   :  { %22708 = vmatmul.mubr.msk.f32.gmra.mrb[128].mxu0 %vm26_vm0, %v6404_v7  ;;  %v134_v7 = vld [vmem:[%s37466_s1 + $0xa0] sm:$0xff] }
 0x9e0   :  { %22710 = vmatprep.mubr.msk.f32.mxu0 %vm28339_vm1, %v28338_v0  ;;  %8277 = vperm.xlu0 %28334, %v134_v7  }
 0x9e1   :  { %8282 = vperm.xlu1 %28335, %v135_v9  }
 0x9e3   :  { %22711 = vmatmul.mubr.msk.f32.gmra.mrb[130].mxu0 %vm26_vm0, %v6405_v10  ;;  %v7229_v10 = vld [vmem:[%s37465_s0 + $0x8b] sm:$0xff] }
 0x9e4   :  { %22713 = vmatprep.mubr.msk.f32.mxu0 %vm28339_vm1, %v28338_v0  ;;  %8287 = vperm.xlu0 %28334, %v136_v11   ;;  %v7255_v11 = vld [vmem:[%s37465_s0 + $0x15b] sm:$0xff] }
 0x9e7   :  { %22714 = vmatmul.mubr.msk.f32.gmra.mrb[132].mxu0 %vm26_vm0, %v6406_v13  ;;  %v137_v13 = vld [vmem:[%s37466_s1 + $0xb8] sm:$0xff] }
 0x9e8   :  { %22716 = vmatprep.mubr.msk.f32.mxu0 %vm28339_vm1, %v28338_v0  ;;  %8292 = vperm.xlu1 %28335, %v137_v13   ;;  %v7256_v13 = vld [vmem:[%s37465_s0 + $0x163] sm:$0xff] }
 0x9e9   :  { %8297 = vperm.xlu0 %28334, %v138_v15   ;;  %v7257_v15 = vld [vmem:[%s37465_s0 + $0x16b] sm:$0xff] }
 0x9eb   :  { %22717 = vmatmul.mubr.msk.f32.gmra.mrb[134].mxu0 %vm26_vm0, %v6407_v16  ;;  %v7232_v16 = vld [vmem:[%s37465_s0 + $0xa3] sm:$0xff] }
 0x9ec   :  { %22719 = vmatprep.mubr.msk.f32.mxu0 %vm28339_vm1, %v28338_v0  ;;  %8302 = vperm.xlu1 %28335, %v139_v17  }
 0x9ef   :  { %22720 = vmatmul.mubr.msk.f32.gmra.mrb[136].mxu0 %vm26_vm0, %v6408_v19  ;;  %v140_v19 = vld [vmem:[%s37466_s1 + $0xd0] sm:$0xff] }
 0x9f0   :  { %22722 = vmatprep.mubr.msk.f32.mxu0 %vm28339_vm1, %v28338_v0  ;;  %8307 = vperm.xlu0 %28334, %v140_v19  }
 0x9f1   :  { %8312 = vperm.xlu1 %28335, %v141_v21  }
 0x9f3   :  { %22723 = vmatmul.mubr.msk.f32.gmra.mrb[138].mxu0 %vm26_vm0, %v6409_v22  ;;  %v7235_v22 = vld [vmem:[%s37465_s0 + $0xbb] sm:$0xff] }
 0x9f4   :  { %22725 = vmatprep.mubr.msk.f32.mxu0 %vm28339_vm1, %v28338_v0  ;;  %8317 = vperm.xlu0 %28334, %v142_v23  }
 0x9f7   :  { %22726 = vmatmul.mubr.msk.f32.gmra.mrb[140].mxu0 %vm26_vm0, %v6410_v25  ;;  %v143_v25 = vld [vmem:[%s37466_s1 + $0xe8] sm:$0xff] }
 0x9f8   :  { %22728 = vmatprep.mubr.msk.f32.mxu0 %vm28339_vm1, %v28338_v0  ;;  %8322 = vperm.xlu1 %28335, %v143_v25   ;;  %v7261_v25 = vld [vmem:[%s37465_s0 + $0x18b] sm:$0xff] }
 0x9f9   :  { %8327 = vperm.xlu0 %28334, %v144_v27   ;;  %v7262_v27 = vld [vmem:[%s37465_s0 + $0x193] sm:$0xff] }
 0x9fb   :  { %22729 = vmatmul.mubr.msk.f32.gmra.mrb[142].mxu0 %vm26_vm0, %v6411_v28  ;;  %v7238_v28 = vld [vmem:[%s37465_s0 + $0xd3] sm:$0xff] }
 0x9fc   :  { %22731 = vmatprep.mubr.msk.f32.mxu0 %vm28339_vm1, %v28338_v0  ;;  %8332 = vperm.xlu1 %28335, %v145_v29   ;;  %v7263_v29 = vld [vmem:[%s37465_s0 + $0x19b] sm:$0xff] }
 0x9fd   :  { %8337 = vperm.xlu0 %28334, %v146_v32  }
 0x9ff   :  { %22732 = vmatmul.mubr.msk.f32.gmra.mrb[144].mxu0 %vm26_vm0, %v6412_v31  ;;  %v33006_v31 = vpop.permute.xlu0 %8362 }
 0xa00   :  { %22734 = vmatprep.mubr.msk.f32.mxu0 %vm28339_vm1, %v28338_v0 }
 0xa01   :  { %8347 = vperm.xlu0 %28334, %v148_v38  }
 0xa03   :  { %22735 = vmatmul.mubr.msk.f32.gmra.mrb[146].mxu0 %vm26_vm0, %v6413_v33  ;;  %v7240_v33 = vld [vmem:[%s37465_s0 + $0xe3] sm:$0xff] }
 0xa04   :  { %22737 = vmatprep.mubr.msk.f32.mxu0 %vm28339_vm1, %v28338_v0 }
 0xa07   :  { %22738 = vmatmul.mubr.msk.f32.gmra.mrb[148].mxu0 %vm26_vm0, %v6414_v35  ;;  %v147_v35 = vld [vmem:[%s37466_s1 + $0x108] sm:$0xff] }
 0xa08   :  { %22740 = vmatprep.mubr.msk.f32.mxu0 %vm28339_vm1, %v28338_v0  ;;  %8342 = vperm.xlu1 %28335, %v147_v35  }
 0xa0b   :  { %22741 = vmatmul.mubr.msk.f32.gmra.mrb[150].mxu0 %vm26_vm0, %v6415_v37  ;;  %v33028_v37 = vpop.permute.xlu0 %8367 }
 0xa0c   :  { %22743 = vmatprep.mubr.msk.f32.mxu0 %vm28339_vm1, %v28338_v0  ;;  %8352 = vperm.xlu1 %28335, %v149_v42  }
 0xa0f   :  { %22744 = vmatmul.mubr.msk.f32.gmra.mrb[152].mxu0 %vm26_vm0, %v6416_v39  ;;  %v7242_v39 = vld [vmem:[%s37465_s0 + $0xf3] sm:$0xff] }
 0xa10   :  { %22746 = vmatprep.mubr.msk.f32.mxu0 %vm28339_vm1, %v28338_v0  ;;  %8572 = vperm.xlu1 %28335, %v193_v54   ;;  %v7269_v54 = vld [vmem:[%s37465_s0 + $0x1cb] sm:$0xff] }
 0xa13   :  { %22747 = vmatmul.mubr.msk.f32.gmra.mrb[154].mxu0 %vm26_vm0, %v6417_v41  ;;  %v33041_v41 = vpop.permute.xlu0 %8382 }
 0xa14   :  { %22749 = vmatprep.mubr.msk.f32.mxu0 %vm28339_vm1, %v28338_v0 }
 0xa17   :  { %22750 = vmatmul.mubr.msk.f32.gmra.mrb[156].mxu0 %vm26_vm0, %v6418_v43  ;;  %v7243_v43 = vld [vmem:[%s37465_s0 + $0xfb] sm:$0xff] }
 0xa18   :  { %22752 = vmatprep.mubr.msk.f32.mxu0 %vm28339_vm1, %v28338_v0 }
 0xa1b   :  { %22753 = vmatmul.mubr.msk.f32.gmra.mrb[158].mxu0 %vm26_vm0, %v6419_v45  ;;  %v150_v45 = vld [vmem:[%s37466_s1 + $0x120] sm:$0xff] }
 0xa1c   :  { %22755 = vmatprep.mubr.msk.f32.mxu0 %vm28339_vm1, %v28338_v0  ;;  %8357 = vperm.xlu0 %28334, %v150_v45  }
 0xa1f   :  { %22756 = vmatmul.mubr.msk.f32.gmra.mrb[160].mxu0 %vm26_vm0, %v6420_v47  ;;  %v33063_v47 = vpop.permute.xlu0 %8392 }
 0xa20   :  { %22760 = vmatprep.mubr.msk.f32.mxu0 %vm28339_vm1, %v28338_v0  ;;  %8577 = vperm.xlu0 %28334, %v194_v48  }
 0xa23   :  { %22761 = vmatmul.mubr.msk.f32.vlgmr.msra.gmra.mrb[0].mxu0 %vm26_vm0, %v7217_v49  ;;  %v7245_v49 = vld [vmem:[%s37465_s0 + $0x10b] sm:$0xff] }
 0xa24   :  { %22763 = vmatprep.mubr.msk.f32.mxu0 %vm28339_vm1, %v28338_v0 }
 0xa27   :  { %22764 = vmatmul.mubr.msk.f32.gmra.mrb[2].mxu0 %vm26_vm0, %v7218_v51  ;;  %v33076_v51 = vpop.permute.xlu0 %8402 }
 0xa28   :  { %22766 = vmatprep.mubr.msk.f32.mxu0 %vm28339_vm1, %v28338_v0 }
 0xa2b   :  { %22767 = vmatmul.mubr.msk.f32.gmra.mrb[4].mxu0 %vm26_vm0, %v7219_v53  ;;  %v33084_v53 = vpop.permute.xlu1 %8407  ;;  %v33095_v56 = vpop.permute.xlu0 %8412 }
 0xa2c   :  { %22769 = vmatprep.mubr.msk.f32.mxu0 %vm28339_vm1, %v28338_v0 }
 0xa2f   :  { %22770 = vmatmul.mubr.msk.f32.gmra.mrb[6].mxu0 %vm26_vm0, %v7220_v55  ;;  %v7247_v55 = vld [vmem:[%s37465_s0 + $0x11b] sm:$0xff]  ;;  %v33103_v58 = vpop.permute.xlu1 %8417 }
 0xa30   :  { %22772 = vmatprep.mubr.msk.f32.mxu0 %vm28339_vm1, %v28338_v0 }
 0xa33   :  { %22773 = vmatmul.mubr.msk.f32.gmra.mrb[8].mxu0 %vm26_vm0, %v7221_v57  ;;  %v7248_v57 = vld [vmem:[%s37465_s0 + $0x123] sm:$0xff] }
 0xa34   :  { %22775 = vmatprep.mubr.msk.f32.mxu0 %vm28339_vm1, %v28338_v0 }
 0xa37   :  { %22776 = vmatmul.mubr.msk.f32.gmra.mrb[10].mxu0 %vm26_vm0, %v7222_v59  ;;  %v33105_v59 = vpop.permute.xlu0 %8422 }
 0xa38   :  { %22778 = vmatprep.mubr.msk.f32.mxu0 %vm28339_vm1, %v28338_v0 }
 0xa3b   :  { %22779 = vmatmul.mubr.msk.f32.gmra.mrb[12].mxu0 %vm26_vm0, %v7223_v61  ;;  %v33113_v61 = vpop.permute.xlu1 %8427 }
 0xa3c   :  { %22781 = vmatprep.mubr.msk.f32.mxu0 %vm28339_vm1, %v28338_v0 }
 0xa3f   :  { %22782 = vmatmul.mubr.msk.f32.gmra.mrb[14].mxu0 %vm26_vm0, %v7224_v63  ;;  %v33121_v63 = vpop.permute.xlu0 %8432 }
 0xa40   :  { %22784 = vmatprep.mubr.msk.f32.mxu0 %vm28339_vm1, %v28338_v0 }
 0xa43   :  { %22785 = vmatmul.mubr.msk.f32.gmra.mrb[16].mxu0 %vm26_vm0, %v7225_v2  ;;  %v33129_v2 = vpop.permute.xlu1 %8437  ;;  %v33131_v3 = vpop.permute.xlu0 %8442 }
 0xa44   :  { %22787 = vmatprep.mubr.msk.f32.mxu0 %vm28339_vm1, %v28338_v0 }
 0xa47   :  { %22788 = vmatmul.mubr.msk.f32.gmra.mrb[18].mxu0 %vm26_vm0, %v7226_v4  ;;  %v7252_v4 = vld [vmem:[%s37465_s0 + $0x143] sm:$0xff]  ;;  %v33139_v5 = vpop.permute.xlu1 %8447  ;;  %v33147_v7 = vpop.permute.xlu0 %8452 }
 0xa48   :  { %22790 = vmatprep.mubr.msk.f32.mxu0 %vm28339_vm1, %v28338_v0 }
 0xa4b   :  { %22791 = vmatmul.mubr.msk.f32.gmra.mrb[20].mxu0 %vm26_vm0, %v7227_v6  ;;  %v7253_v6 = vld [vmem:[%s37465_s0 + $0x14b] sm:$0xff]  ;;  %v33155_v9 = vpop.permute.xlu1 %8457 }
 0xa4c   :  { %22793 = vmatprep.mubr.msk.f32.mxu0 %vm28339_vm1, %v28338_v0 }
 0xa4f   :  { %22794 = vmatmul.mubr.msk.f32.gmra.mrb[22].mxu0 %vm26_vm0, %v7228_v8  ;;  %v7254_v8 = vld [vmem:[%s37465_s0 + $0x153] sm:$0xff] }
 0xa50   :  { %22796 = vmatprep.mubr.msk.f32.mxu0 %vm28339_vm1, %v28338_v0 }
 0xa53   :  { %22797 = vmatmul.mubr.msk.f32.gmra.mrb[24].mxu0 %vm26_vm0, %v7229_v10  ;;  %v33157_v10 = vpop.permute.xlu0 %8462 }
 0xa54   :  { %22799 = vmatprep.mubr.msk.f32.mxu0 %vm28339_vm1, %v28338_v0 }
 0xa57   :  { %22800 = vmatmul.mubr.msk.f32.gmra.mrb[26].mxu0 %vm26_vm0, %v7230_v12  ;;  %v33165_v12 = vpop.permute.xlu1 %8467 }
 0xa58   :  { %22802 = vmatprep.mubr.msk.f32.mxu0 %vm28339_vm1, %v28338_v0 }
 0xa5b   :  { %22803 = vmatmul.mubr.msk.f32.gmra.mrb[28].mxu0 %vm26_vm0, %v7231_v14  ;;  %v33173_v14 = vpop.permute.xlu0 %8472 }
 0xa5c   :  { %22805 = vmatprep.mubr.msk.f32.mxu0 %vm28339_vm1, %v28338_v0 }
 0xa5f   :  { %22806 = vmatmul.mubr.msk.f32.gmra.mrb[30].mxu0 %vm26_vm0, %v7232_v16  ;;  %v33181_v16 = vpop.permute.xlu1 %8477  ;;  %v33183_v17 = vpop.permute.xlu0 %8482 }
 0xa60   :  { %22808 = vmatprep.mubr.msk.f32.mxu0 %vm28339_vm1, %v28338_v0 }
 0xa63   :  { %22809 = vmatmul.mubr.msk.f32.gmra.mrb[32].mxu0 %vm26_vm0, %v7233_v18  ;;  %v7258_v18 = vld [vmem:[%s37465_s0 + $0x173] sm:$0xff]  ;;  %v33191_v19 = vpop.permute.xlu1 %8487  ;;  %v33199_v21 = vpop.permute.xlu0 %8492 }
 0xa64   :  { %22811 = vmatprep.mubr.msk.f32.mxu0 %vm28339_vm1, %v28338_v0 }
 0xa67   :  { %22812 = vmatmul.mubr.msk.f32.gmra.mrb[34].mxu0 %vm26_vm0, %v7234_v20  ;;  %v7259_v20 = vld [vmem:[%s37465_s0 + $0x17b] sm:$0xff]  ;;  %v33207_v23 = vpop.permute.xlu1 %8497 }
 0xa68   :  { %22814 = vmatprep.mubr.msk.f32.mxu0 %vm28339_vm1, %v28338_v0 }
 0xa6b   :  { %22815 = vmatmul.mubr.msk.f32.gmra.mrb[36].mxu0 %vm26_vm0, %v7235_v22  ;;  %v7260_v22 = vld [vmem:[%s37465_s0 + $0x183] sm:$0xff] }
 0xa6c   :  { %22817 = vmatprep.mubr.msk.f32.mxu0 %vm28339_vm1, %v28338_v0 }
 0xa6f   :  { %22818 = vmatmul.mubr.msk.f32.gmra.mrb[38].mxu0 %vm26_vm0, %v7236_v24  ;;  %v33209_v24 = vpop.permute.xlu0 %8502 }
 0xa70   :  { %22820 = vmatprep.mubr.msk.f32.mxu0 %vm28339_vm1, %v28338_v0 }
 0xa73   :  { %22821 = vmatmul.mubr.msk.f32.gmra.mrb[40].mxu0 %vm26_vm0, %v7237_v26  ;;  %v33217_v26 = vpop.permute.xlu1 %8507 }
 0xa74   :  { %22823 = vmatprep.mubr.msk.f32.mxu0 %vm28339_vm1, %v28338_v0 }
 0xa77   :  { %22824 = vmatmul.mubr.msk.f32.gmra.mrb[42].mxu0 %vm26_vm0, %v7238_v28  ;;  %v33225_v28 = vpop.permute.xlu0 %8512 }
 0xa78   :  { %22826 = vmatprep.mubr.msk.f32.mxu0 %vm28339_vm1, %v28338_v0 }
 0xa7b   :  { %22827 = vmatmul.mubr.msk.f32.gmra.mrb[44].mxu0 %vm26_vm0, %v7239_v30  ;;  %v33233_v30 = vpop.permute.xlu1 %8517  ;;  %v33235_v32 = vpop.permute.xlu0 %8522 }
 0xa7c   :  { %22829 = vmatprep.mubr.msk.f32.mxu0 %vm28339_vm1, %v28338_v0 }
 0xa7f   :  { %22830 = vmatmul.mubr.msk.f32.gmra.mrb[46].mxu0 %vm26_vm0, %v7240_v33  ;;  %v7264_v33 = vld [vmem:[%s37465_s0 + $0x1a3] sm:$0xff]  ;;  %v33243_v35 = vpop.permute.xlu1 %8527  ;;  %v33251_v38 = vpop.permute.xlu0 %8532 }
 0xa80   :  { %22832 = vmatprep.mubr.msk.f32.mxu0 %vm28339_vm1, %v28338_v0 }
 0xa83   :  { %22833 = vmatmul.mubr.msk.f32.gmra.mrb[48].mxu0 %vm26_vm0, %v7241_v36  ;;  %v7265_v36 = vld [vmem:[%s37465_s0 + $0x1ab] sm:$0xff]  ;;  %v33259_v42 = vpop.permute.xlu1 %8537  ;;  %v33264_v45 = vpop.permute.xlu0 %8542 }
 0xa84   :  { %22835 = vmatprep.mubr.msk.f32.mxu0 %vm28339_vm1, %v28338_v0 }
 0xa87   :  { %22836 = vmatmul.mubr.msk.f32.gmra.mrb[50].mxu0 %vm26_vm0, %v7242_v39  ;;  %v7266_v39 = vld [vmem:[%s37465_s0 + $0x1b3] sm:$0xff]  ;;  %v33273_v48 = vpop.permute.xlu1 %8547 }
 0xa88   :  { %22838 = vmatprep.mubr.msk.f32.mxu0 %vm28339_vm1, %v28338_v0 }
 0xa8b   :  { %22839 = vmatmul.mubr.msk.f32.gmra.mrb[52].mxu0 %vm26_vm0, %v7243_v43  ;;  %v8830_v43 = vld [vmem:[%s37467_s3] sm:$0xff] }
 0xa8c   :  { %22841 = vmatprep.mubr.msk.f32.mxu0 %vm28339_vm1, %v28338_v0  ;;  %23004 = vmatpush3.msra.mxu0 %v8830_v43 }
 0xa8d   :  { %25454 = vmatpush3.msra.mxu1 %v8830_v43 }
 0xa8e   :  { %23248 = vmatprep.subr.mxu1 %v28338_v0 }
 0xa8f   :  { %22842 = vmatmul.mubr.msk.f32.gmra.mrb[54].mxu0 %vm26_vm0, %v7244_v46  ;;  %v7267_v46 = vld [vmem:[%s37465_s0 + $0x1bb] sm:$0xff] }
 0xa90   :  { %22844 = vmatprep.mubr.msk.f32.mxu0 %vm28339_vm1, %v28338_v0 }
 0xa93   :  { %22845 = vmatmul.mubr.msk.f32.gmra.mrb[56].mxu0 %vm26_vm0, %v7245_v49  ;;  %v7268_v49 = vld [vmem:[%s37465_s0 + $0x1c3] sm:$0xff] }
 0xa94   :  { %22847 = vmatprep.mubr.msk.f32.mxu0 %vm28339_vm1, %v28338_v0 }
 0xa97   :  { %22848 = vmatmul.mubr.msk.f32.gmra.mrb[58].mxu0 %vm26_vm0, %v7246_v52  ;;  %v33281_v52 = vpop.permute.xlu0 %8552 }
 0xa98   :  { %22850 = vmatprep.mubr.msk.f32.mxu0 %vm28339_vm1, %v28338_v0 }
 0xa9b   :  { %22851 = vmatmul.mubr.msk.f32.gmra.mrb[60].mxu0 %vm26_vm0, %v7247_v55  ;;  %v33289_v55 = vpop.permute.xlu1 %8557 }
 0xa9c   :  { %22853 = vmatprep.mubr.msk.f32.mxu0 %vm28339_vm1, %v28338_v0 }
 0xa9f   :  { %22854 = vmatmul.mubr.msk.f32.gmra.mrb[62].mxu0 %vm26_vm0, %v7248_v57  ;;  %v33291_v57 = vpop.permute.xlu0 %8562 }
 0xaa0   :  { %22856 = vmatprep.mubr.msk.f32.mxu0 %vm28339_vm1, %v28338_v0 }
 0xaa3   :  { %22857 = vmatmul.mubr.msk.f32.gmra.mrb[64].mxu0 %vm26_vm0, %v7249_v60  ;;  %v33297_v60 = vld [vmem:[%s37468_s4] ss:$0 sm:$0xff] }
 0xaa4   :  { %22859 = vmatprep.mubr.msk.f32.mxu0 %vm28339_vm1, %v28338_v0 }
 0xaa7   :  { %22860 = vmatmul.mubr.msk.f32.gmra.mrb[66].mxu0 %vm26_vm0, %v7250_v62  ;;  %v7270_v62 = vld [vmem:[%s37465_s0 + $0x1d3] sm:$0xff] }
 0xaa8   :  { %22862 = vmatprep.mubr.msk.f32.mxu0 %vm28339_vm1, %v28338_v0 }
 0xaab   :  { %22863 = vmatmul.mubr.msk.f32.gmra.mrb[68].mxu0 %vm26_vm0, %v7251_v1 }
 0xaac   :  { %22865 = vmatprep.mubr.msk.f32.mxu0 %vm28339_vm1, %v28338_v0 }
 0xaaf   :  { %22866 = vmatmul.mubr.msk.f32.gmra.mrb[70].mxu0 %vm26_vm0, %v7252_v4  ;;  %v33304_v4 = vpop.permute.xlu1 %8567 }
 0xab0   :  { %22868 = vmatprep.mubr.msk.f32.mxu0 %vm28339_vm1, %v28338_v0 }
 0xab3   :  { %22869 = vmatmul.mubr.msk.f32.gmra.mrb[72].mxu0 %vm26_vm0, %v7253_v6 }
 0xab4   :  { %22871 = vmatprep.mubr.msk.f32.mxu0 %vm28339_vm1, %v28338_v0 }
 0xab7   :  { %22872 = vmatmul.mubr.msk.f32.gmra.mrb[74].mxu0 %vm26_vm0, %v7254_v8 }
 0xab8   :  { %22874 = vmatprep.mubr.msk.f32.mxu0 %vm28339_vm1, %v28338_v0 }
 0xabb   :  { %22875 = vmatmul.mubr.msk.f32.gmra.mrb[76].mxu0 %vm26_vm0, %v7255_v11  ;;  %v8178_v11 = vpop.permute.xlu0 %8177 }
 0xabc   :  { %22877 = vmatprep.mubr.msk.f32.mxu0 %vm28339_vm1, %v28338_v0 }
 0xabf   :  { %22878 = vmatmul.mubr.msk.f32.gmra.mrb[78].mxu0 %vm26_vm0, %v7256_v13  ;;  %v7271_v13 = vld [vmem:[%s37465_s0 + $0x1db] sm:$0xff] }
 0xac0   :  { %22880 = vmatprep.mubr.msk.f32.mxu0 %vm28339_vm1, %v28338_v0 }
 0xac3   :  { %22881 = vmatmul.mubr.msk.f32.gmra.mrb[80].mxu0 %vm26_vm0, %v7257_v15 }
 0xac4   :  { %22883 = vmatprep.mubr.msk.f32.mxu0 %vm28339_vm1, %v28338_v0 }
 0xac7   :  { %22884 = vmatmul.mubr.msk.f32.gmra.mrb[82].mxu0 %vm26_vm0, %v7258_v18 }
 0xac8   :  { %22886 = vmatprep.mubr.msk.f32.mxu0 %vm28339_vm1, %v28338_v0 }
 0xacb   :  { %22887 = vmatmul.mubr.msk.f32.gmra.mrb[84].mxu0 %vm26_vm0, %v7259_v20 }
 0xacc   :  { %22889 = vmatprep.mubr.msk.f32.mxu0 %vm28339_vm1, %v28338_v0 }
 0xacf   :  { %22890 = vmatmul.mubr.msk.f32.gmra.mrb[86].mxu0 %vm26_vm0, %v7260_v22 }
 0xad0   :  { %22892 = vmatprep.mubr.msk.f32.mxu0 %vm28339_vm1, %v28338_v0 }
 0xad3   :  { %22893 = vmatmul.mubr.msk.f32.gmra.mrb[88].mxu0 %vm26_vm0, %v7261_v25 }
 0xad4   :  { %22895 = vmatprep.mubr.msk.f32.mxu0 %vm28339_vm1, %v28338_v0 }
 0xad7   :  { %22896 = vmatmul.mubr.msk.f32.gmra.mrb[90].mxu0 %vm26_vm0, %v7262_v27  ;;  %v8183_v27 = vpop.permute.xlu1 %8182 }
 0xad8   :  { %22898 = vmatprep.mubr.msk.f32.mxu0 %vm28339_vm1, %v28338_v0 }
 0xadb   :  { %22899 = vmatmul.mubr.msk.f32.gmra.mrb[92].mxu0 %vm26_vm0, %v7263_v29  ;;  %v7272_v29 = vld [vmem:[%s37465_s0 + $0x1e3] sm:$0xff] }
 0xadc   :  { %22901 = vmatprep.mubr.msk.f32.mxu0 %vm28339_vm1, %v28338_v0 }
 0xadf   :  { %22902 = vmatmul.mubr.msk.f32.gmra.mrb[94].mxu0 %vm26_vm0, %v7264_v33 }
 0xae0   :  { %22904 = vmatprep.mubr.msk.f32.mxu0 %vm28339_vm1, %v28338_v0 }
 0xae3   :  { %22905 = vmatmul.mubr.msk.f32.gmra.mrb[96].mxu0 %vm26_vm0, %v7265_v36 }
 0xae4   :  { %22907 = vmatprep.mubr.msk.f32.mxu0 %vm28339_vm1, %v28338_v0 }
 0xae7   :  { %22908 = vmatmul.mubr.msk.f32.gmra.mrb[98].mxu0 %vm26_vm0, %v7266_v39 }
 0xae8   :  { %22910 = vmatprep.mubr.msk.f32.mxu0 %vm28339_vm1, %v28338_v0 }
 0xaeb   :  { %22911 = vmatmul.mubr.msk.f32.gmra.mrb[100].mxu0 %vm26_vm0, %v7267_v46 }
 0xaec   :  { %22913 = vmatprep.mubr.msk.f32.mxu0 %vm28339_vm1, %v28338_v0 }
 0xaef   :  { %22914 = vmatmul.mubr.msk.f32.gmra.mrb[102].mxu0 %vm26_vm0, %v7268_v49  ;;  %v8188_v49 = vpop.permute.xlu0 %8187 }
 0xaf0   :  { %22916 = vmatprep.mubr.msk.f32.mxu0 %vm28339_vm1, %v28338_v0 }
 0xaf3   :  { %22917 = vmatmul.mubr.msk.f32.gmra.mrb[104].mxu0 %vm26_vm0, %v7269_v54  ;;  %v7273_v54 = vld [vmem:[%s37465_s0 + $0x1eb] sm:$0xff] }
 0xaf4   :  { %22919 = vmatprep.mubr.msk.f32.mxu0 %vm28339_vm1, %v28338_v0 }
 0xaf6   :  { %v7609_v1 = vpop.f32.mrb[0].mxu0 }
 0xaf7   :  { %v25455_v6 = vadd.f32 %v33297_v60, %v7609_v1  ;;  %v22762_v8 = vpop.f32.mrb[1].mxu0  ;;  %22920 = vmatmul.mubr.msk.f32.gmra.mrb[106].mxu0 %vm26_vm0, %v7270_v62 }
 0xaf8   :  { %22922 = vmatprep.mubr.msk.f32.mxu0 %vm28339_vm1, %v28338_v0 }
 0xaf9   :  { %v8094_v15 = vmax.f32 %v25455_v6, 0.0 }
 0xafa   :  { %v7614_v18 = vpop.f32.mrb[2].mxu0 }
 0xafb   :  { %v8580_v20 = vmul.f32 %v8178_v11, %v8094_v15  ;;  %v25456_v22 = vadd.f32 %v33297_v60, %v7614_v18  ;;  %v22765_v25 = vpop.f32.mrb[3].mxu0  ;;  %22923 = vmatmul.mubr.msk.f32.gmra.mrb[108].mxu0 %vm26_vm0, %v7271_v13  ;;  %v8193_v13 = vpop.permute.xlu1 %8192  ;;  %v7274_v15 = vld [vmem:[%s37465_s0 + $0x1f3] sm:$0xff] }
 0xafc   :  { %22925 = vmatprep.mubr.msk.f32.mxu0 %vm28339_vm1, %v28338_v0 }
 0xafd   :  { %8661 = vst.msk [vmem:[#allocation2 + $0x18] sm:$0xff] %vm26_vm0, %v8580_v20  ;;  %v8095_v33 = vmax.f32 %v25456_v22, 0.0 }
 0xafe   :  { %v7619_v36 = vpop.f32.mrb[4].mxu0 }
 0xaff   :  { %v8581_v39 = vmul.f32 %v8183_v27, %v8095_v33  ;;  %v25457_v43 = vadd.f32 %v33297_v60, %v7619_v36  ;;  %v22768_v46 = vpop.f32.mrb[5].mxu0  ;;  %22926 = vmatmul.mubr.msk.f32.gmra.mrb[110].mxu0 %vm26_vm0, %v7272_v29  ;;  %v8198_v29 = vpop.permute.xlu0 %8197  ;;  %v7275_v33 = vld [vmem:[%s37465_s0 + $0x1fb] sm:$0xff] }
 0xb00   :  { %22928 = vmatprep.mubr.msk.f32.mxu0 %vm28339_vm1, %v28338_v0 }
 0xb01   :  { %8662 = vst.msk [vmem:[#allocation2 + $0x20] sm:$0xff] %vm26_vm0, %v8581_v39  ;;  %v8096_v62 = vmax.f32 %v25457_v43, 0.0 }
 0xb02   :  { %v7624_v1 = vpop.f32.mrb[6].mxu0 }
 0xb03   :  { %v8582_v6 = vmul.f32 %v8188_v49, %v8096_v62  ;;  %v25458_v8 = vadd.f32 %v33297_v60, %v7624_v1  ;;  %v22771_v11 = vpop.f32.mrb[7].mxu0  ;;  %22929 = vmatmul.mubr.msk.f32.gmra.mrb[112].mxu0 %vm26_vm0, %v7273_v54  ;;  %v8203_v54 = vpop.permute.xlu1 %8202  ;;  %v7276_v62 = vld [vmem:[%s37465_s0 + $0x203] sm:$0xff] }
 0xb04   :  { %22931 = vmatprep.mubr.msk.f32.mxu0 %vm28339_vm1, %v28338_v0 }
 0xb05   :  { %8663 = vst.msk [vmem:[#allocation2 + $0x28] sm:$0xff] %vm26_vm0, %v8582_v6  ;;  %v8097_v18 = vmax.f32 %v25458_v8, 0.0 }
 0xb06   :  { %v7629_v20 = vpop.f32.mrb[8].mxu0 }
 0xb07   :  { %v8583_v22 = vmul.f32 %v8193_v13, %v8097_v18  ;;  %v25459_v25 = vadd.f32 %v33297_v60, %v7629_v20  ;;  %v22774_v27 = vpop.f32.mrb[9].mxu0  ;;  %22932 = vmatmul.mubr.msk.f32.gmra.mrb[114].mxu0 %vm26_vm0, %v7274_v15  ;;  %v8208_v15 = vpop.permute.xlu0 %8207  ;;  %v7277_v18 = vld [vmem:[%s37465_s0 + $0x20b] sm:$0xff] }
 0xb08   :  { %22934 = vmatprep.mubr.msk.f32.mxu0 %vm28339_vm1, %v28338_v0 }
 0xb09   :  { %8664 = vst.msk [vmem:[#allocation2 + $0x30] sm:$0xff] %vm26_vm0, %v8583_v22  ;;  %v8098_v36 = vmax.f32 %v25459_v25, 0.0 }
 0xb0a   :  { %v7634_v39 = vpop.f32.mrb[10].mxu0 }
 0xb0b   :  { %v8584_v43 = vmul.f32 %v8198_v29, %v8098_v36  ;;  %v25460_v46 = vadd.f32 %v33297_v60, %v7634_v39  ;;  %v22777_v49 = vpop.f32.mrb[11].mxu0  ;;  %22935 = vmatmul.mubr.msk.f32.gmra.mrb[116].mxu0 %vm26_vm0, %v7275_v33  ;;  %v8213_v33 = vpop.permute.xlu1 %8212  ;;  %v7278_v36 = vld [vmem:[%s37465_s0 + $0x213] sm:$0xff] }
 0xb0c   :  { %22937 = vmatprep.mubr.msk.f32.mxu0 %vm28339_vm1, %v28338_v0 }
 0xb0d   :  { %8665 = vst.msk [vmem:[#allocation2 + $0x38] sm:$0xff] %vm26_vm0, %v8584_v43  ;;  %v8099_v1 = vmax.f32 %v25460_v46, 0.0 }
 0xb0e   :  { %v7639_v6 = vpop.f32.mrb[12].mxu0 }
 0xb0f   :  { %v8585_v8 = vmul.f32 %v8203_v54, %v8099_v1  ;;  %v25461_v11 = vadd.f32 %v33297_v60, %v7639_v6  ;;  %v22780_v13 = vpop.f32.mrb[13].mxu0  ;;  %22938 = vmatmul.mubr.msk.f32.gmra.mrb[118].mxu0 %vm26_vm0, %v7276_v62  ;;  %v8218_v62 = vpop.permute.xlu0 %8217  ;;  %v7279_v1 = vld [vmem:[%s37465_s0 + $0x21b] sm:$0xff] }
 0xb10   :  { %22940 = vmatprep.mubr.msk.f32.mxu0 %vm28339_vm1, %v28338_v0 }
 0xb11   :  { %8666 = vst.msk [vmem:[#allocation2 + $0x40] sm:$0xff] %vm26_vm0, %v8585_v8  ;;  %v8100_v20 = vmax.f32 %v25461_v11, 0.0 }
 0xb12   :  { %v7644_v22 = vpop.f32.mrb[14].mxu0 }
 0xb13   :  { %v8586_v25 = vmul.f32 %v8208_v15, %v8100_v20  ;;  %v25462_v27 = vadd.f32 %v33297_v60, %v7644_v22  ;;  %v22783_v29 = vpop.f32.mrb[15].mxu0  ;;  %22941 = vmatmul.mubr.msk.f32.gmra.mrb[120].mxu0 %vm26_vm0, %v7277_v18  ;;  %v8223_v18 = vpop.permute.xlu1 %8222  ;;  %v7280_v20 = vld [vmem:[%s37465_s0 + $0x223] sm:$0xff] }
 0xb14   :  { %22943 = vmatprep.mubr.msk.f32.mxu0 %vm28339_vm1, %v28338_v0 }
 0xb15   :  { %8667 = vst.msk [vmem:[#allocation2 + $0x48] sm:$0xff] %vm26_vm0, %v8586_v25  ;;  %v8101_v39 = vmax.f32 %v25462_v27, 0.0 }
 0xb16   :  { %v7649_v43 = vpop.f32.mrb[16].mxu0 }
 0xb17   :  { %v8587_v46 = vmul.f32 %v8213_v33, %v8101_v39  ;;  %v25463_v49 = vadd.f32 %v33297_v60, %v7649_v43  ;;  %v22786_v54 = vpop.f32.mrb[17].mxu0  ;;  %22944 = vmatmul.mubr.msk.f32.gmra.mrb[122].mxu0 %vm26_vm0, %v7278_v36  ;;  %v8228_v36 = vpop.permute.xlu0 %8227  ;;  %v7281_v39 = vld [vmem:[%s37465_s0 + $0x22b] sm:$0xff] }
 0xb18   :  { %22946 = vmatprep.mubr.msk.f32.mxu0 %vm28339_vm1, %v28338_v0 }
 0xb19   :  { %8668 = vst.msk [vmem:[#allocation2 + $0x50] sm:$0xff] %vm26_vm0, %v8587_v46  ;;  %v8102_v6 = vmax.f32 %v25463_v49, 0.0 }
 0xb1a   :  { %v7654_v8 = vpop.f32.mrb[18].mxu0 }
 0xb1b   :  { %v8588_v11 = vmul.f32 %v8218_v62, %v8102_v6  ;;  %v25464_v13 = vadd.f32 %v33297_v60, %v7654_v8  ;;  %v22789_v15 = vpop.f32.mrb[19].mxu0  ;;  %22947 = vmatmul.mubr.msk.f32.gmra.mrb[124].mxu0 %vm26_vm0, %v7279_v1  ;;  %v8233_v1 = vpop.permute.xlu1 %8232  ;;  %v7282_v6 = vld [vmem:[%s37465_s0 + $0x233] sm:$0xff] }
 0xb1c   :  { %22949 = vmatprep.mubr.msk.f32.mxu0 %vm28339_vm1, %v28338_v0 }
 0xb1d   :  { %8669 = vst.msk [vmem:[#allocation2 + $0x58] sm:$0xff] %vm26_vm0, %v8588_v11  ;;  %v8103_v22 = vmax.f32 %v25464_v13, 0.0 }
 0xb1e   :  { %v7659_v25 = vpop.f32.mrb[20].mxu0 }
 0xb1f   :  { %v8589_v27 = vmul.f32 %v8223_v18, %v8103_v22  ;;  %v25465_v29 = vadd.f32 %v33297_v60, %v7659_v25  ;;  %v22792_v33 = vpop.f32.mrb[21].mxu0  ;;  %22950 = vmatmul.mubr.msk.f32.gmra.mrb[126].mxu0 %vm26_vm0, %v7280_v20  ;;  %v8238_v20 = vpop.permute.xlu0 %8237  ;;  %v7283_v22 = vld [vmem:[%s37465_s0 + $0x23b] sm:$0xff] }
 0xb20   :  { %22952 = vmatprep.mubr.msk.f32.mxu0 %vm28339_vm1, %v28338_v0 }
 0xb21   :  { %8670 = vst.msk [vmem:[#allocation2 + $0x60] sm:$0xff] %vm26_vm0, %v8589_v27  ;;  %v8104_v43 = vmax.f32 %v25465_v29, 0.0 }
 0xb22   :  { %v7664_v46 = vpop.f32.mrb[22].mxu0 }
 0xb23   :  { %v8590_v49 = vmul.f32 %v8228_v36, %v8104_v43  ;;  %v25466_v54 = vadd.f32 %v33297_v60, %v7664_v46  ;;  %v22795_v62 = vpop.f32.mrb[23].mxu0  ;;  %22953 = vmatmul.mubr.msk.f32.gmra.mrb[128].mxu0 %vm26_vm0, %v7281_v39  ;;  %v8243_v39 = vpop.permute.xlu1 %8242  ;;  %v7284_v43 = vld [vmem:[%s37465_s0 + $0x243] sm:$0xff] }
 0xb24   :  { %22955 = vmatprep.mubr.msk.f32.mxu0 %vm28339_vm1, %v28338_v0 }
 0xb25   :  { %8671 = vst.msk [vmem:[#allocation2 + $0x68] sm:$0xff] %vm26_vm0, %v8590_v49  ;;  %v8105_v8 = vmax.f32 %v25466_v54, 0.0 }
 0xb26   :  { %v7669_v11 = vpop.f32.mrb[24].mxu0 }
 0xb27   :  { %v8591_v13 = vmul.f32 %v8233_v1, %v8105_v8  ;;  %v25467_v15 = vadd.f32 %v33297_v60, %v7669_v11  ;;  %v22798_v18 = vpop.f32.mrb[25].mxu0  ;;  %22956 = vmatmul.mubr.msk.f32.gmra.mrb[130].mxu0 %vm26_vm0, %v7282_v6  ;;  %v8248_v6 = vpop.permute.xlu0 %8247  ;;  %v7285_v8 = vld [vmem:[%s37465_s0 + $0x24b] sm:$0xff] }
 0xb28   :  { %22958 = vmatprep.mubr.msk.f32.mxu0 %vm28339_vm1, %v28338_v0 }
 0xb29   :  { %8672 = vst.msk [vmem:[#allocation2 + $0x70] sm:$0xff] %vm26_vm0, %v8591_v13  ;;  %v8106_v25 = vmax.f32 %v25467_v15, 0.0 }
 0xb2a   :  { %v7674_v27 = vpop.f32.mrb[26].mxu0 }
 0xb2b   :  { %v8592_v29 = vmul.f32 %v8238_v20, %v8106_v25  ;;  %v25468_v33 = vadd.f32 %v33297_v60, %v7674_v27  ;;  %v22801_v36 = vpop.f32.mrb[27].mxu0  ;;  %22959 = vmatmul.mubr.msk.f32.gmra.mrb[132].mxu0 %vm26_vm0, %v7283_v22  ;;  %v8253_v22 = vpop.permute.xlu1 %8252  ;;  %v7286_v25 = vld [vmem:[%s37465_s0 + $0x253] sm:$0xff] }
 0xb2c   :  { %22961 = vmatprep.mubr.msk.f32.mxu0 %vm28339_vm1, %v28338_v0 }
 0xb2d   :  { %8673 = vst.msk [vmem:[#allocation2 + $0x78] sm:$0xff] %vm26_vm0, %v8592_v29  ;;  %v8107_v46 = vmax.f32 %v25468_v33, 0.0 }
 0xb2e   :  { %v7679_v49 = vpop.f32.mrb[28].mxu0 }
 0xb2f   :  { %v8593_v54 = vmul.f32 %v8243_v39, %v8107_v46  ;;  %v25469_v62 = vadd.f32 %v33297_v60, %v7679_v49  ;;  %v22804_v1 = vpop.f32.mrb[29].mxu0  ;;  %22962 = vmatmul.mubr.msk.f32.gmra.mrb[134].mxu0 %vm26_vm0, %v7284_v43  ;;  %v8258_v43 = vpop.permute.xlu0 %8257  ;;  %v7287_v46 = vld [vmem:[%s37465_s0 + $0x25b] sm:$0xff] }
 0xb30   :  { %22964 = vmatprep.mubr.msk.f32.mxu0 %vm28339_vm1, %v28338_v0 }
 0xb31   :  { %8674 = vst.msk [vmem:[#allocation2 + $0x80] sm:$0xff] %vm26_vm0, %v8593_v54  ;;  %v8108_v11 = vmax.f32 %v25469_v62, 0.0 }
 0xb32   :  { %v7684_v13 = vpop.f32.mrb[30].mxu0 }
 0xb33   :  { %v8594_v15 = vmul.f32 %v8248_v6, %v8108_v11  ;;  %v25470_v18 = vadd.f32 %v33297_v60, %v7684_v13  ;;  %v22807_v20 = vpop.f32.mrb[31].mxu0  ;;  %22965 = vmatmul.mubr.msk.f32.gmra.mrb[136].mxu0 %vm26_vm0, %v7285_v8  ;;  %v8263_v8 = vpop.permute.xlu1 %8262  ;;  %v7288_v11 = vld [vmem:[%s37465_s0 + $0x263] sm:$0xff] }
 0xb34   :  { %22967 = vmatprep.mubr.msk.f32.mxu0 %vm28339_vm1, %v28338_v0 }
 0xb35   :  { %8675 = vst.msk [vmem:[#allocation2 + $0x88] sm:$0xff] %vm26_vm0, %v8594_v15  ;;  %v8109_v27 = vmax.f32 %v25470_v18, 0.0 }
 0xb36   :  { %v7689_v29 = vpop.f32.mrb[32].mxu0 }
 0xb37   :  { %v8595_v33 = vmul.f32 %v8253_v22, %v8109_v27  ;;  %v25471_v36 = vadd.f32 %v33297_v60, %v7689_v29  ;;  %v22810_v39 = vpop.f32.mrb[33].mxu0  ;;  %22968 = vmatmul.mubr.msk.f32.gmra.mrb[138].mxu0 %vm26_vm0, %v7286_v25  ;;  %v8268_v25 = vpop.permute.xlu0 %8267  ;;  %v7289_v27 = vld [vmem:[%s37465_s0 + $0x26b] sm:$0xff] }
 0xb38   :  { %22970 = vmatprep.mubr.msk.f32.mxu0 %vm28339_vm1, %v28338_v0 }
 0xb39   :  { %8676 = vst.msk [vmem:[#allocation2 + $0x90] sm:$0xff] %vm26_vm0, %v8595_v33  ;;  %v8110_v49 = vmax.f32 %v25471_v36, 0.0 }
 0xb3a   :  { %v7694_v54 = vpop.f32.mrb[34].mxu0 }
 0xb3b   :  { %v8596_v62 = vmul.f32 %v8258_v43, %v8110_v49  ;;  %v25472_v1 = vadd.f32 %v33297_v60, %v7694_v54  ;;  %v22813_v6 = vpop.f32.mrb[35].mxu0  ;;  %22971 = vmatmul.mubr.msk.f32.gmra.mrb[140].mxu0 %vm26_vm0, %v7287_v46  ;;  %v8273_v46 = vpop.permute.xlu1 %8272  ;;  %v7290_v49 = vld [vmem:[%s37465_s0 + $0x273] sm:$0xff] }
 0xb3c   :  { %22973 = vmatprep.mubr.msk.f32.mxu0 %vm28339_vm1, %v28338_v0 }
 0xb3d   :  { %8677 = vst.msk [vmem:[#allocation2 + $0x98] sm:$0xff] %vm26_vm0, %v8596_v62  ;;  %v8111_v13 = vmax.f32 %v25472_v1, 0.0 }
 0xb3e   :  { %v7699_v15 = vpop.f32.mrb[36].mxu0 }
 0xb3f   :  { %v8597_v18 = vmul.f32 %v8263_v8, %v8111_v13  ;;  %v25473_v20 = vadd.f32 %v33297_v60, %v7699_v15  ;;  %v22816_v22 = vpop.f32.mrb[37].mxu0  ;;  %22974 = vmatmul.mubr.msk.f32.gmra.mrb[142].mxu0 %vm26_vm0, %v7288_v11  ;;  %v8278_v11 = vpop.permute.xlu0 %8277  ;;  %v7291_v13 = vld [vmem:[%s37465_s0 + $0x27b] sm:$0xff] }
 0xb40   :  { %22976 = vmatprep.mubr.msk.f32.mxu0 %vm28339_vm1, %v28338_v0 }
 0xb41   :  { %8678 = vst.msk [vmem:[#allocation2 + $0xa0] sm:$0xff] %vm26_vm0, %v8597_v18  ;;  %v8112_v29 = vmax.f32 %v25473_v20, 0.0 }
 0xb42   :  { %v7704_v33 = vpop.f32.mrb[38].mxu0 }
 0xb43   :  { %v8598_v36 = vmul.f32 %v8268_v25, %v8112_v29  ;;  %v25474_v39 = vadd.f32 %v33297_v60, %v7704_v33  ;;  %v22819_v43 = vpop.f32.mrb[39].mxu0  ;;  %22977 = vmatmul.mubr.msk.f32.gmra.mrb[144].mxu0 %vm26_vm0, %v7289_v27  ;;  %v8283_v27 = vpop.permute.xlu1 %8282  ;;  %v7292_v29 = vld [vmem:[%s37465_s0 + $0x283] sm:$0xff] }
 0xb44   :  { %22979 = vmatprep.mubr.msk.f32.mxu0 %vm28339_vm1, %v28338_v0 }
 0xb45   :  { %8679 = vst.msk [vmem:[#allocation2 + $0xa8] sm:$0xff] %vm26_vm0, %v8598_v36  ;;  %v8113_v54 = vmax.f32 %v25474_v39, 0.0 }
 0xb46   :  { %v7709_v62 = vpop.f32.mrb[40].mxu0 }
 0xb47   :  { %v8599_v1 = vmul.f32 %v8273_v46, %v8113_v54  ;;  %v25475_v6 = vadd.f32 %v33297_v60, %v7709_v62  ;;  %v22822_v8 = vpop.f32.mrb[41].mxu0  ;;  %22980 = vmatmul.mubr.msk.f32.gmra.mrb[146].mxu0 %vm26_vm0, %v7290_v49  ;;  %v8288_v49 = vpop.permute.xlu0 %8287  ;;  %v7293_v54 = vld [vmem:[%s37465_s0 + $0x28b] sm:$0xff] }
 0xb48   :  { %22982 = vmatprep.mubr.msk.f32.mxu0 %vm28339_vm1, %v28338_v0 }
 0xb49   :  { %8680 = vst.msk [vmem:[#allocation2 + $0xb0] sm:$0xff] %vm26_vm0, %v8599_v1  ;;  %v8114_v15 = vmax.f32 %v25475_v6, 0.0 }
 0xb4a   :  { %v7714_v18 = vpop.f32.mrb[42].mxu0 }
 0xb4b   :  { %v8600_v20 = vmul.f32 %v8278_v11, %v8114_v15  ;;  %v25476_v22 = vadd.f32 %v33297_v60, %v7714_v18  ;;  %v22825_v25 = vpop.f32.mrb[43].mxu0  ;;  %22983 = vmatmul.mubr.msk.f32.gmra.mrb[148].mxu0 %vm26_vm0, %v7291_v13  ;;  %v8293_v13 = vpop.permute.xlu1 %8292  ;;  %v7294_v15 = vld [vmem:[%s37465_s0 + $0x293] sm:$0xff] }
 0xb4c   :  { %22985 = vmatprep.mubr.msk.f32.mxu0 %vm28339_vm1, %v28338_v0 }
 0xb4d   :  { %8681 = vst.msk [vmem:[#allocation2 + $0xb8] sm:$0xff] %vm26_vm0, %v8600_v20  ;;  %v8115_v33 = vmax.f32 %v25476_v22, 0.0 }
 0xb4e   :  { %v7719_v36 = vpop.f32.mrb[44].mxu0 }
 0xb4f   :  { %v8601_v39 = vmul.f32 %v8283_v27, %v8115_v33  ;;  %v25477_v43 = vadd.f32 %v33297_v60, %v7719_v36  ;;  %v22828_v46 = vpop.f32.mrb[45].mxu0  ;;  %22986 = vmatmul.mubr.msk.f32.gmra.mrb[150].mxu0 %vm26_vm0, %v7292_v29  ;;  %v8298_v29 = vpop.permute.xlu0 %8297  ;;  %v7295_v33 = vld [vmem:[%s37465_s0 + $0x29b] sm:$0xff] }
 0xb50   :  { %22988 = vmatprep.mubr.msk.f32.mxu0 %vm28339_vm1, %v28338_v0 }
 0xb51   :  { %8682 = vst.msk [vmem:[#allocation2 + $0xc0] sm:$0xff] %vm26_vm0, %v8601_v39  ;;  %v8116_v62 = vmax.f32 %v25477_v43, 0.0 }
 0xb52   :  { %v7724_v1 = vpop.f32.mrb[46].mxu0 }
 0xb53   :  { %v8602_v6 = vmul.f32 %v8288_v49, %v8116_v62  ;;  %v25478_v8 = vadd.f32 %v33297_v60, %v7724_v1  ;;  %v22831_v11 = vpop.f32.mrb[47].mxu0  ;;  %22989 = vmatmul.mubr.msk.f32.gmra.mrb[152].mxu0 %vm26_vm0, %v7293_v54  ;;  %v8303_v54 = vpop.permute.xlu1 %8302  ;;  %v7296_v62 = vld [vmem:[%s37465_s0 + $0x2a3] sm:$0xff] }
 0xb54   :  { %22991 = vmatprep.mubr.msk.f32.mxu0 %vm28339_vm1, %v28338_v0 }
 0xb55   :  { %8683 = vst.msk [vmem:[#allocation2 + $0xc8] sm:$0xff] %vm26_vm0, %v8602_v6  ;;  %v8117_v18 = vmax.f32 %v25478_v8, 0.0 }
 0xb56   :  { %v7729_v20 = vpop.f32.mrb[48].mxu0 }
 0xb57   :  { %v8603_v22 = vmul.f32 %v8293_v13, %v8117_v18  ;;  %v25479_v25 = vadd.f32 %v33297_v60, %v7729_v20  ;;  %v22834_v27 = vpop.f32.mrb[49].mxu0  ;;  %22992 = vmatmul.mubr.msk.f32.gmra.mrb[154].mxu0 %vm26_vm0, %v7294_v15  ;;  %v8308_v15 = vpop.permute.xlu0 %8307  ;;  %v7297_v18 = vld [vmem:[%s37465_s0 + $0x2ab] sm:$0xff] }
 0xb58   :  { %22994 = vmatprep.mubr.msk.f32.mxu0 %vm28339_vm1, %v28338_v0 }
 0xb59   :  { %8684 = vst.msk [vmem:[#allocation2 + $0xd0] sm:$0xff] %vm26_vm0, %v8603_v22  ;;  %v8118_v36 = vmax.f32 %v25479_v25, 0.0 }
 0xb5a   :  { %v7734_v39 = vpop.f32.mrb[50].mxu0 }
 0xb5b   :  { %v8604_v43 = vmul.f32 %v8298_v29, %v8118_v36  ;;  %v25480_v46 = vadd.f32 %v33297_v60, %v7734_v39  ;;  %v22837_v49 = vpop.f32.mrb[51].mxu0  ;;  %22995 = vmatmul.mubr.msk.f32.gmra.mrb[156].mxu0 %vm26_vm0, %v7295_v33  ;;  %v8313_v33 = vpop.permute.xlu1 %8312  ;;  %v8749_v36 = vld [vmem:[#allocation2 + $0x5] sm:$0xff] }
 0xb5c   :  { %22997 = vmatprep.mubr.msk.f32.mxu0 %vm28339_vm1, %v28338_v0 }
 0xb5d   :  { %8685 = vst.msk [vmem:[#allocation2 + $0xd8] sm:$0xff] %vm26_vm0, %v8604_v43  ;;  %v8119_v1 = vmax.f32 %v25480_v46, 0.0 }
 0xb5e   :  { %v7739_v6 = vpop.f32.mrb[52].mxu0 }
 0xb5f   :  { %v8605_v8 = vmul.f32 %v8303_v54, %v8119_v1  ;;  %v25481_v11 = vadd.f32 %v33297_v60, %v7739_v6  ;;  %v22840_v13 = vpop.f32.mrb[53].mxu0  ;;  %22998 = vmatmul.mubr.msk.f32.gmra.mrb[158].mxu0 %vm26_vm0, %v7296_v62  ;;  %v8318_v62 = vpop.permute.xlu0 %8317  ;;  %v8750_v1 = vld [vmem:[#allocation2 + $0xd] sm:$0xff] }
 0xb60   :  { %23000 = vmatprep.mubr.msk.f32.mxu0 %vm28339_vm1, %v28338_v0 }
 0xb61   :  { %8686 = vst.msk [vmem:[#allocation2 + $0xe0] sm:$0xff] %vm26_vm0, %v8605_v8  ;;  %v8120_v20 = vmax.f32 %v25481_v11, 0.0 }
 0xb62   :  { %v7744_v22 = vpop.f32.mrb[54].mxu0 }
 0xb63   :  { %v8606_v25 = vmul.f32 %v8308_v15, %v8120_v20  ;;  %v25482_v27 = vadd.f32 %v33297_v60, %v7744_v22  ;;  %v22843_v29 = vpop.f32.mrb[55].mxu0  ;;  %23001 = vmatmul.mubr.msk.f32.gmra.mrb[160].mxu0 %vm26_vm0, %v7297_v18  ;;  %v8323_v18 = vpop.permute.xlu1 %8322 }
 0xb64   :  { %23005 = vmatprep.mubr.msk.f32.mxu0 %vm28339_vm1, %v28338_v0 }
 0xb65   :  { %8687 = vst.msk [vmem:[#allocation2 + $0xe8] sm:$0xff] %vm26_vm0, %v8606_v25  ;;  %v8121_v39 = vmax.f32 %v25482_v27, 0.0  ;;  %v8751_v25 = vld [vmem:[#allocation2 + $0x15] sm:$0xff] }
 0xb66   :  { %v7749_v43 = vpop.f32.mrb[56].mxu0 }
 0xb67   :  { %v8607_v46 = vmul.f32 %v8313_v33, %v8121_v39  ;;  %v25483_v49 = vadd.f32 %v33297_v60, %v7749_v43  ;;  %v22846_v54 = vpop.f32.mrb[57].mxu0  ;;  %23006 = vmatmul.mubr.msk.f32.vlgmr.msra.gmra.mrb[162].mxu0 %vm26_vm0, %v8749_v36  ;;  %v8328_v36 = vpop.permute.xlu0 %8327 }
 0xb68   :  { %23008 = vmatprep.mubr.msk.f32.mxu0 %vm28339_vm1, %v28338_v0 }
 0xb69   :  { %8688 = vst.msk [vmem:[#allocation2 + $0xf0] sm:$0xff] %vm26_vm0, %v8607_v46  ;;  %v8122_v6 = vmax.f32 %v25483_v49, 0.0  ;;  %v8752_v46 = vld [vmem:[#allocation2 + $0x1d] sm:$0xff] }
 0xb6a   :  { %v7754_v8 = vpop.f32.mrb[58].mxu0 }
 0xb6b   :  { %v8608_v11 = vmul.f32 %v8318_v62, %v8122_v6  ;;  %v25484_v13 = vadd.f32 %v33297_v60, %v7754_v8  ;;  %v22849_v15 = vpop.f32.mrb[59].mxu0  ;;  %23009 = vmatmul.mubr.msk.f32.gmra.mrb[164].mxu0 %vm26_vm0, %v8750_v1  ;;  %v8333_v1 = vpop.permute.xlu1 %8332 }
 0xb6c   :  { %23011 = vmatprep.mubr.msk.f32.mxu0 %vm28339_vm1, %v28338_v0 }
 0xb6d   :  { %8689 = vst.msk [vmem:[#allocation2 + $0xf8] sm:$0xff] %vm26_vm0, %v8608_v11  ;;  %v8123_v20 = vmax.f32 %v25484_v13, 0.0  ;;  %v8753_v11 = vld [vmem:[#allocation2 + $0x25] sm:$0xff] }
 0xb6e   :  { %v7759_v22 = vpop.f32.mrb[60].mxu0 }
 0xb6f   :  { %v8609_v27 = vmul.f32 %v8323_v18, %v8123_v20  ;;  %v25485_v29 = vadd.f32 %v33297_v60, %v7759_v22  ;;  %v22852_v33 = vpop.f32.mrb[61].mxu0  ;;  %23012 = vmatmul.mubr.msk.f32.gmra.mrb[166].mxu0 %vm26_vm0, %v8751_v25  ;;  %v8338_v20 = vpop.permute.xlu0 %8337 }
 0xb70   :  { %23014 = vmatprep.mubr.msk.f32.mxu0 %vm28339_vm1, %v28338_v0 }
 0xb71   :  { %8690 = vst.msk [vmem:[#allocation2 + $0x100] sm:$0xff] %vm26_vm0, %v8609_v27  ;;  %v8124_v39 = vmax.f32 %v25485_v29, 0.0  ;;  %v8754_v27 = vld [vmem:[#allocation2 + $0x2d] sm:$0xff] }
 0xb72   :  { %v7764_v43 = vpop.f32.mrb[62].mxu0 }
 0xb73   :  { %v8610_v49 = vmul.f32 %v8328_v36, %v8124_v39  ;;  %v25486_v54 = vadd.f32 %v33297_v60, %v7764_v43  ;;  %v22855_v62 = vpop.f32.mrb[63].mxu0  ;;  %23015 = vmatmul.mubr.msk.f32.gmra.mrb[168].mxu0 %vm26_vm0, %v8752_v46  ;;  %v8343_v39 = vpop.permute.xlu1 %8342 }
 0xb74   :  { %23017 = vmatprep.mubr.msk.f32.mxu0 %vm28339_vm1, %v28338_v0 }
 0xb75   :  { %8691 = vst.msk [vmem:[#allocation2 + $0x108] sm:$0xff] %vm26_vm0, %v8610_v49  ;;  %v8125_v6 = vmax.f32 %v25486_v54, 0.0  ;;  %v8755_v49 = vld [vmem:[#allocation2 + $0x35] sm:$0xff] }
 0xb76   :  { %v7769_v8 = vpop.f32.mrb[64].mxu0 }
 0xb77   :  { %v8611_v13 = vmul.f32 %v8333_v1, %v8125_v6  ;;  %v25487_v15 = vadd.f32 %v33297_v60, %v7769_v8  ;;  %v22858_v18 = vpop.f32.mrb[65].mxu0  ;;  %23018 = vmatmul.mubr.msk.f32.gmra.mrb[170].mxu0 %vm26_vm0, %v8753_v11  ;;  %v8348_v6 = vpop.permute.xlu0 %8347 }
 0xb78   :  { %23020 = vmatprep.mubr.msk.f32.mxu0 %vm28339_vm1, %v28338_v0 }
 0xb79   :  { %8692 = vst.msk [vmem:[#allocation2 + $0x110] sm:$0xff] %vm26_vm0, %v8611_v13  ;;  %v8126_v22 = vmax.f32 %v25487_v15, 0.0  ;;  %v8756_v13 = vld [vmem:[#allocation2 + $0x3d] sm:$0xff] }
 0xb7a   :  { %v7774_v25 = vpop.f32.mrb[66].mxu0 }
 0xb7b   :  { %v8612_v29 = vmul.f32 %v8338_v20, %v8126_v22  ;;  %v25488_v33 = vadd.f32 %v33297_v60, %v7774_v25  ;;  %v22861_v36 = vpop.f32.mrb[67].mxu0  ;;  %23021 = vmatmul.mubr.msk.f32.gmra.mrb[172].mxu0 %vm26_vm0, %v8754_v27  ;;  %v8353_v22 = vpop.permute.xlu1 %8352 }
 0xb7c   :  { %23023 = vmatprep.mubr.msk.f32.mxu0 %vm28339_vm1, %v28338_v0 }
 0xb7d   :  { %8693 = vst.msk [vmem:[#allocation2 + $0x118] sm:$0xff] %vm26_vm0, %v8612_v29  ;;  %v8127_v43 = vmax.f32 %v25488_v33, 0.0  ;;  %v8757_v29 = vld [vmem:[#allocation2 + $0x45] sm:$0xff] }
 0xb7e   :  { %v7779_v46 = vpop.f32.mrb[68].mxu0 }
 0xb7f   :  { %v8613_v54 = vmul.f32 %v8343_v39, %v8127_v43  ;;  %v25489_v62 = vadd.f32 %v33297_v60, %v7779_v46  ;;  %v22864_v1 = vpop.f32.mrb[69].mxu0  ;;  %23024 = vmatmul.mubr.msk.f32.gmra.mrb[174].mxu0 %vm26_vm0, %v8755_v49  ;;  %v8358_v43 = vpop.permute.xlu0 %8357 }
 0xb80   :  { %23026 = vmatprep.mubr.msk.f32.mxu0 %vm28339_vm1, %v28338_v0 }
 0xb81   :  { %8694 = vst.msk [vmem:[#allocation2 + $0x120] sm:$0xff] %vm26_vm0, %v8613_v54  ;;  %v8128_v8 = vmax.f32 %v25489_v62, 0.0  ;;  %v8758_v54 = vld [vmem:[#allocation2 + $0x4d] sm:$0xff] }
 0xb82   :  { %v7784_v11 = vpop.f32.mrb[70].mxu0 }
 0xb83   :  { %v8614_v15 = vmul.f32 %v8348_v6, %v8128_v8  ;;  %v25490_v18 = vadd.f32 %v33297_v60, %v7784_v11  ;;  %v22867_v20 = vpop.f32.mrb[71].mxu0  ;;  %23027 = vmatmul.mubr.msk.f32.gmra.mrb[176].mxu0 %vm26_vm0, %v8756_v13  ;;  %v8759_v13 = vld [vmem:[#allocation2 + $0x55] sm:$0xff] }
 0xb84   :  { %23029 = vmatprep.mubr.msk.f32.mxu0 %vm28339_vm1, %v28338_v0 }
 0xb85   :  { %8695 = vst.msk [vmem:[#allocation2 + $0x128] sm:$0xff] %vm26_vm0, %v8614_v15  ;;  %v8129_v25 = vmax.f32 %v25490_v18, 0.0 }
 0xb86   :  { %v7789_v27 = vpop.f32.mrb[72].mxu0 }
 0xb87   :  { %v8615_v33 = vmul.f32 %v8353_v22, %v8129_v25  ;;  %v25491_v36 = vadd.f32 %v33297_v60, %v7789_v27  ;;  %v22870_v39 = vpop.f32.mrb[73].mxu0  ;;  %23030 = vmatmul.mubr.msk.f32.gmra.mrb[178].mxu0 %vm26_vm0, %v8757_v29  ;;  %v8760_v27 = vld [vmem:[#allocation2 + $0x5d] sm:$0xff] }
 0xb88   :  { %23032 = vmatprep.mubr.msk.f32.mxu0 %vm28339_vm1, %v28338_v0 }
 0xb89   :  { %8696 = vst.msk [vmem:[#allocation2 + $0x130] sm:$0xff] %vm26_vm0, %v8615_v33  ;;  %v8130_v46 = vmax.f32 %v25491_v36, 0.0 }
 0xb8a   :  { %v7794_v49 = vpop.f32.mrb[74].mxu0 }
 0xb8b   :  { %v8616_v62 = vmul.f32 %v8358_v43, %v8130_v46  ;;  %v25492_v1 = vadd.f32 %v33297_v60, %v7794_v49  ;;  %v22873_v6 = vpop.f32.mrb[75].mxu0  ;;  %23033 = vmatmul.mubr.msk.f32.gmra.mrb[180].mxu0 %vm26_vm0, %v8758_v54  ;;  %v8761_v43 = vld [vmem:[#allocation2 + $0x65] sm:$0xff] }
 0xb8c   :  { %23035 = vmatprep.mubr.msk.f32.mxu0 %vm28339_vm1, %v28338_v0 }
 0xb8d   :  { %8697 = vst.msk [vmem:[#allocation2 + $0x138] sm:$0xff] %vm26_vm0, %v8616_v62  ;;  %v8131_v8 = vmax.f32 %v25492_v1, 0.0  ;;  %v8762_v1 = vld [vmem:[#allocation2 + $0x6d] sm:$0xff] }
 0xb8e   :  { %v7799_v11 = vpop.f32.mrb[76].mxu0 }
 0xb8f   :  { %v8617_v15 = vmul.f32 %v33006_v31, %v8131_v8  ;;  %v25493_v18 = vadd.f32 %v33297_v60, %v7799_v11  ;;  %v22876_v20 = vpop.f32.mrb[77].mxu0  ;;  %23036 = vmatmul.mubr.msk.f32.gmra.mrb[182].mxu0 %vm26_vm0, %v8759_v13 }
 0xb90   :  { %23038 = vmatprep.mubr.msk.f32.mxu0 %vm28339_vm1, %v28338_v0 }
 0xb91   :  { %8698 = vst.msk [vmem:[#allocation2 + $0x140] sm:$0xff] %vm26_vm0, %v8617_v15  ;;  %v8132_v22 = vmax.f32 %v25493_v18, 0.0 }
 0xb92   :  { %v7804_v25 = vpop.f32.mrb[78].mxu0 }
 0xb93   :  { %v8618_v29 = vmul.f32 %v33028_v37, %v8132_v22  ;;  %v25494_v33 = vadd.f32 %v33297_v60, %v7804_v25  ;;  %v22879_v36 = vpop.f32.mrb[79].mxu0  ;;  %23039 = vmatmul.mubr.msk.f32.gmra.mrb[184].mxu0 %vm26_vm0, %v8760_v27 }
 0xb94   :  { %23041 = vmatprep.mubr.msk.f32.mxu0 %vm28339_vm1, %v28338_v0  ;;  %v8764_v36 = vld [vmem:[#allocation2 + $0x7d] sm:$0xff] }
 0xb95   :  { %8699 = vst.msk [vmem:[#allocation2 + $0x148] sm:$0xff] %vm26_vm0, %v8618_v29  ;;  %v8133_v31 = vmax.f32 %v25494_v33, 0.0 }
 0xb96   :  { %v7809_v39 = vpop.f32.mrb[80].mxu0 }
 0xb97   :  { %v8619_v46 = vmul.f32 %v33017_v34, %v8133_v31  ;;  %v25495_v49 = vadd.f32 %v33297_v60, %v7809_v39  ;;  %v22882_v54 = vpop.f32.mrb[81].mxu0  ;;  %23042 = vmatmul.mubr.msk.f32.gmra.mrb[186].mxu0 %vm26_vm0, %v8761_v43  ;;  %v18503_v34 = vld [vmem:[%s37467_s3 + $0x8] sm:$0xff] }
 0xb98   :  { %23044 = vmatprep.mubr.msk.f32.mxu0 %vm28339_vm1, %v28338_v0  ;;  %v8765_v54 = vld [vmem:[#allocation2 + $0x85] sm:$0xff] }
 0xb99   :  { %8700 = vst.msk [vmem:[#allocation2 + $0x150] sm:$0xff] %vm26_vm0, %v8619_v46  ;;  %v8134_v37 = vmax.f32 %v25495_v49, 0.0 }
 0xb9a   :  { %v7814_v62 = vpop.f32.mrb[82].mxu0 }
 0xb9b   :  { %v8620_v6 = vmul.f32 %v33039_v40, %v8134_v37  ;;  %v25496_v8 = vadd.f32 %v33297_v60, %v7814_v62  ;;  %v22885_v11 = vpop.f32.mrb[83].mxu0  ;;  %23045 = vmatmul.mubr.msk.f32.gmra.mrb[188].mxu0 %vm26_vm0, %v8762_v1  ;;  %v8763_v40 = vld [vmem:[#allocation2 + $0x75] sm:$0xff] }
 0xb9c   :  { %v8789_v13 = vld [vmem:[#allocation2 + $0x145] sm:$0xff]  ;;  %23047 = vmatprep.mubr.msk.f32.mxu0 %vm28339_vm1, %v28338_v0  ;;  %v8766_v11 = vld [vmem:[#allocation2 + $0x8d] sm:$0xff] }
 0xb9d   :  { %8701 = vst.msk [vmem:[#allocation2 + $0x158] sm:$0xff] %vm26_vm0, %v8620_v6  ;;  %v8135_v15 = vmax.f32 %v25496_v8, 0.0  ;;  %23126 = vmatmul.mubr.msk.f32.vlgmr.msra.gmra.mrb[0].mxu1 %vm26_vm0, %v8789_v13 }
 0xb9e   :  { %v7819_v18 = vpop.f32.mrb[84].mxu0  ;;  %23249 = vmatpush3.msra.mxu1 %v18503_v34  ;;  %23128 = vmatprep.mubr.msk.f32.mxu1 %vm28339_vm1, %v28338_v0 }
 0xb9f   :  { %v8621_v20 = vmul.f32 %v33041_v41, %v8135_v15  ;;  %v25497_v22 = vadd.f32 %v33297_v60, %v7819_v18  ;;  %v22888_v25 = vpop.f32.mrb[85].mxu0  ;;  %23048 = vmatmul.mubr.msk.f32.gmra.mrb[190].mxu0 %vm26_vm0, %v8763_v40  ;;  %23493 = vmatprep.subr.mxu1 %v28338_v0 }
 0xba0   :  { %v8790_v27 = vld [vmem:[#allocation2 + $0x14d] sm:$0xff]  ;;  %23050 = vmatprep.mubr.msk.f32.mxu0 %vm28339_vm1, %v28338_v0 }
 0xba1   :  { %8702 = vst.msk [vmem:[#allocation2 + $0x160] sm:$0xff] %vm26_vm0, %v8621_v20  ;;  %v8136_v29 = vmax.f32 %v25497_v22, 0.0  ;;  %23129 = vmatmul.mubr.msk.f32.gmra.mrb[2].mxu1 %vm26_vm0, %v8790_v27  ;;  %v8767_v20 = vld [vmem:[#allocation2 + $0x95] sm:$0xff] }
 0xba2   :  { %v7824_v33 = vpop.f32.mrb[86].mxu0  ;;  %23131 = vmatprep.mubr.msk.f32.mxu1 %vm28339_vm1, %v28338_v0 }
 0xba3   :  { %v8622_v41 = vmul.f32 %v33052_v44, %v8136_v29  ;;  %v25498_v31 = vadd.f32 %v33297_v60, %v7824_v33  ;;  %v22891_v39 = vpop.f32.mrb[87].mxu0  ;;  %23051 = vmatmul.mubr.msk.f32.gmra.mrb[192].mxu0 %vm26_vm0, %v8764_v36  ;;  %v8768_v36 = vld [vmem:[#allocation2 + $0x9d] sm:$0xff] }
 0xba4   :  { %v8791_v43 = vld [vmem:[#allocation2 + $0x155] sm:$0xff]  ;;  %23053 = vmatprep.mubr.msk.f32.mxu0 %vm28339_vm1, %v28338_v0 }
 0xba5   :  { %8703 = vst.msk [vmem:[#allocation2 + $0x168] sm:$0xff] %vm26_vm0, %v8622_v41  ;;  %v8137_v46 = vmax.f32 %v25498_v31, 0.0  ;;  %23132 = vmatmul.mubr.msk.f32.gmra.mrb[4].mxu1 %vm26_vm0, %v8791_v43 }
 0xba6   :  { %v7829_v49 = vpop.f32.mrb[88].mxu0  ;;  %23134 = vmatprep.mubr.msk.f32.mxu1 %vm28339_vm1, %v28338_v0 }
 0xba7   :  { %v8623_v44 = vmul.f32 %v33063_v47, %v8137_v46  ;;  %v25499_v37 = vadd.f32 %v33297_v60, %v7829_v49  ;;  %v22894_v62 = vpop.f32.mrb[89].mxu0  ;;  %23054 = vmatmul.mubr.msk.f32.gmra.mrb[194].mxu0 %vm26_vm0, %v8765_v54  ;;  %v8769_v49 = vld [vmem:[#allocation2 + $0xa5] sm:$0xff] }
 0xba8   :  { %v8792_v1 = vld [vmem:[#allocation2 + $0x15d] sm:$0xff]  ;;  %23056 = vmatprep.mubr.msk.f32.mxu0 %vm28339_vm1, %v28338_v0 }
 0xba9   :  { %8704 = vst.msk [vmem:[#allocation2 + $0x170] sm:$0xff] %vm26_vm0, %v8623_v44  ;;  %v8138_v6 = vmax.f32 %v25499_v37, 0.0  ;;  %23135 = vmatmul.mubr.msk.f32.gmra.mrb[6].mxu1 %vm26_vm0, %v8792_v1 }
 0xbaa   :  { %v7834_v8 = vpop.f32.mrb[90].mxu0  ;;  %23137 = vmatprep.mubr.msk.f32.mxu1 %vm28339_vm1, %v28338_v0 }
 0xbab   :  { %v8624_v47 = vmul.f32 %v33074_v50, %v8138_v6  ;;  %v25500_v34 = vadd.f32 %v33297_v60, %v7834_v8  ;;  %v22897_v13 = vpop.f32.mrb[91].mxu0  ;;  %23057 = vmatmul.mubr.msk.f32.gmra.mrb[196].mxu0 %vm26_vm0, %v8766_v11  ;;  %v8770_v6 = vld [vmem:[#allocation2 + $0xad] sm:$0xff] }
 0xbac   :  { %v8793_v15 = vld [vmem:[#allocation2 + $0x165] sm:$0xff]  ;;  %23059 = vmatprep.mubr.msk.f32.mxu0 %vm28339_vm1, %v28338_v0 }
 0xbad   :  { %8705 = vst.msk [vmem:[#allocation2 + $0x178] sm:$0xff] %vm26_vm0, %v8624_v47  ;;  %v8139_v18 = vmax.f32 %v25500_v34, 0.0  ;;  %23138 = vmatmul.mubr.msk.f32.gmra.mrb[8].mxu1 %vm26_vm0, %v8793_v15  ;;  %v8771_v15 = vld [vmem:[#allocation2 + $0xb5] sm:$0xff] }
 0xbae   :  { %v7839_v40 = vpop.f32.mrb[92].mxu0  ;;  %23140 = vmatprep.mubr.msk.f32.mxu1 %vm28339_vm1, %v28338_v0 }
 0xbaf   :  { %v8625_v50 = vmul.f32 %v33076_v51, %v8139_v18  ;;  %v25501_v22 = vadd.f32 %v33297_v60, %v7839_v40  ;;  %v22900_v25 = vpop.f32.mrb[93].mxu0  ;;  %23060 = vmatmul.mubr.msk.f32.gmra.mrb[198].mxu0 %vm26_vm0, %v8767_v20 }
 0xbb0   :  { %v8794_v27 = vld [vmem:[#allocation2 + $0x16d] sm:$0xff]  ;;  %23062 = vmatprep.mubr.msk.f32.mxu0 %vm28339_vm1, %v28338_v0 }
 0xbb1   :  { %8706 = vst.msk [vmem:[#allocation2 + $0x180] sm:$0xff] %vm26_vm0, %v8625_v50  ;;  %v8140_v29 = vmax.f32 %v25501_v22, 0.0  ;;  %23141 = vmatmul.mubr.msk.f32.gmra.mrb[10].mxu1 %vm26_vm0, %v8794_v27  ;;  %v8772_v22 = vld [vmem:[#allocation2 + $0xbd] sm:$0xff] }
 0xbb2   :  { %v7844_v33 = vpop.f32.mrb[94].mxu0  ;;  %23143 = vmatprep.mubr.msk.f32.mxu1 %vm28339_vm1, %v28338_v0 }
 0xbb3   :  { %v8626_v51 = vmul.f32 %v33084_v53, %v8140_v29  ;;  %v25502_v41 = vadd.f32 %v33297_v60, %v7844_v33  ;;  %v22903_v31 = vpop.f32.mrb[95].mxu0  ;;  %23063 = vmatmul.mubr.msk.f32.gmra.mrb[200].mxu0 %vm26_vm0, %v8768_v36 }
 0xbb4   :  { %v8795_v39 = vld [vmem:[#allocation2 + $0x175] sm:$0xff]  ;;  %23065 = vmatprep.mubr.msk.f32.mxu0 %vm28339_vm1, %v28338_v0 }
 0xbb5   :  { %8707 = vst.msk [vmem:[#allocation2 + $0x188] sm:$0xff] %vm26_vm0, %v8626_v51  ;;  %v8141_v43 = vmax.f32 %v25502_v41, 0.0  ;;  %23144 = vmatmul.mubr.msk.f32.gmra.mrb[12].mxu1 %vm26_vm0, %v8795_v39  ;;  %v8773_v41 = vld [vmem:[#allocation2 + $0xc5] sm:$0xff] }
 0xbb6   :  { %v7849_v46 = vpop.f32.mrb[96].mxu0  ;;  %23146 = vmatprep.mubr.msk.f32.mxu1 %vm28339_vm1, %v28338_v0 }
 0xbb7   :  { %v8627_v53 = vmul.f32 %v33095_v56, %v8141_v43  ;;  %v25503_v54 = vadd.f32 %v33297_v60, %v7849_v46  ;;  %v22906_v44 = vpop.f32.mrb[97].mxu0  ;;  %23066 = vmatmul.mubr.msk.f32.gmra.mrb[202].mxu0 %vm26_vm0, %v8769_v49 }
 0xbb8   :  { %v8796_v37 = vld [vmem:[#allocation2 + $0x17d] sm:$0xff]  ;;  %23068 = vmatprep.mubr.msk.f32.mxu0 %vm28339_vm1, %v28338_v0 }
 0xbb9   :  { %8708 = vst.msk [vmem:[#allocation2 + $0x190] sm:$0xff] %vm26_vm0, %v8627_v53  ;;  %v8142_v62 = vmax.f32 %v25503_v54, 0.0  ;;  %23147 = vmatmul.mubr.msk.f32.gmra.mrb[14].mxu1 %vm26_vm0, %v8796_v37  ;;  %v8774_v53 = vld [vmem:[#allocation2 + $0xcd] sm:$0xff] }
 0xbba   :  { %v7854_v1 = vpop.f32.mrb[98].mxu0  ;;  %23149 = vmatprep.mubr.msk.f32.mxu1 %vm28339_vm1, %v28338_v0 }
 0xbbb   :  { %v8628_v56 = vmul.f32 %v33103_v58, %v8142_v62  ;;  %v25504_v8 = vadd.f32 %v33297_v60, %v7854_v1  ;;  %v22909_v11 = vpop.f32.mrb[99].mxu0  ;;  %23069 = vmatmul.mubr.msk.f32.gmra.mrb[204].mxu0 %vm26_vm0, %v8770_v6  ;;  %v33683_v60 = vld [vmem:[%s37468_s4] ss:$0 sm:$0xff]  ;;  %v8775_v6 = vld [vmem:[#allocation2 + $0xd5] sm:$0xff] }
 0xbbc   :  { %v8797_v47 = vld [vmem:[#allocation2 + $0x185] sm:$0xff]  ;;  %23071 = vmatprep.mubr.msk.f32.mxu0 %vm28339_vm1, %v28338_v0 }
 0xbbd   :  { %8709 = vst.msk [vmem:[#allocation2 + $0x198] sm:$0xff] %vm26_vm0, %v8628_v56  ;;  %v8143_v34 = vmax.f32 %v25504_v8, 0.0  ;;  %23150 = vmatmul.mubr.msk.f32.gmra.mrb[16].mxu1 %vm26_vm0, %v8797_v47 }
 0xbbe   :  { %v7859_v13 = vpop.f32.mrb[100].mxu0  ;;  %23152 = vmatprep.mubr.msk.f32.mxu1 %vm28339_vm1, %v28338_v0 }
 0xbbf   :  { %v8629_v58 = vmul.f32 %v33105_v59, %v8143_v34  ;;  %v25505_v18 = vadd.f32 %v33683_v60, %v7859_v13  ;;  %v22912_v40 = vpop.f32.mrb[101].mxu0  ;;  %23072 = vmatmul.mubr.msk.f32.gmra.mrb[206].mxu0 %vm26_vm0, %v8771_v15  ;;  %v8776_v13 = vld [vmem:[#allocation2 + $0xdd] sm:$0xff] }
 0xbc0   :  { %v8798_v20 = vld [vmem:[#allocation2 + $0x18d] sm:$0xff]  ;;  %23074 = vmatprep.mubr.msk.f32.mxu0 %vm28339_vm1, %v28338_v0 }
 0xbc1   :  { %8710 = vst.msk [vmem:[#allocation2 + $0x1a0] sm:$0xff] %vm26_vm0, %v8629_v58  ;;  %v8144_v50 = vmax.f32 %v25505_v18, 0.0  ;;  %23153 = vmatmul.mubr.msk.f32.gmra.mrb[18].mxu1 %vm26_vm0, %v8798_v20 }
 0xbc2   :  { %v7864_v59 = vpop.f32.mrb[102].mxu0  ;;  %23155 = vmatprep.mubr.msk.f32.mxu1 %vm28339_vm1, %v28338_v0 }
 0xbc3   :  { %v8630_v25 = vmul.f32 %v33113_v61, %v8144_v50  ;;  %v25506_v27 = vadd.f32 %v33683_v60, %v7864_v59  ;;  %v22915_v29 = vpop.f32.mrb[103].mxu0  ;;  %23075 = vmatmul.mubr.msk.f32.gmra.mrb[208].mxu0 %vm26_vm0, %v8772_v22  ;;  %v8777_v50 = vld [vmem:[#allocation2 + $0xe5] sm:$0xff] }
 0xbc4   :  { %v8799_v33 = vld [vmem:[#allocation2 + $0x195] sm:$0xff]  ;;  %23077 = vmatprep.mubr.msk.f32.mxu0 %vm28339_vm1, %v28338_v0 }
 0xbc5   :  { %8711 = vst.msk [vmem:[#allocation2 + $0x1a8] sm:$0xff] %vm26_vm0, %v8630_v25  ;;  %v8145_v36 = vmax.f32 %v25506_v27, 0.0  ;;  %23156 = vmatmul.mubr.msk.f32.gmra.mrb[20].mxu1 %vm26_vm0, %v8799_v33  ;;  %v8778_v33 = vld [vmem:[#allocation2 + $0xed] sm:$0xff] }
 0xbc6   :  { %v7869_v51 = vpop.f32.mrb[104].mxu0  ;;  %23158 = vmatprep.mubr.msk.f32.mxu1 %vm28339_vm1, %v28338_v0 }
 0xbc7   :  { %v8631_v61 = vmul.f32 %v33121_v63, %v8145_v36  ;;  %v25507_v31 = vadd.f32 %v33683_v60, %v7869_v51  ;;  %v22918_v39 = vpop.f32.mrb[105].mxu0  ;;  %23078 = vmatmul.mubr.msk.f32.gmra.mrb[210].mxu0 %vm26_vm0, %v8773_v41 }
 0xbc8   :  { %v8800_v43 = vld [vmem:[#allocation2 + $0x19d] sm:$0xff]  ;;  %23080 = vmatprep.mubr.msk.f32.mxu0 %vm28339_vm1, %v28338_v0  ;;  %v8779_v39 = vld [vmem:[#allocation2 + $0xf5] sm:$0xff] }
 0xbc9   :  { %8712 = vst.msk [vmem:[#allocation2 + $0x1b0] sm:$0xff] %vm26_vm0, %v8631_v61  ;;  %v8146_v46 = vmax.f32 %v25507_v31, 0.0  ;;  %23159 = vmatmul.mubr.msk.f32.gmra.mrb[22].mxu1 %vm26_vm0, %v8800_v43 }
 0xbca   :  { %v7874_v49 = vpop.f32.mrb[106].mxu0  ;;  %23161 = vmatprep.mubr.msk.f32.mxu1 %vm28339_vm1, %v28338_v0 }
 0xbcb   :  { %v8632_v63 = vmul.f32 %v33129_v2, %v8146_v46  ;;  %v25508_v54 = vadd.f32 %v33683_v60, %v7874_v49  ;;  %v22921_v44 = vpop.f32.mrb[107].mxu0  ;;  %23081 = vmatmul.mubr.msk.f32.gmra.mrb[212].mxu0 %vm26_vm0, %v8774_v53 }
 0xbcc   :  { %v8801_v37 = vld [vmem:[#allocation2 + $0x1a5] sm:$0xff]  ;;  %23083 = vmatprep.mubr.msk.f32.mxu0 %vm28339_vm1, %v28338_v0 }
 0xbcd   :  { %8713 = vst.msk [vmem:[#allocation2 + $0x1b8] sm:$0xff] %vm26_vm0, %v8632_v63  ;;  %v8147_v62 = vmax.f32 %v25508_v54, 0.0  ;;  %23162 = vmatmul.mubr.msk.f32.gmra.mrb[24].mxu1 %vm26_vm0, %v8801_v37  ;;  %v8780_v54 = vld [vmem:[#allocation2 + $0xfd] sm:$0xff] }
 0xbce   :  { %v7879_v1 = vpop.f32.mrb[108].mxu0  ;;  %23164 = vmatprep.mubr.msk.f32.mxu1 %vm28339_vm1, %v28338_v0 }
 0xbcf   :  { %v8633_v2 = vmul.f32 %v33131_v3, %v8147_v62  ;;  %v25509_v56 = vadd.f32 %v33683_v60, %v7879_v1  ;;  %v22924_v8 = vpop.f32.mrb[109].mxu0  ;;  %23084 = vmatmul.mubr.msk.f32.gmra.mrb[214].mxu0 %vm26_vm0, %v8775_v6 }
 0xbd0   :  { %v8802_v11 = vld [vmem:[#allocation2 + $0x1ad] sm:$0xff]  ;;  %23086 = vmatprep.mubr.msk.f32.mxu0 %vm28339_vm1, %v28338_v0 }
 0xbd1   :  { %8714 = vst.msk [vmem:[#allocation2 + $0x1c0] sm:$0xff] %vm26_vm0, %v8633_v2  ;;  %v8148_v47 = vmax.f32 %v25509_v56, 0.0  ;;  %23165 = vmatmul.mubr.msk.f32.gmra.mrb[26].mxu1 %vm26_vm0, %v8802_v11  ;;  %v8781_v2 = vld [vmem:[#allocation2 + $0x105] sm:$0xff] }
 0xbd2   :  { %v7884_v34 = vpop.f32.mrb[110].mxu0  ;;  %23167 = vmatprep.mubr.msk.f32.mxu1 %vm28339_vm1, %v28338_v0 }
 0xbd3   :  { %v8634_v3 = vmul.f32 %v33139_v5, %v8148_v47  ;;  %v25510_v15 = vadd.f32 %v33683_v60, %v7884_v34  ;;  %v22927_v58 = vpop.f32.mrb[111].mxu0  ;;  %23087 = vmatmul.mubr.msk.f32.gmra.mrb[216].mxu0 %vm26_vm0, %v8776_v13  ;;  %v8782_v13 = vld [vmem:[#allocation2 + $0x10d] sm:$0xff] }
 0xbd4   :  { %v8803_v18 = vld [vmem:[#allocation2 + $0x1b5] sm:$0xff]  ;;  %23089 = vmatprep.mubr.msk.f32.mxu0 %vm28339_vm1, %v28338_v0 }
 0xbd5   :  { %8715 = vst.msk [vmem:[#allocation2 + $0x1c8] sm:$0xff] %vm26_vm0, %v8634_v3  ;;  %v8149_v40 = vmax.f32 %v25510_v15, 0.0  ;;  %23168 = vmatmul.mubr.msk.f32.gmra.mrb[28].mxu1 %vm26_vm0, %v8803_v18 }
 0xbd6   :  { %v7889_v20 = vpop.f32.mrb[112].mxu0  ;;  %23170 = vmatprep.mubr.msk.f32.mxu1 %vm28339_vm1, %v28338_v0 }
 0xbd7   :  { %v8635_v5 = vmul.f32 %v33147_v7, %v8149_v40  ;;  %v25511_v59 = vadd.f32 %v33683_v60, %v7889_v20  ;;  %v22930_v22 = vpop.f32.mrb[113].mxu0  ;;  %23090 = vmatmul.mubr.msk.f32.gmra.mrb[218].mxu0 %vm26_vm0, %v8777_v50  ;;  %v8783_v20 = vld [vmem:[#allocation2 + $0x115] sm:$0xff] }
 0xbd8   :  { %v8804_v25 = vld [vmem:[#allocation2 + $0x1bd] sm:$0xff]  ;;  %23092 = vmatprep.mubr.msk.f32.mxu0 %vm28339_vm1, %v28338_v0 }
 0xbd9   :  { %8716 = vst.msk [vmem:[#allocation2 + $0x1d0] sm:$0xff] %vm26_vm0, %v8635_v5  ;;  %v8150_v27 = vmax.f32 %v25511_v59, 0.0  ;;  %23171 = vmatmul.mubr.msk.f32.gmra.mrb[30].mxu1 %vm26_vm0, %v8804_v25 }
 0xbda   :  { %v7894_v29 = vpop.f32.mrb[114].mxu0  ;;  %23173 = vmatprep.mubr.msk.f32.mxu1 %vm28339_vm1, %v28338_v0 }
 0xbdb   :  { %v8636_v7 = vmul.f32 %v33155_v9, %v8150_v27  ;;  %v25512_v36 = vadd.f32 %v33683_v60, %v7894_v29  ;;  %v22933_v51 = vpop.f32.mrb[115].mxu0  ;;  %23093 = vmatmul.mubr.msk.f32.gmra.mrb[220].mxu0 %vm26_vm0, %v8778_v33  ;;  %v8784_v27 = vld [vmem:[#allocation2 + $0x11d] sm:$0xff] }
 0xbdc   :  { %v8805_v41 = vld [vmem:[#allocation2 + $0x1c5] sm:$0xff]  ;;  %23095 = vmatprep.mubr.msk.f32.mxu0 %vm28339_vm1, %v28338_v0 }
 0xbdd   :  { %8717 = vst.msk [vmem:[#allocation2 + $0x1d8] sm:$0xff] %vm26_vm0, %v8636_v7  ;;  %v8151_v61 = vmax.f32 %v25512_v36, 0.0  ;;  %23174 = vmatmul.mubr.msk.f32.gmra.mrb[32].mxu1 %vm26_vm0, %v8805_v41  ;;  %v8785_v41 = vld [vmem:[#allocation2 + $0x125] sm:$0xff] }
 0xbde   :  { %v7899_v31 = vpop.f32.mrb[116].mxu0  ;;  %23176 = vmatprep.mubr.msk.f32.mxu1 %vm28339_vm1, %v28338_v0 }
 0xbdf   :  { %v8637_v9 = vmul.f32 %v33157_v10, %v8151_v61  ;;  %v25513_v43 = vadd.f32 %v33683_v60, %v7899_v31  ;;  %v22936_v46 = vpop.f32.mrb[117].mxu0  ;;  %23096 = vmatmul.mubr.msk.f32.gmra.mrb[222].mxu0 %vm26_vm0, %v8779_v39 }
 0xbe0   :  { %v8806_v49 = vld [vmem:[#allocation2 + $0x1cd] sm:$0xff]  ;;  %23098 = vmatprep.mubr.msk.f32.mxu0 %vm28339_vm1, %v28338_v0 }
 0xbe1   :  { %8718 = vst.msk [vmem:[#allocation2 + $0x1e0] sm:$0xff] %vm26_vm0, %v8637_v9  ;;  %v8152_v53 = vmax.f32 %v25513_v43, 0.0  ;;  %23177 = vmatmul.mubr.msk.f32.gmra.mrb[34].mxu1 %vm26_vm0, %v8806_v49  ;;  %v8786_v46 = vld [vmem:[#allocation2 + $0x12d] sm:$0xff] }
 0xbe2   :  { %v7904_v63 = vpop.f32.mrb[118].mxu0  ;;  %23179 = vmatprep.mubr.msk.f32.mxu1 %vm28339_vm1, %v28338_v0 }
 0xbe3   :  { %v8638_v10 = vmul.f32 %v33165_v12, %v8152_v53  ;;  %v25514_v44 = vadd.f32 %v33683_v60, %v7904_v63  ;;  %v22939_v37 = vpop.f32.mrb[119].mxu0  ;;  %23099 = vmatmul.mubr.msk.f32.gmra.mrb[224].mxu0 %vm26_vm0, %v8780_v54 }
 0xbe4   :  { %v8807_v62 = vld [vmem:[#allocation2 + $0x1d5] sm:$0xff]  ;;  %23101 = vmatprep.mubr.msk.f32.mxu0 %vm28339_vm1, %v28338_v0 }
 0xbe5   :  { %8719 = vst.msk [vmem:[#allocation2 + $0x1e8] sm:$0xff] %vm26_vm0, %v8638_v10  ;;  %v8153_v1 = vmax.f32 %v25514_v44, 0.0  ;;  %23180 = vmatmul.mubr.msk.f32.gmra.mrb[36].mxu1 %vm26_vm0, %v8807_v62  ;;  %v8787_v44 = vld [vmem:[#allocation2 + $0x135] sm:$0xff] }
 0xbe6   :  { %v7909_v6 = vpop.f32.mrb[120].mxu0  ;;  %23182 = vmatprep.mubr.msk.f32.mxu1 %vm28339_vm1, %v28338_v0 }
 0xbe7   :  { %v8639_v12 = vmul.f32 %v33173_v14, %v8153_v1  ;;  %v25515_v56 = vadd.f32 %v33683_v60, %v7909_v6  ;;  %v22942_v8 = vpop.f32.mrb[121].mxu0  ;;  %23102 = vmatmul.mubr.msk.f32.gmra.mrb[226].mxu0 %vm26_vm0, %v8781_v2 }
 0xbe8   :  { %v8808_v11 = vld [vmem:[#allocation2 + $0x1dd] sm:$0xff]  ;;  %23104 = vmatprep.mubr.msk.f32.mxu0 %vm28339_vm1, %v28338_v0 }
 0xbe9   :  { %8720 = vst.msk [vmem:[#allocation2 + $0x1f0] sm:$0xff] %vm26_vm0, %v8639_v12  ;;  %v8154_v47 = vmax.f32 %v25515_v56, 0.0  ;;  %23183 = vmatmul.mubr.msk.f32.gmra.mrb[38].mxu1 %vm26_vm0, %v8808_v11  ;;  %v8788_v12 = vld [vmem:[#allocation2 + $0x13d] sm:$0xff] }
 0xbea   :  { %v7914_v34 = vpop.f32.mrb[122].mxu0  ;;  %23185 = vmatprep.mubr.msk.f32.mxu1 %vm28339_vm1, %v28338_v0 }
 0xbeb   :  { %v8640_v14 = vmul.f32 %v33181_v16, %v8154_v47  ;;  %v25516_v3 = vadd.f32 %v33683_v60, %v7914_v34  ;;  %v22945_v15 = vpop.f32.mrb[123].mxu0  ;;  %23105 = vmatmul.mubr.msk.f32.gmra.mrb[228].mxu0 %vm26_vm0, %v8782_v13 }
 0xbec   :  { %v8809_v58 = vld [vmem:[#allocation2 + $0x1e5] sm:$0xff]  ;;  %23107 = vmatprep.mubr.msk.f32.mxu0 %vm28339_vm1, %v28338_v0 }
 0xbed   :  { %8721 = vst.msk [vmem:[#allocation2 + $0x1f8] sm:$0xff] %vm26_vm0, %v8640_v14  ;;  %v8155_v18 = vmax.f32 %v25516_v3, 0.0  ;;  %23186 = vmatmul.mubr.msk.f32.gmra.mrb[40].mxu1 %vm26_vm0, %v8809_v58 }
 0xbee   :  { %v7919_v40 = vpop.f32.mrb[124].mxu0  ;;  %23188 = vmatprep.mubr.msk.f32.mxu1 %vm28339_vm1, %v28338_v0 }
 0xbef   :  { %v8641_v16 = vmul.f32 %v33183_v17, %v8155_v18  ;;  %v25517_v50 = vadd.f32 %v33683_v60, %v7919_v40  ;;  %v22948_v5 = vpop.f32.mrb[125].mxu0  ;;  %23108 = vmatmul.mubr.msk.f32.gmra.mrb[230].mxu0 %vm26_vm0, %v8783_v20 }
 0xbf0   :  { %v8810_v59 = vld [vmem:[#allocation2 + $0x1ed] sm:$0xff]  ;;  %23110 = vmatprep.mubr.msk.f32.mxu0 %vm28339_vm1, %v28338_v0 }
 0xbf1   :  { %8722 = vst.msk [vmem:[#allocation2 + $0x200] sm:$0xff] %vm26_vm0, %v8641_v16  ;;  %v8156_v22 = vmax.f32 %v25517_v50, 0.0  ;;  %23189 = vmatmul.mubr.msk.f32.gmra.mrb[42].mxu1 %vm26_vm0, %v8810_v59 }
 0xbf2   :  { %v7924_v25 = vpop.f32.mrb[126].mxu0  ;;  %23191 = vmatprep.mubr.msk.f32.mxu1 %vm28339_vm1, %v28338_v0 }
 0xbf3   :  { %v8642_v17 = vmul.f32 %v33191_v19, %v8156_v22  ;;  %v25518_v29 = vadd.f32 %v33683_v60, %v7924_v25  ;;  %v22951_v33 = vpop.f32.mrb[127].mxu0  ;;  %23111 = vmatmul.mubr.msk.f32.gmra.mrb[232].mxu0 %vm26_vm0, %v8784_v27 }
 0xbf4   :  { %v8811_v7 = vld [vmem:[#allocation2 + $0x1f5] sm:$0xff]  ;;  %23113 = vmatprep.mubr.msk.f32.mxu0 %vm28339_vm1, %v28338_v0 }
 0xbf5   :  { %8723 = vst.msk [vmem:[#allocation2 + $0x208] sm:$0xff] %vm26_vm0, %v8642_v17  ;;  %v8157_v36 = vmax.f32 %v25518_v29, 0.0  ;;  %23192 = vmatmul.mubr.msk.f32.gmra.mrb[44].mxu1 %vm26_vm0, %v8811_v7 }
 0xbf6   :  { %v7929_v51 = vpop.f32.mrb[128].mxu0  ;;  %23194 = vmatprep.mubr.msk.f32.mxu1 %vm28339_vm1, %v28338_v0 }
 0xbf7   :  { %v8643_v19 = vmul.f32 %v33199_v21, %v8157_v36  ;;  %v25519_v61 = vadd.f32 %v33683_v60, %v7929_v51  ;;  %v22954_v31 = vpop.f32.mrb[129].mxu0  ;;  %23114 = vmatmul.mubr.msk.f32.gmra.mrb[234].mxu0 %vm26_vm0, %v8785_v41 }
 0xbf8   :  { %v8812_v39 = vld [vmem:[#allocation2 + $0x1fd] sm:$0xff]  ;;  %23116 = vmatprep.mubr.msk.f32.mxu0 %vm28339_vm1, %v28338_v0 }
 0xbf9   :  { %8724 = vst.msk [vmem:[#allocation2 + $0x210] sm:$0xff] %vm26_vm0, %v8643_v19  ;;  %v8158_v9 = vmax.f32 %v25519_v61, 0.0  ;;  %23195 = vmatmul.mubr.msk.f32.gmra.mrb[46].mxu1 %vm26_vm0, %v8812_v39 }
 0xbfa   :  { %v7934_v43 = vpop.f32.mrb[130].mxu0  ;;  %23197 = vmatprep.mubr.msk.f32.mxu1 %vm28339_vm1, %v28338_v0 }
 0xbfb   :  { %v8644_v21 = vmul.f32 %v33207_v23, %v8158_v9  ;;  %v25520_v49 = vadd.f32 %v33683_v60, %v7934_v43  ;;  %v22957_v53 = vpop.f32.mrb[131].mxu0  ;;  %23117 = vmatmul.mubr.msk.f32.gmra.mrb[236].mxu0 %vm26_vm0, %v8786_v46 }
 0xbfc   :  { %v8813_v63 = vld [vmem:[#allocation2 + $0x205] sm:$0xff]  ;;  %23119 = vmatprep.mubr.msk.f32.mxu0 %vm28339_vm1, %v28338_v0 }
 0xbfd   :  { %8725 = vst.msk [vmem:[#allocation2 + $0x218] sm:$0xff] %vm26_vm0, %v8644_v21  ;;  %v8159_v54 = vmax.f32 %v25520_v49, 0.0  ;;  %23198 = vmatmul.mubr.msk.f32.gmra.mrb[48].mxu1 %vm26_vm0, %v8813_v63 }
 0xbfe   :  { %v7939_v10 = vpop.f32.mrb[132].mxu0  ;;  %23200 = vmatprep.mubr.msk.f32.mxu1 %vm28339_vm1, %v28338_v0 }
 0xbff   :  { %v8645_v23 = vmul.f32 %v33209_v24, %v8159_v54  ;;  %v25521_v37 = vadd.f32 %v33683_v60, %v7939_v10  ;;  %v22960_v62 = vpop.f32.mrb[133].mxu0  ;;  %23120 = vmatmul.mubr.msk.f32.gmra.mrb[238].mxu0 %vm26_vm0, %v8787_v44 }
 0xc00   :  { %v8814_v1 = vld [vmem:[#allocation2 + $0x20d] sm:$0xff]  ;;  %23122 = vmatprep.mubr.msk.f32.mxu0 %vm28339_vm1, %v28338_v0 }
 0xc01   :  { %8726 = vst.msk [vmem:[#allocation2 + $0x220] sm:$0xff] %vm26_vm0, %v8645_v23  ;;  %v8160_v6 = vmax.f32 %v25521_v37, 0.0  ;;  %23201 = vmatmul.mubr.msk.f32.gmra.mrb[50].mxu1 %vm26_vm0, %v8814_v1 }
 0xc02   :  { %v7944_v2 = vpop.f32.mrb[134].mxu0  ;;  %23203 = vmatprep.mubr.msk.f32.mxu1 %vm28339_vm1, %v28338_v0 }
 0xc03   :  { %v8646_v24 = vmul.f32 %v33217_v26, %v8160_v6  ;;  %v25522_v56 = vadd.f32 %v33683_v60, %v7944_v2  ;;  %v22963_v8 = vpop.f32.mrb[135].mxu0  ;;  %23123 = vmatmul.mubr.msk.f32.gmra.mrb[240].mxu0 %vm26_vm0, %v8788_v12 }
 0xc04   :  { %v8815_v11 = vld [vmem:[#allocation2 + $0x215] sm:$0xff] }
 0xc05   :  { %8727 = vst.msk [vmem:[#allocation2 + $0x228] sm:$0xff] %vm26_vm0, %v8646_v24  ;;  %v8161_v47 = vmax.f32 %v25522_v56, 0.0  ;;  %23204 = vmatmul.mubr.msk.f32.gmra.mrb[52].mxu1 %vm26_vm0, %v8815_v11 }
 0xc06   :  { %v7949_v34 = vpop.f32.mrb[136].mxu0  ;;  %23206 = vmatprep.mubr.msk.f32.mxu1 %vm28339_vm1, %v28338_v0 }
 0xc07   :  { %v8647_v13 = vmul.f32 %v33225_v28, %v8161_v47  ;;  %v25523_v14 = vadd.f32 %v33683_v60, %v7949_v34  ;;  %v22966_v26 = vpop.f32.mrb[137].mxu0 }
 0xc08   :  { %v8816_v3 = vld [vmem:[#allocation2 + $0x21d] sm:$0xff] }
 0xc09   :  { %8728 = vst.msk [vmem:[#allocation2 + $0x230] sm:$0xff] %vm26_vm0, %v8647_v13  ;;  %v8162_v15 = vmax.f32 %v25523_v14, 0.0  ;;  %23207 = vmatmul.mubr.msk.f32.gmra.mrb[54].mxu1 %vm26_vm0, %v8816_v3 }
 0xc0a   :  { %v7954_v58 = vpop.f32.mrb[138].mxu0  ;;  %23209 = vmatprep.mubr.msk.f32.mxu1 %vm28339_vm1, %v28338_v0 }
 0xc0b   :  { %v8648_v18 = vmul.f32 %v33233_v30, %v8162_v15  ;;  %v25524_v40 = vadd.f32 %v33683_v60, %v7954_v58  ;;  %v22969_v20 = vpop.f32.mrb[139].mxu0 }
 0xc0c   :  { %v8817_v16 = vld [vmem:[#allocation2 + $0x225] sm:$0xff] }
 0xc0d   :  { %8729 = vst.msk [vmem:[#allocation2 + $0x238] sm:$0xff] %vm26_vm0, %v8648_v18  ;;  %v8163_v28 = vmax.f32 %v25524_v40, 0.0  ;;  %23210 = vmatmul.mubr.msk.f32.gmra.mrb[56].mxu1 %vm26_vm0, %v8817_v16 }
 0xc0e   :  { %v7959_v50 = vpop.f32.mrb[140].mxu0  ;;  %23212 = vmatprep.mubr.msk.f32.mxu1 %vm28339_vm1, %v28338_v0 }
 0xc0f   :  { %v8649_v5 = vmul.f32 %v33235_v32, %v8163_v28  ;;  %v25525_v59 = vadd.f32 %v33683_v60, %v7959_v50  ;;  %v22972_v22 = vpop.f32.mrb[141].mxu0  ;;  %v8573_v28 = vpop.permute.xlu1 %8572 }
 0xc10   :  { %v8818_v25 = vld [vmem:[#allocation2 + $0x22d] sm:$0xff] }
 0xc11   :  { %8730 = vst.msk [vmem:[#allocation2 + $0x240] sm:$0xff] %vm26_vm0, %v8649_v5  ;;  %v8164_v30 = vmax.f32 %v25525_v59, 0.0  ;;  %23213 = vmatmul.mubr.msk.f32.gmra.mrb[58].mxu1 %vm26_vm0, %v8818_v25 }
 0xc12   :  { %v7964_v27 = vpop.f32.mrb[142].mxu0  ;;  %23215 = vmatprep.mubr.msk.f32.mxu1 %vm28339_vm1, %v28338_v0 }
 0xc13   :  { %v8650_v17 = vmul.f32 %v33243_v35, %v8164_v30  ;;  %v25526_v29 = vadd.f32 %v33683_v60, %v7964_v27  ;;  %v22975_v33 = vpop.f32.mrb[143].mxu0  ;;  %v8578_v30 = vpop.permute.xlu0 %8577 }
 0xc14   :  { %v8819_v7 = vld [vmem:[#allocation2 + $0x235] sm:$0xff] }
 0xc15   :  { %8731 = vst.msk [vmem:[#allocation2 + $0x248] sm:$0xff] %vm26_vm0, %v8650_v17  ;;  %v8165_v32 = vmax.f32 %v25526_v29, 0.0  ;;  %23216 = vmatmul.mubr.msk.f32.gmra.mrb[60].mxu1 %vm26_vm0, %v8819_v7  ;;  %v9625_v7 = vld [vmem:[#allocation2 + $0x6] sm:$0xff] }
 0xc16   :  { %v7969_v36 = vpop.f32.mrb[144].mxu0  ;;  %23218 = vmatprep.mubr.msk.f32.mxu1 %vm28339_vm1, %v28338_v0 }
 0xc17   :  { %v8651_v51 = vmul.f32 %v33251_v38, %v8165_v32  ;;  %v25527_v41 = vadd.f32 %v33683_v60, %v7969_v36  ;;  %v22978_v19 = vpop.f32.mrb[145].mxu0  ;;  %v18585_v36 = vld [vmem:[%s37467_s3 + $0x10] sm:$0xff] }
 0xc18   :  { %v8820_v61 = vld [vmem:[#allocation2 + $0x23d] sm:$0xff] }
 0xc19   :  { %8732 = vst.msk [vmem:[#allocation2 + $0x250] sm:$0xff] %vm26_vm0, %v8651_v51  ;;  %v8166_v35 = vmax.f32 %v25527_v41, 0.0  ;;  %23219 = vmatmul.mubr.msk.f32.gmra.mrb[62].mxu1 %vm26_vm0, %v8820_v61  ;;  %v9626_v41 = vld [vmem:[#allocation2 + $0xe] sm:$0xff] }
 0xc1a   :  { %v7974_v31 = vpop.f32.mrb[146].mxu0  ;;  %23221 = vmatprep.mubr.msk.f32.mxu1 %vm28339_vm1, %v28338_v0 }
 0xc1b   :  { %v8652_v39 = vmul.f32 %v33259_v42, %v8166_v35  ;;  %v25528_v9 = vadd.f32 %v33683_v60, %v7974_v31  ;;  %v22981_v43 = vpop.f32.mrb[147].mxu0  ;;  %v9627_v31 = vld [vmem:[#allocation2 + $0x16] sm:$0xff] }
 0xc1c   :  { %v8821_v46 = vld [vmem:[#allocation2 + $0x245] sm:$0xff] }
 0xc1d   :  { %8733 = vst.msk [vmem:[#allocation2 + $0x258] sm:$0xff] %vm26_vm0, %v8652_v39  ;;  %v8167_v38 = vmax.f32 %v25528_v9, 0.0  ;;  %23222 = vmatmul.mubr.msk.f32.gmra.mrb[64].mxu1 %vm26_vm0, %v8821_v46  ;;  %v9628_v43 = vld [vmem:[#allocation2 + $0x1e] sm:$0xff] }
 0xc1e   :  { %v7979_v21 = vpop.f32.mrb[148].mxu0  ;;  %23224 = vmatprep.mubr.msk.f32.mxu1 %vm28339_vm1, %v28338_v0 }
 0xc1f   :  { %v8653_v49 = vmul.f32 %v33264_v45, %v8167_v38  ;;  %v25529_v53 = vadd.f32 %v33683_v60, %v7979_v21  ;;  %v22984_v63 = vpop.f32.mrb[149].mxu0  ;;  %v9629_v21 = vld [vmem:[#allocation2 + $0x26] sm:$0xff] }
 0xc20   :  { %v8822_v54 = vld [vmem:[#allocation2 + $0x24d] sm:$0xff] }
 0xc21   :  { %8734 = vst.msk [vmem:[#allocation2 + $0x260] sm:$0xff] %vm26_vm0, %v8653_v49  ;;  %v8168_v42 = vmax.f32 %v25529_v53, 0.0  ;;  %23225 = vmatmul.mubr.msk.f32.gmra.mrb[66].mxu1 %vm26_vm0, %v8822_v54  ;;  %v9630_v63 = vld [vmem:[#allocation2 + $0x2e] sm:$0xff] }
 0xc22   :  { %v7984_v10 = vpop.f32.mrb[150].mxu0  ;;  %23227 = vmatprep.mubr.msk.f32.mxu1 %vm28339_vm1, %v28338_v0 }
 0xc23   :  { %v8654_v44 = vmul.f32 %v33273_v48, %v8168_v42  ;;  %v25530_v23 = vadd.f32 %v33683_v60, %v7984_v10  ;;  %v22987_v37 = vpop.f32.mrb[151].mxu0  ;;  %v9631_v10 = vld [vmem:[#allocation2 + $0x36] sm:$0xff] }
 0xc24   :  { %v8823_v62 = vld [vmem:[#allocation2 + $0x255] sm:$0xff]  ;;  %v9632_v37 = vld [vmem:[#allocation2 + $0x3e] sm:$0xff] }
 0xc25   :  { %8735 = vst.msk [vmem:[#allocation2 + $0x268] sm:$0xff] %vm26_vm0, %v8654_v44  ;;  %v8169_v45 = vmax.f32 %v25530_v23, 0.0  ;;  %23228 = vmatmul.mubr.msk.f32.gmra.mrb[68].mxu1 %vm26_vm0, %v8823_v62 }
 0xc26   :  { %v7989_v1 = vpop.f32.mrb[152].mxu0  ;;  %23230 = vmatprep.mubr.msk.f32.mxu1 %vm28339_vm1, %v28338_v0 }
 0xc27   :  { %v8655_v6 = vmul.f32 %v33281_v52, %v8169_v45  ;;  %v25531_v2 = vadd.f32 %v33683_v60, %v7989_v1  ;;  %v22990_v12 = vpop.f32.mrb[153].mxu0  ;;  %v9633_v1 = vld [vmem:[#allocation2 + $0x46] sm:$0xff] }
 0xc28   :  { %v8824_v24 = vld [vmem:[#allocation2 + $0x25d] sm:$0xff]  ;;  %v9634_v12 = vld [vmem:[#allocation2 + $0x4e] sm:$0xff] }
 0xc29   :  { %8736 = vst.msk [vmem:[#allocation2 + $0x270] sm:$0xff] %vm26_vm0, %v8655_v6  ;;  %v8170_v48 = vmax.f32 %v25531_v2, 0.0  ;;  %23231 = vmatmul.mubr.msk.f32.gmra.mrb[70].mxu1 %vm26_vm0, %v8824_v24 }
 0xc2a   :  { %v7994_v56 = vpop.f32.mrb[154].mxu0  ;;  %23233 = vmatprep.mubr.msk.f32.mxu1 %vm28339_vm1, %v28338_v0 }
 0xc2b   :  { %v8656_v8 = vmul.f32 %v33289_v55, %v8170_v48  ;;  %v25532_v11 = vadd.f32 %v33683_v60, %v7994_v56  ;;  %v22993_v47 = vpop.f32.mrb[155].mxu0  ;;  %v9635_v56 = vld [vmem:[#allocation2 + $0x56] sm:$0xff] }
 0xc2c   :  { %v8825_v34 = vld [vmem:[#allocation2 + $0x265] sm:$0xff] }
 0xc2d   :  { %8737 = vst.msk [vmem:[#allocation2 + $0x278] sm:$0xff] %vm26_vm0, %v8656_v8  ;;  %v8171_v52 = vmax.f32 %v25532_v11, 0.0  ;;  %23234 = vmatmul.mubr.msk.f32.gmra.mrb[72].mxu1 %vm26_vm0, %v8825_v34  ;;  %v9636_v47 = vld [vmem:[#allocation2 + $0x5e] sm:$0xff] }
 0xc2e   :  { %v7999_v13 = vpop.f32.mrb[156].mxu0  ;;  %23236 = vmatprep.mubr.msk.f32.mxu1 %vm28339_vm1, %v28338_v0 }
 0xc2f   :  { %v8657_v14 = vmul.f32 %v33291_v57, %v8171_v52  ;;  %v25533_v26 = vadd.f32 %v33683_v60, %v7999_v13  ;;  %v22996_v3 = vpop.f32.mrb[157].mxu0  ;;  %v9637_v13 = vld [vmem:[#allocation2 + $0x66] sm:$0xff] }
 0xc30   :  { %v8826_v15 = vld [vmem:[#allocation2 + $0x26d] sm:$0xff] }
 0xc31   :  { %8738 = vst.msk [vmem:[#allocation2 + $0x280] sm:$0xff] %vm26_vm0, %v8657_v14  ;;  %v8172_v55 = vmax.f32 %v25533_v26, 0.0  ;;  %23237 = vmatmul.mubr.msk.f32.gmra.mrb[74].mxu1 %vm26_vm0, %v8826_v15  ;;  %v9638_v3 = vld [vmem:[#allocation2 + $0x6e] sm:$0xff] }
 0xc32   :  { %v8004_v58 = vpop.f32.mrb[158].mxu0  ;;  %23239 = vmatprep.mubr.msk.f32.mxu1 %vm28339_vm1, %v28338_v0 }
 0xc33   :  { %v8658_v18 = vmul.f32 %v33304_v4, %v8172_v55  ;;  %v25534_v40 = vadd.f32 %v33683_v60, %v8004_v58  ;;  %v22999_v20 = vpop.f32.mrb[159].mxu0  ;;  %v9639_v58 = vld [vmem:[#allocation2 + $0x76] sm:$0xff] }
 0xc34   :  { %v8827_v16 = vld [vmem:[#allocation2 + $0x275] sm:$0xff]  ;;  %v9640_v20 = vld [vmem:[#allocation2 + $0x7e] sm:$0xff] }
 0xc35   :  { %8739 = vst.msk [vmem:[#allocation2 + $0x288] sm:$0xff] %vm26_vm0, %v8658_v18  ;;  %v8173_v57 = vmax.f32 %v25534_v40, 0.0  ;;  %23240 = vmatmul.mubr.msk.f32.gmra.mrb[76].mxu1 %vm26_vm0, %v8827_v16 }
 0xc36   :  { %v8009_v50 = vpop.f32.mrb[160].mxu0  ;;  %23242 = vmatprep.mubr.msk.f32.mxu1 %vm28339_vm1, %v28338_v0 }
 0xc37   :  { %v8659_v5 = vmul.f32 %v8573_v28, %v8173_v57  ;;  %v25535_v59 = vadd.f32 %v33683_v60, %v8009_v50  ;;  %v23002_v22 = vpop.f32.mrb[161].mxu0  ;;  %v9641_v28 = vld [vmem:[#allocation2 + $0x86] sm:$0xff] }
 0xc38   :  { %v8828_v25 = vld [vmem:[#allocation2 + $0x27d] sm:$0xff] }
 0xc39   :  { %8740 = vst.msk [vmem:[#allocation2 + $0x290] sm:$0xff] %vm26_vm0, %v8659_v5  ;;  %v8174_v4 = vmax.f32 %v25535_v59, 0.0  ;;  %23243 = vmatmul.mubr.msk.f32.gmra.mrb[78].mxu1 %vm26_vm0, %v8828_v25  ;;  %v9642_v59 = vld [vmem:[#allocation2 + $0x8e] sm:$0xff] }
 0xc3a   :  { %23245 = vmatprep.mubr.msk.f32.mxu1 %vm28339_vm1, %v28338_v0  ;;  %v33921_v27 = vpop.f32.mrb[162].mxu0 }
 0xc3b   :  { %37608 = vst [vmem:[#allocation3_spill] sm:$0xff] %v33921_v27  ;;  %v8660_v17 = vmul.f32 %v8578_v30, %v8174_v4  ;;  %v23007_v29 = vpop.f32.mrb[163].mxu0  ;;  %v9643_v4 = vld [vmem:[#allocation2 + $0x96] sm:$0xff]  ;;  %v34634_v27 = vld [vmem:[#allocation2 + $0x207] sm:$0xff] }
 0xc3c   :  { %v8829_v33 = vld [vmem:[#allocation2 + $0x285] sm:$0xff]  ;;  %37650 = vst [vmem:[#allocation45_spill] sm:$0xff] %v34634_v27 }
 0xc3d   :  { %8741 = vst.msk [vmem:[#allocation2 + $0x298] sm:$0xff] %vm26_vm0, %v8660_v17  ;;  %23246 = vmatmul.mubr.msk.f32.gmra.mrb[80].mxu1 %vm26_vm0, %v8829_v33  ;;  %v9644_v29 = vld [vmem:[#allocation2 + $0x9e] sm:$0xff] }
 0xc3e   :  { %v33925_v60 = vpop.f32.mrb[164].mxu0  ;;  %23250 = vmatprep.mubr.msk.f32.mxu1 %vm28339_vm1, %v28338_v0 }
 0xc3f   :  { %37609 = vst [vmem:[#allocation4_spill] sm:$0xff] %v33925_v60  ;;  %v23010_v32 = vpop.f32.mrb[165].mxu0  ;;  %v34628_v60 = vld [vmem:[#allocation2 + $0x1ff] sm:$0xff] }
 0xc40   :  { %v9645_v32 = vld [vmem:[#allocation2 + $0xa6] sm:$0xff]  ;;  %37649 = vst [vmem:[#allocation44_spill] sm:$0xff] %v34628_v60 }
 0xc41   :  { %23251 = vmatmul.mubr.msk.f32.vlgmr.msra.gmra.mrb[82].mxu1 %vm26_vm0, %v9625_v7 }
 0xc42   :  { %v33933_v51 = vpop.f32.mrb[166].mxu0  ;;  %23494 = vmatpush3.msra.mxu1 %v18585_v36  ;;  %23253 = vmatprep.mubr.msk.f32.mxu1 %vm28339_vm1, %v28338_v0 }
 0xc43   :  { %37610 = vst [vmem:[#allocation5_spill] sm:$0xff] %v33933_v51  ;;  %v23013_v19 = vpop.f32.mrb[167].mxu0  ;;  %23738 = vmatprep.subr.mxu1 %v28338_v0  ;;  %v34622_v51 = vld [vmem:[#allocation2 + $0x1f7] sm:$0xff] }
 0xc44   :  { %v9646_v19 = vld [vmem:[#allocation2 + $0xae] sm:$0xff]  ;;  %37648 = vst [vmem:[#allocation43_spill] sm:$0xff] %v34622_v51 }
 0xc45   :  { %23254 = vmatmul.mubr.msk.f32.gmra.mrb[84].mxu1 %vm26_vm0, %v9626_v41 }
 0xc46   :  { %v33939_v61 = vpop.f32.mrb[168].mxu0  ;;  %23256 = vmatprep.mubr.msk.f32.mxu1 %vm28339_vm1, %v28338_v0 }
 0xc47   :  { %37611 = vst [vmem:[#allocation6_spill] sm:$0xff] %v33939_v61  ;;  %v23016_v35 = vpop.f32.mrb[169].mxu0  ;;  %v34616_v61 = vld [vmem:[#allocation2 + $0x1ef] sm:$0xff] }
 0xc49   :  { %23257 = vmatmul.mubr.msk.f32.gmra.mrb[86].mxu1 %vm26_vm0, %v9627_v31 }
 0xc4a   :  { %v33944_v39 = vpop.f32.mrb[170].mxu0  ;;  %23259 = vmatprep.mubr.msk.f32.mxu1 %vm28339_vm1, %v28338_v0 }
 0xc4b   :  { %37612 = vst [vmem:[#allocation7_spill] sm:$0xff] %v33944_v39  ;;  %v23019_v9 = vpop.f32.mrb[171].mxu0  ;;  %v34610_v39 = vld [vmem:[#allocation2 + $0x1e7] sm:$0xff] }
 0xc4c   :  { %v9647_v9 = vld [vmem:[#allocation2 + $0xb6] sm:$0xff] }
 0xc4d   :  { %23260 = vmatmul.mubr.msk.f32.gmra.mrb[88].mxu1 %vm26_vm0, %v9628_v43 }
 0xc4e   :  { %v33949_v46 = vpop.f32.mrb[172].mxu0  ;;  %23262 = vmatprep.mubr.msk.f32.mxu1 %vm28339_vm1, %v28338_v0 }
 0xc4f   :  { %37613 = vst [vmem:[#allocation8_spill] sm:$0xff] %v33949_v46  ;;  %v23022_v38 = vpop.f32.mrb[173].mxu0  ;;  %v34604_v46 = vld [vmem:[#allocation2 + $0x1df] sm:$0xff] }
 0xc51   :  { %23263 = vmatmul.mubr.msk.f32.gmra.mrb[90].mxu1 %vm26_vm0, %v9629_v21  ;;  %v9648_v21 = vld [vmem:[#allocation2 + $0xbe] sm:$0xff] }
 0xc52   :  { %v33954_v49 = vpop.f32.mrb[174].mxu0  ;;  %23265 = vmatprep.mubr.msk.f32.mxu1 %vm28339_vm1, %v28338_v0 }
 0xc53   :  { %37614 = vst [vmem:[#allocation9_spill] sm:$0xff] %v33954_v49  ;;  %v23025_v53 = vpop.f32.mrb[175].mxu0  ;;  %v34598_v49 = vld [vmem:[#allocation2 + $0x1d7] sm:$0xff] }
 0xc55   :  { %23266 = vmatmul.mubr.msk.f32.gmra.mrb[92].mxu1 %vm26_vm0, %v9630_v63 }
 0xc56   :  { %v33959_v54 = vpop.f32.mrb[176].mxu0  ;;  %23268 = vmatprep.mubr.msk.f32.mxu1 %vm28339_vm1, %v28338_v0 }
 0xc57   :  { %37615 = vst [vmem:[#allocation10_spill] sm:$0xff] %v33959_v54  ;;  %v23028_v42 = vpop.f32.mrb[177].mxu0  ;;  %v34592_v54 = vld [vmem:[#allocation2 + $0x1cf] sm:$0xff] }
 0xc58   :  { %v9649_v42 = vld [vmem:[#allocation2 + $0xc6] sm:$0xff] }
 0xc59   :  { %23269 = vmatmul.mubr.msk.f32.gmra.mrb[94].mxu1 %vm26_vm0, %v9631_v10 }
 0xc5a   :  { %v33964_v44 = vpop.f32.mrb[178].mxu0  ;;  %23271 = vmatprep.mubr.msk.f32.mxu1 %vm28339_vm1, %v28338_v0 }
 0xc5b   :  { %37616 = vst [vmem:[#allocation11_spill] sm:$0xff] %v33964_v44  ;;  %v23031_v23 = vpop.f32.mrb[179].mxu0  ;;  %v34586_v44 = vld [vmem:[#allocation2 + $0x1c7] sm:$0xff] }
 0xc5d   :  { %23272 = vmatmul.mubr.msk.f32.gmra.mrb[96].mxu1 %vm26_vm0, %v9632_v37  ;;  %v9650_v37 = vld [vmem:[#allocation2 + $0xce] sm:$0xff] }
 0xc5e   :  { %v33969_v62 = vpop.f32.mrb[180].mxu0  ;;  %23274 = vmatprep.mubr.msk.f32.mxu1 %vm28339_vm1, %v28338_v0 }
 0xc5f   :  { %37617 = vst [vmem:[#allocation12_spill] sm:$0xff] %v33969_v62  ;;  %v23034_v45 = vpop.f32.mrb[181].mxu0  ;;  %v34580_v62 = vld [vmem:[#allocation2 + $0x1bf] sm:$0xff] }
 0xc61   :  { %23275 = vmatmul.mubr.msk.f32.gmra.mrb[98].mxu1 %vm26_vm0, %v9633_v1 }
 0xc62   :  { %v33974_v6 = vpop.f32.mrb[182].mxu0  ;;  %23277 = vmatprep.mubr.msk.f32.mxu1 %vm28339_vm1, %v28338_v0 }
 0xc63   :  { %37618 = vst [vmem:[#allocation13_spill] sm:$0xff] %v33974_v6  ;;  %v23037_v2 = vpop.f32.mrb[183].mxu0  ;;  %v34574_v6 = vld [vmem:[#allocation2 + $0x1b7] sm:$0xff] }
 0xc64   :  { %v9651_v2 = vld [vmem:[#allocation2 + $0xd6] sm:$0xff] }
 0xc65   :  { %23278 = vmatmul.mubr.msk.f32.gmra.mrb[100].mxu1 %vm26_vm0, %v9634_v12 }
 0xc66   :  { %v33979_v24 = vpop.f32.mrb[184].mxu0  ;;  %23280 = vmatprep.mubr.msk.f32.mxu1 %vm28339_vm1, %v28338_v0 }
 0xc67   :  { %37619 = vst [vmem:[#allocation14_spill] sm:$0xff] %v33979_v24  ;;  %v23040_v48 = vpop.f32.mrb[185].mxu0  ;;  %v34568_v24 = vld [vmem:[#allocation2 + $0x1af] sm:$0xff] }
 0xc69   :  { %23281 = vmatmul.mubr.msk.f32.gmra.mrb[102].mxu1 %vm26_vm0, %v9635_v56  ;;  %v9652_v56 = vld [vmem:[#allocation2 + $0xde] sm:$0xff] }
 0xc6a   :  { %v33984_v8 = vpop.f32.mrb[186].mxu0  ;;  %23283 = vmatprep.mubr.msk.f32.mxu1 %vm28339_vm1, %v28338_v0 }
 0xc6b   :  { %37620 = vst [vmem:[#allocation15_spill] sm:$0xff] %v33984_v8  ;;  %v23043_v11 = vpop.f32.mrb[187].mxu0  ;;  %v34562_v8 = vld [vmem:[#allocation2 + $0x1a7] sm:$0xff] }
 0xc6d   :  { %23284 = vmatmul.mubr.msk.f32.gmra.mrb[104].mxu1 %vm26_vm0, %v9636_v47 }
 0xc6e   :  { %v33989_v34 = vpop.f32.mrb[188].mxu0  ;;  %23286 = vmatprep.mubr.msk.f32.mxu1 %vm28339_vm1, %v28338_v0 }
 0xc6f   :  { %37621 = vst [vmem:[#allocation16_spill] sm:$0xff] %v33989_v34  ;;  %v23046_v52 = vpop.f32.mrb[189].mxu0  ;;  %v34556_v34 = vld [vmem:[#allocation2 + $0x19f] sm:$0xff] }
 0xc70   :  { %v9653_v52 = vld [vmem:[#allocation2 + $0xe6] sm:$0xff] }
 0xc71   :  { %23287 = vmatmul.mubr.msk.f32.gmra.mrb[106].mxu1 %vm26_vm0, %v9637_v13 }
 0xc72   :  { %v33994_v14 = vpop.f32.mrb[190].mxu0  ;;  %23289 = vmatprep.mubr.msk.f32.mxu1 %vm28339_vm1, %v28338_v0 }
 0xc73   :  { %37622 = vst [vmem:[#allocation17_spill] sm:$0xff] %v33994_v14  ;;  %v23049_v26 = vpop.f32.mrb[191].mxu0  ;;  %v34550_v14 = vld [vmem:[#allocation2 + $0x197] sm:$0xff] }
 0xc75   :  { %23290 = vmatmul.mubr.msk.f32.gmra.mrb[108].mxu1 %vm26_vm0, %v9638_v3  ;;  %v9654_v3 = vld [vmem:[#allocation2 + $0xee] sm:$0xff] }
 0xc76   :  { %v33999_v15 = vpop.f32.mrb[192].mxu0  ;;  %23292 = vmatprep.mubr.msk.f32.mxu1 %vm28339_vm1, %v28338_v0 }
 0xc77   :  { %37623 = vst [vmem:[#allocation18_spill] sm:$0xff] %v33999_v15  ;;  %v23052_v55 = vpop.f32.mrb[193].mxu0  ;;  %v34544_v15 = vld [vmem:[#allocation2 + $0x18f] sm:$0xff] }
 0xc79   :  { %23293 = vmatmul.mubr.msk.f32.gmra.mrb[110].mxu1 %vm26_vm0, %v9639_v58 }
 0xc7a   :  { %v34004_v18 = vpop.f32.mrb[194].mxu0  ;;  %23295 = vmatprep.mubr.msk.f32.mxu1 %vm28339_vm1, %v28338_v0 }
 0xc7b   :  { %37624 = vst [vmem:[#allocation19_spill] sm:$0xff] %v34004_v18  ;;  %v23055_v40 = vpop.f32.mrb[195].mxu0  ;;  %v34538_v18 = vld [vmem:[#allocation2 + $0x187] sm:$0xff] }
 0xc7c   :  { %v9655_v40 = vld [vmem:[#allocation2 + $0xf6] sm:$0xff] }
 0xc7d   :  { %23296 = vmatmul.mubr.msk.f32.gmra.mrb[112].mxu1 %vm26_vm0, %v9640_v20 }
 0xc7e   :  { %v34009_v16 = vpop.f32.mrb[196].mxu0  ;;  %23298 = vmatprep.mubr.msk.f32.mxu1 %vm28339_vm1, %v28338_v0 }
 0xc7f   :  { %37625 = vst [vmem:[#allocation20_spill] sm:$0xff] %v34009_v16  ;;  %v23058_v57 = vpop.f32.mrb[197].mxu0  ;;  %v34532_v16 = vld [vmem:[#allocation2 + $0x17f] sm:$0xff] }
 0xc81   :  { %23299 = vmatmul.mubr.msk.f32.gmra.mrb[114].mxu1 %vm26_vm0, %v9641_v28  ;;  %v9656_v28 = vld [vmem:[#allocation2 + $0xfe] sm:$0xff] }
 0xc82   :  { %v34014_v50 = vpop.f32.mrb[198].mxu0  ;;  %23301 = vmatprep.mubr.msk.f32.mxu1 %vm28339_vm1, %v28338_v0 }
 0xc83   :  { %37626 = vst [vmem:[#allocation21_spill] sm:$0xff] %v34014_v50  ;;  %v23061_v5 = vpop.f32.mrb[199].mxu0  ;;  %v34526_v50 = vld [vmem:[#allocation2 + $0x177] sm:$0xff] }
 0xc85   :  { %23302 = vmatmul.mubr.msk.f32.gmra.mrb[116].mxu1 %vm26_vm0, %v9642_v59 }
 0xc86   :  { %v34019_v22 = vpop.f32.mrb[200].mxu0  ;;  %23304 = vmatprep.mubr.msk.f32.mxu1 %vm28339_vm1, %v28338_v0 }
 0xc87   :  { %37627 = vst [vmem:[#allocation22_spill] sm:$0xff] %v34019_v22  ;;  %v23064_v25 = vpop.f32.mrb[201].mxu0  ;;  %v34520_v22 = vld [vmem:[#allocation2 + $0x16f] sm:$0xff] }
 0xc88   :  { %v9657_v25 = vld [vmem:[#allocation2 + $0x106] sm:$0xff] }
 0xc89   :  { %23305 = vmatmul.mubr.msk.f32.gmra.mrb[118].mxu1 %vm26_vm0, %v9643_v4 }
 0xc8a   :  { %v34024_v30 = vpop.f32.mrb[202].mxu0  ;;  %23307 = vmatprep.mubr.msk.f32.mxu1 %vm28339_vm1, %v28338_v0 }
 0xc8b   :  { %37628 = vst [vmem:[#allocation23_spill] sm:$0xff] %v34024_v30  ;;  %v23067_v17 = vpop.f32.mrb[203].mxu0  ;;  %v34514_v30 = vld [vmem:[#allocation2 + $0x167] sm:$0xff] }
 0xc8d   :  { %23308 = vmatmul.mubr.msk.f32.gmra.mrb[120].mxu1 %vm26_vm0, %v9644_v29  ;;  %v9658_v29 = vld [vmem:[#allocation2 + $0x10e] sm:$0xff] }
 0xc8e   :  { %v34029_v33 = vpop.f32.mrb[204].mxu0  ;;  %23310 = vmatprep.mubr.msk.f32.mxu1 %vm28339_vm1, %v28338_v0 }
 0xc8f   :  { %37629 = vst [vmem:[#allocation24_spill] sm:$0xff] %v34029_v33  ;;  %v23070_v7 = vpop.f32.mrb[205].mxu0  ;;  %v34508_v33 = vld [vmem:[#allocation2 + $0x15f] sm:$0xff] }
 0xc91   :  { %23311 = vmatmul.mubr.msk.f32.gmra.mrb[122].mxu1 %vm26_vm0, %v9645_v32 }
 0xc92   :  { %v34034_v36 = vpop.f32.mrb[206].mxu0  ;;  %23313 = vmatprep.mubr.msk.f32.mxu1 %vm28339_vm1, %v28338_v0 }
 0xc93   :  { %37630 = vst [vmem:[#allocation25_spill] sm:$0xff] %v34034_v36  ;;  %v23073_v41 = vpop.f32.mrb[207].mxu0  ;;  %v34502_v36 = vld [vmem:[#allocation2 + $0x157] sm:$0xff] }
 0xc94   :  { %v9659_v41 = vld [vmem:[#allocation2 + $0x116] sm:$0xff] }
 0xc95   :  { %23314 = vmatmul.mubr.msk.f32.gmra.mrb[124].mxu1 %vm26_vm0, %v9646_v19 }
 0xc96   :  { %v34039_v35 = vpop.f32.mrb[208].mxu0  ;;  %23316 = vmatprep.mubr.msk.f32.mxu1 %vm28339_vm1, %v28338_v0 }
 0xc97   :  { %37631 = vst [vmem:[#allocation26_spill] sm:$0xff] %v34039_v35  ;;  %v23076_v31 = vpop.f32.mrb[209].mxu0  ;;  %v34496_v35 = vld [vmem:[#allocation2 + $0x14f] sm:$0xff] }
 0xc99   :  { %23317 = vmatmul.mubr.msk.f32.gmra.mrb[126].mxu1 %vm26_vm0, %v9647_v9  ;;  %v9660_v9 = vld [vmem:[#allocation2 + $0x11e] sm:$0xff] }
 0xc9a   :  { %v34044_v43 = vpop.f32.mrb[210].mxu0  ;;  %23319 = vmatprep.mubr.msk.f32.mxu1 %vm28339_vm1, %v28338_v0 }
 0xc9b   :  { %37632 = vst [vmem:[#allocation27_spill] sm:$0xff] %v34044_v43  ;;  %v23079_v38 = vpop.f32.mrb[211].mxu0  ;;  %v34490_v43 = vld [vmem:[#allocation2 + $0x147] sm:$0xff] }
 0xc9d   :  { %23320 = vmatmul.mubr.msk.f32.gmra.mrb[128].mxu1 %vm26_vm0, %v9648_v21 }
 0xc9e   :  { %v34049_v53 = vpop.f32.mrb[212].mxu0  ;;  %23322 = vmatprep.mubr.msk.f32.mxu1 %vm28339_vm1, %v28338_v0 }
 0xc9f   :  { %37633 = vst [vmem:[#allocation28_spill] sm:$0xff] %v34049_v53  ;;  %v23082_v63 = vpop.f32.mrb[213].mxu0  ;;  %v34484_v53 = vld [vmem:[#allocation2 + $0x13f] sm:$0xff] }
 0xca0   :  { %v9661_v63 = vld [vmem:[#allocation2 + $0x126] sm:$0xff] }
 0xca1   :  { %23323 = vmatmul.mubr.msk.f32.gmra.mrb[130].mxu1 %vm26_vm0, %v9649_v42 }
 0xca2   :  { %v34054_v10 = vpop.f32.mrb[214].mxu0  ;;  %23325 = vmatprep.mubr.msk.f32.mxu1 %vm28339_vm1, %v28338_v0 }
 0xca3   :  { %37634 = vst [vmem:[#allocation29_spill] sm:$0xff] %v34054_v10  ;;  %v23085_v23 = vpop.f32.mrb[215].mxu0  ;;  %v34478_v10 = vld [vmem:[#allocation2 + $0x137] sm:$0xff] }
 0xca5   :  { %23326 = vmatmul.mubr.msk.f32.gmra.mrb[132].mxu1 %vm26_vm0, %v9650_v37  ;;  %v9662_v37 = vld [vmem:[#allocation2 + $0x12e] sm:$0xff] }
 0xca6   :  { %v34059_v45 = vpop.f32.mrb[216].mxu0  ;;  %23328 = vmatprep.mubr.msk.f32.mxu1 %vm28339_vm1, %v28338_v0 }
 0xca7   :  { %37635 = vst [vmem:[#allocation30_spill] sm:$0xff] %v34059_v45  ;;  %v23088_v1 = vpop.f32.mrb[217].mxu0  ;;  %v34472_v45 = vld [vmem:[#allocation2 + $0x12f] sm:$0xff] }
 0xca9   :  { %23329 = vmatmul.mubr.msk.f32.gmra.mrb[134].mxu1 %vm26_vm0, %v9651_v2 }
 0xcaa   :  { %v34064_v12 = vpop.f32.mrb[218].mxu0  ;;  %23331 = vmatprep.mubr.msk.f32.mxu1 %vm28339_vm1, %v28338_v0 }
 0xcab   :  { %37636 = vst [vmem:[#allocation31_spill] sm:$0xff] %v34064_v12  ;;  %v23091_v48 = vpop.f32.mrb[219].mxu0  ;;  %v34466_v12 = vld [vmem:[#allocation2 + $0x127] sm:$0xff] }
 0xcac   :  { %v9663_v48 = vld [vmem:[#allocation2 + $0x136] sm:$0xff] }
 0xcad   :  { %23332 = vmatmul.mubr.msk.f32.gmra.mrb[136].mxu1 %vm26_vm0, %v9652_v56  ;;  %v9664_v56 = vld [vmem:[#allocation2 + $0x13e] sm:$0xff] }
 0xcae   :  { %v34069_v11 = vpop.f32.mrb[220].mxu0  ;;  %23334 = vmatprep.mubr.msk.f32.mxu1 %vm28339_vm1, %v28338_v0 }
 0xcaf   :  { %37637 = vst [vmem:[#allocation32_spill] sm:$0xff] %v34069_v11  ;;  %v23094_v47 = vpop.f32.mrb[221].mxu0  ;;  %v34460_v11 = vld [vmem:[#allocation2 + $0x11f] sm:$0xff] }
 0xcb0   :  { %v9665_v47 = vld [vmem:[#allocation2 + $0x146] sm:$0xff] }
 0xcb1   :  { %23335 = vmatmul.mubr.msk.f32.gmra.mrb[138].mxu1 %vm26_vm0, %v9653_v52  ;;  %v9666_v52 = vld [vmem:[#allocation2 + $0x14e] sm:$0xff] }
 0xcb2   :  { %v34074_v13 = vpop.f32.mrb[222].mxu0  ;;  %23337 = vmatprep.mubr.msk.f32.mxu1 %vm28339_vm1, %v28338_v0 }
 0xcb3   :  { %37638 = vst [vmem:[#allocation33_spill] sm:$0xff] %v34074_v13  ;;  %v23097_v26 = vpop.f32.mrb[223].mxu0  ;;  %v34454_v13 = vld [vmem:[#allocation2 + $0x117] sm:$0xff] }
 0xcb4   :  { %v9667_v26 = vld [vmem:[#allocation2 + $0x156] sm:$0xff] }
 0xcb5   :  { %23338 = vmatmul.mubr.msk.f32.gmra.mrb[140].mxu1 %vm26_vm0, %v9654_v3  ;;  %v9668_v3 = vld [vmem:[#allocation2 + $0x15e] sm:$0xff] }
 0xcb6   :  { %v34079_v55 = vpop.f32.mrb[224].mxu0  ;;  %23340 = vmatprep.mubr.msk.f32.mxu1 %vm28339_vm1, %v28338_v0 }
 0xcb7   :  { %37639 = vst [vmem:[#allocation34_spill] sm:$0xff] %v34079_v55  ;;  %v23100_v58 = vpop.f32.mrb[225].mxu0  ;;  %v34448_v55 = vld [vmem:[#allocation2 + $0x10f] sm:$0xff] }
 0xcb8   :  { %v9669_v58 = vld [vmem:[#allocation2 + $0x166] sm:$0xff] }
 0xcb9   :  { %23341 = vmatmul.mubr.msk.f32.gmra.mrb[142].mxu1 %vm26_vm0, %v9655_v40  ;;  %v9670_v40 = vld [vmem:[#allocation2 + $0x16e] sm:$0xff] }
 0xcba   :  { %v34084_v20 = vpop.f32.mrb[226].mxu0  ;;  %23343 = vmatprep.mubr.msk.f32.mxu1 %vm28339_vm1, %v28338_v0 }
 0xcbb   :  { %37640 = vst [vmem:[#allocation35_spill] sm:$0xff] %v34084_v20  ;;  %v23103_v57 = vpop.f32.mrb[227].mxu0  ;;  %v34442_v20 = vld [vmem:[#allocation2 + $0x107] sm:$0xff] }
 0xcbc   :  { %v9671_v57 = vld [vmem:[#allocation2 + $0x176] sm:$0xff] }
 0xcbd   :  { %23344 = vmatmul.mubr.msk.f32.gmra.mrb[144].mxu1 %vm26_vm0, %v9656_v28  ;;  %v9672_v28 = vld [vmem:[#allocation2 + $0x17e] sm:$0xff] }
 0xcbe   :  { %v34089_v5 = vpop.f32.mrb[228].mxu0  ;;  %23346 = vmatprep.mubr.msk.f32.mxu1 %vm28339_vm1, %v28338_v0 }
 0xcbf   :  { %37641 = vst [vmem:[#allocation36_spill] sm:$0xff] %v34089_v5  ;;  %v23106_v59 = vpop.f32.mrb[229].mxu0  ;;  %v34436_v5 = vld [vmem:[#allocation2 + $0xff] sm:$0xff] }
 0xcc0   :  { %v9673_v59 = vld [vmem:[#allocation2 + $0x186] sm:$0xff] }
 0xcc1   :  { %23347 = vmatmul.mubr.msk.f32.gmra.mrb[146].mxu1 %vm26_vm0, %v9657_v25  ;;  %v9674_v25 = vld [vmem:[#allocation2 + $0x18e] sm:$0xff] }
 0xcc2   :  { %v34094_v4 = vpop.f32.mrb[230].mxu0  ;;  %23349 = vmatprep.mubr.msk.f32.mxu1 %vm28339_vm1, %v28338_v0 }
 0xcc3   :  { %37642 = vst [vmem:[#allocation37_spill] sm:$0xff] %v34094_v4  ;;  %v23109_v17 = vpop.f32.mrb[231].mxu0  ;;  %v34430_v4 = vld [vmem:[#allocation2 + $0xf7] sm:$0xff] }
 0xcc4   :  { %v9675_v17 = vld [vmem:[#allocation2 + $0x196] sm:$0xff] }
 0xcc5   :  { %23350 = vmatmul.mubr.msk.f32.gmra.mrb[148].mxu1 %vm26_vm0, %v9658_v29  ;;  %v9676_v29 = vld [vmem:[#allocation2 + $0x19e] sm:$0xff] }
 0xcc6   :  { %v34099_v7 = vpop.f32.mrb[232].mxu0  ;;  %23352 = vmatprep.mubr.msk.f32.mxu1 %vm28339_vm1, %v28338_v0 }
 0xcc7   :  { %37643 = vst [vmem:[#allocation38_spill] sm:$0xff] %v34099_v7  ;;  %v23112_v32 = vpop.f32.mrb[233].mxu0  ;;  %v34424_v7 = vld [vmem:[#allocation2 + $0xef] sm:$0xff] }
 0xcc8   :  { %v9677_v32 = vld [vmem:[#allocation2 + $0x1a6] sm:$0xff] }
 0xcc9   :  { %23353 = vmatmul.mubr.msk.f32.gmra.mrb[150].mxu1 %vm26_vm0, %v9659_v41  ;;  %v9678_v41 = vld [vmem:[#allocation2 + $0x1ae] sm:$0xff] }
 0xcca   :  { %v34104_v19 = vpop.f32.mrb[234].mxu0  ;;  %23355 = vmatprep.mubr.msk.f32.mxu1 %vm28339_vm1, %v28338_v0 }
 0xccb   :  { %37644 = vst [vmem:[#allocation39_spill] sm:$0xff] %v34104_v19  ;;  %v23115_v31 = vpop.f32.mrb[235].mxu0  ;;  %v34418_v19 = vld [vmem:[#allocation2 + $0xe7] sm:$0xff] }
 0xccc   :  { %v9679_v31 = vld [vmem:[#allocation2 + $0x1b6] sm:$0xff] }
 0xccd   :  { %23356 = vmatmul.mubr.msk.f32.gmra.mrb[152].mxu1 %vm26_vm0, %v9660_v9  ;;  %v9680_v9 = vld [vmem:[#allocation2 + $0x1be] sm:$0xff] }
 0xcce   :  { %v34109_v38 = vpop.f32.mrb[236].mxu0  ;;  %23358 = vmatprep.mubr.msk.f32.mxu1 %vm28339_vm1, %v28338_v0 }
 0xccf   :  { %37645 = vst [vmem:[#allocation40_spill] sm:$0xff] %v34109_v38  ;;  %v23118_v21 = vpop.f32.mrb[237].mxu0  ;;  %v34412_v38 = vld [vmem:[#allocation2 + $0xdf] sm:$0xff] }
 0xcd0   :  { %v9681_v21 = vld [vmem:[#allocation2 + $0x1c6] sm:$0xff] }
 0xcd1   :  { %23359 = vmatmul.mubr.msk.f32.gmra.mrb[154].mxu1 %vm26_vm0, %v9661_v63  ;;  %v9682_v63 = vld [vmem:[#allocation2 + $0x1ce] sm:$0xff] }
 0xcd2   :  { %v34114_v42 = vpop.f32.mrb[238].mxu0  ;;  %23361 = vmatprep.mubr.msk.f32.mxu1 %vm28339_vm1, %v28338_v0 }
 0xcd3   :  { %37646 = vst [vmem:[#allocation41_spill] sm:$0xff] %v34114_v42  ;;  %v23121_v23 = vpop.f32.mrb[239].mxu0  ;;  %v34406_v42 = vld [vmem:[#allocation2 + $0xd7] sm:$0xff] }
 0xcd4   :  { %v9683_v23 = vld [vmem:[#allocation2 + $0x1d6] sm:$0xff] }
 0xcd5   :  { %23362 = vmatmul.mubr.msk.f32.gmra.mrb[156].mxu1 %vm26_vm0, %v9662_v37  ;;  %v9684_v37 = vld [vmem:[#allocation2 + $0x1de] sm:$0xff] }
 0xcd6   :  { %v34119_v1 = vpop.f32.mrb[240].mxu0  ;;  %23364 = vmatprep.mubr.msk.f32.mxu1 %vm28339_vm1, %v28338_v0 }
 0xcd7   :  { %37647 = vst [vmem:[#allocation42_spill] sm:$0xff] %v34119_v1  ;;  %v23124_v2 = vpop.f32.mrb[241].mxu0  ;;  %v34400_v1 = vld [vmem:[#allocation2 + $0xcf] sm:$0xff] }
 0xcd8   :  { %v9685_v2 = vld [vmem:[#allocation2 + $0x1e6] sm:$0xff] }
 0xcd9   :  { %23365 = vmatmul.mubr.msk.f32.gmra.mrb[158].mxu1 %vm26_vm0, %v9663_v48  ;;  %v9686_v48 = vld [vmem:[#allocation2 + $0x1ee] sm:$0xff] }
 0xcda   :  { %23367 = vmatprep.mubr.msk.f32.mxu1 %vm28339_vm1, %v28338_v0 }
 0xcdd   :  { %23368 = vmatmul.mubr.msk.f32.gmra.mrb[160].mxu1 %vm26_vm0, %v9664_v56  ;;  %v9687_v56 = vld [vmem:[#allocation2 + $0x1f6] sm:$0xff] }
 0xcde   :  { %23370 = vmatprep.mubr.msk.f32.mxu1 %vm28339_vm1, %v28338_v0 }
 0xce1   :  { %23371 = vmatmul.mubr.msk.f32.gmra.mrb[0].mxu1 %vm26_vm0, %v9665_v47  ;;  %v9688_v47 = vld [vmem:[#allocation2 + $0x1fe] sm:$0xff] }
 0xce2   :  { %23373 = vmatprep.mubr.msk.f32.mxu1 %vm28339_vm1, %v28338_v0 }
 0xce5   :  { %23374 = vmatmul.mubr.msk.f32.gmra.mrb[2].mxu1 %vm26_vm0, %v9666_v52  ;;  %v9689_v52 = vld [vmem:[#allocation2 + $0x206] sm:$0xff] }
 0xce6   :  { %23376 = vmatprep.mubr.msk.f32.mxu1 %vm28339_vm1, %v28338_v0 }
 0xce9   :  { %23377 = vmatmul.mubr.msk.f32.gmra.mrb[4].mxu1 %vm26_vm0, %v9667_v26  ;;  %v9690_v26 = vld [vmem:[#allocation2 + $0x20e] sm:$0xff] }
 0xcea   :  { %23379 = vmatprep.mubr.msk.f32.mxu1 %vm28339_vm1, %v28338_v0 }
 0xced   :  { %23380 = vmatmul.mubr.msk.f32.gmra.mrb[6].mxu1 %vm26_vm0, %v9668_v3  ;;  %v9691_v3 = vld [vmem:[#allocation2 + $0x216] sm:$0xff] }
 0xcee   :  { %23382 = vmatprep.mubr.msk.f32.mxu1 %vm28339_vm1, %v28338_v0 }
 0xcf1   :  { %23383 = vmatmul.mubr.msk.f32.gmra.mrb[8].mxu1 %vm26_vm0, %v9669_v58  ;;  %v9692_v58 = vld [vmem:[#allocation2 + $0x21e] sm:$0xff] }
 0xcf2   :  { %23385 = vmatprep.mubr.msk.f32.mxu1 %vm28339_vm1, %v28338_v0 }
 0xcf5   :  { %23386 = vmatmul.mubr.msk.f32.gmra.mrb[10].mxu1 %vm26_vm0, %v9670_v40  ;;  %v9693_v40 = vld [vmem:[#allocation2 + $0x226] sm:$0xff] }
 0xcf6   :  { %23388 = vmatprep.mubr.msk.f32.mxu1 %vm28339_vm1, %v28338_v0 }
 0xcf9   :  { %23389 = vmatmul.mubr.msk.f32.gmra.mrb[12].mxu1 %vm26_vm0, %v9671_v57  ;;  %v9694_v57 = vld [vmem:[#allocation2 + $0x22e] sm:$0xff] }
 0xcfa   :  { %23391 = vmatprep.mubr.msk.f32.mxu1 %vm28339_vm1, %v28338_v0 }
 0xcfd   :  { %23392 = vmatmul.mubr.msk.f32.gmra.mrb[14].mxu1 %vm26_vm0, %v9672_v28  ;;  %v9695_v28 = vld [vmem:[#allocation2 + $0x236] sm:$0xff] }
 0xcfe   :  { %23394 = vmatprep.mubr.msk.f32.mxu1 %vm28339_vm1, %v28338_v0 }
 0xd01   :  { %23395 = vmatmul.mubr.msk.f32.gmra.mrb[16].mxu1 %vm26_vm0, %v9673_v59  ;;  %v9696_v59 = vld [vmem:[#allocation2 + $0x23e] sm:$0xff] }
 0xd02   :  { %23397 = vmatprep.mubr.msk.f32.mxu1 %vm28339_vm1, %v28338_v0 }
 0xd05   :  { %23398 = vmatmul.mubr.msk.f32.gmra.mrb[18].mxu1 %vm26_vm0, %v9674_v25  ;;  %v9697_v25 = vld [vmem:[#allocation2 + $0x246] sm:$0xff] }
 0xd06   :  { %23400 = vmatprep.mubr.msk.f32.mxu1 %vm28339_vm1, %v28338_v0 }
 0xd09   :  { %23401 = vmatmul.mubr.msk.f32.gmra.mrb[20].mxu1 %vm26_vm0, %v9675_v17  ;;  %v9698_v17 = vld [vmem:[#allocation2 + $0x24e] sm:$0xff] }
 0xd0a   :  { %23403 = vmatprep.mubr.msk.f32.mxu1 %vm28339_vm1, %v28338_v0 }
 0xd0d   :  { %23404 = vmatmul.mubr.msk.f32.gmra.mrb[22].mxu1 %vm26_vm0, %v9676_v29  ;;  %v9699_v29 = vld [vmem:[#allocation2 + $0x256] sm:$0xff] }
 0xd0e   :  { %23406 = vmatprep.mubr.msk.f32.mxu1 %vm28339_vm1, %v28338_v0 }
 0xd11   :  { %23407 = vmatmul.mubr.msk.f32.gmra.mrb[24].mxu1 %vm26_vm0, %v9677_v32  ;;  %v9700_v32 = vld [vmem:[#allocation2 + $0x25e] sm:$0xff] }
 0xd12   :  { %23409 = vmatprep.mubr.msk.f32.mxu1 %vm28339_vm1, %v28338_v0 }
 0xd15   :  { %23410 = vmatmul.mubr.msk.f32.gmra.mrb[26].mxu1 %vm26_vm0, %v9678_v41  ;;  %v9701_v41 = vld [vmem:[#allocation2 + $0x266] sm:$0xff] }
 0xd16   :  { %23412 = vmatprep.mubr.msk.f32.mxu1 %vm28339_vm1, %v28338_v0 }
 0xd19   :  { %23413 = vmatmul.mubr.msk.f32.gmra.mrb[28].mxu1 %vm26_vm0, %v9679_v31  ;;  %v9702_v31 = vld [vmem:[#allocation2 + $0x26e] sm:$0xff] }
 0xd1a   :  { %23415 = vmatprep.mubr.msk.f32.mxu1 %vm28339_vm1, %v28338_v0 }
 0xd1d   :  { %23416 = vmatmul.mubr.msk.f32.gmra.mrb[30].mxu1 %vm26_vm0, %v9680_v9  ;;  %v9703_v9 = vld [vmem:[#allocation2 + $0x276] sm:$0xff] }
 0xd1e   :  { %23418 = vmatprep.mubr.msk.f32.mxu1 %vm28339_vm1, %v28338_v0 }
 0xd21   :  { %23419 = vmatmul.mubr.msk.f32.gmra.mrb[32].mxu1 %vm26_vm0, %v9681_v21  ;;  %v9704_v21 = vld [vmem:[#allocation2 + $0x27e] sm:$0xff] }
 0xd22   :  { %23421 = vmatprep.mubr.msk.f32.mxu1 %vm28339_vm1, %v28338_v0 }
 0xd25   :  { %23422 = vmatmul.mubr.msk.f32.gmra.mrb[34].mxu1 %vm26_vm0, %v9682_v63  ;;  %v9705_v63 = vld [vmem:[#allocation2 + $0x286] sm:$0xff] }
 0xd26   :  { %23424 = vmatprep.mubr.msk.f32.mxu1 %vm28339_vm1, %v28338_v0 }
 0xd29   :  { %23425 = vmatmul.mubr.msk.f32.gmra.mrb[36].mxu1 %vm26_vm0, %v9683_v23  ;;  %v10502_v23 = vld [vmem:[#allocation2 + $0x7] sm:$0xff] }
 0xd2a   :  { %23427 = vmatprep.mubr.msk.f32.mxu1 %vm28339_vm1, %v28338_v0 }
 0xd2d   :  { %23428 = vmatmul.mubr.msk.f32.gmra.mrb[38].mxu1 %vm26_vm0, %v9684_v37  ;;  %v18667_v37 = vld [vmem:[%s37467_s3 + $0x18] sm:$0xff] }
 0xd2e   :  { %23430 = vmatprep.mubr.msk.f32.mxu1 %vm28339_vm1, %v28338_v0 }
 0xd31   :  { %23431 = vmatmul.mubr.msk.f32.gmra.mrb[40].mxu1 %vm26_vm0, %v9685_v2  ;;  %v10503_v2 = vld [vmem:[#allocation2 + $0xf] sm:$0xff] }
 0xd32   :  { %23433 = vmatprep.mubr.msk.f32.mxu1 %vm28339_vm1, %v28338_v0 }
 0xd35   :  { %23434 = vmatmul.mubr.msk.f32.gmra.mrb[42].mxu1 %vm26_vm0, %v9686_v48  ;;  %v34262_v48 = vld [vmem:[#allocation2 + $0x17] sm:$0xff] }
 0xd36   :  { %23436 = vmatprep.mubr.msk.f32.mxu1 %vm28339_vm1, %v28338_v0 }
 0xd39   :  { %23437 = vmatmul.mubr.msk.f32.gmra.mrb[44].mxu1 %vm26_vm0, %v9687_v56  ;;  %v34268_v56 = vld [vmem:[#allocation2 + $0x1f] sm:$0xff] }
 0xd3a   :  { %23439 = vmatprep.mubr.msk.f32.mxu1 %vm28339_vm1, %v28338_v0 }
 0xd3d   :  { %23440 = vmatmul.mubr.msk.f32.gmra.mrb[46].mxu1 %vm26_vm0, %v9688_v47  ;;  %v34274_v47 = vld [vmem:[#allocation2 + $0x27] sm:$0xff] }
 0xd3e   :  { %23442 = vmatprep.mubr.msk.f32.mxu1 %vm28339_vm1, %v28338_v0 }
 0xd41   :  { %23443 = vmatmul.mubr.msk.f32.gmra.mrb[48].mxu1 %vm26_vm0, %v9689_v52  ;;  %v34280_v52 = vld [vmem:[#allocation2 + $0x2f] sm:$0xff] }
 0xd42   :  { %23445 = vmatprep.mubr.msk.f32.mxu1 %vm28339_vm1, %v28338_v0 }
 0xd45   :  { %23446 = vmatmul.mubr.msk.f32.gmra.mrb[50].mxu1 %vm26_vm0, %v9690_v26  ;;  %v34286_v26 = vld [vmem:[#allocation2 + $0x37] sm:$0xff] }
 0xd46   :  { %23448 = vmatprep.mubr.msk.f32.mxu1 %vm28339_vm1, %v28338_v0 }
 0xd49   :  { %23449 = vmatmul.mubr.msk.f32.gmra.mrb[52].mxu1 %vm26_vm0, %v9691_v3  ;;  %v34292_v3 = vld [vmem:[#allocation2 + $0x3f] sm:$0xff] }
 0xd4a   :  { %23451 = vmatprep.mubr.msk.f32.mxu1 %vm28339_vm1, %v28338_v0 }
 0xd4d   :  { %23452 = vmatmul.mubr.msk.f32.gmra.mrb[54].mxu1 %vm26_vm0, %v9692_v58  ;;  %v34298_v58 = vld [vmem:[#allocation2 + $0x47] sm:$0xff] }
 0xd4e   :  { %23454 = vmatprep.mubr.msk.f32.mxu1 %vm28339_vm1, %v28338_v0 }
 0xd51   :  { %23455 = vmatmul.mubr.msk.f32.gmra.mrb[56].mxu1 %vm26_vm0, %v9693_v40  ;;  %v34304_v40 = vld [vmem:[#allocation2 + $0x4f] sm:$0xff] }
 0xd52   :  { %23457 = vmatprep.mubr.msk.f32.mxu1 %vm28339_vm1, %v28338_v0 }
 0xd55   :  { %23458 = vmatmul.mubr.msk.f32.gmra.mrb[58].mxu1 %vm26_vm0, %v9694_v57  ;;  %v34310_v57 = vld [vmem:[#allocation2 + $0x57] sm:$0xff] }
 0xd56   :  { %23460 = vmatprep.mubr.msk.f32.mxu1 %vm28339_vm1, %v28338_v0 }
 0xd59   :  { %23461 = vmatmul.mubr.msk.f32.gmra.mrb[60].mxu1 %vm26_vm0, %v9695_v28  ;;  %v34316_v28 = vld [vmem:[#allocation2 + $0x5f] sm:$0xff] }
 0xd5a   :  { %23463 = vmatprep.mubr.msk.f32.mxu1 %vm28339_vm1, %v28338_v0 }
 0xd5d   :  { %23464 = vmatmul.mubr.msk.f32.gmra.mrb[62].mxu1 %vm26_vm0, %v9696_v59  ;;  %v34322_v59 = vld [vmem:[#allocation2 + $0x67] sm:$0xff] }
 0xd5e   :  { %23466 = vmatprep.mubr.msk.f32.mxu1 %vm28339_vm1, %v28338_v0 }
 0xd61   :  { %23467 = vmatmul.mubr.msk.f32.gmra.mrb[64].mxu1 %vm26_vm0, %v9697_v25  ;;  %v34328_v25 = vld [vmem:[#allocation2 + $0x6f] sm:$0xff] }
 0xd62   :  { %23469 = vmatprep.mubr.msk.f32.mxu1 %vm28339_vm1, %v28338_v0 }
 0xd65   :  { %23470 = vmatmul.mubr.msk.f32.gmra.mrb[66].mxu1 %vm26_vm0, %v9698_v17  ;;  %v34334_v17 = vld [vmem:[#allocation2 + $0x77] sm:$0xff] }
 0xd66   :  { %23472 = vmatprep.mubr.msk.f32.mxu1 %vm28339_vm1, %v28338_v0 }
 0xd69   :  { %23473 = vmatmul.mubr.msk.f32.gmra.mrb[68].mxu1 %vm26_vm0, %v9699_v29  ;;  %v34340_v29 = vld [vmem:[#allocation2 + $0x7f] sm:$0xff] }
 0xd6a   :  { %23475 = vmatprep.mubr.msk.f32.mxu1 %vm28339_vm1, %v28338_v0 }
 0xd6d   :  { %23476 = vmatmul.mubr.msk.f32.gmra.mrb[70].mxu1 %vm26_vm0, %v9700_v32  ;;  %v34346_v32 = vld [vmem:[#allocation2 + $0x87] sm:$0xff] }
 0xd6e   :  { %23478 = vmatprep.mubr.msk.f32.mxu1 %vm28339_vm1, %v28338_v0 }
 0xd71   :  { %23479 = vmatmul.mubr.msk.f32.gmra.mrb[72].mxu1 %vm26_vm0, %v9701_v41  ;;  %v34352_v41 = vld [vmem:[#allocation2 + $0x8f] sm:$0xff] }
 0xd72   :  { %23481 = vmatprep.mubr.msk.f32.mxu1 %vm28339_vm1, %v28338_v0 }
 0xd75   :  { %23482 = vmatmul.mubr.msk.f32.gmra.mrb[74].mxu1 %vm26_vm0, %v9702_v31  ;;  %v34358_v31 = vld [vmem:[#allocation2 + $0x97] sm:$0xff] }
 0xd76   :  { %23484 = vmatprep.mubr.msk.f32.mxu1 %vm28339_vm1, %v28338_v0 }
 0xd79   :  { %23485 = vmatmul.mubr.msk.f32.gmra.mrb[76].mxu1 %vm26_vm0, %v9703_v9  ;;  %v34364_v9 = vld [vmem:[#allocation2 + $0x9f] sm:$0xff] }
 0xd7a   :  { %23487 = vmatprep.mubr.msk.f32.mxu1 %vm28339_vm1, %v28338_v0 }
 0xd7d   :  { %23488 = vmatmul.mubr.msk.f32.gmra.mrb[78].mxu1 %vm26_vm0, %v9704_v21  ;;  %v34370_v21 = vld [vmem:[#allocation2 + $0xa7] sm:$0xff] }
 0xd7e   :  { %23490 = vmatprep.mubr.msk.f32.mxu1 %vm28339_vm1, %v28338_v0 }
 0xd81   :  { %23491 = vmatmul.mubr.msk.f32.gmra.mrb[80].mxu1 %vm26_vm0, %v9705_v63  ;;  %v34376_v63 = vld [vmem:[#allocation2 + $0xaf] sm:$0xff] }
 0xd82   :  { %23495 = vmatprep.mubr.msk.f32.mxu1 %vm28339_vm1, %v28338_v0 }
 0xd85   :  { %23496 = vmatmul.mubr.msk.f32.vlgmr.msra.gmra.mrb[82].mxu1 %vm26_vm0, %v10502_v23  ;;  %v34382_v23 = vld [vmem:[#allocation2 + $0xb7] sm:$0xff] }
 0xd86   :  { %23739 = vmatpush3.msra.mxu1 %v18667_v37  ;;  %23498 = vmatprep.mubr.msk.f32.mxu1 %vm28339_vm1, %v28338_v0  ;;  %v34388_v37 = vld [vmem:[#allocation2 + $0xbf] sm:$0xff] }
 0xd87   :  { %23983 = vmatprep.subr.mxu1 %v28338_v0 }
 0xd89   :  { %23499 = vmatmul.mubr.msk.f32.gmra.mrb[84].mxu1 %vm26_vm0, %v10503_v2  ;;  %v34394_v2 = vld [vmem:[#allocation2 + $0xc7] sm:$0xff] }
 0xd8a   :  { %23501 = vmatprep.mubr.msk.f32.mxu1 %vm28339_vm1, %v28338_v0 }
 0xd8d   :  { %23502 = vmatmul.mubr.msk.f32.gmra.mrb[86].mxu1 %vm26_vm0, %v34262_v48 }
 0xd8e   :  { %23504 = vmatprep.mubr.msk.f32.mxu1 %vm28339_vm1, %v28338_v0 }
 0xd91   :  { %23505 = vmatmul.mubr.msk.f32.gmra.mrb[88].mxu1 %vm26_vm0, %v34268_v56 }
 0xd92   :  { %23507 = vmatprep.mubr.msk.f32.mxu1 %vm28339_vm1, %v28338_v0 }
 0xd95   :  { %23508 = vmatmul.mubr.msk.f32.gmra.mrb[90].mxu1 %vm26_vm0, %v34274_v47 }
 0xd96   :  { %23510 = vmatprep.mubr.msk.f32.mxu1 %vm28339_vm1, %v28338_v0 }
 0xd99   :  { %23511 = vmatmul.mubr.msk.f32.gmra.mrb[92].mxu1 %vm26_vm0, %v34280_v52 }
 0xd9a   :  { %23513 = vmatprep.mubr.msk.f32.mxu1 %vm28339_vm1, %v28338_v0 }
 0xd9d   :  { %23514 = vmatmul.mubr.msk.f32.gmra.mrb[94].mxu1 %vm26_vm0, %v34286_v26 }
 0xd9e   :  { %23516 = vmatprep.mubr.msk.f32.mxu1 %vm28339_vm1, %v28338_v0 }
 0xda1   :  { %23517 = vmatmul.mubr.msk.f32.gmra.mrb[96].mxu1 %vm26_vm0, %v34292_v3 }
 0xda2   :  { %23519 = vmatprep.mubr.msk.f32.mxu1 %vm28339_vm1, %v28338_v0 }
 0xda5   :  { %23520 = vmatmul.mubr.msk.f32.gmra.mrb[98].mxu1 %vm26_vm0, %v34298_v58 }
 0xda6   :  { %23522 = vmatprep.mubr.msk.f32.mxu1 %vm28339_vm1, %v28338_v0 }
 0xda9   :  { %23523 = vmatmul.mubr.msk.f32.gmra.mrb[100].mxu1 %vm26_vm0, %v34304_v40 }
 0xdaa   :  { %23525 = vmatprep.mubr.msk.f32.mxu1 %vm28339_vm1, %v28338_v0 }
 0xdad   :  { %23526 = vmatmul.mubr.msk.f32.gmra.mrb[102].mxu1 %vm26_vm0, %v34310_v57 }
 0xdae   :  { %23528 = vmatprep.mubr.msk.f32.mxu1 %vm28339_vm1, %v28338_v0 }
 0xdb1   :  { %23529 = vmatmul.mubr.msk.f32.gmra.mrb[104].mxu1 %vm26_vm0, %v34316_v28 }
 0xdb2   :  { %23531 = vmatprep.mubr.msk.f32.mxu1 %vm28339_vm1, %v28338_v0 }
 0xdb5   :  { %23532 = vmatmul.mubr.msk.f32.gmra.mrb[106].mxu1 %vm26_vm0, %v34322_v59 }
 0xdb6   :  { %23534 = vmatprep.mubr.msk.f32.mxu1 %vm28339_vm1, %v28338_v0 }
 0xdb9   :  { %23535 = vmatmul.mubr.msk.f32.gmra.mrb[108].mxu1 %vm26_vm0, %v34328_v25 }
 0xdba   :  { %23537 = vmatprep.mubr.msk.f32.mxu1 %vm28339_vm1, %v28338_v0 }
 0xdbd   :  { %23538 = vmatmul.mubr.msk.f32.gmra.mrb[110].mxu1 %vm26_vm0, %v34334_v17 }
 0xdbe   :  { %23540 = vmatprep.mubr.msk.f32.mxu1 %vm28339_vm1, %v28338_v0 }
 0xdc1   :  { %23541 = vmatmul.mubr.msk.f32.gmra.mrb[112].mxu1 %vm26_vm0, %v34340_v29 }
 0xdc2   :  { %23543 = vmatprep.mubr.msk.f32.mxu1 %vm28339_vm1, %v28338_v0 }
 0xdc5   :  { %23544 = vmatmul.mubr.msk.f32.gmra.mrb[114].mxu1 %vm26_vm0, %v34346_v32 }
 0xdc6   :  { %23546 = vmatprep.mubr.msk.f32.mxu1 %vm28339_vm1, %v28338_v0 }
 0xdc9   :  { %23547 = vmatmul.mubr.msk.f32.gmra.mrb[116].mxu1 %vm26_vm0, %v34352_v41 }
 0xdca   :  { %23549 = vmatprep.mubr.msk.f32.mxu1 %vm28339_vm1, %v28338_v0 }
 0xdcd   :  { %23550 = vmatmul.mubr.msk.f32.gmra.mrb[118].mxu1 %vm26_vm0, %v34358_v31 }
 0xdce   :  { %23552 = vmatprep.mubr.msk.f32.mxu1 %vm28339_vm1, %v28338_v0 }
 0xdd1   :  { %23553 = vmatmul.mubr.msk.f32.gmra.mrb[120].mxu1 %vm26_vm0, %v34364_v9 }
 0xdd2   :  { %23555 = vmatprep.mubr.msk.f32.mxu1 %vm28339_vm1, %v28338_v0 }
 0xdd5   :  { %23556 = vmatmul.mubr.msk.f32.gmra.mrb[122].mxu1 %vm26_vm0, %v34370_v21 }
 0xdd6   :  { %23558 = vmatprep.mubr.msk.f32.mxu1 %vm28339_vm1, %v28338_v0 }
 0xdd9   :  { %23559 = vmatmul.mubr.msk.f32.gmra.mrb[124].mxu1 %vm26_vm0, %v34376_v63 }
 0xdda   :  { %23561 = vmatprep.mubr.msk.f32.mxu1 %vm28339_vm1, %v28338_v0 }
 0xddd   :  { %23562 = vmatmul.mubr.msk.f32.gmra.mrb[126].mxu1 %vm26_vm0, %v34382_v23 }
 0xdde   :  { %23564 = vmatprep.mubr.msk.f32.mxu1 %vm28339_vm1, %v28338_v0 }
 0xde1   :  { %23565 = vmatmul.mubr.msk.f32.gmra.mrb[128].mxu1 %vm26_vm0, %v34388_v37 }
 0xde2   :  { %23567 = vmatprep.mubr.msk.f32.mxu1 %vm28339_vm1, %v28338_v0 }
 0xde5   :  { %23568 = vmatmul.mubr.msk.f32.gmra.mrb[130].mxu1 %vm26_vm0, %v34394_v2 }
 0xde6   :  { %23570 = vmatprep.mubr.msk.f32.mxu1 %vm28339_vm1, %v28338_v0 }
 0xde9   :  { %23571 = vmatmul.mubr.msk.f32.gmra.mrb[132].mxu1 %vm26_vm0, %v34400_v1 }
 0xdea   :  { %23573 = vmatprep.mubr.msk.f32.mxu1 %vm28339_vm1, %v28338_v0 }
 0xded   :  { %23574 = vmatmul.mubr.msk.f32.gmra.mrb[134].mxu1 %vm26_vm0, %v34406_v42 }
 0xdee   :  { %23576 = vmatprep.mubr.msk.f32.mxu1 %vm28339_vm1, %v28338_v0 }
 0xdf1   :  { %23577 = vmatmul.mubr.msk.f32.gmra.mrb[136].mxu1 %vm26_vm0, %v34412_v38 }
 0xdf2   :  { %23579 = vmatprep.mubr.msk.f32.mxu1 %vm28339_vm1, %v28338_v0 }
 0xdf5   :  { %23580 = vmatmul.mubr.msk.f32.gmra.mrb[138].mxu1 %vm26_vm0, %v34418_v19 }
 0xdf6   :  { %23582 = vmatprep.mubr.msk.f32.mxu1 %vm28339_vm1, %v28338_v0 }
 0xdf9   :  { %23583 = vmatmul.mubr.msk.f32.gmra.mrb[140].mxu1 %vm26_vm0, %v34424_v7 }
 0xdfa   :  { %23585 = vmatprep.mubr.msk.f32.mxu1 %vm28339_vm1, %v28338_v0 }
 0xdfd   :  { %23586 = vmatmul.mubr.msk.f32.gmra.mrb[142].mxu1 %vm26_vm0, %v34430_v4 }
 0xdfe   :  { %23588 = vmatprep.mubr.msk.f32.mxu1 %vm28339_vm1, %v28338_v0 }
 0xe01   :  { %23589 = vmatmul.mubr.msk.f32.gmra.mrb[144].mxu1 %vm26_vm0, %v34436_v5 }
 0xe02   :  { %23591 = vmatprep.mubr.msk.f32.mxu1 %vm28339_vm1, %v28338_v0 }
 0xe05   :  { %23592 = vmatmul.mubr.msk.f32.gmra.mrb[146].mxu1 %vm26_vm0, %v34442_v20 }
 0xe06   :  { %23594 = vmatprep.mubr.msk.f32.mxu1 %vm28339_vm1, %v28338_v0 }
 0xe09   :  { %23595 = vmatmul.mubr.msk.f32.gmra.mrb[148].mxu1 %vm26_vm0, %v34448_v55 }
 0xe0a   :  { %23597 = vmatprep.mubr.msk.f32.mxu1 %vm28339_vm1, %v28338_v0 }
 0xe0d   :  { %23598 = vmatmul.mubr.msk.f32.gmra.mrb[150].mxu1 %vm26_vm0, %v34454_v13 }
 0xe0e   :  { %23600 = vmatprep.mubr.msk.f32.mxu1 %vm28339_vm1, %v28338_v0 }
 0xe11   :  { %23601 = vmatmul.mubr.msk.f32.gmra.mrb[152].mxu1 %vm26_vm0, %v34460_v11 }
 0xe12   :  { %23603 = vmatprep.mubr.msk.f32.mxu1 %vm28339_vm1, %v28338_v0 }
 0xe15   :  { %23604 = vmatmul.mubr.msk.f32.gmra.mrb[154].mxu1 %vm26_vm0, %v34466_v12 }
 0xe16   :  { %23606 = vmatprep.mubr.msk.f32.mxu1 %vm28339_vm1, %v28338_v0 }
 0xe19   :  { %23607 = vmatmul.mubr.msk.f32.gmra.mrb[156].mxu1 %vm26_vm0, %v34472_v45 }
 0xe1a   :  { %23609 = vmatprep.mubr.msk.f32.mxu1 %vm28339_vm1, %v28338_v0 }
 0xe1d   :  { %23610 = vmatmul.mubr.msk.f32.gmra.mrb[158].mxu1 %vm26_vm0, %v34478_v10 }
 0xe1e   :  { %23612 = vmatprep.mubr.msk.f32.mxu1 %vm28339_vm1, %v28338_v0 }
 0xe21   :  { %23613 = vmatmul.mubr.msk.f32.gmra.mrb[160].mxu1 %vm26_vm0, %v34484_v53 }
 0xe22   :  { %23615 = vmatprep.mubr.msk.f32.mxu1 %vm28339_vm1, %v28338_v0 }
 0xe25   :  { %23616 = vmatmul.mubr.msk.f32.gmra.mrb[0].mxu1 %vm26_vm0, %v34490_v43 }
 0xe26   :  { %23618 = vmatprep.mubr.msk.f32.mxu1 %vm28339_vm1, %v28338_v0 }
 0xe29   :  { %23619 = vmatmul.mubr.msk.f32.gmra.mrb[2].mxu1 %vm26_vm0, %v34496_v35 }
 0xe2a   :  { %23621 = vmatprep.mubr.msk.f32.mxu1 %vm28339_vm1, %v28338_v0 }
 0xe2d   :  { %23622 = vmatmul.mubr.msk.f32.gmra.mrb[4].mxu1 %vm26_vm0, %v34502_v36 }
 0xe2e   :  { %23624 = vmatprep.mubr.msk.f32.mxu1 %vm28339_vm1, %v28338_v0 }
 0xe31   :  { %23625 = vmatmul.mubr.msk.f32.gmra.mrb[6].mxu1 %vm26_vm0, %v34508_v33 }
 0xe32   :  { %23627 = vmatprep.mubr.msk.f32.mxu1 %vm28339_vm1, %v28338_v0 }
 0xe35   :  { %23628 = vmatmul.mubr.msk.f32.gmra.mrb[8].mxu1 %vm26_vm0, %v34514_v30 }
 0xe36   :  { %23630 = vmatprep.mubr.msk.f32.mxu1 %vm28339_vm1, %v28338_v0 }
 0xe39   :  { %23631 = vmatmul.mubr.msk.f32.gmra.mrb[10].mxu1 %vm26_vm0, %v34520_v22 }
 0xe3a   :  { %23633 = vmatprep.mubr.msk.f32.mxu1 %vm28339_vm1, %v28338_v0 }
 0xe3d   :  { %23634 = vmatmul.mubr.msk.f32.gmra.mrb[12].mxu1 %vm26_vm0, %v34526_v50 }
 0xe3e   :  { %23636 = vmatprep.mubr.msk.f32.mxu1 %vm28339_vm1, %v28338_v0 }
 0xe41   :  { %23637 = vmatmul.mubr.msk.f32.gmra.mrb[14].mxu1 %vm26_vm0, %v34532_v16 }
 0xe42   :  { %23639 = vmatprep.mubr.msk.f32.mxu1 %vm28339_vm1, %v28338_v0 }
 0xe45   :  { %23640 = vmatmul.mubr.msk.f32.gmra.mrb[16].mxu1 %vm26_vm0, %v34538_v18 }
 0xe46   :  { %23642 = vmatprep.mubr.msk.f32.mxu1 %vm28339_vm1, %v28338_v0 }
 0xe49   :  { %23643 = vmatmul.mubr.msk.f32.gmra.mrb[18].mxu1 %vm26_vm0, %v34544_v15 }
 0xe4a   :  { %23645 = vmatprep.mubr.msk.f32.mxu1 %vm28339_vm1, %v28338_v0 }
 0xe4d   :  { %23646 = vmatmul.mubr.msk.f32.gmra.mrb[20].mxu1 %vm26_vm0, %v34550_v14 }
 0xe4e   :  { %23648 = vmatprep.mubr.msk.f32.mxu1 %vm28339_vm1, %v28338_v0 }
 0xe51   :  { %23649 = vmatmul.mubr.msk.f32.gmra.mrb[22].mxu1 %vm26_vm0, %v34556_v34 }
 0xe52   :  { %23651 = vmatprep.mubr.msk.f32.mxu1 %vm28339_vm1, %v28338_v0 }
 0xe55   :  { %23652 = vmatmul.mubr.msk.f32.gmra.mrb[24].mxu1 %vm26_vm0, %v34562_v8 }
 0xe56   :  { %23654 = vmatprep.mubr.msk.f32.mxu1 %vm28339_vm1, %v28338_v0 }
 0xe59   :  { %23655 = vmatmul.mubr.msk.f32.gmra.mrb[26].mxu1 %vm26_vm0, %v34568_v24 }
 0xe5a   :  { %23657 = vmatprep.mubr.msk.f32.mxu1 %vm28339_vm1, %v28338_v0 }
 0xe5d   :  { %23658 = vmatmul.mubr.msk.f32.gmra.mrb[28].mxu1 %vm26_vm0, %v34574_v6 }
 0xe5e   :  { %23660 = vmatprep.mubr.msk.f32.mxu1 %vm28339_vm1, %v28338_v0 }
 0xe61   :  { %23661 = vmatmul.mubr.msk.f32.gmra.mrb[30].mxu1 %vm26_vm0, %v34580_v62 }
 0xe62   :  { %23663 = vmatprep.mubr.msk.f32.mxu1 %vm28339_vm1, %v28338_v0 }
 0xe65   :  { %23664 = vmatmul.mubr.msk.f32.gmra.mrb[32].mxu1 %vm26_vm0, %v34586_v44 }
 0xe66   :  { %23666 = vmatprep.mubr.msk.f32.mxu1 %vm28339_vm1, %v28338_v0 }
 0xe69   :  { %23667 = vmatmul.mubr.msk.f32.gmra.mrb[34].mxu1 %vm26_vm0, %v34592_v54 }
 0xe6a   :  { %23669 = vmatprep.mubr.msk.f32.mxu1 %vm28339_vm1, %v28338_v0 }
 0xe6d   :  { %23670 = vmatmul.mubr.msk.f32.gmra.mrb[36].mxu1 %vm26_vm0, %v34598_v49 }
 0xe6e   :  { %23672 = vmatprep.mubr.msk.f32.mxu1 %vm28339_vm1, %v28338_v0 }
 0xe71   :  { %23673 = vmatmul.mubr.msk.f32.gmra.mrb[38].mxu1 %vm26_vm0, %v34604_v46 }
 0xe72   :  { %23675 = vmatprep.mubr.msk.f32.mxu1 %vm28339_vm1, %v28338_v0 }
 0xe75   :  { %23676 = vmatmul.mubr.msk.f32.gmra.mrb[40].mxu1 %vm26_vm0, %v34610_v39 }
 0xe76   :  { %23678 = vmatprep.mubr.msk.f32.mxu1 %vm28339_vm1, %v28338_v0 }
 0xe79   :  { %23679 = vmatmul.mubr.msk.f32.gmra.mrb[42].mxu1 %vm26_vm0, %v34616_v61 }
 0xe7a   :  { %23681 = vmatprep.mubr.msk.f32.mxu1 %vm28339_vm1, %v28338_v0 }
 0xe7d   :  { %23682 = vmatmul.mubr.msk.f32.gmra.mrb[44].mxu1 %vm26_vm0, %v34622_v51  ;;  %v34640_v51 = vld [vmem:[#allocation2 + $0x20f] sm:$0xff] }
 0xe7e   :  { %23684 = vmatprep.mubr.msk.f32.mxu1 %vm28339_vm1, %v28338_v0  ;;  %37651 = vst [vmem:[#allocation46_spill] sm:$0xff] %v34640_v51 }
 0xe81   :  { %23685 = vmatmul.mubr.msk.f32.gmra.mrb[46].mxu1 %vm26_vm0, %v34628_v60  ;;  %v34646_v60 = vld [vmem:[#allocation2 + $0x217] sm:$0xff] }
 0xe82   :  { %23687 = vmatprep.mubr.msk.f32.mxu1 %vm28339_vm1, %v28338_v0  ;;  %37652 = vst [vmem:[#allocation47_spill] sm:$0xff] %v34646_v60 }
 0xe85   :  { %23688 = vmatmul.mubr.msk.f32.gmra.mrb[48].mxu1 %vm26_vm0, %v34634_v27  ;;  %v34652_v27 = vld [vmem:[#allocation2 + $0x21f] sm:$0xff] }
 0xe86   :  { %23690 = vmatprep.mubr.msk.f32.mxu1 %vm28339_vm1, %v28338_v0  ;;  %37653 = vst [vmem:[#allocation48_spill] sm:$0xff] %v34652_v27 }
 0xe89   :  { %23691 = vmatmul.mubr.msk.f32.gmra.mrb[50].mxu1 %vm26_vm0, %v34640_v51  ;;  %v34658_v51 = vld [vmem:[#allocation2 + $0x227] sm:$0xff] }
 0xe8a   :  { %23693 = vmatprep.mubr.msk.f32.mxu1 %vm28339_vm1, %v28338_v0  ;;  %37654 = vst [vmem:[#allocation49_spill] sm:$0xff] %v34658_v51 }
 0xe8d   :  { %23694 = vmatmul.mubr.msk.f32.gmra.mrb[52].mxu1 %vm26_vm0, %v34646_v60  ;;  %v34664_v60 = vld [vmem:[#allocation2 + $0x22f] sm:$0xff] }
 0xe8e   :  { %23696 = vmatprep.mubr.msk.f32.mxu1 %vm28339_vm1, %v28338_v0  ;;  %37655 = vst [vmem:[#allocation50_spill] sm:$0xff] %v34664_v60 }
 0xe91   :  { %23697 = vmatmul.mubr.msk.f32.gmra.mrb[54].mxu1 %vm26_vm0, %v34652_v27  ;;  %v34670_v27 = vld [vmem:[#allocation2 + $0x237] sm:$0xff] }
 0xe92   :  { %23699 = vmatprep.mubr.msk.f32.mxu1 %vm28339_vm1, %v28338_v0  ;;  %37656 = vst [vmem:[#allocation51_spill] sm:$0xff] %v34670_v27 }
 0xe95   :  { %23700 = vmatmul.mubr.msk.f32.gmra.mrb[56].mxu1 %vm26_vm0, %v34658_v51  ;;  %v34676_v51 = vld [vmem:[#allocation2 + $0x23f] sm:$0xff] }
 0xe96   :  { %23702 = vmatprep.mubr.msk.f32.mxu1 %vm28339_vm1, %v28338_v0  ;;  %37657 = vst [vmem:[#allocation52_spill] sm:$0xff] %v34676_v51 }
 0xe99   :  { %23703 = vmatmul.mubr.msk.f32.gmra.mrb[58].mxu1 %vm26_vm0, %v34664_v60  ;;  %v34682_v60 = vld [vmem:[#allocation2 + $0x247] sm:$0xff] }
 0xe9a   :  { %23705 = vmatprep.mubr.msk.f32.mxu1 %vm28339_vm1, %v28338_v0  ;;  %37658 = vst [vmem:[#allocation53_spill] sm:$0xff] %v34682_v60 }
 0xe9d   :  { %23706 = vmatmul.mubr.msk.f32.gmra.mrb[60].mxu1 %vm26_vm0, %v34670_v27  ;;  %v34688_v27 = vld [vmem:[#allocation2 + $0x24f] sm:$0xff] }
 0xe9e   :  { %23708 = vmatprep.mubr.msk.f32.mxu1 %vm28339_vm1, %v28338_v0  ;;  %37659 = vst [vmem:[#allocation54_spill] sm:$0xff] %v34688_v27 }
 0xea1   :  { %23709 = vmatmul.mubr.msk.f32.gmra.mrb[62].mxu1 %vm26_vm0, %v34676_v51  ;;  %v34694_v51 = vld [vmem:[#allocation2 + $0x257] sm:$0xff] }
 0xea2   :  { %23711 = vmatprep.mubr.msk.f32.mxu1 %vm28339_vm1, %v28338_v0  ;;  %37660 = vst [vmem:[#allocation55_spill] sm:$0xff] %v34694_v51 }
 0xea5   :  { %23712 = vmatmul.mubr.msk.f32.gmra.mrb[64].mxu1 %vm26_vm0, %v34682_v60  ;;  %v34700_v60 = vld [vmem:[#allocation2 + $0x25f] sm:$0xff] }
 0xea6   :  { %23714 = vmatprep.mubr.msk.f32.mxu1 %vm28339_vm1, %v28338_v0  ;;  %37661 = vst [vmem:[#allocation56_spill] sm:$0xff] %v34700_v60 }
 0xea9   :  { %23715 = vmatmul.mubr.msk.f32.gmra.mrb[66].mxu1 %vm26_vm0, %v34688_v27  ;;  %v34706_v27 = vld [vmem:[#allocation2 + $0x267] sm:$0xff] }
 0xeaa   :  { %23717 = vmatprep.mubr.msk.f32.mxu1 %vm28339_vm1, %v28338_v0  ;;  %37662 = vst [vmem:[#allocation57_spill] sm:$0xff] %v34706_v27 }
 0xead   :  { %23718 = vmatmul.mubr.msk.f32.gmra.mrb[68].mxu1 %vm26_vm0, %v34694_v51  ;;  %v34712_v51 = vld [vmem:[#allocation2 + $0x26f] sm:$0xff] }
 0xeae   :  { %23720 = vmatprep.mubr.msk.f32.mxu1 %vm28339_vm1, %v28338_v0  ;;  %37663 = vst [vmem:[#allocation58_spill] sm:$0xff] %v34712_v51 }
 0xeb1   :  { %23721 = vmatmul.mubr.msk.f32.gmra.mrb[70].mxu1 %vm26_vm0, %v34700_v60  ;;  %v34718_v60 = vld [vmem:[#allocation2 + $0x277] sm:$0xff] }
 0xeb2   :  { %23723 = vmatprep.mubr.msk.f32.mxu1 %vm28339_vm1, %v28338_v0  ;;  %37664 = vst [vmem:[#allocation59_spill] sm:$0xff] %v34718_v60 }
 0xeb5   :  { %23724 = vmatmul.mubr.msk.f32.gmra.mrb[72].mxu1 %vm26_vm0, %v34706_v27  ;;  %v34724_v27 = vld [vmem:[#allocation2 + $0x27f] sm:$0xff] }
 0xeb6   :  { %23726 = vmatprep.mubr.msk.f32.mxu1 %vm28339_vm1, %v28338_v0 }
 0xeb9   :  { %23727 = vmatmul.mubr.msk.f32.gmra.mrb[74].mxu1 %vm26_vm0, %v34712_v51  ;;  %v34730_v51 = vld [vmem:[#allocation2 + $0x287] sm:$0xff] }
 0xeba   :  { %23729 = vmatprep.mubr.msk.f32.mxu1 %vm28339_vm1, %v28338_v0 }
 0xebd   :  { %23730 = vmatmul.mubr.msk.f32.gmra.mrb[76].mxu1 %vm26_vm0, %v34718_v60  ;;  %v18749_v60 = vld [vmem:[%s37467_s3 + $0x20] sm:$0xff] }
 0xebe   :  { %23732 = vmatprep.mubr.msk.f32.mxu1 %vm28339_vm1, %v28338_v0 }
 0xec1   :  { %23733 = vmatmul.mubr.msk.f32.gmra.mrb[78].mxu1 %vm26_vm0, %v34724_v27 }
 0xec2   :  { %23735 = vmatprep.mubr.msk.f32.mxu1 %vm28339_vm1, %v28338_v0 }
 0xec5   :  { %23736 = vmatmul.mubr.msk.f32.gmra.mrb[80].mxu1 %vm26_vm0, %v34730_v51 }
 0xec6   :  { %23740 = vmatprep.mubr.msk.f32.mxu1 %vm28339_vm1, %v28338_v0 }
 0xec9   :  { %23741 = vmatmul.mubr.msk.f32.vlgmr.msra.gmra.mrb[82].mxu1 %vm26_vm0, %v34262_v48  ;;  %v12276_v48 = vld [vmem:[#allocation2 + $0xb8] sm:$0xff] }
 0xeca   :  { %23984 = vmatpush3.msra.mxu1 %v18749_v60  ;;  %23743 = vmatprep.mubr.msk.f32.mxu1 %vm28339_vm1, %v28338_v0  ;;  %v37665_v60 = vld [vmem:[#allocation43_spill] sm:$0xff] }
 0xecb   :  { %24228 = vmatprep.subr.mxu1 %v28338_v0 }
 0xecd   :  { %23744 = vmatmul.mubr.msk.f32.gmra.mrb[84].mxu1 %vm26_vm0, %v34268_v56  ;;  %v12277_v56 = vld [vmem:[#allocation2 + $0xc0] sm:$0xff] }
 0xece   :  { %23746 = vmatprep.mubr.msk.f32.mxu1 %vm28339_vm1, %v28338_v0 }
 0xed1   :  { %23747 = vmatmul.mubr.msk.f32.gmra.mrb[86].mxu1 %vm26_vm0, %v34274_v47  ;;  %v12278_v47 = vld [vmem:[#allocation2 + $0xc8] sm:$0xff] }
 0xed2   :  { %23749 = vmatprep.mubr.msk.f32.mxu1 %vm28339_vm1, %v28338_v0 }
 0xed5   :  { %23750 = vmatmul.mubr.msk.f32.gmra.mrb[88].mxu1 %vm26_vm0, %v34280_v52  ;;  %v12279_v52 = vld [vmem:[#allocation2 + $0xd0] sm:$0xff] }
 0xed6   :  { %23752 = vmatprep.mubr.msk.f32.mxu1 %vm28339_vm1, %v28338_v0 }
 0xed9   :  { %23753 = vmatmul.mubr.msk.f32.gmra.mrb[90].mxu1 %vm26_vm0, %v34286_v26  ;;  %v12280_v26 = vld [vmem:[#allocation2 + $0xd8] sm:$0xff] }
 0xeda   :  { %23755 = vmatprep.mubr.msk.f32.mxu1 %vm28339_vm1, %v28338_v0 }
 0xedd   :  { %23756 = vmatmul.mubr.msk.f32.gmra.mrb[92].mxu1 %vm26_vm0, %v34292_v3  ;;  %v12281_v3 = vld [vmem:[#allocation2 + $0xe0] sm:$0xff] }
 0xede   :  { %23758 = vmatprep.mubr.msk.f32.mxu1 %vm28339_vm1, %v28338_v0 }
 0xee1   :  { %23759 = vmatmul.mubr.msk.f32.gmra.mrb[94].mxu1 %vm26_vm0, %v34298_v58  ;;  %v12282_v58 = vld [vmem:[#allocation2 + $0xe8] sm:$0xff] }
 0xee2   :  { %23761 = vmatprep.mubr.msk.f32.mxu1 %vm28339_vm1, %v28338_v0 }
 0xee5   :  { %23762 = vmatmul.mubr.msk.f32.gmra.mrb[96].mxu1 %vm26_vm0, %v34304_v40  ;;  %v12283_v40 = vld [vmem:[#allocation2 + $0xf0] sm:$0xff] }
 0xee6   :  { %23764 = vmatprep.mubr.msk.f32.mxu1 %vm28339_vm1, %v28338_v0 }
 0xee9   :  { %23765 = vmatmul.mubr.msk.f32.gmra.mrb[98].mxu1 %vm26_vm0, %v34310_v57  ;;  %v12284_v57 = vld [vmem:[#allocation2 + $0xf8] sm:$0xff] }
 0xeea   :  { %23767 = vmatprep.mubr.msk.f32.mxu1 %vm28339_vm1, %v28338_v0 }
 0xeed   :  { %23768 = vmatmul.mubr.msk.f32.gmra.mrb[100].mxu1 %vm26_vm0, %v34316_v28  ;;  %v12285_v28 = vld [vmem:[#allocation2 + $0x100] sm:$0xff] }
 0xeee   :  { %23770 = vmatprep.mubr.msk.f32.mxu1 %vm28339_vm1, %v28338_v0 }
 0xef1   :  { %23771 = vmatmul.mubr.msk.f32.gmra.mrb[102].mxu1 %vm26_vm0, %v34322_v59  ;;  %v12286_v59 = vld [vmem:[#allocation2 + $0x108] sm:$0xff] }
 0xef2   :  { %23773 = vmatprep.mubr.msk.f32.mxu1 %vm28339_vm1, %v28338_v0 }
 0xef5   :  { %23774 = vmatmul.mubr.msk.f32.gmra.mrb[104].mxu1 %vm26_vm0, %v34328_v25  ;;  %v12287_v25 = vld [vmem:[#allocation2 + $0x110] sm:$0xff] }
 0xef6   :  { %23776 = vmatprep.mubr.msk.f32.mxu1 %vm28339_vm1, %v28338_v0 }
 0xef9   :  { %23777 = vmatmul.mubr.msk.f32.gmra.mrb[106].mxu1 %vm26_vm0, %v34334_v17  ;;  %v12288_v17 = vld [vmem:[#allocation2 + $0x118] sm:$0xff] }
 0xefa   :  { %23779 = vmatprep.mubr.msk.f32.mxu1 %vm28339_vm1, %v28338_v0 }
 0xefd   :  { %23780 = vmatmul.mubr.msk.f32.gmra.mrb[108].mxu1 %vm26_vm0, %v34340_v29  ;;  %v12289_v29 = vld [vmem:[#allocation2 + $0x120] sm:$0xff] }
 0xefe   :  { %23782 = vmatprep.mubr.msk.f32.mxu1 %vm28339_vm1, %v28338_v0 }
 0xf01   :  { %23783 = vmatmul.mubr.msk.f32.gmra.mrb[110].mxu1 %vm26_vm0, %v34346_v32  ;;  %v12290_v32 = vld [vmem:[#allocation2 + $0x128] sm:$0xff] }
 0xf02   :  { %23785 = vmatprep.mubr.msk.f32.mxu1 %vm28339_vm1, %v28338_v0 }
 0xf05   :  { %23786 = vmatmul.mubr.msk.f32.gmra.mrb[112].mxu1 %vm26_vm0, %v34352_v41  ;;  %v12291_v41 = vld [vmem:[#allocation2 + $0x130] sm:$0xff] }
 0xf06   :  { %23788 = vmatprep.mubr.msk.f32.mxu1 %vm28339_vm1, %v28338_v0 }
 0xf09   :  { %23789 = vmatmul.mubr.msk.f32.gmra.mrb[114].mxu1 %vm26_vm0, %v34358_v31  ;;  %v12292_v31 = vld [vmem:[#allocation2 + $0x138] sm:$0xff] }
 0xf0a   :  { %23791 = vmatprep.mubr.msk.f32.mxu1 %vm28339_vm1, %v28338_v0 }
 0xf0d   :  { %23792 = vmatmul.mubr.msk.f32.gmra.mrb[116].mxu1 %vm26_vm0, %v34364_v9  ;;  %v12293_v9 = vld [vmem:[#allocation2 + $0x140] sm:$0xff] }
 0xf0e   :  { %23794 = vmatprep.mubr.msk.f32.mxu1 %vm28339_vm1, %v28338_v0 }
 0xf11   :  { %23795 = vmatmul.mubr.msk.f32.gmra.mrb[118].mxu1 %vm26_vm0, %v34370_v21  ;;  %v12294_v21 = vld [vmem:[#allocation2 + $0x148] sm:$0xff] }
 0xf12   :  { %23797 = vmatprep.mubr.msk.f32.mxu1 %vm28339_vm1, %v28338_v0 }
 0xf15   :  { %23798 = vmatmul.mubr.msk.f32.gmra.mrb[120].mxu1 %vm26_vm0, %v34376_v63  ;;  %v12295_v63 = vld [vmem:[#allocation2 + $0x150] sm:$0xff] }
 0xf16   :  { %23800 = vmatprep.mubr.msk.f32.mxu1 %vm28339_vm1, %v28338_v0 }
 0xf19   :  { %23801 = vmatmul.mubr.msk.f32.gmra.mrb[122].mxu1 %vm26_vm0, %v34382_v23  ;;  %v12296_v23 = vld [vmem:[#allocation2 + $0x158] sm:$0xff] }
 0xf1a   :  { %23803 = vmatprep.mubr.msk.f32.mxu1 %vm28339_vm1, %v28338_v0 }
 0xf1d   :  { %23804 = vmatmul.mubr.msk.f32.gmra.mrb[124].mxu1 %vm26_vm0, %v34388_v37  ;;  %v12297_v37 = vld [vmem:[#allocation2 + $0x160] sm:$0xff] }
 0xf1e   :  { %23806 = vmatprep.mubr.msk.f32.mxu1 %vm28339_vm1, %v28338_v0 }
 0xf21   :  { %23807 = vmatmul.mubr.msk.f32.gmra.mrb[126].mxu1 %vm26_vm0, %v34394_v2  ;;  %v12298_v2 = vld [vmem:[#allocation2 + $0x168] sm:$0xff] }
 0xf22   :  { %23809 = vmatprep.mubr.msk.f32.mxu1 %vm28339_vm1, %v28338_v0 }
 0xf25   :  { %23810 = vmatmul.mubr.msk.f32.gmra.mrb[128].mxu1 %vm26_vm0, %v34400_v1  ;;  %v12275_v1 = vld [vmem:[#allocation2 + $0xb0] sm:$0xff] }
 0xf26   :  { %23812 = vmatprep.mubr.msk.f32.mxu1 %vm28339_vm1, %v28338_v0 }
 0xf29   :  { %23813 = vmatmul.mubr.msk.f32.gmra.mrb[130].mxu1 %vm26_vm0, %v34406_v42  ;;  %v12274_v42 = vld [vmem:[#allocation2 + $0xa8] sm:$0xff] }
 0xf2a   :  { %23815 = vmatprep.mubr.msk.f32.mxu1 %vm28339_vm1, %v28338_v0 }
 0xf2d   :  { %23816 = vmatmul.mubr.msk.f32.gmra.mrb[132].mxu1 %vm26_vm0, %v34412_v38  ;;  %v12273_v38 = vld [vmem:[#allocation2 + $0xa0] sm:$0xff] }
 0xf2e   :  { %23818 = vmatprep.mubr.msk.f32.mxu1 %vm28339_vm1, %v28338_v0 }
 0xf31   :  { %23819 = vmatmul.mubr.msk.f32.gmra.mrb[134].mxu1 %vm26_vm0, %v34418_v19  ;;  %v12272_v19 = vld [vmem:[#allocation2 + $0x98] sm:$0xff] }
 0xf32   :  { %23821 = vmatprep.mubr.msk.f32.mxu1 %vm28339_vm1, %v28338_v0 }
 0xf35   :  { %23822 = vmatmul.mubr.msk.f32.gmra.mrb[136].mxu1 %vm26_vm0, %v34424_v7  ;;  %v12271_v7 = vld [vmem:[#allocation2 + $0x90] sm:$0xff] }
 0xf36   :  { %23824 = vmatprep.mubr.msk.f32.mxu1 %vm28339_vm1, %v28338_v0 }
 0xf39   :  { %23825 = vmatmul.mubr.msk.f32.gmra.mrb[138].mxu1 %vm26_vm0, %v34430_v4  ;;  %v12270_v4 = vld [vmem:[#allocation2 + $0x88] sm:$0xff] }
 0xf3a   :  { %23827 = vmatprep.mubr.msk.f32.mxu1 %vm28339_vm1, %v28338_v0 }
 0xf3d   :  { %23828 = vmatmul.mubr.msk.f32.gmra.mrb[140].mxu1 %vm26_vm0, %v34436_v5  ;;  %v12269_v5 = vld [vmem:[#allocation2 + $0x80] sm:$0xff] }
 0xf3e   :  { %23830 = vmatprep.mubr.msk.f32.mxu1 %vm28339_vm1, %v28338_v0 }
 0xf41   :  { %23831 = vmatmul.mubr.msk.f32.gmra.mrb[142].mxu1 %vm26_vm0, %v34442_v20  ;;  %v12268_v20 = vld [vmem:[#allocation2 + $0x78] sm:$0xff] }
 0xf42   :  { %23833 = vmatprep.mubr.msk.f32.mxu1 %vm28339_vm1, %v28338_v0 }
 0xf45   :  { %23834 = vmatmul.mubr.msk.f32.gmra.mrb[144].mxu1 %vm26_vm0, %v34448_v55  ;;  %v12267_v55 = vld [vmem:[#allocation2 + $0x70] sm:$0xff] }
 0xf46   :  { %23836 = vmatprep.mubr.msk.f32.mxu1 %vm28339_vm1, %v28338_v0 }
 0xf49   :  { %23837 = vmatmul.mubr.msk.f32.gmra.mrb[146].mxu1 %vm26_vm0, %v34454_v13  ;;  %v12266_v13 = vld [vmem:[#allocation2 + $0x68] sm:$0xff] }
 0xf4a   :  { %23839 = vmatprep.mubr.msk.f32.mxu1 %vm28339_vm1, %v28338_v0 }
 0xf4d   :  { %23840 = vmatmul.mubr.msk.f32.gmra.mrb[148].mxu1 %vm26_vm0, %v34460_v11  ;;  %v12265_v11 = vld [vmem:[#allocation2 + $0x60] sm:$0xff] }
 0xf4e   :  { %23842 = vmatprep.mubr.msk.f32.mxu1 %vm28339_vm1, %v28338_v0 }
 0xf51   :  { %23843 = vmatmul.mubr.msk.f32.gmra.mrb[150].mxu1 %vm26_vm0, %v34466_v12  ;;  %v12264_v12 = vld [vmem:[#allocation2 + $0x58] sm:$0xff] }
 0xf52   :  { %23845 = vmatprep.mubr.msk.f32.mxu1 %vm28339_vm1, %v28338_v0 }
 0xf55   :  { %23846 = vmatmul.mubr.msk.f32.gmra.mrb[152].mxu1 %vm26_vm0, %v34472_v45  ;;  %v12263_v45 = vld [vmem:[#allocation2 + $0x50] sm:$0xff] }
 0xf56   :  { %23848 = vmatprep.mubr.msk.f32.mxu1 %vm28339_vm1, %v28338_v0 }
 0xf59   :  { %23849 = vmatmul.mubr.msk.f32.gmra.mrb[154].mxu1 %vm26_vm0, %v34478_v10  ;;  %v12262_v10 = vld [vmem:[#allocation2 + $0x48] sm:$0xff] }
 0xf5a   :  { %23851 = vmatprep.mubr.msk.f32.mxu1 %vm28339_vm1, %v28338_v0 }
 0xf5d   :  { %23852 = vmatmul.mubr.msk.f32.gmra.mrb[156].mxu1 %vm26_vm0, %v34484_v53  ;;  %v12261_v53 = vld [vmem:[#allocation2 + $0x40] sm:$0xff] }
 0xf5e   :  { %23854 = vmatprep.mubr.msk.f32.mxu1 %vm28339_vm1, %v28338_v0 }
 0xf61   :  { %23855 = vmatmul.mubr.msk.f32.gmra.mrb[158].mxu1 %vm26_vm0, %v34490_v43  ;;  %v12260_v43 = vld [vmem:[#allocation2 + $0x38] sm:$0xff] }
 0xf62   :  { %23857 = vmatprep.mubr.msk.f32.mxu1 %vm28339_vm1, %v28338_v0 }
 0xf65   :  { %23858 = vmatmul.mubr.msk.f32.gmra.mrb[160].mxu1 %vm26_vm0, %v34496_v35  ;;  %v12259_v35 = vld [vmem:[#allocation2 + $0x30] sm:$0xff] }
 0xf66   :  { %23860 = vmatprep.mubr.msk.f32.mxu1 %vm28339_vm1, %v28338_v0 }
 0xf69   :  { %23861 = vmatmul.mubr.msk.f32.gmra.mrb[0].mxu1 %vm26_vm0, %v34502_v36  ;;  %v12258_v36 = vld [vmem:[#allocation2 + $0x28] sm:$0xff] }
 0xf6a   :  { %23863 = vmatprep.mubr.msk.f32.mxu1 %vm28339_vm1, %v28338_v0 }
 0xf6d   :  { %23864 = vmatmul.mubr.msk.f32.gmra.mrb[2].mxu1 %vm26_vm0, %v34508_v33  ;;  %v12257_v33 = vld [vmem:[#allocation2 + $0x20] sm:$0xff] }
 0xf6e   :  { %23866 = vmatprep.mubr.msk.f32.mxu1 %vm28339_vm1, %v28338_v0 }
 0xf71   :  { %23867 = vmatmul.mubr.msk.f32.gmra.mrb[4].mxu1 %vm26_vm0, %v34514_v30  ;;  %v11459_v30 = vld [vmem:[#allocation2 + $0x297] sm:$0xff] }
 0xf72   :  { %23869 = vmatprep.mubr.msk.f32.mxu1 %vm28339_vm1, %v28338_v0 }
 0xf75   :  { %23870 = vmatmul.mubr.msk.f32.gmra.mrb[6].mxu1 %vm26_vm0, %v34520_v22  ;;  %v11458_v22 = vld [vmem:[#allocation2 + $0x28f] sm:$0xff] }
 0xf76   :  { %23872 = vmatprep.mubr.msk.f32.mxu1 %vm28339_vm1, %v28338_v0 }
 0xf79   :  { %23873 = vmatmul.mubr.msk.f32.gmra.mrb[8].mxu1 %vm26_vm0, %v34526_v50  ;;  %v37681_v50 = vld [vmem:[#allocation59_spill] sm:$0xff] }
 0xf7a   :  { %23875 = vmatprep.mubr.msk.f32.mxu1 %vm28339_vm1, %v28338_v0 }
 0xf7d   :  { %23876 = vmatmul.mubr.msk.f32.gmra.mrb[10].mxu1 %vm26_vm0, %v34532_v16  ;;  %v37680_v16 = vld [vmem:[#allocation58_spill] sm:$0xff] }
 0xf7e   :  { %23878 = vmatprep.mubr.msk.f32.mxu1 %vm28339_vm1, %v28338_v0 }
 0xf81   :  { %23879 = vmatmul.mubr.msk.f32.gmra.mrb[12].mxu1 %vm26_vm0, %v34538_v18  ;;  %v37679_v18 = vld [vmem:[#allocation57_spill] sm:$0xff] }
 0xf82   :  { %23881 = vmatprep.mubr.msk.f32.mxu1 %vm28339_vm1, %v28338_v0 }
 0xf85   :  { %23882 = vmatmul.mubr.msk.f32.gmra.mrb[14].mxu1 %vm26_vm0, %v34544_v15  ;;  %v37678_v15 = vld [vmem:[#allocation56_spill] sm:$0xff] }
 0xf86   :  { %23884 = vmatprep.mubr.msk.f32.mxu1 %vm28339_vm1, %v28338_v0 }
 0xf89   :  { %23885 = vmatmul.mubr.msk.f32.gmra.mrb[16].mxu1 %vm26_vm0, %v34550_v14  ;;  %v37677_v14 = vld [vmem:[#allocation55_spill] sm:$0xff] }
 0xf8a   :  { %23887 = vmatprep.mubr.msk.f32.mxu1 %vm28339_vm1, %v28338_v0 }
 0xf8d   :  { %23888 = vmatmul.mubr.msk.f32.gmra.mrb[18].mxu1 %vm26_vm0, %v34556_v34  ;;  %v37676_v34 = vld [vmem:[#allocation54_spill] sm:$0xff] }
 0xf8e   :  { %23890 = vmatprep.mubr.msk.f32.mxu1 %vm28339_vm1, %v28338_v0 }
 0xf91   :  { %23891 = vmatmul.mubr.msk.f32.gmra.mrb[20].mxu1 %vm26_vm0, %v34562_v8  ;;  %v37675_v8 = vld [vmem:[#allocation53_spill] sm:$0xff] }
 0xf92   :  { %23893 = vmatprep.mubr.msk.f32.mxu1 %vm28339_vm1, %v28338_v0 }
 0xf95   :  { %23894 = vmatmul.mubr.msk.f32.gmra.mrb[22].mxu1 %vm26_vm0, %v34568_v24  ;;  %v37674_v24 = vld [vmem:[#allocation52_spill] sm:$0xff] }
 0xf96   :  { %23896 = vmatprep.mubr.msk.f32.mxu1 %vm28339_vm1, %v28338_v0 }
 0xf99   :  { %23897 = vmatmul.mubr.msk.f32.gmra.mrb[24].mxu1 %vm26_vm0, %v34574_v6  ;;  %v37673_v6 = vld [vmem:[#allocation51_spill] sm:$0xff] }
 0xf9a   :  { %23899 = vmatprep.mubr.msk.f32.mxu1 %vm28339_vm1, %v28338_v0 }
 0xf9d   :  { %23900 = vmatmul.mubr.msk.f32.gmra.mrb[26].mxu1 %vm26_vm0, %v34580_v62  ;;  %v37672_v62 = vld [vmem:[#allocation50_spill] sm:$0xff] }
 0xf9e   :  { %23902 = vmatprep.mubr.msk.f32.mxu1 %vm28339_vm1, %v28338_v0 }
 0xfa1   :  { %23903 = vmatmul.mubr.msk.f32.gmra.mrb[28].mxu1 %vm26_vm0, %v34586_v44  ;;  %v37671_v44 = vld [vmem:[#allocation49_spill] sm:$0xff] }
 0xfa2   :  { %23905 = vmatprep.mubr.msk.f32.mxu1 %vm28339_vm1, %v28338_v0 }
 0xfa5   :  { %23906 = vmatmul.mubr.msk.f32.gmra.mrb[30].mxu1 %vm26_vm0, %v34592_v54  ;;  %v37670_v54 = vld [vmem:[#allocation48_spill] sm:$0xff] }
 0xfa6   :  { %23908 = vmatprep.mubr.msk.f32.mxu1 %vm28339_vm1, %v28338_v0 }
 0xfa9   :  { %23909 = vmatmul.mubr.msk.f32.gmra.mrb[32].mxu1 %vm26_vm0, %v34598_v49  ;;  %v37669_v49 = vld [vmem:[#allocation47_spill] sm:$0xff] }
 0xfaa   :  { %23911 = vmatprep.mubr.msk.f32.mxu1 %vm28339_vm1, %v28338_v0 }
 0xfad   :  { %23912 = vmatmul.mubr.msk.f32.gmra.mrb[34].mxu1 %vm26_vm0, %v34604_v46  ;;  %v37666_v46 = vld [vmem:[#allocation44_spill] sm:$0xff] }
 0xfae   :  { %23914 = vmatprep.mubr.msk.f32.mxu1 %vm28339_vm1, %v28338_v0 }
 0xfb1   :  { %23915 = vmatmul.mubr.msk.f32.gmra.mrb[36].mxu1 %vm26_vm0, %v34610_v39  ;;  %v37667_v39 = vld [vmem:[#allocation45_spill] sm:$0xff] }
 0xfb2   :  { %23917 = vmatprep.mubr.msk.f32.mxu1 %vm28339_vm1, %v28338_v0 }
 0xfb5   :  { %23918 = vmatmul.mubr.msk.f32.gmra.mrb[38].mxu1 %vm26_vm0, %v34616_v61  ;;  %v37668_v61 = vld [vmem:[#allocation46_spill] sm:$0xff] }
 0xfb6   :  { %23920 = vmatprep.mubr.msk.f32.mxu1 %vm28339_vm1, %v28338_v0 }
 0xfb9   :  { %23921 = vmatmul.mubr.msk.f32.gmra.mrb[40].mxu1 %vm26_vm0, %v37665_v60  ;;  %v12299_v60 = vld [vmem:[#allocation2 + $0x170] sm:$0xff] }
 0xfba   :  { %23923 = vmatprep.mubr.msk.f32.mxu1 %vm28339_vm1, %v28338_v0 }
 0xfbd   :  { %23924 = vmatmul.mubr.msk.f32.gmra.mrb[42].mxu1 %vm26_vm0, %v37666_v46  ;;  %v12300_v46 = vld [vmem:[#allocation2 + $0x178] sm:$0xff] }
 0xfbe   :  { %23926 = vmatprep.mubr.msk.f32.mxu1 %vm28339_vm1, %v28338_v0 }
 0xfc1   :  { %23927 = vmatmul.mubr.msk.f32.gmra.mrb[44].mxu1 %vm26_vm0, %v37667_v39  ;;  %v12301_v39 = vld [vmem:[#allocation2 + $0x180] sm:$0xff] }
 0xfc2   :  { %23929 = vmatprep.mubr.msk.f32.mxu1 %vm28339_vm1, %v28338_v0 }
 0xfc5   :  { %23930 = vmatmul.mubr.msk.f32.gmra.mrb[46].mxu1 %vm26_vm0, %v37668_v61  ;;  %v12302_v61 = vld [vmem:[#allocation2 + $0x188] sm:$0xff] }
 0xfc6   :  { %23932 = vmatprep.mubr.msk.f32.mxu1 %vm28339_vm1, %v28338_v0 }
 0xfc9   :  { %23933 = vmatmul.mubr.msk.f32.gmra.mrb[48].mxu1 %vm26_vm0, %v37669_v49  ;;  %v12303_v49 = vld [vmem:[#allocation2 + $0x190] sm:$0xff] }
 0xfca   :  { %23935 = vmatprep.mubr.msk.f32.mxu1 %vm28339_vm1, %v28338_v0 }
 0xfcd   :  { %23936 = vmatmul.mubr.msk.f32.gmra.mrb[50].mxu1 %vm26_vm0, %v37670_v54  ;;  %v12304_v54 = vld [vmem:[#allocation2 + $0x198] sm:$0xff] }
 0xfce   :  { %23938 = vmatprep.mubr.msk.f32.mxu1 %vm28339_vm1, %v28338_v0 }
 0xfd1   :  { %23939 = vmatmul.mubr.msk.f32.gmra.mrb[52].mxu1 %vm26_vm0, %v37671_v44  ;;  %v12305_v44 = vld [vmem:[#allocation2 + $0x1a0] sm:$0xff] }
 0xfd2   :  { %23941 = vmatprep.mubr.msk.f32.mxu1 %vm28339_vm1, %v28338_v0 }
 0xfd5   :  { %23942 = vmatmul.mubr.msk.f32.gmra.mrb[54].mxu1 %vm26_vm0, %v37672_v62  ;;  %v12306_v62 = vld [vmem:[#allocation2 + $0x1a8] sm:$0xff] }
 0xfd6   :  { %23944 = vmatprep.mubr.msk.f32.mxu1 %vm28339_vm1, %v28338_v0 }
 0xfd9   :  { %23945 = vmatmul.mubr.msk.f32.gmra.mrb[56].mxu1 %vm26_vm0, %v37673_v6  ;;  %v12307_v6 = vld [vmem:[#allocation2 + $0x1b0] sm:$0xff] }
 0xfda   :  { %23947 = vmatprep.mubr.msk.f32.mxu1 %vm28339_vm1, %v28338_v0 }
 0xfdd   :  { %23948 = vmatmul.mubr.msk.f32.gmra.mrb[58].mxu1 %vm26_vm0, %v37674_v24  ;;  %v12308_v24 = vld [vmem:[#allocation2 + $0x1b8] sm:$0xff] }
 0xfde   :  { %23950 = vmatprep.mubr.msk.f32.mxu1 %vm28339_vm1, %v28338_v0 }
 0xfe1   :  { %23951 = vmatmul.mubr.msk.f32.gmra.mrb[60].mxu1 %vm26_vm0, %v37675_v8  ;;  %v12309_v8 = vld [vmem:[#allocation2 + $0x1c0] sm:$0xff] }
 0xfe2   :  { %23953 = vmatprep.mubr.msk.f32.mxu1 %vm28339_vm1, %v28338_v0 }
 0xfe5   :  { %23954 = vmatmul.mubr.msk.f32.gmra.mrb[62].mxu1 %vm26_vm0, %v37676_v34  ;;  %v12310_v34 = vld [vmem:[#allocation2 + $0x1c8] sm:$0xff] }
 0xfe6   :  { %23956 = vmatprep.mubr.msk.f32.mxu1 %vm28339_vm1, %v28338_v0 }
 0xfe9   :  { %23957 = vmatmul.mubr.msk.f32.gmra.mrb[64].mxu1 %vm26_vm0, %v37677_v14  ;;  %v12311_v14 = vld [vmem:[#allocation2 + $0x1d0] sm:$0xff] }
 0xfea   :  { %23959 = vmatprep.mubr.msk.f32.mxu1 %vm28339_vm1, %v28338_v0 }
 0xfed   :  { %23960 = vmatmul.mubr.msk.f32.gmra.mrb[66].mxu1 %vm26_vm0, %v37678_v15  ;;  %v12312_v15 = vld [vmem:[#allocation2 + $0x1d8] sm:$0xff] }
 0xfee   :  { %23962 = vmatprep.mubr.msk.f32.mxu1 %vm28339_vm1, %v28338_v0 }
 0xff1   :  { %23963 = vmatmul.mubr.msk.f32.gmra.mrb[68].mxu1 %vm26_vm0, %v37679_v18  ;;  %v12313_v18 = vld [vmem:[#allocation2 + $0x1e0] sm:$0xff] }
 0xff2   :  { %23965 = vmatprep.mubr.msk.f32.mxu1 %vm28339_vm1, %v28338_v0 }
 0xff5   :  { %23966 = vmatmul.mubr.msk.f32.gmra.mrb[70].mxu1 %vm26_vm0, %v37680_v16  ;;  %v12314_v16 = vld [vmem:[#allocation2 + $0x1e8] sm:$0xff] }
 0xff6   :  { %23968 = vmatprep.mubr.msk.f32.mxu1 %vm28339_vm1, %v28338_v0 }
 0xff9   :  { %23969 = vmatmul.mubr.msk.f32.gmra.mrb[72].mxu1 %vm26_vm0, %v37681_v50  ;;  %v12315_v50 = vld [vmem:[#allocation2 + $0x1f0] sm:$0xff] }
 0xffa   :  { %23971 = vmatprep.mubr.msk.f32.mxu1 %vm28339_vm1, %v28338_v0 }
 0xffd   :  { %23972 = vmatmul.mubr.msk.f32.gmra.mrb[74].mxu1 %vm26_vm0, %v34724_v27  ;;  %v18831_v27 = vld [vmem:[%s37467_s3 + $0x28] sm:$0xff] }
 0xffe   :  { %23974 = vmatprep.mubr.msk.f32.mxu1 %vm28339_vm1, %v28338_v0 }
0x1001   :  { %23975 = vmatmul.mubr.msk.f32.gmra.mrb[76].mxu1 %vm26_vm0, %v34730_v51  ;;  %v12256_v51 = vld [vmem:[#allocation2 + $0x18] sm:$0xff] }
0x1002   :  { %23977 = vmatprep.mubr.msk.f32.mxu1 %vm28339_vm1, %v28338_v0 }
0x1005   :  { %23978 = vmatmul.mubr.msk.f32.gmra.mrb[78].mxu1 %vm26_vm0, %v11458_v22  ;;  %v12316_v22 = vld [vmem:[#allocation2 + $0x1f8] sm:$0xff] }
0x1006   :  { %23980 = vmatprep.mubr.msk.f32.mxu1 %vm28339_vm1, %v28338_v0 }
0x1009   :  { %23981 = vmatmul.mubr.msk.f32.gmra.mrb[80].mxu1 %vm26_vm0, %v11459_v30  ;;  %v12317_v30 = vld [vmem:[#allocation2 + $0x200] sm:$0xff] }
0x100a   :  { %23985 = vmatprep.mubr.msk.f32.mxu1 %vm28339_vm1, %v28338_v0 }
0x100d   :  { %23986 = vmatmul.mubr.msk.f32.vlgmr.msra.gmra.mrb[82].mxu1 %vm26_vm0, %v12256_v51  ;;  %v12319_v51 = vld [vmem:[#allocation2 + $0x210] sm:$0xff] }
0x100e   :  { %24229 = vmatpush3.msra.mxu1 %v18831_v27  ;;  %23988 = vmatprep.mubr.msk.f32.mxu1 %vm28339_vm1, %v28338_v0  ;;  %v12318_v27 = vld [vmem:[#allocation2 + $0x208] sm:$0xff] }
0x100f   :  { %24473 = vmatprep.subr.mxu1 %v28338_v0 }
0x1011   :  { %23989 = vmatmul.mubr.msk.f32.gmra.mrb[84].mxu1 %vm26_vm0, %v12257_v33  ;;  %v12320_v33 = vld [vmem:[#allocation2 + $0x218] sm:$0xff] }
0x1012   :  { %23991 = vmatprep.mubr.msk.f32.mxu1 %vm28339_vm1, %v28338_v0 }
0x1015   :  { %23992 = vmatmul.mubr.msk.f32.gmra.mrb[86].mxu1 %vm26_vm0, %v12258_v36  ;;  %v12321_v36 = vld [vmem:[#allocation2 + $0x220] sm:$0xff] }
0x1016   :  { %23994 = vmatprep.mubr.msk.f32.mxu1 %vm28339_vm1, %v28338_v0 }
0x1019   :  { %23995 = vmatmul.mubr.msk.f32.gmra.mrb[88].mxu1 %vm26_vm0, %v12259_v35  ;;  %v12322_v35 = vld [vmem:[#allocation2 + $0x228] sm:$0xff] }
0x101a   :  { %23997 = vmatprep.mubr.msk.f32.mxu1 %vm28339_vm1, %v28338_v0 }
0x101d   :  { %23998 = vmatmul.mubr.msk.f32.gmra.mrb[90].mxu1 %vm26_vm0, %v12260_v43  ;;  %v12323_v43 = vld [vmem:[#allocation2 + $0x230] sm:$0xff] }
0x101e   :  { %24000 = vmatprep.mubr.msk.f32.mxu1 %vm28339_vm1, %v28338_v0 }
0x1021   :  { %24001 = vmatmul.mubr.msk.f32.gmra.mrb[92].mxu1 %vm26_vm0, %v12261_v53  ;;  %v12324_v53 = vld [vmem:[#allocation2 + $0x238] sm:$0xff] }
0x1022   :  { %24003 = vmatprep.mubr.msk.f32.mxu1 %vm28339_vm1, %v28338_v0 }
0x1025   :  { %24004 = vmatmul.mubr.msk.f32.gmra.mrb[94].mxu1 %vm26_vm0, %v12262_v10  ;;  %v12325_v10 = vld [vmem:[#allocation2 + $0x240] sm:$0xff] }
0x1026   :  { %24006 = vmatprep.mubr.msk.f32.mxu1 %vm28339_vm1, %v28338_v0 }
0x1029   :  { %24007 = vmatmul.mubr.msk.f32.gmra.mrb[96].mxu1 %vm26_vm0, %v12263_v45  ;;  %v12326_v45 = vld [vmem:[#allocation2 + $0x248] sm:$0xff] }
0x102a   :  { %24009 = vmatprep.mubr.msk.f32.mxu1 %vm28339_vm1, %v28338_v0 }
0x102d   :  { %24010 = vmatmul.mubr.msk.f32.gmra.mrb[98].mxu1 %vm26_vm0, %v12264_v12  ;;  %v12327_v12 = vld [vmem:[#allocation2 + $0x250] sm:$0xff] }
0x102e   :  { %24012 = vmatprep.mubr.msk.f32.mxu1 %vm28339_vm1, %v28338_v0 }
0x1031   :  { %24013 = vmatmul.mubr.msk.f32.gmra.mrb[100].mxu1 %vm26_vm0, %v12265_v11  ;;  %v12328_v11 = vld [vmem:[#allocation2 + $0x258] sm:$0xff] }
0x1032   :  { %24015 = vmatprep.mubr.msk.f32.mxu1 %vm28339_vm1, %v28338_v0 }
0x1035   :  { %24016 = vmatmul.mubr.msk.f32.gmra.mrb[102].mxu1 %vm26_vm0, %v12266_v13  ;;  %v12329_v13 = vld [vmem:[#allocation2 + $0x260] sm:$0xff] }
0x1036   :  { %24018 = vmatprep.mubr.msk.f32.mxu1 %vm28339_vm1, %v28338_v0 }
0x1039   :  { %24019 = vmatmul.mubr.msk.f32.gmra.mrb[104].mxu1 %vm26_vm0, %v12267_v55  ;;  %v12330_v55 = vld [vmem:[#allocation2 + $0x268] sm:$0xff] }
0x103a   :  { %24021 = vmatprep.mubr.msk.f32.mxu1 %vm28339_vm1, %v28338_v0 }
0x103d   :  { %24022 = vmatmul.mubr.msk.f32.gmra.mrb[106].mxu1 %vm26_vm0, %v12268_v20  ;;  %v12331_v20 = vld [vmem:[#allocation2 + $0x270] sm:$0xff] }
0x103e   :  { %24024 = vmatprep.mubr.msk.f32.mxu1 %vm28339_vm1, %v28338_v0 }
0x1041   :  { %24025 = vmatmul.mubr.msk.f32.gmra.mrb[108].mxu1 %vm26_vm0, %v12269_v5  ;;  %v12332_v5 = vld [vmem:[#allocation2 + $0x278] sm:$0xff] }
0x1042   :  { %24027 = vmatprep.mubr.msk.f32.mxu1 %vm28339_vm1, %v28338_v0 }
0x1045   :  { %24028 = vmatmul.mubr.msk.f32.gmra.mrb[110].mxu1 %vm26_vm0, %v12270_v4  ;;  %v12333_v4 = vld [vmem:[#allocation2 + $0x280] sm:$0xff] }
0x1046   :  { %24030 = vmatprep.mubr.msk.f32.mxu1 %vm28339_vm1, %v28338_v0 }
0x1049   :  { %24031 = vmatmul.mubr.msk.f32.gmra.mrb[112].mxu1 %vm26_vm0, %v12271_v7  ;;  %v12334_v7 = vld [vmem:[#allocation2 + $0x288] sm:$0xff] }
0x104a   :  { %24033 = vmatprep.mubr.msk.f32.mxu1 %vm28339_vm1, %v28338_v0 }
0x104d   :  { %24034 = vmatmul.mubr.msk.f32.gmra.mrb[114].mxu1 %vm26_vm0, %v12272_v19  ;;  %v12335_v19 = vld [vmem:[#allocation2 + $0x290] sm:$0xff] }
0x104e   :  { %24036 = vmatprep.mubr.msk.f32.mxu1 %vm28339_vm1, %v28338_v0 }
0x1051   :  { %24037 = vmatmul.mubr.msk.f32.gmra.mrb[116].mxu1 %vm26_vm0, %v12273_v38  ;;  %v12336_v38 = vld [vmem:[#allocation2 + $0x298] sm:$0xff] }
0x1052   :  { %24039 = vmatprep.mubr.msk.f32.mxu1 %vm28339_vm1, %v28338_v0 }
0x1055   :  { %24040 = vmatmul.mubr.msk.f32.gmra.mrb[118].mxu1 %vm26_vm0, %v12274_v42  ;;  %v18913_v42 = vld [vmem:[%s37467_s3 + $0x30] sm:$0xff] }
0x1056   :  { %24042 = vmatprep.mubr.msk.f32.mxu1 %vm28339_vm1, %v28338_v0 }
0x1059   :  { %24043 = vmatmul.mubr.msk.f32.gmra.mrb[120].mxu1 %vm26_vm0, %v12275_v1  ;;  %v13133_v1 = vld [vmem:[#allocation2 + $0x19] sm:$0xff] }
0x105a   :  { %24045 = vmatprep.mubr.msk.f32.mxu1 %vm28339_vm1, %v28338_v0 }
0x105d   :  { %24046 = vmatmul.mubr.msk.f32.gmra.mrb[122].mxu1 %vm26_vm0, %v12276_v48  ;;  %v13134_v48 = vld [vmem:[#allocation2 + $0x21] sm:$0xff] }
0x105e   :  { %24048 = vmatprep.mubr.msk.f32.mxu1 %vm28339_vm1, %v28338_v0 }
0x1061   :  { %24049 = vmatmul.mubr.msk.f32.gmra.mrb[124].mxu1 %vm26_vm0, %v12277_v56  ;;  %v35319_v56 = vld [vmem:[#allocation2 + $0x29] sm:$0xff] }
0x1062   :  { %24051 = vmatprep.mubr.msk.f32.mxu1 %vm28339_vm1, %v28338_v0 }
0x1065   :  { %24052 = vmatmul.mubr.msk.f32.gmra.mrb[126].mxu1 %vm26_vm0, %v12278_v47  ;;  %v35325_v47 = vld [vmem:[#allocation2 + $0x31] sm:$0xff] }
0x1066   :  { %24054 = vmatprep.mubr.msk.f32.mxu1 %vm28339_vm1, %v28338_v0 }
0x1069   :  { %24055 = vmatmul.mubr.msk.f32.gmra.mrb[128].mxu1 %vm26_vm0, %v12279_v52  ;;  %v35331_v52 = vld [vmem:[#allocation2 + $0x39] sm:$0xff] }
0x106a   :  { %24057 = vmatprep.mubr.msk.f32.mxu1 %vm28339_vm1, %v28338_v0 }
0x106d   :  { %24058 = vmatmul.mubr.msk.f32.gmra.mrb[130].mxu1 %vm26_vm0, %v12280_v26  ;;  %v35337_v26 = vld [vmem:[#allocation2 + $0x41] sm:$0xff] }
0x106e   :  { %24060 = vmatprep.mubr.msk.f32.mxu1 %vm28339_vm1, %v28338_v0 }
0x1071   :  { %24061 = vmatmul.mubr.msk.f32.gmra.mrb[132].mxu1 %vm26_vm0, %v12281_v3  ;;  %v35343_v3 = vld [vmem:[#allocation2 + $0x49] sm:$0xff] }
0x1072   :  { %24063 = vmatprep.mubr.msk.f32.mxu1 %vm28339_vm1, %v28338_v0 }
0x1075   :  { %24064 = vmatmul.mubr.msk.f32.gmra.mrb[134].mxu1 %vm26_vm0, %v12282_v58  ;;  %v35349_v58 = vld [vmem:[#allocation2 + $0x51] sm:$0xff] }
0x1076   :  { %24066 = vmatprep.mubr.msk.f32.mxu1 %vm28339_vm1, %v28338_v0 }
0x1079   :  { %24067 = vmatmul.mubr.msk.f32.gmra.mrb[136].mxu1 %vm26_vm0, %v12283_v40  ;;  %v35355_v40 = vld [vmem:[#allocation2 + $0x59] sm:$0xff] }
0x107a   :  { %24069 = vmatprep.mubr.msk.f32.mxu1 %vm28339_vm1, %v28338_v0 }
0x107d   :  { %24070 = vmatmul.mubr.msk.f32.gmra.mrb[138].mxu1 %vm26_vm0, %v12284_v57  ;;  %v35361_v57 = vld [vmem:[#allocation2 + $0x61] sm:$0xff] }
0x107e   :  { %24072 = vmatprep.mubr.msk.f32.mxu1 %vm28339_vm1, %v28338_v0 }
0x1081   :  { %24073 = vmatmul.mubr.msk.f32.gmra.mrb[140].mxu1 %vm26_vm0, %v12285_v28  ;;  %v35367_v28 = vld [vmem:[#allocation2 + $0x69] sm:$0xff] }
0x1082   :  { %24075 = vmatprep.mubr.msk.f32.mxu1 %vm28339_vm1, %v28338_v0 }
0x1085   :  { %24076 = vmatmul.mubr.msk.f32.gmra.mrb[142].mxu1 %vm26_vm0, %v12286_v59  ;;  %v35373_v59 = vld [vmem:[#allocation2 + $0x71] sm:$0xff] }
0x1086   :  { %24078 = vmatprep.mubr.msk.f32.mxu1 %vm28339_vm1, %v28338_v0 }
0x1089   :  { %24079 = vmatmul.mubr.msk.f32.gmra.mrb[144].mxu1 %vm26_vm0, %v12287_v25  ;;  %v35379_v25 = vld [vmem:[#allocation2 + $0x79] sm:$0xff] }
0x108a   :  { %24081 = vmatprep.mubr.msk.f32.mxu1 %vm28339_vm1, %v28338_v0 }
0x108d   :  { %24082 = vmatmul.mubr.msk.f32.gmra.mrb[146].mxu1 %vm26_vm0, %v12288_v17  ;;  %v35385_v17 = vld [vmem:[#allocation2 + $0x81] sm:$0xff] }
0x108e   :  { %24084 = vmatprep.mubr.msk.f32.mxu1 %vm28339_vm1, %v28338_v0 }
0x1091   :  { %24085 = vmatmul.mubr.msk.f32.gmra.mrb[148].mxu1 %vm26_vm0, %v12289_v29  ;;  %v35391_v29 = vld [vmem:[#allocation2 + $0x89] sm:$0xff] }
0x1092   :  { %24087 = vmatprep.mubr.msk.f32.mxu1 %vm28339_vm1, %v28338_v0 }
0x1095   :  { %24088 = vmatmul.mubr.msk.f32.gmra.mrb[150].mxu1 %vm26_vm0, %v12290_v32  ;;  %v35397_v32 = vld [vmem:[#allocation2 + $0x91] sm:$0xff] }
0x1096   :  { %24090 = vmatprep.mubr.msk.f32.mxu1 %vm28339_vm1, %v28338_v0 }
0x1099   :  { %24091 = vmatmul.mubr.msk.f32.gmra.mrb[152].mxu1 %vm26_vm0, %v12291_v41  ;;  %v35403_v41 = vld [vmem:[#allocation2 + $0x99] sm:$0xff] }
0x109a   :  { %24093 = vmatprep.mubr.msk.f32.mxu1 %vm28339_vm1, %v28338_v0 }
0x109d   :  { %24094 = vmatmul.mubr.msk.f32.gmra.mrb[154].mxu1 %vm26_vm0, %v12292_v31  ;;  %v35409_v31 = vld [vmem:[#allocation2 + $0xa1] sm:$0xff] }
0x109e   :  { %24096 = vmatprep.mubr.msk.f32.mxu1 %vm28339_vm1, %v28338_v0 }
0x10a1   :  { %24097 = vmatmul.mubr.msk.f32.gmra.mrb[156].mxu1 %vm26_vm0, %v12293_v9  ;;  %v35415_v9 = vld [vmem:[#allocation2 + $0xa9] sm:$0xff] }
0x10a2   :  { %24099 = vmatprep.mubr.msk.f32.mxu1 %vm28339_vm1, %v28338_v0 }
0x10a5   :  { %24100 = vmatmul.mubr.msk.f32.gmra.mrb[158].mxu1 %vm26_vm0, %v12294_v21  ;;  %v35421_v21 = vld [vmem:[#allocation2 + $0xb1] sm:$0xff] }
0x10a6   :  { %24102 = vmatprep.mubr.msk.f32.mxu1 %vm28339_vm1, %v28338_v0 }
0x10a9   :  { %24103 = vmatmul.mubr.msk.f32.gmra.mrb[160].mxu1 %vm26_vm0, %v12295_v63  ;;  %v35427_v63 = vld [vmem:[#allocation2 + $0xb9] sm:$0xff] }
0x10aa   :  { %24105 = vmatprep.mubr.msk.f32.mxu1 %vm28339_vm1, %v28338_v0 }
0x10ad   :  { %24106 = vmatmul.mubr.msk.f32.gmra.mrb[0].mxu1 %vm26_vm0, %v12296_v23  ;;  %v35433_v23 = vld [vmem:[#allocation2 + $0xc1] sm:$0xff] }
0x10ae   :  { %24108 = vmatprep.mubr.msk.f32.mxu1 %vm28339_vm1, %v28338_v0 }
0x10b1   :  { %24109 = vmatmul.mubr.msk.f32.gmra.mrb[2].mxu1 %vm26_vm0, %v12297_v37  ;;  %v35439_v37 = vld [vmem:[#allocation2 + $0xc9] sm:$0xff] }
0x10b2   :  { %24111 = vmatprep.mubr.msk.f32.mxu1 %vm28339_vm1, %v28338_v0 }
0x10b5   :  { %24112 = vmatmul.mubr.msk.f32.gmra.mrb[4].mxu1 %vm26_vm0, %v12298_v2  ;;  %v35445_v2 = vld [vmem:[#allocation2 + $0xd1] sm:$0xff] }
0x10b6   :  { %24114 = vmatprep.mubr.msk.f32.mxu1 %vm28339_vm1, %v28338_v0 }
0x10b9   :  { %24115 = vmatmul.mubr.msk.f32.gmra.mrb[6].mxu1 %vm26_vm0, %v12299_v60  ;;  %v35451_v60 = vld [vmem:[#allocation2 + $0xd9] sm:$0xff] }
0x10ba   :  { %24117 = vmatprep.mubr.msk.f32.mxu1 %vm28339_vm1, %v28338_v0 }
0x10bd   :  { %24118 = vmatmul.mubr.msk.f32.gmra.mrb[8].mxu1 %vm26_vm0, %v12300_v46  ;;  %v35457_v46 = vld [vmem:[#allocation2 + $0xe1] sm:$0xff] }
0x10be   :  { %24120 = vmatprep.mubr.msk.f32.mxu1 %vm28339_vm1, %v28338_v0 }
0x10c1   :  { %24121 = vmatmul.mubr.msk.f32.gmra.mrb[10].mxu1 %vm26_vm0, %v12301_v39  ;;  %v35463_v39 = vld [vmem:[#allocation2 + $0xe9] sm:$0xff] }
0x10c2   :  { %24123 = vmatprep.mubr.msk.f32.mxu1 %vm28339_vm1, %v28338_v0 }
0x10c5   :  { %24124 = vmatmul.mubr.msk.f32.gmra.mrb[12].mxu1 %vm26_vm0, %v12302_v61  ;;  %v35469_v61 = vld [vmem:[#allocation2 + $0xf1] sm:$0xff] }
0x10c6   :  { %24126 = vmatprep.mubr.msk.f32.mxu1 %vm28339_vm1, %v28338_v0 }
0x10c9   :  { %24127 = vmatmul.mubr.msk.f32.gmra.mrb[14].mxu1 %vm26_vm0, %v12303_v49  ;;  %v35475_v49 = vld [vmem:[#allocation2 + $0xf9] sm:$0xff] }
0x10ca   :  { %24129 = vmatprep.mubr.msk.f32.mxu1 %vm28339_vm1, %v28338_v0 }
0x10cd   :  { %24130 = vmatmul.mubr.msk.f32.gmra.mrb[16].mxu1 %vm26_vm0, %v12304_v54  ;;  %v35481_v54 = vld [vmem:[#allocation2 + $0x101] sm:$0xff] }
0x10ce   :  { %24132 = vmatprep.mubr.msk.f32.mxu1 %vm28339_vm1, %v28338_v0 }
0x10d1   :  { %24133 = vmatmul.mubr.msk.f32.gmra.mrb[18].mxu1 %vm26_vm0, %v12305_v44  ;;  %v35487_v44 = vld [vmem:[#allocation2 + $0x109] sm:$0xff] }
0x10d2   :  { %24135 = vmatprep.mubr.msk.f32.mxu1 %vm28339_vm1, %v28338_v0 }
0x10d5   :  { %24136 = vmatmul.mubr.msk.f32.gmra.mrb[20].mxu1 %vm26_vm0, %v12306_v62  ;;  %v35493_v62 = vld [vmem:[#allocation2 + $0x111] sm:$0xff] }
0x10d6   :  { %24138 = vmatprep.mubr.msk.f32.mxu1 %vm28339_vm1, %v28338_v0 }
0x10d9   :  { %24139 = vmatmul.mubr.msk.f32.gmra.mrb[22].mxu1 %vm26_vm0, %v12307_v6  ;;  %v35499_v6 = vld [vmem:[#allocation2 + $0x119] sm:$0xff] }
0x10da   :  { %24141 = vmatprep.mubr.msk.f32.mxu1 %vm28339_vm1, %v28338_v0 }
0x10dd   :  { %24142 = vmatmul.mubr.msk.f32.gmra.mrb[24].mxu1 %vm26_vm0, %v12308_v24  ;;  %v35505_v24 = vld [vmem:[#allocation2 + $0x121] sm:$0xff] }
0x10de   :  { %24144 = vmatprep.mubr.msk.f32.mxu1 %vm28339_vm1, %v28338_v0 }
0x10e1   :  { %24145 = vmatmul.mubr.msk.f32.gmra.mrb[26].mxu1 %vm26_vm0, %v12309_v8  ;;  %v35511_v8 = vld [vmem:[#allocation2 + $0x129] sm:$0xff] }
0x10e2   :  { %24147 = vmatprep.mubr.msk.f32.mxu1 %vm28339_vm1, %v28338_v0 }
0x10e5   :  { %24148 = vmatmul.mubr.msk.f32.gmra.mrb[28].mxu1 %vm26_vm0, %v12310_v34  ;;  %v35517_v34 = vld [vmem:[#allocation2 + $0x131] sm:$0xff] }
0x10e6   :  { %24150 = vmatprep.mubr.msk.f32.mxu1 %vm28339_vm1, %v28338_v0 }
0x10e9   :  { %24151 = vmatmul.mubr.msk.f32.gmra.mrb[30].mxu1 %vm26_vm0, %v12311_v14  ;;  %v35523_v14 = vld [vmem:[#allocation2 + $0x139] sm:$0xff] }
0x10ea   :  { %24153 = vmatprep.mubr.msk.f32.mxu1 %vm28339_vm1, %v28338_v0 }
0x10ed   :  { %24154 = vmatmul.mubr.msk.f32.gmra.mrb[32].mxu1 %vm26_vm0, %v12312_v15  ;;  %v35529_v15 = vld [vmem:[#allocation2 + $0x141] sm:$0xff] }
0x10ee   :  { %24156 = vmatprep.mubr.msk.f32.mxu1 %vm28339_vm1, %v28338_v0 }
0x10f1   :  { %24157 = vmatmul.mubr.msk.f32.gmra.mrb[34].mxu1 %vm26_vm0, %v12313_v18  ;;  %v35535_v18 = vld [vmem:[#allocation2 + $0x149] sm:$0xff] }
0x10f2   :  { %24159 = vmatprep.mubr.msk.f32.mxu1 %vm28339_vm1, %v28338_v0 }
0x10f5   :  { %24160 = vmatmul.mubr.msk.f32.gmra.mrb[36].mxu1 %vm26_vm0, %v12314_v16  ;;  %v35541_v16 = vld [vmem:[#allocation2 + $0x151] sm:$0xff] }
0x10f6   :  { %24162 = vmatprep.mubr.msk.f32.mxu1 %vm28339_vm1, %v28338_v0 }
0x10f9   :  { %24163 = vmatmul.mubr.msk.f32.gmra.mrb[38].mxu1 %vm26_vm0, %v12315_v50  ;;  %v35547_v50 = vld [vmem:[#allocation2 + $0x159] sm:$0xff] }
0x10fa   :  { %24165 = vmatprep.mubr.msk.f32.mxu1 %vm28339_vm1, %v28338_v0 }
0x10fd   :  { %24166 = vmatmul.mubr.msk.f32.gmra.mrb[40].mxu1 %vm26_vm0, %v12316_v22  ;;  %v35553_v22 = vld [vmem:[#allocation2 + $0x161] sm:$0xff] }
0x10fe   :  { %24168 = vmatprep.mubr.msk.f32.mxu1 %vm28339_vm1, %v28338_v0 }
0x1101   :  { %24169 = vmatmul.mubr.msk.f32.gmra.mrb[42].mxu1 %vm26_vm0, %v12317_v30  ;;  %v35559_v30 = vld [vmem:[#allocation2 + $0x169] sm:$0xff] }
0x1102   :  { %24171 = vmatprep.mubr.msk.f32.mxu1 %vm28339_vm1, %v28338_v0 }
0x1105   :  { %24172 = vmatmul.mubr.msk.f32.gmra.mrb[44].mxu1 %vm26_vm0, %v12318_v27  ;;  %v35565_v27 = vld [vmem:[#allocation2 + $0x171] sm:$0xff] }
0x1106   :  { %24174 = vmatprep.mubr.msk.f32.mxu1 %vm28339_vm1, %v28338_v0 }
0x1109   :  { %24175 = vmatmul.mubr.msk.f32.gmra.mrb[46].mxu1 %vm26_vm0, %v12319_v51  ;;  %v35571_v51 = vld [vmem:[#allocation2 + $0x179] sm:$0xff] }
0x110a   :  { %24177 = vmatprep.mubr.msk.f32.mxu1 %vm28339_vm1, %v28338_v0 }
0x110d   :  { %24178 = vmatmul.mubr.msk.f32.gmra.mrb[48].mxu1 %vm26_vm0, %v12320_v33  ;;  %v35577_v33 = vld [vmem:[#allocation2 + $0x181] sm:$0xff] }
0x110e   :  { %24180 = vmatprep.mubr.msk.f32.mxu1 %vm28339_vm1, %v28338_v0 }
0x1111   :  { %24181 = vmatmul.mubr.msk.f32.gmra.mrb[50].mxu1 %vm26_vm0, %v12321_v36  ;;  %v35583_v36 = vld [vmem:[#allocation2 + $0x189] sm:$0xff] }
0x1112   :  { %24183 = vmatprep.mubr.msk.f32.mxu1 %vm28339_vm1, %v28338_v0 }
0x1115   :  { %24184 = vmatmul.mubr.msk.f32.gmra.mrb[52].mxu1 %vm26_vm0, %v12322_v35  ;;  %v35589_v35 = vld [vmem:[#allocation2 + $0x191] sm:$0xff] }
0x1116   :  { %24186 = vmatprep.mubr.msk.f32.mxu1 %vm28339_vm1, %v28338_v0 }
0x1119   :  { %24187 = vmatmul.mubr.msk.f32.gmra.mrb[54].mxu1 %vm26_vm0, %v12323_v43  ;;  %v35595_v43 = vld [vmem:[#allocation2 + $0x199] sm:$0xff] }
0x111a   :  { %24189 = vmatprep.mubr.msk.f32.mxu1 %vm28339_vm1, %v28338_v0 }
0x111d   :  { %24190 = vmatmul.mubr.msk.f32.gmra.mrb[56].mxu1 %vm26_vm0, %v12324_v53  ;;  %v35601_v53 = vld [vmem:[#allocation2 + $0x1a1] sm:$0xff] }
0x111e   :  { %24192 = vmatprep.mubr.msk.f32.mxu1 %vm28339_vm1, %v28338_v0 }
0x1121   :  { %24193 = vmatmul.mubr.msk.f32.gmra.mrb[58].mxu1 %vm26_vm0, %v12325_v10  ;;  %v35607_v10 = vld [vmem:[#allocation2 + $0x1a9] sm:$0xff] }
0x1122   :  { %24195 = vmatprep.mubr.msk.f32.mxu1 %vm28339_vm1, %v28338_v0 }
0x1125   :  { %24196 = vmatmul.mubr.msk.f32.gmra.mrb[60].mxu1 %vm26_vm0, %v12326_v45  ;;  %v35613_v45 = vld [vmem:[#allocation2 + $0x1b1] sm:$0xff] }
0x1126   :  { %24198 = vmatprep.mubr.msk.f32.mxu1 %vm28339_vm1, %v28338_v0 }
0x1129   :  { %24199 = vmatmul.mubr.msk.f32.gmra.mrb[62].mxu1 %vm26_vm0, %v12327_v12  ;;  %v35619_v12 = vld [vmem:[#allocation2 + $0x1b9] sm:$0xff] }
0x112a   :  { %24201 = vmatprep.mubr.msk.f32.mxu1 %vm28339_vm1, %v28338_v0 }
0x112d   :  { %24202 = vmatmul.mubr.msk.f32.gmra.mrb[64].mxu1 %vm26_vm0, %v12328_v11  ;;  %v35625_v11 = vld [vmem:[#allocation2 + $0x1c1] sm:$0xff] }
0x112e   :  { %24204 = vmatprep.mubr.msk.f32.mxu1 %vm28339_vm1, %v28338_v0 }
0x1131   :  { %24205 = vmatmul.mubr.msk.f32.gmra.mrb[66].mxu1 %vm26_vm0, %v12329_v13  ;;  %v35631_v13 = vld [vmem:[#allocation2 + $0x1c9] sm:$0xff] }
0x1132   :  { %24207 = vmatprep.mubr.msk.f32.mxu1 %vm28339_vm1, %v28338_v0 }
0x1135   :  { %24208 = vmatmul.mubr.msk.f32.gmra.mrb[68].mxu1 %vm26_vm0, %v12330_v55  ;;  %v35637_v55 = vld [vmem:[#allocation2 + $0x1d1] sm:$0xff] }
0x1136   :  { %24210 = vmatprep.mubr.msk.f32.mxu1 %vm28339_vm1, %v28338_v0 }
0x1139   :  { %24211 = vmatmul.mubr.msk.f32.gmra.mrb[70].mxu1 %vm26_vm0, %v12331_v20  ;;  %v35643_v20 = vld [vmem:[#allocation2 + $0x1d9] sm:$0xff] }
0x113a   :  { %24213 = vmatprep.mubr.msk.f32.mxu1 %vm28339_vm1, %v28338_v0 }
0x113d   :  { %24214 = vmatmul.mubr.msk.f32.gmra.mrb[72].mxu1 %vm26_vm0, %v12332_v5  ;;  %v35649_v5 = vld [vmem:[#allocation2 + $0x1e1] sm:$0xff] }
0x113e   :  { %24216 = vmatprep.mubr.msk.f32.mxu1 %vm28339_vm1, %v28338_v0 }
0x1141   :  { %24217 = vmatmul.mubr.msk.f32.gmra.mrb[74].mxu1 %vm26_vm0, %v12333_v4  ;;  %v35655_v4 = vld [vmem:[#allocation2 + $0x1e9] sm:$0xff] }
0x1142   :  { %24219 = vmatprep.mubr.msk.f32.mxu1 %vm28339_vm1, %v28338_v0 }
0x1145   :  { %24220 = vmatmul.mubr.msk.f32.gmra.mrb[76].mxu1 %vm26_vm0, %v12334_v7  ;;  %v35661_v7 = vld [vmem:[#allocation2 + $0x1f1] sm:$0xff] }
0x1146   :  { %24222 = vmatprep.mubr.msk.f32.mxu1 %vm28339_vm1, %v28338_v0 }
0x1149   :  { %24223 = vmatmul.mubr.msk.f32.gmra.mrb[78].mxu1 %vm26_vm0, %v12335_v19  ;;  %v35667_v19 = vld [vmem:[#allocation2 + $0x1f9] sm:$0xff] }
0x114a   :  { %24225 = vmatprep.mubr.msk.f32.mxu1 %vm28339_vm1, %v28338_v0 }
0x114d   :  { %24226 = vmatmul.mubr.msk.f32.gmra.mrb[80].mxu1 %vm26_vm0, %v12336_v38  ;;  %v35673_v38 = vld [vmem:[#allocation2 + $0x201] sm:$0xff] }
0x114e   :  { %24230 = vmatprep.mubr.msk.f32.mxu1 %vm28339_vm1, %v28338_v0 }
0x1151   :  { %24231 = vmatmul.mubr.msk.f32.vlgmr.msra.gmra.mrb[82].mxu1 %vm26_vm0, %v13133_v1  ;;  %v35685_v1 = vld [vmem:[#allocation2 + $0x211] sm:$0xff] }
0x1152   :  { %24474 = vmatpush3.msra.mxu1 %v18913_v42  ;;  %24233 = vmatprep.mubr.msk.f32.mxu1 %vm28339_vm1, %v28338_v0  ;;  %v35679_v42 = vld [vmem:[#allocation2 + $0x209] sm:$0xff]  ;;  %37683 = vst [vmem:[#allocation44_spill] sm:$0xff] %v35685_v1 }
0x1153   :  { %24718 = vmatprep.subr.mxu1 %v28338_v0  ;;  %37682 = vst [vmem:[#allocation43_spill] sm:$0xff] %v35679_v42 }
0x1155   :  { %24234 = vmatmul.mubr.msk.f32.gmra.mrb[84].mxu1 %vm26_vm0, %v13134_v48  ;;  %v35691_v48 = vld [vmem:[#allocation2 + $0x219] sm:$0xff] }
0x1156   :  { %24236 = vmatprep.mubr.msk.f32.mxu1 %vm28339_vm1, %v28338_v0  ;;  %37684 = vst [vmem:[#allocation45_spill] sm:$0xff] %v35691_v48 }
0x1159   :  { %24237 = vmatmul.mubr.msk.f32.gmra.mrb[86].mxu1 %vm26_vm0, %v35319_v56 }
0x115a   :  { %24239 = vmatprep.mubr.msk.f32.mxu1 %vm28339_vm1, %v28338_v0 }
0x115d   :  { %24240 = vmatmul.mubr.msk.f32.gmra.mrb[88].mxu1 %vm26_vm0, %v35325_v47 }
0x115e   :  { %24242 = vmatprep.mubr.msk.f32.mxu1 %vm28339_vm1, %v28338_v0 }
0x1161   :  { %24243 = vmatmul.mubr.msk.f32.gmra.mrb[90].mxu1 %vm26_vm0, %v35331_v52 }
0x1162   :  { %24245 = vmatprep.mubr.msk.f32.mxu1 %vm28339_vm1, %v28338_v0 }
0x1165   :  { %24246 = vmatmul.mubr.msk.f32.gmra.mrb[92].mxu1 %vm26_vm0, %v35337_v26 }
0x1166   :  { %24248 = vmatprep.mubr.msk.f32.mxu1 %vm28339_vm1, %v28338_v0 }
0x1169   :  { %24249 = vmatmul.mubr.msk.f32.gmra.mrb[94].mxu1 %vm26_vm0, %v35343_v3 }
0x116a   :  { %24251 = vmatprep.mubr.msk.f32.mxu1 %vm28339_vm1, %v28338_v0 }
0x116d   :  { %24252 = vmatmul.mubr.msk.f32.gmra.mrb[96].mxu1 %vm26_vm0, %v35349_v58 }
0x116e   :  { %24254 = vmatprep.mubr.msk.f32.mxu1 %vm28339_vm1, %v28338_v0 }
0x1171   :  { %24255 = vmatmul.mubr.msk.f32.gmra.mrb[98].mxu1 %vm26_vm0, %v35355_v40 }
0x1172   :  { %24257 = vmatprep.mubr.msk.f32.mxu1 %vm28339_vm1, %v28338_v0 }
0x1175   :  { %24258 = vmatmul.mubr.msk.f32.gmra.mrb[100].mxu1 %vm26_vm0, %v35361_v57 }
0x1176   :  { %24260 = vmatprep.mubr.msk.f32.mxu1 %vm28339_vm1, %v28338_v0 }
0x1179   :  { %24261 = vmatmul.mubr.msk.f32.gmra.mrb[102].mxu1 %vm26_vm0, %v35367_v28 }
0x117a   :  { %24263 = vmatprep.mubr.msk.f32.mxu1 %vm28339_vm1, %v28338_v0 }
0x117d   :  { %24264 = vmatmul.mubr.msk.f32.gmra.mrb[104].mxu1 %vm26_vm0, %v35373_v59 }
0x117e   :  { %24266 = vmatprep.mubr.msk.f32.mxu1 %vm28339_vm1, %v28338_v0 }
0x1181   :  { %24267 = vmatmul.mubr.msk.f32.gmra.mrb[106].mxu1 %vm26_vm0, %v35379_v25 }
0x1182   :  { %24269 = vmatprep.mubr.msk.f32.mxu1 %vm28339_vm1, %v28338_v0 }
0x1185   :  { %24270 = vmatmul.mubr.msk.f32.gmra.mrb[108].mxu1 %vm26_vm0, %v35385_v17 }
0x1186   :  { %24272 = vmatprep.mubr.msk.f32.mxu1 %vm28339_vm1, %v28338_v0 }
0x1189   :  { %24273 = vmatmul.mubr.msk.f32.gmra.mrb[110].mxu1 %vm26_vm0, %v35391_v29 }
0x118a   :  { %24275 = vmatprep.mubr.msk.f32.mxu1 %vm28339_vm1, %v28338_v0 }
0x118d   :  { %24276 = vmatmul.mubr.msk.f32.gmra.mrb[112].mxu1 %vm26_vm0, %v35397_v32 }
0x118e   :  { %24278 = vmatprep.mubr.msk.f32.mxu1 %vm28339_vm1, %v28338_v0 }
0x1191   :  { %24279 = vmatmul.mubr.msk.f32.gmra.mrb[114].mxu1 %vm26_vm0, %v35403_v41 }
0x1192   :  { %24281 = vmatprep.mubr.msk.f32.mxu1 %vm28339_vm1, %v28338_v0 }
0x1195   :  { %24282 = vmatmul.mubr.msk.f32.gmra.mrb[116].mxu1 %vm26_vm0, %v35409_v31 }
0x1196   :  { %24284 = vmatprep.mubr.msk.f32.mxu1 %vm28339_vm1, %v28338_v0 }
0x1199   :  { %24285 = vmatmul.mubr.msk.f32.gmra.mrb[118].mxu1 %vm26_vm0, %v35415_v9 }
0x119a   :  { %24287 = vmatprep.mubr.msk.f32.mxu1 %vm28339_vm1, %v28338_v0 }
0x119d   :  { %24288 = vmatmul.mubr.msk.f32.gmra.mrb[120].mxu1 %vm26_vm0, %v35421_v21 }
0x119e   :  { %24290 = vmatprep.mubr.msk.f32.mxu1 %vm28339_vm1, %v28338_v0 }
0x11a1   :  { %24291 = vmatmul.mubr.msk.f32.gmra.mrb[122].mxu1 %vm26_vm0, %v35427_v63 }
0x11a2   :  { %24293 = vmatprep.mubr.msk.f32.mxu1 %vm28339_vm1, %v28338_v0 }
0x11a5   :  { %24294 = vmatmul.mubr.msk.f32.gmra.mrb[124].mxu1 %vm26_vm0, %v35433_v23 }
0x11a6   :  { %24296 = vmatprep.mubr.msk.f32.mxu1 %vm28339_vm1, %v28338_v0 }
0x11a9   :  { %24297 = vmatmul.mubr.msk.f32.gmra.mrb[126].mxu1 %vm26_vm0, %v35439_v37 }
0x11aa   :  { %24299 = vmatprep.mubr.msk.f32.mxu1 %vm28339_vm1, %v28338_v0 }
0x11ad   :  { %24300 = vmatmul.mubr.msk.f32.gmra.mrb[128].mxu1 %vm26_vm0, %v35445_v2 }
0x11ae   :  { %24302 = vmatprep.mubr.msk.f32.mxu1 %vm28339_vm1, %v28338_v0 }
0x11b1   :  { %24303 = vmatmul.mubr.msk.f32.gmra.mrb[130].mxu1 %vm26_vm0, %v35451_v60 }
0x11b2   :  { %24305 = vmatprep.mubr.msk.f32.mxu1 %vm28339_vm1, %v28338_v0 }
0x11b5   :  { %24306 = vmatmul.mubr.msk.f32.gmra.mrb[132].mxu1 %vm26_vm0, %v35457_v46 }
0x11b6   :  { %24308 = vmatprep.mubr.msk.f32.mxu1 %vm28339_vm1, %v28338_v0 }
0x11b9   :  { %24309 = vmatmul.mubr.msk.f32.gmra.mrb[134].mxu1 %vm26_vm0, %v35463_v39 }
0x11ba   :  { %24311 = vmatprep.mubr.msk.f32.mxu1 %vm28339_vm1, %v28338_v0 }
0x11bd   :  { %24312 = vmatmul.mubr.msk.f32.gmra.mrb[136].mxu1 %vm26_vm0, %v35469_v61 }
0x11be   :  { %24314 = vmatprep.mubr.msk.f32.mxu1 %vm28339_vm1, %v28338_v0 }
0x11c1   :  { %24315 = vmatmul.mubr.msk.f32.gmra.mrb[138].mxu1 %vm26_vm0, %v35475_v49 }
0x11c2   :  { %24317 = vmatprep.mubr.msk.f32.mxu1 %vm28339_vm1, %v28338_v0 }
0x11c5   :  { %24318 = vmatmul.mubr.msk.f32.gmra.mrb[140].mxu1 %vm26_vm0, %v35481_v54 }
0x11c6   :  { %24320 = vmatprep.mubr.msk.f32.mxu1 %vm28339_vm1, %v28338_v0 }
0x11c9   :  { %24321 = vmatmul.mubr.msk.f32.gmra.mrb[142].mxu1 %vm26_vm0, %v35487_v44 }
0x11ca   :  { %24323 = vmatprep.mubr.msk.f32.mxu1 %vm28339_vm1, %v28338_v0 }
0x11cd   :  { %24324 = vmatmul.mubr.msk.f32.gmra.mrb[144].mxu1 %vm26_vm0, %v35493_v62 }
0x11ce   :  { %24326 = vmatprep.mubr.msk.f32.mxu1 %vm28339_vm1, %v28338_v0 }
0x11d1   :  { %24327 = vmatmul.mubr.msk.f32.gmra.mrb[146].mxu1 %vm26_vm0, %v35499_v6 }
0x11d2   :  { %24329 = vmatprep.mubr.msk.f32.mxu1 %vm28339_vm1, %v28338_v0 }
0x11d5   :  { %24330 = vmatmul.mubr.msk.f32.gmra.mrb[148].mxu1 %vm26_vm0, %v35505_v24 }
0x11d6   :  { %24332 = vmatprep.mubr.msk.f32.mxu1 %vm28339_vm1, %v28338_v0 }
0x11d9   :  { %24333 = vmatmul.mubr.msk.f32.gmra.mrb[150].mxu1 %vm26_vm0, %v35511_v8 }
0x11da   :  { %24335 = vmatprep.mubr.msk.f32.mxu1 %vm28339_vm1, %v28338_v0 }
0x11dd   :  { %24336 = vmatmul.mubr.msk.f32.gmra.mrb[152].mxu1 %vm26_vm0, %v35517_v34 }
0x11de   :  { %24338 = vmatprep.mubr.msk.f32.mxu1 %vm28339_vm1, %v28338_v0 }
0x11e1   :  { %24339 = vmatmul.mubr.msk.f32.gmra.mrb[154].mxu1 %vm26_vm0, %v35523_v14 }
0x11e2   :  { %24341 = vmatprep.mubr.msk.f32.mxu1 %vm28339_vm1, %v28338_v0 }
0x11e5   :  { %24342 = vmatmul.mubr.msk.f32.gmra.mrb[156].mxu1 %vm26_vm0, %v35529_v15 }
0x11e6   :  { %24344 = vmatprep.mubr.msk.f32.mxu1 %vm28339_vm1, %v28338_v0 }
0x11e9   :  { %24345 = vmatmul.mubr.msk.f32.gmra.mrb[158].mxu1 %vm26_vm0, %v35535_v18 }
0x11ea   :  { %24347 = vmatprep.mubr.msk.f32.mxu1 %vm28339_vm1, %v28338_v0 }
0x11ed   :  { %24348 = vmatmul.mubr.msk.f32.gmra.mrb[160].mxu1 %vm26_vm0, %v35541_v16 }
0x11ee   :  { %24350 = vmatprep.mubr.msk.f32.mxu1 %vm28339_vm1, %v28338_v0 }
0x11f1   :  { %24351 = vmatmul.mubr.msk.f32.gmra.mrb[0].mxu1 %vm26_vm0, %v35547_v50 }
0x11f2   :  { %24353 = vmatprep.mubr.msk.f32.mxu1 %vm28339_vm1, %v28338_v0 }
0x11f5   :  { %24354 = vmatmul.mubr.msk.f32.gmra.mrb[2].mxu1 %vm26_vm0, %v35553_v22 }
0x11f6   :  { %24356 = vmatprep.mubr.msk.f32.mxu1 %vm28339_vm1, %v28338_v0 }
0x11f9   :  { %24357 = vmatmul.mubr.msk.f32.gmra.mrb[4].mxu1 %vm26_vm0, %v35559_v30 }
0x11fa   :  { %24359 = vmatprep.mubr.msk.f32.mxu1 %vm28339_vm1, %v28338_v0 }
0x11fd   :  { %24360 = vmatmul.mubr.msk.f32.gmra.mrb[6].mxu1 %vm26_vm0, %v35565_v27 }
0x11fe   :  { %24362 = vmatprep.mubr.msk.f32.mxu1 %vm28339_vm1, %v28338_v0 }
0x1201   :  { %24363 = vmatmul.mubr.msk.f32.gmra.mrb[8].mxu1 %vm26_vm0, %v35571_v51 }
0x1202   :  { %24365 = vmatprep.mubr.msk.f32.mxu1 %vm28339_vm1, %v28338_v0 }
0x1205   :  { %24366 = vmatmul.mubr.msk.f32.gmra.mrb[10].mxu1 %vm26_vm0, %v35577_v33 }
0x1206   :  { %24368 = vmatprep.mubr.msk.f32.mxu1 %vm28339_vm1, %v28338_v0 }
0x1209   :  { %24369 = vmatmul.mubr.msk.f32.gmra.mrb[12].mxu1 %vm26_vm0, %v35583_v36 }
0x120a   :  { %24371 = vmatprep.mubr.msk.f32.mxu1 %vm28339_vm1, %v28338_v0 }
0x120d   :  { %24372 = vmatmul.mubr.msk.f32.gmra.mrb[14].mxu1 %vm26_vm0, %v35589_v35 }
0x120e   :  { %24374 = vmatprep.mubr.msk.f32.mxu1 %vm28339_vm1, %v28338_v0 }
0x1211   :  { %24375 = vmatmul.mubr.msk.f32.gmra.mrb[16].mxu1 %vm26_vm0, %v35595_v43 }
0x1212   :  { %24377 = vmatprep.mubr.msk.f32.mxu1 %vm28339_vm1, %v28338_v0 }
0x1215   :  { %24378 = vmatmul.mubr.msk.f32.gmra.mrb[18].mxu1 %vm26_vm0, %v35601_v53 }
0x1216   :  { %24380 = vmatprep.mubr.msk.f32.mxu1 %vm28339_vm1, %v28338_v0 }
0x1219   :  { %24381 = vmatmul.mubr.msk.f32.gmra.mrb[20].mxu1 %vm26_vm0, %v35607_v10 }
0x121a   :  { %24383 = vmatprep.mubr.msk.f32.mxu1 %vm28339_vm1, %v28338_v0 }
0x121d   :  { %24384 = vmatmul.mubr.msk.f32.gmra.mrb[22].mxu1 %vm26_vm0, %v35613_v45 }
0x121e   :  { %24386 = vmatprep.mubr.msk.f32.mxu1 %vm28339_vm1, %v28338_v0 }
0x1221   :  { %24387 = vmatmul.mubr.msk.f32.gmra.mrb[24].mxu1 %vm26_vm0, %v35619_v12 }
0x1222   :  { %24389 = vmatprep.mubr.msk.f32.mxu1 %vm28339_vm1, %v28338_v0 }
0x1225   :  { %24390 = vmatmul.mubr.msk.f32.gmra.mrb[26].mxu1 %vm26_vm0, %v35625_v11 }
0x1226   :  { %24392 = vmatprep.mubr.msk.f32.mxu1 %vm28339_vm1, %v28338_v0 }
0x1229   :  { %24393 = vmatmul.mubr.msk.f32.gmra.mrb[28].mxu1 %vm26_vm0, %v35631_v13 }
0x122a   :  { %24395 = vmatprep.mubr.msk.f32.mxu1 %vm28339_vm1, %v28338_v0 }
0x122d   :  { %24396 = vmatmul.mubr.msk.f32.gmra.mrb[30].mxu1 %vm26_vm0, %v35637_v55 }
0x122e   :  { %24398 = vmatprep.mubr.msk.f32.mxu1 %vm28339_vm1, %v28338_v0 }
0x1231   :  { %24399 = vmatmul.mubr.msk.f32.gmra.mrb[32].mxu1 %vm26_vm0, %v35643_v20 }
0x1232   :  { %24401 = vmatprep.mubr.msk.f32.mxu1 %vm28339_vm1, %v28338_v0 }
0x1235   :  { %24402 = vmatmul.mubr.msk.f32.gmra.mrb[34].mxu1 %vm26_vm0, %v35649_v5 }
0x1236   :  { %24404 = vmatprep.mubr.msk.f32.mxu1 %vm28339_vm1, %v28338_v0 }
0x1239   :  { %24405 = vmatmul.mubr.msk.f32.gmra.mrb[36].mxu1 %vm26_vm0, %v35655_v4 }
0x123a   :  { %24407 = vmatprep.mubr.msk.f32.mxu1 %vm28339_vm1, %v28338_v0 }
0x123d   :  { %24408 = vmatmul.mubr.msk.f32.gmra.mrb[38].mxu1 %vm26_vm0, %v35661_v7 }
0x123e   :  { %24410 = vmatprep.mubr.msk.f32.mxu1 %vm28339_vm1, %v28338_v0 }
0x1241   :  { %24411 = vmatmul.mubr.msk.f32.gmra.mrb[40].mxu1 %vm26_vm0, %v35667_v19 }
0x1242   :  { %24413 = vmatprep.mubr.msk.f32.mxu1 %vm28339_vm1, %v28338_v0 }
0x1245   :  { %24414 = vmatmul.mubr.msk.f32.gmra.mrb[42].mxu1 %vm26_vm0, %v35673_v38 }
0x1246   :  { %24416 = vmatprep.mubr.msk.f32.mxu1 %vm28339_vm1, %v28338_v0 }
0x1249   :  { %24417 = vmatmul.mubr.msk.f32.gmra.mrb[44].mxu1 %vm26_vm0, %v35679_v42  ;;  %v35697_v42 = vld [vmem:[#allocation2 + $0x221] sm:$0xff] }
0x124a   :  { %24419 = vmatprep.mubr.msk.f32.mxu1 %vm28339_vm1, %v28338_v0  ;;  %37685 = vst [vmem:[#allocation46_spill] sm:$0xff] %v35697_v42 }
0x124d   :  { %24420 = vmatmul.mubr.msk.f32.gmra.mrb[46].mxu1 %vm26_vm0, %v35685_v1  ;;  %v35703_v1 = vld [vmem:[#allocation2 + $0x229] sm:$0xff] }
0x124e   :  { %24422 = vmatprep.mubr.msk.f32.mxu1 %vm28339_vm1, %v28338_v0  ;;  %37686 = vst [vmem:[#allocation47_spill] sm:$0xff] %v35703_v1 }
0x1251   :  { %24423 = vmatmul.mubr.msk.f32.gmra.mrb[48].mxu1 %vm26_vm0, %v35691_v48  ;;  %v35709_v48 = vld [vmem:[#allocation2 + $0x231] sm:$0xff] }
0x1252   :  { %24425 = vmatprep.mubr.msk.f32.mxu1 %vm28339_vm1, %v28338_v0  ;;  %37687 = vst [vmem:[#allocation48_spill] sm:$0xff] %v35709_v48 }
0x1255   :  { %24426 = vmatmul.mubr.msk.f32.gmra.mrb[50].mxu1 %vm26_vm0, %v35697_v42  ;;  %v35715_v42 = vld [vmem:[#allocation2 + $0x239] sm:$0xff] }
0x1256   :  { %24428 = vmatprep.mubr.msk.f32.mxu1 %vm28339_vm1, %v28338_v0  ;;  %37688 = vst [vmem:[#allocation49_spill] sm:$0xff] %v35715_v42 }
0x1259   :  { %24429 = vmatmul.mubr.msk.f32.gmra.mrb[52].mxu1 %vm26_vm0, %v35703_v1  ;;  %v35721_v1 = vld [vmem:[#allocation2 + $0x241] sm:$0xff] }
0x125a   :  { %24431 = vmatprep.mubr.msk.f32.mxu1 %vm28339_vm1, %v28338_v0  ;;  %37689 = vst [vmem:[#allocation50_spill] sm:$0xff] %v35721_v1 }
0x125d   :  { %24432 = vmatmul.mubr.msk.f32.gmra.mrb[54].mxu1 %vm26_vm0, %v35709_v48  ;;  %v35727_v48 = vld [vmem:[#allocation2 + $0x249] sm:$0xff] }
0x125e   :  { %24434 = vmatprep.mubr.msk.f32.mxu1 %vm28339_vm1, %v28338_v0  ;;  %37690 = vst [vmem:[#allocation51_spill] sm:$0xff] %v35727_v48 }
0x1261   :  { %24435 = vmatmul.mubr.msk.f32.gmra.mrb[56].mxu1 %vm26_vm0, %v35715_v42  ;;  %v35733_v42 = vld [vmem:[#allocation2 + $0x251] sm:$0xff] }
0x1262   :  { %24437 = vmatprep.mubr.msk.f32.mxu1 %vm28339_vm1, %v28338_v0  ;;  %37691 = vst [vmem:[#allocation52_spill] sm:$0xff] %v35733_v42 }
0x1265   :  { %24438 = vmatmul.mubr.msk.f32.gmra.mrb[58].mxu1 %vm26_vm0, %v35721_v1  ;;  %v35739_v1 = vld [vmem:[#allocation2 + $0x259] sm:$0xff] }
0x1266   :  { %24440 = vmatprep.mubr.msk.f32.mxu1 %vm28339_vm1, %v28338_v0  ;;  %37692 = vst [vmem:[#allocation53_spill] sm:$0xff] %v35739_v1 }
0x1269   :  { %24441 = vmatmul.mubr.msk.f32.gmra.mrb[60].mxu1 %vm26_vm0, %v35727_v48  ;;  %v35745_v48 = vld [vmem:[#allocation2 + $0x261] sm:$0xff] }
0x126a   :  { %24443 = vmatprep.mubr.msk.f32.mxu1 %vm28339_vm1, %v28338_v0  ;;  %37693 = vst [vmem:[#allocation54_spill] sm:$0xff] %v35745_v48 }
0x126d   :  { %24444 = vmatmul.mubr.msk.f32.gmra.mrb[62].mxu1 %vm26_vm0, %v35733_v42  ;;  %v35751_v42 = vld [vmem:[#allocation2 + $0x269] sm:$0xff] }
0x126e   :  { %24446 = vmatprep.mubr.msk.f32.mxu1 %vm28339_vm1, %v28338_v0  ;;  %37694 = vst [vmem:[#allocation55_spill] sm:$0xff] %v35751_v42 }
0x1271   :  { %24447 = vmatmul.mubr.msk.f32.gmra.mrb[64].mxu1 %vm26_vm0, %v35739_v1  ;;  %v35757_v1 = vld [vmem:[#allocation2 + $0x271] sm:$0xff] }
0x1272   :  { %24449 = vmatprep.mubr.msk.f32.mxu1 %vm28339_vm1, %v28338_v0  ;;  %37695 = vst [vmem:[#allocation56_spill] sm:$0xff] %v35757_v1 }
0x1275   :  { %24450 = vmatmul.mubr.msk.f32.gmra.mrb[66].mxu1 %vm26_vm0, %v35745_v48  ;;  %v35763_v48 = vld [vmem:[#allocation2 + $0x279] sm:$0xff] }
0x1276   :  { %24452 = vmatprep.mubr.msk.f32.mxu1 %vm28339_vm1, %v28338_v0  ;;  %37696 = vst [vmem:[#allocation57_spill] sm:$0xff] %v35763_v48 }
0x1279   :  { %24453 = vmatmul.mubr.msk.f32.gmra.mrb[68].mxu1 %vm26_vm0, %v35751_v42  ;;  %v35769_v42 = vld [vmem:[#allocation2 + $0x281] sm:$0xff] }
0x127a   :  { %24455 = vmatprep.mubr.msk.f32.mxu1 %vm28339_vm1, %v28338_v0  ;;  %37697 = vst [vmem:[#allocation58_spill] sm:$0xff] %v35769_v42 }
0x127d   :  { %24456 = vmatmul.mubr.msk.f32.gmra.mrb[70].mxu1 %vm26_vm0, %v35757_v1  ;;  %v35775_v1 = vld [vmem:[#allocation2 + $0x289] sm:$0xff] }
0x127e   :  { %24458 = vmatprep.mubr.msk.f32.mxu1 %vm28339_vm1, %v28338_v0  ;;  %37698 = vst [vmem:[#allocation59_spill] sm:$0xff] %v35775_v1 }
0x1281   :  { %24459 = vmatmul.mubr.msk.f32.gmra.mrb[72].mxu1 %vm26_vm0, %v35763_v48  ;;  %v35781_v48 = vld [vmem:[#allocation2 + $0x291] sm:$0xff] }
0x1282   :  { %24461 = vmatprep.mubr.msk.f32.mxu1 %vm28339_vm1, %v28338_v0 }
0x1285   :  { %24462 = vmatmul.mubr.msk.f32.gmra.mrb[74].mxu1 %vm26_vm0, %v35769_v42  ;;  %v35787_v42 = vld [vmem:[#allocation2 + $0x299] sm:$0xff] }
0x1286   :  { %24464 = vmatprep.mubr.msk.f32.mxu1 %vm28339_vm1, %v28338_v0 }
0x1289   :  { %24465 = vmatmul.mubr.msk.f32.gmra.mrb[76].mxu1 %vm26_vm0, %v35775_v1  ;;  %v18995_v1 = vld [vmem:[%s37467_s3 + $0x38] sm:$0xff] }
0x128a   :  { %24467 = vmatprep.mubr.msk.f32.mxu1 %vm28339_vm1, %v28338_v0 }
0x128d   :  { %24468 = vmatmul.mubr.msk.f32.gmra.mrb[78].mxu1 %vm26_vm0, %v35781_v48 }
0x128e   :  { %24470 = vmatprep.mubr.msk.f32.mxu1 %vm28339_vm1, %v28338_v0 }
0x1291   :  { %24471 = vmatmul.mubr.msk.f32.gmra.mrb[80].mxu1 %vm26_vm0, %v35787_v42 }
0x1292   :  { %24475 = vmatprep.mubr.msk.f32.mxu1 %vm28339_vm1, %v28338_v0 }
0x1295   :  { %24476 = vmatmul.mubr.msk.f32.vlgmr.msra.gmra.mrb[82].mxu1 %vm26_vm0, %v35319_v56  ;;  %v37699_v56 = vld [vmem:[#allocation43_spill] sm:$0xff] }
0x1296   :  { %24719 = vmatpush3.msra.mxu1 %v18995_v1  ;;  %24478 = vmatprep.mubr.msk.f32.mxu1 %vm28339_vm1, %v28338_v0  ;;  %v14928_v1 = vld [vmem:[#allocation2 + $0x172] sm:$0xff] }
0x1297   :  { %24963 = vmatprep.subr.mxu1 %v28338_v0 }
0x1299   :  { %24479 = vmatmul.mubr.msk.f32.gmra.mrb[84].mxu1 %vm26_vm0, %v35325_v47  ;;  %v37700_v47 = vld [vmem:[#allocation44_spill] sm:$0xff] }
0x129a   :  { %24481 = vmatprep.mubr.msk.f32.mxu1 %vm28339_vm1, %v28338_v0 }
0x129d   :  { %24482 = vmatmul.mubr.msk.f32.gmra.mrb[86].mxu1 %vm26_vm0, %v35331_v52  ;;  %v37701_v52 = vld [vmem:[#allocation45_spill] sm:$0xff] }
0x129e   :  { %24484 = vmatprep.mubr.msk.f32.mxu1 %vm28339_vm1, %v28338_v0 }
0x12a1   :  { %24485 = vmatmul.mubr.msk.f32.gmra.mrb[88].mxu1 %vm26_vm0, %v35337_v26  ;;  %v37702_v26 = vld [vmem:[#allocation46_spill] sm:$0xff] }
0x12a2   :  { %24487 = vmatprep.mubr.msk.f32.mxu1 %vm28339_vm1, %v28338_v0 }
0x12a5   :  { %24488 = vmatmul.mubr.msk.f32.gmra.mrb[90].mxu1 %vm26_vm0, %v35343_v3  ;;  %v37703_v3 = vld [vmem:[#allocation47_spill] sm:$0xff] }
0x12a6   :  { %24490 = vmatprep.mubr.msk.f32.mxu1 %vm28339_vm1, %v28338_v0 }
0x12a9   :  { %24491 = vmatmul.mubr.msk.f32.gmra.mrb[92].mxu1 %vm26_vm0, %v35349_v58  ;;  %v37704_v58 = vld [vmem:[#allocation48_spill] sm:$0xff] }
0x12aa   :  { %24493 = vmatprep.mubr.msk.f32.mxu1 %vm28339_vm1, %v28338_v0 }
0x12ad   :  { %24494 = vmatmul.mubr.msk.f32.gmra.mrb[94].mxu1 %vm26_vm0, %v35355_v40  ;;  %v37705_v40 = vld [vmem:[#allocation49_spill] sm:$0xff] }
0x12ae   :  { %24496 = vmatprep.mubr.msk.f32.mxu1 %vm28339_vm1, %v28338_v0 }
0x12b1   :  { %24497 = vmatmul.mubr.msk.f32.gmra.mrb[96].mxu1 %vm26_vm0, %v35361_v57  ;;  %v37706_v57 = vld [vmem:[#allocation50_spill] sm:$0xff] }
0x12b2   :  { %24499 = vmatprep.mubr.msk.f32.mxu1 %vm28339_vm1, %v28338_v0 }
0x12b5   :  { %24500 = vmatmul.mubr.msk.f32.gmra.mrb[98].mxu1 %vm26_vm0, %v35367_v28  ;;  %v37707_v28 = vld [vmem:[#allocation51_spill] sm:$0xff] }
0x12b6   :  { %24502 = vmatprep.mubr.msk.f32.mxu1 %vm28339_vm1, %v28338_v0 }
0x12b9   :  { %24503 = vmatmul.mubr.msk.f32.gmra.mrb[100].mxu1 %vm26_vm0, %v35373_v59  ;;  %v37708_v59 = vld [vmem:[#allocation52_spill] sm:$0xff] }
0x12ba   :  { %24505 = vmatprep.mubr.msk.f32.mxu1 %vm28339_vm1, %v28338_v0 }
0x12bd   :  { %24506 = vmatmul.mubr.msk.f32.gmra.mrb[102].mxu1 %vm26_vm0, %v35379_v25  ;;  %v37709_v25 = vld [vmem:[#allocation53_spill] sm:$0xff] }
0x12be   :  { %24508 = vmatprep.mubr.msk.f32.mxu1 %vm28339_vm1, %v28338_v0 }
0x12c1   :  { %24509 = vmatmul.mubr.msk.f32.gmra.mrb[104].mxu1 %vm26_vm0, %v35385_v17  ;;  %v37710_v17 = vld [vmem:[#allocation54_spill] sm:$0xff] }
0x12c2   :  { %24511 = vmatprep.mubr.msk.f32.mxu1 %vm28339_vm1, %v28338_v0 }
0x12c5   :  { %24512 = vmatmul.mubr.msk.f32.gmra.mrb[106].mxu1 %vm26_vm0, %v35391_v29  ;;  %v37711_v29 = vld [vmem:[#allocation55_spill] sm:$0xff] }
0x12c6   :  { %24514 = vmatprep.mubr.msk.f32.mxu1 %vm28339_vm1, %v28338_v0 }
0x12c9   :  { %24515 = vmatmul.mubr.msk.f32.gmra.mrb[108].mxu1 %vm26_vm0, %v35397_v32  ;;  %v37712_v32 = vld [vmem:[#allocation56_spill] sm:$0xff] }
0x12ca   :  { %24517 = vmatprep.mubr.msk.f32.mxu1 %vm28339_vm1, %v28338_v0 }
0x12cd   :  { %24518 = vmatmul.mubr.msk.f32.gmra.mrb[110].mxu1 %vm26_vm0, %v35403_v41  ;;  %v37713_v41 = vld [vmem:[#allocation57_spill] sm:$0xff] }
0x12ce   :  { %24520 = vmatprep.mubr.msk.f32.mxu1 %vm28339_vm1, %v28338_v0 }
0x12d1   :  { %24521 = vmatmul.mubr.msk.f32.gmra.mrb[112].mxu1 %vm26_vm0, %v35409_v31  ;;  %v37714_v31 = vld [vmem:[#allocation58_spill] sm:$0xff] }
0x12d2   :  { %24523 = vmatprep.mubr.msk.f32.mxu1 %vm28339_vm1, %v28338_v0 }
0x12d5   :  { %24524 = vmatmul.mubr.msk.f32.gmra.mrb[114].mxu1 %vm26_vm0, %v35415_v9  ;;  %v37715_v9 = vld [vmem:[#allocation59_spill] sm:$0xff] }
0x12d6   :  { %24526 = vmatprep.mubr.msk.f32.mxu1 %vm28339_vm1, %v28338_v0 }
0x12d9   :  { %24527 = vmatmul.mubr.msk.f32.gmra.mrb[116].mxu1 %vm26_vm0, %v35421_v21  ;;  %v14089_v21 = vld [vmem:[#allocation2 + $0x2a1] sm:$0xff] }
0x12da   :  { %24529 = vmatprep.mubr.msk.f32.mxu1 %vm28339_vm1, %v28338_v0 }
0x12dd   :  { %24530 = vmatmul.mubr.msk.f32.gmra.mrb[118].mxu1 %vm26_vm0, %v35427_v63  ;;  %v14090_v63 = vld [vmem:[#allocation2 + $0x2a9] sm:$0xff] }
0x12de   :  { %24532 = vmatprep.mubr.msk.f32.mxu1 %vm28339_vm1, %v28338_v0 }
0x12e1   :  { %24533 = vmatmul.mubr.msk.f32.gmra.mrb[120].mxu1 %vm26_vm0, %v35433_v23  ;;  %v19077_v23 = vld [vmem:[%s37467_s3 + $0x40] sm:$0xff] }
0x12e2   :  { %24535 = vmatprep.mubr.msk.f32.mxu1 %vm28339_vm1, %v28338_v0 }
0x12e5   :  { %24536 = vmatmul.mubr.msk.f32.gmra.mrb[122].mxu1 %vm26_vm0, %v35439_v37  ;;  %v14887_v37 = vld [vmem:[#allocation2 + $0x2a] sm:$0xff] }
0x12e6   :  { %24538 = vmatprep.mubr.msk.f32.mxu1 %vm28339_vm1, %v28338_v0 }
0x12e9   :  { %24539 = vmatmul.mubr.msk.f32.gmra.mrb[124].mxu1 %vm26_vm0, %v35445_v2  ;;  %v14888_v2 = vld [vmem:[#allocation2 + $0x32] sm:$0xff] }
0x12ea   :  { %24541 = vmatprep.mubr.msk.f32.mxu1 %vm28339_vm1, %v28338_v0 }
0x12ed   :  { %24542 = vmatmul.mubr.msk.f32.gmra.mrb[126].mxu1 %vm26_vm0, %v35451_v60  ;;  %v14889_v60 = vld [vmem:[#allocation2 + $0x3a] sm:$0xff] }
0x12ee   :  { %24544 = vmatprep.mubr.msk.f32.mxu1 %vm28339_vm1, %v28338_v0 }
0x12f1   :  { %24545 = vmatmul.mubr.msk.f32.gmra.mrb[128].mxu1 %vm26_vm0, %v35457_v46  ;;  %v14890_v46 = vld [vmem:[#allocation2 + $0x42] sm:$0xff] }
0x12f2   :  { %24547 = vmatprep.mubr.msk.f32.mxu1 %vm28339_vm1, %v28338_v0 }
0x12f5   :  { %24548 = vmatmul.mubr.msk.f32.gmra.mrb[130].mxu1 %vm26_vm0, %v35463_v39  ;;  %v14891_v39 = vld [vmem:[#allocation2 + $0x4a] sm:$0xff] }
0x12f6   :  { %24550 = vmatprep.mubr.msk.f32.mxu1 %vm28339_vm1, %v28338_v0 }
0x12f9   :  { %24551 = vmatmul.mubr.msk.f32.gmra.mrb[132].mxu1 %vm26_vm0, %v35469_v61  ;;  %v14892_v61 = vld [vmem:[#allocation2 + $0x52] sm:$0xff] }
0x12fa   :  { %24553 = vmatprep.mubr.msk.f32.mxu1 %vm28339_vm1, %v28338_v0 }
0x12fd   :  { %24554 = vmatmul.mubr.msk.f32.gmra.mrb[134].mxu1 %vm26_vm0, %v35475_v49  ;;  %v14893_v49 = vld [vmem:[#allocation2 + $0x5a] sm:$0xff] }
0x12fe   :  { %24556 = vmatprep.mubr.msk.f32.mxu1 %vm28339_vm1, %v28338_v0 }
0x1301   :  { %24557 = vmatmul.mubr.msk.f32.gmra.mrb[136].mxu1 %vm26_vm0, %v35481_v54  ;;  %v14894_v54 = vld [vmem:[#allocation2 + $0x62] sm:$0xff] }
0x1302   :  { %24559 = vmatprep.mubr.msk.f32.mxu1 %vm28339_vm1, %v28338_v0 }
0x1305   :  { %24560 = vmatmul.mubr.msk.f32.gmra.mrb[138].mxu1 %vm26_vm0, %v35487_v44  ;;  %v14895_v44 = vld [vmem:[#allocation2 + $0x6a] sm:$0xff] }
0x1306   :  { %24562 = vmatprep.mubr.msk.f32.mxu1 %vm28339_vm1, %v28338_v0 }
0x1309   :  { %24563 = vmatmul.mubr.msk.f32.gmra.mrb[140].mxu1 %vm26_vm0, %v35493_v62  ;;  %v14896_v62 = vld [vmem:[#allocation2 + $0x72] sm:$0xff] }
0x130a   :  { %24565 = vmatprep.mubr.msk.f32.mxu1 %vm28339_vm1, %v28338_v0 }
0x130d   :  { %24566 = vmatmul.mubr.msk.f32.gmra.mrb[142].mxu1 %vm26_vm0, %v35499_v6  ;;  %v14897_v6 = vld [vmem:[#allocation2 + $0x7a] sm:$0xff] }
0x130e   :  { %24568 = vmatprep.mubr.msk.f32.mxu1 %vm28339_vm1, %v28338_v0 }
0x1311   :  { %24569 = vmatmul.mubr.msk.f32.gmra.mrb[144].mxu1 %vm26_vm0, %v35505_v24  ;;  %v14898_v24 = vld [vmem:[#allocation2 + $0x82] sm:$0xff] }
0x1312   :  { %24571 = vmatprep.mubr.msk.f32.mxu1 %vm28339_vm1, %v28338_v0 }
0x1315   :  { %24572 = vmatmul.mubr.msk.f32.gmra.mrb[146].mxu1 %vm26_vm0, %v35511_v8  ;;  %v14899_v8 = vld [vmem:[#allocation2 + $0x8a] sm:$0xff] }
0x1316   :  { %24574 = vmatprep.mubr.msk.f32.mxu1 %vm28339_vm1, %v28338_v0 }
0x1319   :  { %24575 = vmatmul.mubr.msk.f32.gmra.mrb[148].mxu1 %vm26_vm0, %v35517_v34  ;;  %v14900_v34 = vld [vmem:[#allocation2 + $0x92] sm:$0xff] }
0x131a   :  { %24577 = vmatprep.mubr.msk.f32.mxu1 %vm28339_vm1, %v28338_v0 }
0x131d   :  { %24578 = vmatmul.mubr.msk.f32.gmra.mrb[150].mxu1 %vm26_vm0, %v35523_v14  ;;  %v14901_v14 = vld [vmem:[#allocation2 + $0x9a] sm:$0xff] }
0x131e   :  { %24580 = vmatprep.mubr.msk.f32.mxu1 %vm28339_vm1, %v28338_v0 }
0x1321   :  { %24581 = vmatmul.mubr.msk.f32.gmra.mrb[152].mxu1 %vm26_vm0, %v35529_v15  ;;  %v14902_v15 = vld [vmem:[#allocation2 + $0xa2] sm:$0xff] }
0x1322   :  { %24583 = vmatprep.mubr.msk.f32.mxu1 %vm28339_vm1, %v28338_v0 }
0x1325   :  { %24584 = vmatmul.mubr.msk.f32.gmra.mrb[154].mxu1 %vm26_vm0, %v35535_v18  ;;  %v14903_v18 = vld [vmem:[#allocation2 + $0xaa] sm:$0xff] }
0x1326   :  { %24586 = vmatprep.mubr.msk.f32.mxu1 %vm28339_vm1, %v28338_v0 }
0x1329   :  { %24587 = vmatmul.mubr.msk.f32.gmra.mrb[156].mxu1 %vm26_vm0, %v35541_v16  ;;  %v14904_v16 = vld [vmem:[#allocation2 + $0xb2] sm:$0xff] }
0x132a   :  { %24589 = vmatprep.mubr.msk.f32.mxu1 %vm28339_vm1, %v28338_v0 }
0x132d   :  { %24590 = vmatmul.mubr.msk.f32.gmra.mrb[158].mxu1 %vm26_vm0, %v35547_v50  ;;  %v14905_v50 = vld [vmem:[#allocation2 + $0xba] sm:$0xff] }
0x132e   :  { %24592 = vmatprep.mubr.msk.f32.mxu1 %vm28339_vm1, %v28338_v0 }
0x1331   :  { %24593 = vmatmul.mubr.msk.f32.gmra.mrb[160].mxu1 %vm26_vm0, %v35553_v22  ;;  %v14906_v22 = vld [vmem:[#allocation2 + $0xc2] sm:$0xff] }
0x1332   :  { %24595 = vmatprep.mubr.msk.f32.mxu1 %vm28339_vm1, %v28338_v0 }
0x1335   :  { %24596 = vmatmul.mubr.msk.f32.gmra.mrb[0].mxu1 %vm26_vm0, %v35559_v30  ;;  %v14907_v30 = vld [vmem:[#allocation2 + $0xca] sm:$0xff] }
0x1336   :  { %24598 = vmatprep.mubr.msk.f32.mxu1 %vm28339_vm1, %v28338_v0 }
0x1339   :  { %24599 = vmatmul.mubr.msk.f32.gmra.mrb[2].mxu1 %vm26_vm0, %v35565_v27  ;;  %v14908_v27 = vld [vmem:[#allocation2 + $0xd2] sm:$0xff] }
0x133a   :  { %24601 = vmatprep.mubr.msk.f32.mxu1 %vm28339_vm1, %v28338_v0 }
0x133d   :  { %24602 = vmatmul.mubr.msk.f32.gmra.mrb[4].mxu1 %vm26_vm0, %v35571_v51  ;;  %v14909_v51 = vld [vmem:[#allocation2 + $0xda] sm:$0xff] }
0x133e   :  { %24604 = vmatprep.mubr.msk.f32.mxu1 %vm28339_vm1, %v28338_v0 }
0x1341   :  { %24605 = vmatmul.mubr.msk.f32.gmra.mrb[6].mxu1 %vm26_vm0, %v35577_v33  ;;  %v14910_v33 = vld [vmem:[#allocation2 + $0xe2] sm:$0xff] }
0x1342   :  { %24607 = vmatprep.mubr.msk.f32.mxu1 %vm28339_vm1, %v28338_v0 }
0x1345   :  { %24608 = vmatmul.mubr.msk.f32.gmra.mrb[8].mxu1 %vm26_vm0, %v35583_v36  ;;  %v14911_v36 = vld [vmem:[#allocation2 + $0xea] sm:$0xff] }
0x1346   :  { %24610 = vmatprep.mubr.msk.f32.mxu1 %vm28339_vm1, %v28338_v0 }
0x1349   :  { %24611 = vmatmul.mubr.msk.f32.gmra.mrb[10].mxu1 %vm26_vm0, %v35589_v35  ;;  %v14912_v35 = vld [vmem:[#allocation2 + $0xf2] sm:$0xff] }
0x134a   :  { %24613 = vmatprep.mubr.msk.f32.mxu1 %vm28339_vm1, %v28338_v0 }
0x134d   :  { %24614 = vmatmul.mubr.msk.f32.gmra.mrb[12].mxu1 %vm26_vm0, %v35595_v43  ;;  %v14913_v43 = vld [vmem:[#allocation2 + $0xfa] sm:$0xff] }
0x134e   :  { %24616 = vmatprep.mubr.msk.f32.mxu1 %vm28339_vm1, %v28338_v0 }
0x1351   :  { %24617 = vmatmul.mubr.msk.f32.gmra.mrb[14].mxu1 %vm26_vm0, %v35601_v53  ;;  %v14914_v53 = vld [vmem:[#allocation2 + $0x102] sm:$0xff] }
0x1352   :  { %24619 = vmatprep.mubr.msk.f32.mxu1 %vm28339_vm1, %v28338_v0 }
0x1355   :  { %24620 = vmatmul.mubr.msk.f32.gmra.mrb[16].mxu1 %vm26_vm0, %v35607_v10  ;;  %v14915_v10 = vld [vmem:[#allocation2 + $0x10a] sm:$0xff] }
0x1356   :  { %24622 = vmatprep.mubr.msk.f32.mxu1 %vm28339_vm1, %v28338_v0 }
0x1359   :  { %24623 = vmatmul.mubr.msk.f32.gmra.mrb[18].mxu1 %vm26_vm0, %v35613_v45  ;;  %v14916_v45 = vld [vmem:[#allocation2 + $0x112] sm:$0xff] }
0x135a   :  { %24625 = vmatprep.mubr.msk.f32.mxu1 %vm28339_vm1, %v28338_v0 }
0x135d   :  { %24626 = vmatmul.mubr.msk.f32.gmra.mrb[20].mxu1 %vm26_vm0, %v35619_v12  ;;  %v14917_v12 = vld [vmem:[#allocation2 + $0x11a] sm:$0xff] }
0x135e   :  { %24628 = vmatprep.mubr.msk.f32.mxu1 %vm28339_vm1, %v28338_v0 }
0x1361   :  { %24629 = vmatmul.mubr.msk.f32.gmra.mrb[22].mxu1 %vm26_vm0, %v35625_v11  ;;  %v14918_v11 = vld [vmem:[#allocation2 + $0x122] sm:$0xff] }
0x1362   :  { %24631 = vmatprep.mubr.msk.f32.mxu1 %vm28339_vm1, %v28338_v0 }
0x1365   :  { %24632 = vmatmul.mubr.msk.f32.gmra.mrb[24].mxu1 %vm26_vm0, %v35631_v13  ;;  %v14919_v13 = vld [vmem:[#allocation2 + $0x12a] sm:$0xff] }
0x1366   :  { %24634 = vmatprep.mubr.msk.f32.mxu1 %vm28339_vm1, %v28338_v0 }
0x1369   :  { %24635 = vmatmul.mubr.msk.f32.gmra.mrb[26].mxu1 %vm26_vm0, %v35637_v55  ;;  %v14920_v55 = vld [vmem:[#allocation2 + $0x132] sm:$0xff] }
0x136a   :  { %24637 = vmatprep.mubr.msk.f32.mxu1 %vm28339_vm1, %v28338_v0 }
0x136d   :  { %24638 = vmatmul.mubr.msk.f32.gmra.mrb[28].mxu1 %vm26_vm0, %v35643_v20  ;;  %v14921_v20 = vld [vmem:[#allocation2 + $0x13a] sm:$0xff] }
0x136e   :  { %24640 = vmatprep.mubr.msk.f32.mxu1 %vm28339_vm1, %v28338_v0 }
0x1371   :  { %24641 = vmatmul.mubr.msk.f32.gmra.mrb[30].mxu1 %vm26_vm0, %v35649_v5  ;;  %v14922_v5 = vld [vmem:[#allocation2 + $0x142] sm:$0xff] }
0x1372   :  { %24643 = vmatprep.mubr.msk.f32.mxu1 %vm28339_vm1, %v28338_v0 }
0x1375   :  { %24644 = vmatmul.mubr.msk.f32.gmra.mrb[32].mxu1 %vm26_vm0, %v35655_v4  ;;  %v14923_v4 = vld [vmem:[#allocation2 + $0x14a] sm:$0xff] }
0x1376   :  { %24646 = vmatprep.mubr.msk.f32.mxu1 %vm28339_vm1, %v28338_v0 }
0x1379   :  { %24647 = vmatmul.mubr.msk.f32.gmra.mrb[34].mxu1 %vm26_vm0, %v35661_v7  ;;  %v14924_v7 = vld [vmem:[#allocation2 + $0x152] sm:$0xff] }
0x137a   :  { %24649 = vmatprep.mubr.msk.f32.mxu1 %vm28339_vm1, %v28338_v0 }
0x137d   :  { %24650 = vmatmul.mubr.msk.f32.gmra.mrb[36].mxu1 %vm26_vm0, %v35667_v19  ;;  %v14925_v19 = vld [vmem:[#allocation2 + $0x15a] sm:$0xff] }
0x137e   :  { %24652 = vmatprep.mubr.msk.f32.mxu1 %vm28339_vm1, %v28338_v0 }
0x1381   :  { %24653 = vmatmul.mubr.msk.f32.gmra.mrb[38].mxu1 %vm26_vm0, %v35673_v38  ;;  %v14926_v38 = vld [vmem:[#allocation2 + $0x162] sm:$0xff] }
0x1382   :  { %24655 = vmatprep.mubr.msk.f32.mxu1 %vm28339_vm1, %v28338_v0 }
0x1385   :  { %24656 = vmatmul.mubr.msk.f32.gmra.mrb[40].mxu1 %vm26_vm0, %v37699_v56  ;;  %v14930_v56 = vld [vmem:[#allocation2 + $0x182] sm:$0xff] }
0x1386   :  { %24658 = vmatprep.mubr.msk.f32.mxu1 %vm28339_vm1, %v28338_v0 }
0x1389   :  { %24659 = vmatmul.mubr.msk.f32.gmra.mrb[42].mxu1 %vm26_vm0, %v37700_v47  ;;  %v14931_v47 = vld [vmem:[#allocation2 + $0x18a] sm:$0xff] }
0x138a   :  { %24661 = vmatprep.mubr.msk.f32.mxu1 %vm28339_vm1, %v28338_v0 }
0x138d   :  { %24662 = vmatmul.mubr.msk.f32.gmra.mrb[44].mxu1 %vm26_vm0, %v37701_v52  ;;  %v14932_v52 = vld [vmem:[#allocation2 + $0x192] sm:$0xff] }
0x138e   :  { %24664 = vmatprep.mubr.msk.f32.mxu1 %vm28339_vm1, %v28338_v0 }
0x1391   :  { %24665 = vmatmul.mubr.msk.f32.gmra.mrb[46].mxu1 %vm26_vm0, %v37702_v26  ;;  %v14933_v26 = vld [vmem:[#allocation2 + $0x19a] sm:$0xff] }
0x1392   :  { %24667 = vmatprep.mubr.msk.f32.mxu1 %vm28339_vm1, %v28338_v0 }
0x1395   :  { %24668 = vmatmul.mubr.msk.f32.gmra.mrb[48].mxu1 %vm26_vm0, %v37703_v3  ;;  %v14934_v3 = vld [vmem:[#allocation2 + $0x1a2] sm:$0xff] }
0x1396   :  { %24670 = vmatprep.mubr.msk.f32.mxu1 %vm28339_vm1, %v28338_v0 }
0x1399   :  { %24671 = vmatmul.mubr.msk.f32.gmra.mrb[50].mxu1 %vm26_vm0, %v37704_v58  ;;  %v14935_v58 = vld [vmem:[#allocation2 + $0x1aa] sm:$0xff] }
0x139a   :  { %24673 = vmatprep.mubr.msk.f32.mxu1 %vm28339_vm1, %v28338_v0 }
0x139d   :  { %24674 = vmatmul.mubr.msk.f32.gmra.mrb[52].mxu1 %vm26_vm0, %v37705_v40  ;;  %v14936_v40 = vld [vmem:[#allocation2 + $0x1b2] sm:$0xff] }
0x139e   :  { %24676 = vmatprep.mubr.msk.f32.mxu1 %vm28339_vm1, %v28338_v0 }
0x13a1   :  { %24677 = vmatmul.mubr.msk.f32.gmra.mrb[54].mxu1 %vm26_vm0, %v37706_v57  ;;  %v14937_v57 = vld [vmem:[#allocation2 + $0x1ba] sm:$0xff] }
0x13a2   :  { %24679 = vmatprep.mubr.msk.f32.mxu1 %vm28339_vm1, %v28338_v0 }
0x13a5   :  { %24680 = vmatmul.mubr.msk.f32.gmra.mrb[56].mxu1 %vm26_vm0, %v37707_v28  ;;  %v14938_v28 = vld [vmem:[#allocation2 + $0x1c2] sm:$0xff] }
0x13a6   :  { %24682 = vmatprep.mubr.msk.f32.mxu1 %vm28339_vm1, %v28338_v0 }
0x13a9   :  { %24683 = vmatmul.mubr.msk.f32.gmra.mrb[58].mxu1 %vm26_vm0, %v37708_v59  ;;  %v14939_v59 = vld [vmem:[#allocation2 + $0x1ca] sm:$0xff] }
0x13aa   :  { %24685 = vmatprep.mubr.msk.f32.mxu1 %vm28339_vm1, %v28338_v0 }
0x13ad   :  { %24686 = vmatmul.mubr.msk.f32.gmra.mrb[60].mxu1 %vm26_vm0, %v37709_v25  ;;  %v14940_v25 = vld [vmem:[#allocation2 + $0x1d2] sm:$0xff] }
0x13ae   :  { %24688 = vmatprep.mubr.msk.f32.mxu1 %vm28339_vm1, %v28338_v0 }
0x13b1   :  { %24689 = vmatmul.mubr.msk.f32.gmra.mrb[62].mxu1 %vm26_vm0, %v37710_v17  ;;  %v14941_v17 = vld [vmem:[#allocation2 + $0x1da] sm:$0xff] }
0x13b2   :  { %24691 = vmatprep.mubr.msk.f32.mxu1 %vm28339_vm1, %v28338_v0 }
0x13b5   :  { %24692 = vmatmul.mubr.msk.f32.gmra.mrb[64].mxu1 %vm26_vm0, %v37711_v29  ;;  %v14942_v29 = vld [vmem:[#allocation2 + $0x1e2] sm:$0xff] }
0x13b6   :  { %24694 = vmatprep.mubr.msk.f32.mxu1 %vm28339_vm1, %v28338_v0 }
0x13b9   :  { %24695 = vmatmul.mubr.msk.f32.gmra.mrb[66].mxu1 %vm26_vm0, %v37712_v32  ;;  %v14943_v32 = vld [vmem:[#allocation2 + $0x1ea] sm:$0xff] }
0x13ba   :  { %24697 = vmatprep.mubr.msk.f32.mxu1 %vm28339_vm1, %v28338_v0 }
0x13bd   :  { %24698 = vmatmul.mubr.msk.f32.gmra.mrb[68].mxu1 %vm26_vm0, %v37713_v41  ;;  %v14944_v41 = vld [vmem:[#allocation2 + $0x1f2] sm:$0xff] }
0x13be   :  { %24700 = vmatprep.mubr.msk.f32.mxu1 %vm28339_vm1, %v28338_v0 }
0x13c1   :  { %24701 = vmatmul.mubr.msk.f32.gmra.mrb[70].mxu1 %vm26_vm0, %v37714_v31  ;;  %v14945_v31 = vld [vmem:[#allocation2 + $0x1fa] sm:$0xff] }
0x13c2   :  { %24703 = vmatprep.mubr.msk.f32.mxu1 %vm28339_vm1, %v28338_v0 }
0x13c5   :  { %24704 = vmatmul.mubr.msk.f32.gmra.mrb[72].mxu1 %vm26_vm0, %v37715_v9  ;;  %v14946_v9 = vld [vmem:[#allocation2 + $0x202] sm:$0xff] }
0x13c6   :  { %24706 = vmatprep.mubr.msk.f32.mxu1 %vm28339_vm1, %v28338_v0 }
0x13c9   :  { %24707 = vmatmul.mubr.msk.f32.gmra.mrb[74].mxu1 %vm26_vm0, %v35781_v48  ;;  %v14929_v48 = vld [vmem:[#allocation2 + $0x17a] sm:$0xff] }
0x13ca   :  { %24709 = vmatprep.mubr.msk.f32.mxu1 %vm28339_vm1, %v28338_v0 }
0x13cd   :  { %24710 = vmatmul.mubr.msk.f32.gmra.mrb[76].mxu1 %vm26_vm0, %v35787_v42  ;;  %v14927_v42 = vld [vmem:[#allocation2 + $0x16a] sm:$0xff] }
0x13ce   :  { %24712 = vmatprep.mubr.msk.f32.mxu1 %vm28339_vm1, %v28338_v0 }
0x13d1   :  { %24713 = vmatmul.mubr.msk.f32.gmra.mrb[78].mxu1 %vm26_vm0, %v14089_v21  ;;  %v14947_v21 = vld [vmem:[#allocation2 + $0x20a] sm:$0xff] }
0x13d2   :  { %24715 = vmatprep.mubr.msk.f32.mxu1 %vm28339_vm1, %v28338_v0 }
0x13d5   :  { %24716 = vmatmul.mubr.msk.f32.gmra.mrb[80].mxu1 %vm26_vm0, %v14090_v63  ;;  %v14948_v63 = vld [vmem:[#allocation2 + $0x212] sm:$0xff] }
0x13d6   :  { %24720 = vmatprep.mubr.msk.f32.mxu1 %vm28339_vm1, %v28338_v0 }
0x13d9   :  { %24721 = vmatmul.mubr.msk.f32.vlgmr.msra.gmra.mrb[82].mxu1 %vm26_vm0, %v14887_v37  ;;  %v14950_v37 = vld [vmem:[#allocation2 + $0x222] sm:$0xff] }
0x13da   :  { %24964 = vmatpush3.msra.mxu1 %v19077_v23  ;;  %24723 = vmatprep.mubr.msk.f32.mxu1 %vm28339_vm1, %v28338_v0  ;;  %v14949_v23 = vld [vmem:[#allocation2 + $0x21a] sm:$0xff] }
0x13db   :  { %25208 = vmatprep.subr.mxu1 %v28338_v0 }
0x13dd   :  { %24724 = vmatmul.mubr.msk.f32.gmra.mrb[84].mxu1 %vm26_vm0, %v14888_v2  ;;  %v14951_v2 = vld [vmem:[#allocation2 + $0x22a] sm:$0xff] }
0x13de   :  { %24726 = vmatprep.mubr.msk.f32.mxu1 %vm28339_vm1, %v28338_v0 }
0x13e1   :  { %24727 = vmatmul.mubr.msk.f32.gmra.mrb[86].mxu1 %vm26_vm0, %v14889_v60  ;;  %v14952_v60 = vld [vmem:[#allocation2 + $0x232] sm:$0xff] }
0x13e2   :  { %24729 = vmatprep.mubr.msk.f32.mxu1 %vm28339_vm1, %v28338_v0 }
0x13e5   :  { %24730 = vmatmul.mubr.msk.f32.gmra.mrb[88].mxu1 %vm26_vm0, %v14890_v46  ;;  %v14953_v46 = vld [vmem:[#allocation2 + $0x23a] sm:$0xff] }
0x13e6   :  { %24732 = vmatprep.mubr.msk.f32.mxu1 %vm28339_vm1, %v28338_v0 }
0x13e9   :  { %24733 = vmatmul.mubr.msk.f32.gmra.mrb[90].mxu1 %vm26_vm0, %v14891_v39  ;;  %v14954_v39 = vld [vmem:[#allocation2 + $0x242] sm:$0xff] }
0x13ea   :  { %24735 = vmatprep.mubr.msk.f32.mxu1 %vm28339_vm1, %v28338_v0 }
0x13ed   :  { %24736 = vmatmul.mubr.msk.f32.gmra.mrb[92].mxu1 %vm26_vm0, %v14892_v61  ;;  %v14955_v61 = vld [vmem:[#allocation2 + $0x24a] sm:$0xff] }
0x13ee   :  { %24738 = vmatprep.mubr.msk.f32.mxu1 %vm28339_vm1, %v28338_v0 }
0x13f1   :  { %24739 = vmatmul.mubr.msk.f32.gmra.mrb[94].mxu1 %vm26_vm0, %v14893_v49  ;;  %v14956_v49 = vld [vmem:[#allocation2 + $0x252] sm:$0xff] }
0x13f2   :  { %24741 = vmatprep.mubr.msk.f32.mxu1 %vm28339_vm1, %v28338_v0 }
0x13f5   :  { %24742 = vmatmul.mubr.msk.f32.gmra.mrb[96].mxu1 %vm26_vm0, %v14894_v54  ;;  %v14957_v54 = vld [vmem:[#allocation2 + $0x25a] sm:$0xff] }
0x13f6   :  { %24744 = vmatprep.mubr.msk.f32.mxu1 %vm28339_vm1, %v28338_v0 }
0x13f9   :  { %24745 = vmatmul.mubr.msk.f32.gmra.mrb[98].mxu1 %vm26_vm0, %v14895_v44  ;;  %v14958_v44 = vld [vmem:[#allocation2 + $0x262] sm:$0xff] }
0x13fa   :  { %24747 = vmatprep.mubr.msk.f32.mxu1 %vm28339_vm1, %v28338_v0 }
0x13fd   :  { %24748 = vmatmul.mubr.msk.f32.gmra.mrb[100].mxu1 %vm26_vm0, %v14896_v62  ;;  %v14959_v62 = vld [vmem:[#allocation2 + $0x26a] sm:$0xff] }
0x13fe   :  { %24750 = vmatprep.mubr.msk.f32.mxu1 %vm28339_vm1, %v28338_v0 }
0x1401   :  { %24751 = vmatmul.mubr.msk.f32.gmra.mrb[102].mxu1 %vm26_vm0, %v14897_v6  ;;  %v14960_v6 = vld [vmem:[#allocation2 + $0x272] sm:$0xff] }
0x1402   :  { %24753 = vmatprep.mubr.msk.f32.mxu1 %vm28339_vm1, %v28338_v0 }
0x1405   :  { %24754 = vmatmul.mubr.msk.f32.gmra.mrb[104].mxu1 %vm26_vm0, %v14898_v24  ;;  %v14961_v24 = vld [vmem:[#allocation2 + $0x27a] sm:$0xff] }
0x1406   :  { %24756 = vmatprep.mubr.msk.f32.mxu1 %vm28339_vm1, %v28338_v0 }
0x1409   :  { %24757 = vmatmul.mubr.msk.f32.gmra.mrb[106].mxu1 %vm26_vm0, %v14899_v8  ;;  %v14962_v8 = vld [vmem:[#allocation2 + $0x282] sm:$0xff] }
0x140a   :  { %24759 = vmatprep.mubr.msk.f32.mxu1 %vm28339_vm1, %v28338_v0 }
0x140d   :  { %24760 = vmatmul.mubr.msk.f32.gmra.mrb[108].mxu1 %vm26_vm0, %v14900_v34  ;;  %v14963_v34 = vld [vmem:[#allocation2 + $0x28a] sm:$0xff] }
0x140e   :  { %24762 = vmatprep.mubr.msk.f32.mxu1 %vm28339_vm1, %v28338_v0 }
0x1411   :  { %24763 = vmatmul.mubr.msk.f32.gmra.mrb[110].mxu1 %vm26_vm0, %v14901_v14  ;;  %v14964_v14 = vld [vmem:[#allocation2 + $0x292] sm:$0xff] }
0x1412   :  { %24765 = vmatprep.mubr.msk.f32.mxu1 %vm28339_vm1, %v28338_v0 }
0x1415   :  { %24766 = vmatmul.mubr.msk.f32.gmra.mrb[112].mxu1 %vm26_vm0, %v14902_v15  ;;  %v14965_v15 = vld [vmem:[#allocation2 + $0x29a] sm:$0xff] }
0x1416   :  { %24768 = vmatprep.mubr.msk.f32.mxu1 %vm28339_vm1, %v28338_v0 }
0x1419   :  { %24769 = vmatmul.mubr.msk.f32.gmra.mrb[114].mxu1 %vm26_vm0, %v14903_v18  ;;  %v14966_v18 = vld [vmem:[#allocation2 + $0x2a2] sm:$0xff] }
0x141a   :  { %24771 = vmatprep.mubr.msk.f32.mxu1 %vm28339_vm1, %v28338_v0 }
0x141d   :  { %24772 = vmatmul.mubr.msk.f32.gmra.mrb[116].mxu1 %vm26_vm0, %v14904_v16  ;;  %v14967_v16 = vld [vmem:[#allocation2 + $0x2aa] sm:$0xff] }
0x141e   :  { %24774 = vmatprep.mubr.msk.f32.mxu1 %vm28339_vm1, %v28338_v0 }
0x1421   :  { %24775 = vmatmul.mubr.msk.f32.gmra.mrb[118].mxu1 %vm26_vm0, %v14905_v50  ;;  %v16722_v50 = vld [vmem:[%s37469_s6] sm:$0xff] }
0x1422   :  { %24777 = vmatprep.mubr.msk.f32.mxu1 %vm28339_vm1, %v28338_v0 }
0x1425   :  { %24778 = vmatmul.mubr.msk.f32.gmra.mrb[120].mxu1 %vm26_vm0, %v14906_v22  ;;  %v15764_v22 = vld [vmem:[#allocation2 + $0x2b] sm:$0xff] }
0x1426   :  { %24780 = vmatprep.mubr.msk.f32.mxu1 %vm28339_vm1, %v28338_v0 }
0x1429   :  { %24781 = vmatmul.mubr.msk.f32.gmra.mrb[122].mxu1 %vm26_vm0, %v14907_v30  ;;  %v15765_v30 = vld [vmem:[#allocation2 + $0x33] sm:$0xff] }
0x142a   :  { %24783 = vmatprep.mubr.msk.f32.mxu1 %vm28339_vm1, %v28338_v0 }
0x142d   :  { %24784 = vmatmul.mubr.msk.f32.gmra.mrb[124].mxu1 %vm26_vm0, %v14908_v27  ;;  %v15766_v27 = vld [vmem:[#allocation2 + $0x3b] sm:$0xff] }
0x142e   :  { %24786 = vmatprep.mubr.msk.f32.mxu1 %vm28339_vm1, %v28338_v0 }
0x1431   :  { %24787 = vmatmul.mubr.msk.f32.gmra.mrb[126].mxu1 %vm26_vm0, %v14909_v51  ;;  %v15767_v51 = vld [vmem:[#allocation2 + $0x43] sm:$0xff] }
0x1432   :  { %24789 = vmatprep.mubr.msk.f32.mxu1 %vm28339_vm1, %v28338_v0 }
0x1435   :  { %24790 = vmatmul.mubr.msk.f32.gmra.mrb[128].mxu1 %vm26_vm0, %v14910_v33  ;;  %v15768_v33 = vld [vmem:[#allocation2 + $0x4b] sm:$0xff] }
0x1436   :  { %24792 = vmatprep.mubr.msk.f32.mxu1 %vm28339_vm1, %v28338_v0 }
0x1439   :  { %24793 = vmatmul.mubr.msk.f32.gmra.mrb[130].mxu1 %vm26_vm0, %v14911_v36  ;;  %v15769_v36 = vld [vmem:[#allocation2 + $0x53] sm:$0xff] }
0x143a   :  { %24795 = vmatprep.mubr.msk.f32.mxu1 %vm28339_vm1, %v28338_v0 }
0x143d   :  { %24796 = vmatmul.mubr.msk.f32.gmra.mrb[132].mxu1 %vm26_vm0, %v14912_v35  ;;  %v15770_v35 = vld [vmem:[#allocation2 + $0x5b] sm:$0xff] }
0x143e   :  { %24798 = vmatprep.mubr.msk.f32.mxu1 %vm28339_vm1, %v28338_v0 }
0x1441   :  { %24799 = vmatmul.mubr.msk.f32.gmra.mrb[134].mxu1 %vm26_vm0, %v14913_v43  ;;  %v15771_v43 = vld [vmem:[#allocation2 + $0x63] sm:$0xff] }
0x1442   :  { %24801 = vmatprep.mubr.msk.f32.mxu1 %vm28339_vm1, %v28338_v0 }
0x1445   :  { %24802 = vmatmul.mubr.msk.f32.gmra.mrb[136].mxu1 %vm26_vm0, %v14914_v53  ;;  %v15772_v53 = vld [vmem:[#allocation2 + $0x6b] sm:$0xff] }
0x1446   :  { %24804 = vmatprep.mubr.msk.f32.mxu1 %vm28339_vm1, %v28338_v0 }
0x1449   :  { %24805 = vmatmul.mubr.msk.f32.gmra.mrb[138].mxu1 %vm26_vm0, %v14915_v10  ;;  %v15773_v10 = vld [vmem:[#allocation2 + $0x73] sm:$0xff] }
0x144a   :  { %24807 = vmatprep.mubr.msk.f32.mxu1 %vm28339_vm1, %v28338_v0 }
0x144d   :  { %24808 = vmatmul.mubr.msk.f32.gmra.mrb[140].mxu1 %vm26_vm0, %v14916_v45  ;;  %v15774_v45 = vld [vmem:[#allocation2 + $0x7b] sm:$0xff] }
0x144e   :  { %24810 = vmatprep.mubr.msk.f32.mxu1 %vm28339_vm1, %v28338_v0 }
0x1451   :  { %24811 = vmatmul.mubr.msk.f32.gmra.mrb[142].mxu1 %vm26_vm0, %v14917_v12  ;;  %v15775_v12 = vld [vmem:[#allocation2 + $0x83] sm:$0xff] }
0x1452   :  { %24813 = vmatprep.mubr.msk.f32.mxu1 %vm28339_vm1, %v28338_v0 }
0x1455   :  { %24814 = vmatmul.mubr.msk.f32.gmra.mrb[144].mxu1 %vm26_vm0, %v14918_v11  ;;  %v15776_v11 = vld [vmem:[#allocation2 + $0x8b] sm:$0xff] }
0x1456   :  { %24816 = vmatprep.mubr.msk.f32.mxu1 %vm28339_vm1, %v28338_v0 }
0x1459   :  { %24817 = vmatmul.mubr.msk.f32.gmra.mrb[146].mxu1 %vm26_vm0, %v14919_v13  ;;  %v15777_v13 = vld [vmem:[#allocation2 + $0x93] sm:$0xff] }
0x145a   :  { %24819 = vmatprep.mubr.msk.f32.mxu1 %vm28339_vm1, %v28338_v0 }
0x145d   :  { %24820 = vmatmul.mubr.msk.f32.gmra.mrb[148].mxu1 %vm26_vm0, %v14920_v55  ;;  %v15778_v55 = vld [vmem:[#allocation2 + $0x9b] sm:$0xff] }
0x145e   :  { %24822 = vmatprep.mubr.msk.f32.mxu1 %vm28339_vm1, %v28338_v0 }
0x1461   :  { %24823 = vmatmul.mubr.msk.f32.gmra.mrb[150].mxu1 %vm26_vm0, %v14921_v20  ;;  %v15779_v20 = vld [vmem:[#allocation2 + $0xa3] sm:$0xff] }
0x1462   :  { %24825 = vmatprep.mubr.msk.f32.mxu1 %vm28339_vm1, %v28338_v0 }
0x1465   :  { %24826 = vmatmul.mubr.msk.f32.gmra.mrb[152].mxu1 %vm26_vm0, %v14922_v5  ;;  %v15780_v5 = vld [vmem:[#allocation2 + $0xab] sm:$0xff] }
0x1466   :  { %24828 = vmatprep.mubr.msk.f32.mxu1 %vm28339_vm1, %v28338_v0 }
0x1469   :  { %24829 = vmatmul.mubr.msk.f32.gmra.mrb[154].mxu1 %vm26_vm0, %v14923_v4  ;;  %v15781_v4 = vld [vmem:[#allocation2 + $0xb3] sm:$0xff] }
0x146a   :  { %24831 = vmatprep.mubr.msk.f32.mxu1 %vm28339_vm1, %v28338_v0 }
0x146d   :  { %24832 = vmatmul.mubr.msk.f32.gmra.mrb[156].mxu1 %vm26_vm0, %v14924_v7  ;;  %v15782_v7 = vld [vmem:[#allocation2 + $0xbb] sm:$0xff] }
0x146e   :  { %24834 = vmatprep.mubr.msk.f32.mxu1 %vm28339_vm1, %v28338_v0 }
0x1471   :  { %24835 = vmatmul.mubr.msk.f32.gmra.mrb[158].mxu1 %vm26_vm0, %v14925_v19  ;;  %v15783_v19 = vld [vmem:[#allocation2 + $0xc3] sm:$0xff] }
0x1472   :  { %24837 = vmatprep.mubr.msk.f32.mxu1 %vm28339_vm1, %v28338_v0 }
0x1475   :  { %24838 = vmatmul.mubr.msk.f32.gmra.mrb[160].mxu1 %vm26_vm0, %v14926_v38  ;;  %v15784_v38 = vld [vmem:[#allocation2 + $0xcb] sm:$0xff] }
0x1476   :  { %24840 = vmatprep.mubr.msk.f32.mxu1 %vm28339_vm1, %v28338_v0 }
0x1479   :  { %24841 = vmatmul.mubr.msk.f32.gmra.mrb[0].mxu1 %vm26_vm0, %v14927_v42  ;;  %v15785_v42 = vld [vmem:[#allocation2 + $0xd3] sm:$0xff] }
0x147a   :  { %24843 = vmatprep.mubr.msk.f32.mxu1 %vm28339_vm1, %v28338_v0 }
0x147d   :  { %24844 = vmatmul.mubr.msk.f32.gmra.mrb[2].mxu1 %vm26_vm0, %v14928_v1  ;;  %v15786_v1 = vld [vmem:[#allocation2 + $0xdb] sm:$0xff] }
0x147e   :  { %24846 = vmatprep.mubr.msk.f32.mxu1 %vm28339_vm1, %v28338_v0 }
0x1481   :  { %24847 = vmatmul.mubr.msk.f32.gmra.mrb[4].mxu1 %vm26_vm0, %v14929_v48  ;;  %v15787_v48 = vld [vmem:[#allocation2 + $0xe3] sm:$0xff] }
0x1482   :  { %24849 = vmatprep.mubr.msk.f32.mxu1 %vm28339_vm1, %v28338_v0 }
0x1485   :  { %24850 = vmatmul.mubr.msk.f32.gmra.mrb[6].mxu1 %vm26_vm0, %v14930_v56  ;;  %v15788_v56 = vld [vmem:[#allocation2 + $0xeb] sm:$0xff] }
0x1486   :  { %24852 = vmatprep.mubr.msk.f32.mxu1 %vm28339_vm1, %v28338_v0 }
0x1489   :  { %24853 = vmatmul.mubr.msk.f32.gmra.mrb[8].mxu1 %vm26_vm0, %v14931_v47  ;;  %v15789_v47 = vld [vmem:[#allocation2 + $0xf3] sm:$0xff] }
0x148a   :  { %24855 = vmatprep.mubr.msk.f32.mxu1 %vm28339_vm1, %v28338_v0 }
0x148d   :  { %24856 = vmatmul.mubr.msk.f32.gmra.mrb[10].mxu1 %vm26_vm0, %v14932_v52  ;;  %v15790_v52 = vld [vmem:[#allocation2 + $0xfb] sm:$0xff] }
0x148e   :  { %24858 = vmatprep.mubr.msk.f32.mxu1 %vm28339_vm1, %v28338_v0 }
0x1491   :  { %24859 = vmatmul.mubr.msk.f32.gmra.mrb[12].mxu1 %vm26_vm0, %v14933_v26  ;;  %v15791_v26 = vld [vmem:[#allocation2 + $0x103] sm:$0xff] }
0x1492   :  { %24861 = vmatprep.mubr.msk.f32.mxu1 %vm28339_vm1, %v28338_v0 }
0x1495   :  { %24862 = vmatmul.mubr.msk.f32.gmra.mrb[14].mxu1 %vm26_vm0, %v14934_v3  ;;  %v15792_v3 = vld [vmem:[#allocation2 + $0x10b] sm:$0xff] }
0x1496   :  { %24864 = vmatprep.mubr.msk.f32.mxu1 %vm28339_vm1, %v28338_v0 }
0x1499   :  { %24865 = vmatmul.mubr.msk.f32.gmra.mrb[16].mxu1 %vm26_vm0, %v14935_v58  ;;  %v15793_v58 = vld [vmem:[#allocation2 + $0x113] sm:$0xff] }
0x149a   :  { %24867 = vmatprep.mubr.msk.f32.mxu1 %vm28339_vm1, %v28338_v0 }
0x149d   :  { %24868 = vmatmul.mubr.msk.f32.gmra.mrb[18].mxu1 %vm26_vm0, %v14936_v40  ;;  %v15794_v40 = vld [vmem:[#allocation2 + $0x11b] sm:$0xff] }
0x149e   :  { %24870 = vmatprep.mubr.msk.f32.mxu1 %vm28339_vm1, %v28338_v0 }
0x14a1   :  { %24871 = vmatmul.mubr.msk.f32.gmra.mrb[20].mxu1 %vm26_vm0, %v14937_v57  ;;  %v15795_v57 = vld [vmem:[#allocation2 + $0x123] sm:$0xff] }
0x14a2   :  { %24873 = vmatprep.mubr.msk.f32.mxu1 %vm28339_vm1, %v28338_v0 }
0x14a5   :  { %24874 = vmatmul.mubr.msk.f32.gmra.mrb[22].mxu1 %vm26_vm0, %v14938_v28  ;;  %v15796_v28 = vld [vmem:[#allocation2 + $0x12b] sm:$0xff] }
0x14a6   :  { %24876 = vmatprep.mubr.msk.f32.mxu1 %vm28339_vm1, %v28338_v0 }
0x14a9   :  { %24877 = vmatmul.mubr.msk.f32.gmra.mrb[24].mxu1 %vm26_vm0, %v14939_v59  ;;  %v15797_v59 = vld [vmem:[#allocation2 + $0x133] sm:$0xff] }
0x14aa   :  { %24879 = vmatprep.mubr.msk.f32.mxu1 %vm28339_vm1, %v28338_v0 }
0x14ad   :  { %24880 = vmatmul.mubr.msk.f32.gmra.mrb[26].mxu1 %vm26_vm0, %v14940_v25  ;;  %v15798_v25 = vld [vmem:[#allocation2 + $0x13b] sm:$0xff] }
0x14ae   :  { %24882 = vmatprep.mubr.msk.f32.mxu1 %vm28339_vm1, %v28338_v0 }
0x14b1   :  { %24883 = vmatmul.mubr.msk.f32.gmra.mrb[28].mxu1 %vm26_vm0, %v14941_v17  ;;  %v15799_v17 = vld [vmem:[#allocation2 + $0x143] sm:$0xff] }
0x14b2   :  { %24885 = vmatprep.mubr.msk.f32.mxu1 %vm28339_vm1, %v28338_v0 }
0x14b5   :  { %24886 = vmatmul.mubr.msk.f32.gmra.mrb[30].mxu1 %vm26_vm0, %v14942_v29  ;;  %v15800_v29 = vld [vmem:[#allocation2 + $0x14b] sm:$0xff] }
0x14b6   :  { %24888 = vmatprep.mubr.msk.f32.mxu1 %vm28339_vm1, %v28338_v0 }
0x14b9   :  { %24889 = vmatmul.mubr.msk.f32.gmra.mrb[32].mxu1 %vm26_vm0, %v14943_v32  ;;  %v15801_v32 = vld [vmem:[#allocation2 + $0x153] sm:$0xff] }
0x14ba   :  { %24891 = vmatprep.mubr.msk.f32.mxu1 %vm28339_vm1, %v28338_v0 }
0x14bd   :  { %24892 = vmatmul.mubr.msk.f32.gmra.mrb[34].mxu1 %vm26_vm0, %v14944_v41  ;;  %v15802_v41 = vld [vmem:[#allocation2 + $0x15b] sm:$0xff] }
0x14be   :  { %24894 = vmatprep.mubr.msk.f32.mxu1 %vm28339_vm1, %v28338_v0 }
0x14c1   :  { %24895 = vmatmul.mubr.msk.f32.gmra.mrb[36].mxu1 %vm26_vm0, %v14945_v31  ;;  %v15803_v31 = vld [vmem:[#allocation2 + $0x163] sm:$0xff] }
0x14c2   :  { %24897 = vmatprep.mubr.msk.f32.mxu1 %vm28339_vm1, %v28338_v0 }
0x14c5   :  { %24898 = vmatmul.mubr.msk.f32.gmra.mrb[38].mxu1 %vm26_vm0, %v14946_v9  ;;  %v15804_v9 = vld [vmem:[#allocation2 + $0x16b] sm:$0xff] }
0x14c6   :  { %24900 = vmatprep.mubr.msk.f32.mxu1 %vm28339_vm1, %v28338_v0 }
0x14c9   :  { %24901 = vmatmul.mubr.msk.f32.gmra.mrb[40].mxu1 %vm26_vm0, %v14947_v21  ;;  %v15805_v21 = vld [vmem:[#allocation2 + $0x173] sm:$0xff] }
0x14ca   :  { %24903 = vmatprep.mubr.msk.f32.mxu1 %vm28339_vm1, %v28338_v0 }
0x14cd   :  { %24904 = vmatmul.mubr.msk.f32.gmra.mrb[42].mxu1 %vm26_vm0, %v14948_v63  ;;  %v15806_v63 = vld [vmem:[#allocation2 + $0x17b] sm:$0xff] }
0x14ce   :  { %24906 = vmatprep.mubr.msk.f32.mxu1 %vm28339_vm1, %v28338_v0 }
0x14d1   :  { %24907 = vmatmul.mubr.msk.f32.gmra.mrb[44].mxu1 %vm26_vm0, %v14949_v23  ;;  %v15807_v23 = vld [vmem:[#allocation2 + $0x183] sm:$0xff] }
0x14d2   :  { %24909 = vmatprep.mubr.msk.f32.mxu1 %vm28339_vm1, %v28338_v0 }
0x14d5   :  { %24910 = vmatmul.mubr.msk.f32.gmra.mrb[46].mxu1 %vm26_vm0, %v14950_v37  ;;  %v15808_v37 = vld [vmem:[#allocation2 + $0x18b] sm:$0xff] }
0x14d6   :  { %24912 = vmatprep.mubr.msk.f32.mxu1 %vm28339_vm1, %v28338_v0 }
0x14d9   :  { %24913 = vmatmul.mubr.msk.f32.gmra.mrb[48].mxu1 %vm26_vm0, %v14951_v2  ;;  %v15809_v2 = vld [vmem:[#allocation2 + $0x193] sm:$0xff] }
0x14da   :  { %24915 = vmatprep.mubr.msk.f32.mxu1 %vm28339_vm1, %v28338_v0 }
0x14dd   :  { %24916 = vmatmul.mubr.msk.f32.gmra.mrb[50].mxu1 %vm26_vm0, %v14952_v60  ;;  %v15810_v60 = vld [vmem:[#allocation2 + $0x19b] sm:$0xff] }
0x14de   :  { %24918 = vmatprep.mubr.msk.f32.mxu1 %vm28339_vm1, %v28338_v0 }
0x14e1   :  { %24919 = vmatmul.mubr.msk.f32.gmra.mrb[52].mxu1 %vm26_vm0, %v14953_v46  ;;  %v15811_v46 = vld [vmem:[#allocation2 + $0x1a3] sm:$0xff] }
0x14e2   :  { %24921 = vmatprep.mubr.msk.f32.mxu1 %vm28339_vm1, %v28338_v0 }
0x14e5   :  { %24922 = vmatmul.mubr.msk.f32.gmra.mrb[54].mxu1 %vm26_vm0, %v14954_v39  ;;  %v15812_v39 = vld [vmem:[#allocation2 + $0x1ab] sm:$0xff] }
0x14e6   :  { %24924 = vmatprep.mubr.msk.f32.mxu1 %vm28339_vm1, %v28338_v0 }
0x14e9   :  { %24925 = vmatmul.mubr.msk.f32.gmra.mrb[56].mxu1 %vm26_vm0, %v14955_v61  ;;  %v15813_v61 = vld [vmem:[#allocation2 + $0x1b3] sm:$0xff] }
0x14ea   :  { %24927 = vmatprep.mubr.msk.f32.mxu1 %vm28339_vm1, %v28338_v0 }
0x14ed   :  { %24928 = vmatmul.mubr.msk.f32.gmra.mrb[58].mxu1 %vm26_vm0, %v14956_v49  ;;  %v15814_v49 = vld [vmem:[#allocation2 + $0x1bb] sm:$0xff] }
0x14ee   :  { %24930 = vmatprep.mubr.msk.f32.mxu1 %vm28339_vm1, %v28338_v0 }
0x14f1   :  { %24931 = vmatmul.mubr.msk.f32.gmra.mrb[60].mxu1 %vm26_vm0, %v14957_v54  ;;  %v15815_v54 = vld [vmem:[#allocation2 + $0x1c3] sm:$0xff] }
0x14f2   :  { %24933 = vmatprep.mubr.msk.f32.mxu1 %vm28339_vm1, %v28338_v0 }
0x14f5   :  { %24934 = vmatmul.mubr.msk.f32.gmra.mrb[62].mxu1 %vm26_vm0, %v14958_v44  ;;  %v15816_v44 = vld [vmem:[#allocation2 + $0x1cb] sm:$0xff] }
0x14f6   :  { %24936 = vmatprep.mubr.msk.f32.mxu1 %vm28339_vm1, %v28338_v0 }
0x14f9   :  { %24937 = vmatmul.mubr.msk.f32.gmra.mrb[64].mxu1 %vm26_vm0, %v14959_v62  ;;  %v15817_v62 = vld [vmem:[#allocation2 + $0x1d3] sm:$0xff] }
0x14fa   :  { %24939 = vmatprep.mubr.msk.f32.mxu1 %vm28339_vm1, %v28338_v0 }
0x14fd   :  { %24940 = vmatmul.mubr.msk.f32.gmra.mrb[66].mxu1 %vm26_vm0, %v14960_v6  ;;  %v15818_v6 = vld [vmem:[#allocation2 + $0x1db] sm:$0xff] }
0x14fe   :  { %24942 = vmatprep.mubr.msk.f32.mxu1 %vm28339_vm1, %v28338_v0 }
0x1501   :  { %24943 = vmatmul.mubr.msk.f32.gmra.mrb[68].mxu1 %vm26_vm0, %v14961_v24  ;;  %v15819_v24 = vld [vmem:[#allocation2 + $0x1e3] sm:$0xff] }
0x1502   :  { %24945 = vmatprep.mubr.msk.f32.mxu1 %vm28339_vm1, %v28338_v0 }
0x1505   :  { %24946 = vmatmul.mubr.msk.f32.gmra.mrb[70].mxu1 %vm26_vm0, %v14962_v8  ;;  %v15820_v8 = vld [vmem:[#allocation2 + $0x1eb] sm:$0xff] }
0x1506   :  { %24948 = vmatprep.mubr.msk.f32.mxu1 %vm28339_vm1, %v28338_v0 }
0x1509   :  { %24949 = vmatmul.mubr.msk.f32.gmra.mrb[72].mxu1 %vm26_vm0, %v14963_v34  ;;  %v15821_v34 = vld [vmem:[#allocation2 + $0x1f3] sm:$0xff] }
0x150a   :  { %24951 = vmatprep.mubr.msk.f32.mxu1 %vm28339_vm1, %v28338_v0 }
0x150d   :  { %24952 = vmatmul.mubr.msk.f32.gmra.mrb[74].mxu1 %vm26_vm0, %v14964_v14  ;;  %v15822_v14 = vld [vmem:[#allocation2 + $0x1fb] sm:$0xff] }
0x150e   :  { %24954 = vmatprep.mubr.msk.f32.mxu1 %vm28339_vm1, %v28338_v0 }
0x1511   :  { %24955 = vmatmul.mubr.msk.f32.gmra.mrb[76].mxu1 %vm26_vm0, %v14965_v15  ;;  %v15823_v15 = vld [vmem:[#allocation2 + $0x203] sm:$0xff] }
0x1512   :  { %24957 = vmatprep.mubr.msk.f32.mxu1 %vm28339_vm1, %v28338_v0 }
0x1515   :  { %24958 = vmatmul.mubr.msk.f32.gmra.mrb[78].mxu1 %vm26_vm0, %v14966_v18  ;;  %v15824_v18 = vld [vmem:[#allocation2 + $0x20b] sm:$0xff] }
0x1516   :  { %24960 = vmatprep.mubr.msk.f32.mxu1 %vm28339_vm1, %v28338_v0 }
0x1519   :  { %24961 = vmatmul.mubr.msk.f32.gmra.mrb[80].mxu1 %vm26_vm0, %v14967_v16  ;;  %v15825_v16 = vld [vmem:[#allocation2 + $0x213] sm:$0xff] }
0x151a   :  { %24965 = vmatprep.mubr.msk.f32.mxu1 %vm28339_vm1, %v28338_v0 }
0x151d   :  { %24966 = vmatmul.mubr.msk.f32.vlgmr.msra.gmra.mrb[82].mxu1 %vm26_vm0, %v15764_v22  ;;  %v15827_v22 = vld [vmem:[#allocation2 + $0x223] sm:$0xff] }
0x151e   :  { %25209 = vmatpush3.msra.mxu1 %v16722_v50  ;;  %24968 = vmatprep.mubr.msk.f32.mxu1 %vm28339_vm1, %v28338_v0  ;;  %v15826_v50 = vld [vmem:[#allocation2 + $0x21b] sm:$0xff] }
0x1521   :  { %24969 = vmatmul.mubr.msk.f32.gmra.mrb[84].mxu1 %vm26_vm0, %v15765_v30  ;;  %v15828_v30 = vld [vmem:[#allocation2 + $0x22b] sm:$0xff] }
0x1522   :  { %24971 = vmatprep.mubr.msk.f32.mxu1 %vm28339_vm1, %v28338_v0 }
0x1525   :  { %24972 = vmatmul.mubr.msk.f32.gmra.mrb[86].mxu1 %vm26_vm0, %v15766_v27  ;;  %v15829_v27 = vld [vmem:[#allocation2 + $0x233] sm:$0xff] }
0x1526   :  { %24974 = vmatprep.mubr.msk.f32.mxu1 %vm28339_vm1, %v28338_v0 }
0x1529   :  { %24975 = vmatmul.mubr.msk.f32.gmra.mrb[88].mxu1 %vm26_vm0, %v15767_v51  ;;  %v15830_v51 = vld [vmem:[#allocation2 + $0x23b] sm:$0xff] }
0x152a   :  { %24977 = vmatprep.mubr.msk.f32.mxu1 %vm28339_vm1, %v28338_v0 }
0x152d   :  { %24978 = vmatmul.mubr.msk.f32.gmra.mrb[90].mxu1 %vm26_vm0, %v15768_v33  ;;  %v15831_v33 = vld [vmem:[#allocation2 + $0x243] sm:$0xff] }
0x152e   :  { %24980 = vmatprep.mubr.msk.f32.mxu1 %vm28339_vm1, %v28338_v0 }
0x1531   :  { %24981 = vmatmul.mubr.msk.f32.gmra.mrb[92].mxu1 %vm26_vm0, %v15769_v36  ;;  %v15832_v36 = vld [vmem:[#allocation2 + $0x24b] sm:$0xff] }
0x1532   :  { %24983 = vmatprep.mubr.msk.f32.mxu1 %vm28339_vm1, %v28338_v0 }
0x1535   :  { %24984 = vmatmul.mubr.msk.f32.gmra.mrb[94].mxu1 %vm26_vm0, %v15770_v35  ;;  %v15833_v35 = vld [vmem:[#allocation2 + $0x253] sm:$0xff] }
0x1536   :  { %24986 = vmatprep.mubr.msk.f32.mxu1 %vm28339_vm1, %v28338_v0 }
0x1539   :  { %24987 = vmatmul.mubr.msk.f32.gmra.mrb[96].mxu1 %vm26_vm0, %v15771_v43  ;;  %v15834_v43 = vld [vmem:[#allocation2 + $0x25b] sm:$0xff] }
0x153a   :  { %24989 = vmatprep.mubr.msk.f32.mxu1 %vm28339_vm1, %v28338_v0 }
0x153d   :  { %24990 = vmatmul.mubr.msk.f32.gmra.mrb[98].mxu1 %vm26_vm0, %v15772_v53  ;;  %v15835_v53 = vld [vmem:[#allocation2 + $0x263] sm:$0xff] }
0x153e   :  { %24992 = vmatprep.mubr.msk.f32.mxu1 %vm28339_vm1, %v28338_v0 }
0x1541   :  { %24993 = vmatmul.mubr.msk.f32.gmra.mrb[100].mxu1 %vm26_vm0, %v15773_v10  ;;  %v15836_v10 = vld [vmem:[#allocation2 + $0x26b] sm:$0xff] }
0x1542   :  { %24995 = vmatprep.mubr.msk.f32.mxu1 %vm28339_vm1, %v28338_v0 }
0x1545   :  { %24996 = vmatmul.mubr.msk.f32.gmra.mrb[102].mxu1 %vm26_vm0, %v15774_v45  ;;  %v15837_v45 = vld [vmem:[#allocation2 + $0x273] sm:$0xff] }
0x1546   :  { %24998 = vmatprep.mubr.msk.f32.mxu1 %vm28339_vm1, %v28338_v0 }
0x1549   :  { %24999 = vmatmul.mubr.msk.f32.gmra.mrb[104].mxu1 %vm26_vm0, %v15775_v12  ;;  %v15838_v12 = vld [vmem:[#allocation2 + $0x27b] sm:$0xff] }
0x154a   :  { %25001 = vmatprep.mubr.msk.f32.mxu1 %vm28339_vm1, %v28338_v0 }
0x154d   :  { %25002 = vmatmul.mubr.msk.f32.gmra.mrb[106].mxu1 %vm26_vm0, %v15776_v11  ;;  %v15839_v11 = vld [vmem:[#allocation2 + $0x283] sm:$0xff] }
0x154e   :  { %25004 = vmatprep.mubr.msk.f32.mxu1 %vm28339_vm1, %v28338_v0 }
0x1551   :  { %25005 = vmatmul.mubr.msk.f32.gmra.mrb[108].mxu1 %vm26_vm0, %v15777_v13  ;;  %v15840_v13 = vld [vmem:[#allocation2 + $0x28b] sm:$0xff] }
0x1552   :  { %25007 = vmatprep.mubr.msk.f32.mxu1 %vm28339_vm1, %v28338_v0 }
0x1555   :  { %25008 = vmatmul.mubr.msk.f32.gmra.mrb[110].mxu1 %vm26_vm0, %v15778_v55  ;;  %v15841_v55 = vld [vmem:[#allocation2 + $0x293] sm:$0xff] }
0x1556   :  { %25010 = vmatprep.mubr.msk.f32.mxu1 %vm28339_vm1, %v28338_v0 }
0x1559   :  { %25011 = vmatmul.mubr.msk.f32.gmra.mrb[112].mxu1 %vm26_vm0, %v15779_v20  ;;  %v15842_v20 = vld [vmem:[#allocation2 + $0x29b] sm:$0xff] }
0x155a   :  { %25013 = vmatprep.mubr.msk.f32.mxu1 %vm28339_vm1, %v28338_v0 }
0x155d   :  { %25014 = vmatmul.mubr.msk.f32.gmra.mrb[114].mxu1 %vm26_vm0, %v15780_v5  ;;  %v15843_v5 = vld [vmem:[#allocation2 + $0x2a3] sm:$0xff] }
0x155e   :  { %25016 = vmatprep.mubr.msk.f32.mxu1 %vm28339_vm1, %v28338_v0 }
0x1561   :  { %25017 = vmatmul.mubr.msk.f32.gmra.mrb[116].mxu1 %vm26_vm0, %v15781_v4  ;;  %v15844_v4 = vld [vmem:[#allocation2 + $0x2ab] sm:$0xff] }
0x1562   :  { %25019 = vmatprep.mubr.msk.f32.mxu1 %vm28339_vm1, %v28338_v0 }
0x1565   :  { %25020 = vmatmul.mubr.msk.f32.gmra.mrb[118].mxu1 %vm26_vm0, %v15782_v7  ;;  %v16641_v7 = vld [vmem:[%s37465_s0 + $0x18] sm:$0xff] }
0x1566   :  { %25022 = vmatprep.mubr.msk.f32.mxu1 %vm28339_vm1, %v28338_v0 }
0x1569   :  { %25023 = vmatmul.mubr.msk.f32.gmra.mrb[120].mxu1 %vm26_vm0, %v15783_v19  ;;  %v16642_v19 = vld [vmem:[%s37465_s0 + $0x20] sm:$0xff] }
0x156a   :  { %25025 = vmatprep.mubr.msk.f32.mxu1 %vm28339_vm1, %v28338_v0 }
0x156d   :  { %25026 = vmatmul.mubr.msk.f32.gmra.mrb[122].mxu1 %vm26_vm0, %v15784_v38  ;;  %v16643_v38 = vld [vmem:[%s37465_s0 + $0x28] sm:$0xff] }
0x156e   :  { %25028 = vmatprep.mubr.msk.f32.mxu1 %vm28339_vm1, %v28338_v0 }
0x1571   :  { %25029 = vmatmul.mubr.msk.f32.gmra.mrb[124].mxu1 %vm26_vm0, %v15785_v42  ;;  %v16644_v42 = vld [vmem:[%s37465_s0 + $0x30] sm:$0xff] }
0x1572   :  { %25031 = vmatprep.mubr.msk.f32.mxu1 %vm28339_vm1, %v28338_v0 }
0x1575   :  { %25032 = vmatmul.mubr.msk.f32.gmra.mrb[126].mxu1 %vm26_vm0, %v15786_v1  ;;  %v16645_v1 = vld [vmem:[%s37465_s0 + $0x38] sm:$0xff] }
0x1576   :  { %25034 = vmatprep.mubr.msk.f32.mxu1 %vm28339_vm1, %v28338_v0 }
0x1579   :  { %25035 = vmatmul.mubr.msk.f32.gmra.mrb[128].mxu1 %vm26_vm0, %v15787_v48  ;;  %v16646_v48 = vld [vmem:[%s37465_s0 + $0x40] sm:$0xff] }
0x157a   :  { %25037 = vmatprep.mubr.msk.f32.mxu1 %vm28339_vm1, %v28338_v0 }
0x157d   :  { %25038 = vmatmul.mubr.msk.f32.gmra.mrb[130].mxu1 %vm26_vm0, %v15788_v56  ;;  %v16647_v56 = vld [vmem:[%s37465_s0 + $0x48] sm:$0xff] }
0x157e   :  { %25040 = vmatprep.mubr.msk.f32.mxu1 %vm28339_vm1, %v28338_v0 }
0x1581   :  { %25041 = vmatmul.mubr.msk.f32.gmra.mrb[132].mxu1 %vm26_vm0, %v15789_v47  ;;  %v16648_v47 = vld [vmem:[%s37465_s0 + $0x50] sm:$0xff] }
0x1582   :  { %25043 = vmatprep.mubr.msk.f32.mxu1 %vm28339_vm1, %v28338_v0 }
0x1585   :  { %25044 = vmatmul.mubr.msk.f32.gmra.mrb[134].mxu1 %vm26_vm0, %v15790_v52  ;;  %v16649_v52 = vld [vmem:[%s37465_s0 + $0x58] sm:$0xff] }
0x1586   :  { %25046 = vmatprep.mubr.msk.f32.mxu1 %vm28339_vm1, %v28338_v0 }
0x1589   :  { %25047 = vmatmul.mubr.msk.f32.gmra.mrb[136].mxu1 %vm26_vm0, %v15791_v26  ;;  %v16650_v26 = vld [vmem:[%s37465_s0 + $0x60] sm:$0xff] }
0x158a   :  { %25049 = vmatprep.mubr.msk.f32.mxu1 %vm28339_vm1, %v28338_v0 }
0x158d   :  { %25050 = vmatmul.mubr.msk.f32.gmra.mrb[138].mxu1 %vm26_vm0, %v15792_v3  ;;  %v16651_v3 = vld [vmem:[%s37465_s0 + $0x68] sm:$0xff] }
0x158e   :  { %25052 = vmatprep.mubr.msk.f32.mxu1 %vm28339_vm1, %v28338_v0 }
0x1591   :  { %25053 = vmatmul.mubr.msk.f32.gmra.mrb[140].mxu1 %vm26_vm0, %v15793_v58  ;;  %v16652_v58 = vld [vmem:[%s37465_s0 + $0x70] sm:$0xff] }
0x1592   :  { %25055 = vmatprep.mubr.msk.f32.mxu1 %vm28339_vm1, %v28338_v0 }
0x1595   :  { %25056 = vmatmul.mubr.msk.f32.gmra.mrb[142].mxu1 %vm26_vm0, %v15794_v40  ;;  %v16653_v40 = vld [vmem:[%s37465_s0 + $0x78] sm:$0xff] }
0x1596   :  { %25058 = vmatprep.mubr.msk.f32.mxu1 %vm28339_vm1, %v28338_v0 }
0x1599   :  { %25059 = vmatmul.mubr.msk.f32.gmra.mrb[144].mxu1 %vm26_vm0, %v15795_v57  ;;  %v16654_v57 = vld [vmem:[%s37465_s0 + $0x80] sm:$0xff] }
0x159a   :  { %25061 = vmatprep.mubr.msk.f32.mxu1 %vm28339_vm1, %v28338_v0 }
0x159d   :  { %25062 = vmatmul.mubr.msk.f32.gmra.mrb[146].mxu1 %vm26_vm0, %v15796_v28  ;;  %v16655_v28 = vld [vmem:[%s37465_s0 + $0x88] sm:$0xff] }
0x159e   :  { %25064 = vmatprep.mubr.msk.f32.mxu1 %vm28339_vm1, %v28338_v0 }
0x15a1   :  { %25065 = vmatmul.mubr.msk.f32.gmra.mrb[148].mxu1 %vm26_vm0, %v15797_v59  ;;  %v16656_v59 = vld [vmem:[%s37465_s0 + $0x90] sm:$0xff] }
0x15a2   :  { %25067 = vmatprep.mubr.msk.f32.mxu1 %vm28339_vm1, %v28338_v0 }
0x15a5   :  { %25068 = vmatmul.mubr.msk.f32.gmra.mrb[150].mxu1 %vm26_vm0, %v15798_v25  ;;  %v16657_v25 = vld [vmem:[%s37465_s0 + $0x98] sm:$0xff] }
0x15a6   :  { %25070 = vmatprep.mubr.msk.f32.mxu1 %vm28339_vm1, %v28338_v0 }
0x15a9   :  { %25071 = vmatmul.mubr.msk.f32.gmra.mrb[152].mxu1 %vm26_vm0, %v15799_v17  ;;  %v16658_v17 = vld [vmem:[%s37465_s0 + $0xa0] sm:$0xff] }
0x15aa   :  { %25073 = vmatprep.mubr.msk.f32.mxu1 %vm28339_vm1, %v28338_v0 }
0x15ad   :  { %25074 = vmatmul.mubr.msk.f32.gmra.mrb[154].mxu1 %vm26_vm0, %v15800_v29  ;;  %v16659_v29 = vld [vmem:[%s37465_s0 + $0xa8] sm:$0xff] }
0x15ae   :  { %25076 = vmatprep.mubr.msk.f32.mxu1 %vm28339_vm1, %v28338_v0 }
0x15b1   :  { %25077 = vmatmul.mubr.msk.f32.gmra.mrb[156].mxu1 %vm26_vm0, %v15801_v32  ;;  %v16660_v32 = vld [vmem:[%s37465_s0 + $0xb0] sm:$0xff] }
0x15b2   :  { %25079 = vmatprep.mubr.msk.f32.mxu1 %vm28339_vm1, %v28338_v0 }
0x15b5   :  { %25080 = vmatmul.mubr.msk.f32.gmra.mrb[158].mxu1 %vm26_vm0, %v15802_v41  ;;  %v16661_v41 = vld [vmem:[%s37465_s0 + $0xb8] sm:$0xff] }
0x15b6   :  { %25082 = vmatprep.mubr.msk.f32.mxu1 %vm28339_vm1, %v28338_v0 }
0x15b9   :  { %25083 = vmatmul.mubr.msk.f32.gmra.mrb[160].mxu1 %vm26_vm0, %v15803_v31  ;;  %v16662_v31 = vld [vmem:[%s37465_s0 + $0xc0] sm:$0xff] }
0x15ba   :  { %25085 = vmatprep.mubr.msk.f32.mxu1 %vm28339_vm1, %v28338_v0 }
0x15bd   :  { %25086 = vmatmul.mubr.msk.f32.gmra.mrb[0].mxu1 %vm26_vm0, %v15804_v9  ;;  %v16663_v9 = vld [vmem:[%s37465_s0 + $0xc8] sm:$0xff] }
0x15be   :  { %25088 = vmatprep.mubr.msk.f32.mxu1 %vm28339_vm1, %v28338_v0 }
0x15c1   :  { %25089 = vmatmul.mubr.msk.f32.gmra.mrb[2].mxu1 %vm26_vm0, %v15805_v21  ;;  %v16664_v21 = vld [vmem:[%s37465_s0 + $0xd0] sm:$0xff] }
0x15c2   :  { %25091 = vmatprep.mubr.msk.f32.mxu1 %vm28339_vm1, %v28338_v0 }
0x15c5   :  { %25092 = vmatmul.mubr.msk.f32.gmra.mrb[4].mxu1 %vm26_vm0, %v15806_v63  ;;  %v16665_v63 = vld [vmem:[%s37465_s0 + $0xd8] sm:$0xff] }
0x15c6   :  { %25094 = vmatprep.mubr.msk.f32.mxu1 %vm28339_vm1, %v28338_v0 }
0x15c9   :  { %25095 = vmatmul.mubr.msk.f32.gmra.mrb[6].mxu1 %vm26_vm0, %v15807_v23  ;;  %v16666_v23 = vld [vmem:[%s37465_s0 + $0xe0] sm:$0xff] }
0x15ca   :  { %25097 = vmatprep.mubr.msk.f32.mxu1 %vm28339_vm1, %v28338_v0 }
0x15cd   :  { %25098 = vmatmul.mubr.msk.f32.gmra.mrb[8].mxu1 %vm26_vm0, %v15808_v37  ;;  %v16667_v37 = vld [vmem:[%s37465_s0 + $0xe8] sm:$0xff] }
0x15ce   :  { %25100 = vmatprep.mubr.msk.f32.mxu1 %vm28339_vm1, %v28338_v0 }
0x15d1   :  { %25101 = vmatmul.mubr.msk.f32.gmra.mrb[10].mxu1 %vm26_vm0, %v15809_v2  ;;  %v16668_v2 = vld [vmem:[%s37465_s0 + $0xf0] sm:$0xff] }
0x15d2   :  { %25103 = vmatprep.mubr.msk.f32.mxu1 %vm28339_vm1, %v28338_v0 }
0x15d5   :  { %25104 = vmatmul.mubr.msk.f32.gmra.mrb[12].mxu1 %vm26_vm0, %v15810_v60  ;;  %v16669_v60 = vld [vmem:[%s37465_s0 + $0xf8] sm:$0xff] }
0x15d6   :  { %25106 = vmatprep.mubr.msk.f32.mxu1 %vm28339_vm1, %v28338_v0 }
0x15d9   :  { %25107 = vmatmul.mubr.msk.f32.gmra.mrb[14].mxu1 %vm26_vm0, %v15811_v46  ;;  %v16670_v46 = vld [vmem:[%s37465_s0 + $0x100] sm:$0xff] }
0x15da   :  { %25109 = vmatprep.mubr.msk.f32.mxu1 %vm28339_vm1, %v28338_v0 }
0x15dd   :  { %25110 = vmatmul.mubr.msk.f32.gmra.mrb[16].mxu1 %vm26_vm0, %v15812_v39  ;;  %v16671_v39 = vld [vmem:[%s37465_s0 + $0x108] sm:$0xff] }
0x15de   :  { %25112 = vmatprep.mubr.msk.f32.mxu1 %vm28339_vm1, %v28338_v0 }
0x15e1   :  { %25113 = vmatmul.mubr.msk.f32.gmra.mrb[18].mxu1 %vm26_vm0, %v15813_v61  ;;  %v16672_v61 = vld [vmem:[%s37465_s0 + $0x110] sm:$0xff] }
0x15e2   :  { %25115 = vmatprep.mubr.msk.f32.mxu1 %vm28339_vm1, %v28338_v0 }
0x15e5   :  { %25116 = vmatmul.mubr.msk.f32.gmra.mrb[20].mxu1 %vm26_vm0, %v15814_v49  ;;  %v16673_v49 = vld [vmem:[%s37465_s0 + $0x118] sm:$0xff] }
0x15e6   :  { %25118 = vmatprep.mubr.msk.f32.mxu1 %vm28339_vm1, %v28338_v0 }
0x15e9   :  { %25119 = vmatmul.mubr.msk.f32.gmra.mrb[22].mxu1 %vm26_vm0, %v15815_v54  ;;  %v16674_v54 = vld [vmem:[%s37465_s0 + $0x120] sm:$0xff] }
0x15ea   :  { %25121 = vmatprep.mubr.msk.f32.mxu1 %vm28339_vm1, %v28338_v0 }
0x15ed   :  { %25122 = vmatmul.mubr.msk.f32.gmra.mrb[24].mxu1 %vm26_vm0, %v15816_v44  ;;  %v16675_v44 = vld [vmem:[%s37465_s0 + $0x128] sm:$0xff] }
0x15ee   :  { %25124 = vmatprep.mubr.msk.f32.mxu1 %vm28339_vm1, %v28338_v0 }
0x15f1   :  { %25125 = vmatmul.mubr.msk.f32.gmra.mrb[26].mxu1 %vm26_vm0, %v15817_v62  ;;  %v16676_v62 = vld [vmem:[%s37465_s0 + $0x130] sm:$0xff] }
0x15f2   :  { %25127 = vmatprep.mubr.msk.f32.mxu1 %vm28339_vm1, %v28338_v0 }
0x15f5   :  { %25128 = vmatmul.mubr.msk.f32.gmra.mrb[28].mxu1 %vm26_vm0, %v15818_v6  ;;  %v16677_v6 = vld [vmem:[%s37465_s0 + $0x138] sm:$0xff] }
0x15f6   :  { %25130 = vmatprep.mubr.msk.f32.mxu1 %vm28339_vm1, %v28338_v0 }
0x15f9   :  { %25131 = vmatmul.mubr.msk.f32.gmra.mrb[30].mxu1 %vm26_vm0, %v15819_v24  ;;  %v16678_v24 = vld [vmem:[%s37465_s0 + $0x140] sm:$0xff] }
0x15fa   :  { %25133 = vmatprep.mubr.msk.f32.mxu1 %vm28339_vm1, %v28338_v0 }
0x15fd   :  { %25134 = vmatmul.mubr.msk.f32.gmra.mrb[32].mxu1 %vm26_vm0, %v15820_v8  ;;  %v16679_v8 = vld [vmem:[%s37465_s0 + $0x148] sm:$0xff] }
0x15fe   :  { %25136 = vmatprep.mubr.msk.f32.mxu1 %vm28339_vm1, %v28338_v0 }
0x1601   :  { %25137 = vmatmul.mubr.msk.f32.gmra.mrb[34].mxu1 %vm26_vm0, %v15821_v34  ;;  %v16680_v34 = vld [vmem:[%s37465_s0 + $0x150] sm:$0xff] }
0x1602   :  { %25139 = vmatprep.mubr.msk.f32.mxu1 %vm28339_vm1, %v28338_v0 }
0x1605   :  { %25140 = vmatmul.mubr.msk.f32.gmra.mrb[36].mxu1 %vm26_vm0, %v15822_v14  ;;  %v16681_v14 = vld [vmem:[%s37465_s0 + $0x158] sm:$0xff] }
0x1606   :  { %25142 = vmatprep.mubr.msk.f32.mxu1 %vm28339_vm1, %v28338_v0 }
0x1609   :  { %25143 = vmatmul.mubr.msk.f32.gmra.mrb[38].mxu1 %vm26_vm0, %v15823_v15  ;;  %v16682_v15 = vld [vmem:[%s37465_s0 + $0x160] sm:$0xff] }
0x160a   :  { %25145 = vmatprep.mubr.msk.f32.mxu1 %vm28339_vm1, %v28338_v0 }
0x160d   :  { %25146 = vmatmul.mubr.msk.f32.gmra.mrb[40].mxu1 %vm26_vm0, %v15824_v18  ;;  %v16683_v18 = vld [vmem:[%s37465_s0 + $0x168] sm:$0xff] }
0x160e   :  { %25148 = vmatprep.mubr.msk.f32.mxu1 %vm28339_vm1, %v28338_v0 }
0x1611   :  { %25149 = vmatmul.mubr.msk.f32.gmra.mrb[42].mxu1 %vm26_vm0, %v15825_v16  ;;  %v16684_v16 = vld [vmem:[%s37465_s0 + $0x170] sm:$0xff] }
0x1612   :  { %25151 = vmatprep.mubr.msk.f32.mxu1 %vm28339_vm1, %v28338_v0 }
0x1615   :  { %25152 = vmatmul.mubr.msk.f32.gmra.mrb[44].mxu1 %vm26_vm0, %v15826_v50  ;;  %v16685_v50 = vld [vmem:[%s37465_s0 + $0x178] sm:$0xff] }
0x1616   :  { %25154 = vmatprep.mubr.msk.f32.mxu1 %vm28339_vm1, %v28338_v0 }
0x1619   :  { %25155 = vmatmul.mubr.msk.f32.gmra.mrb[46].mxu1 %vm26_vm0, %v15827_v22  ;;  %v16686_v22 = vld [vmem:[%s37465_s0 + $0x180] sm:$0xff] }
0x161a   :  { %25157 = vmatprep.mubr.msk.f32.mxu1 %vm28339_vm1, %v28338_v0 }
0x161d   :  { %25158 = vmatmul.mubr.msk.f32.gmra.mrb[48].mxu1 %vm26_vm0, %v15828_v30  ;;  %v16687_v30 = vld [vmem:[%s37465_s0 + $0x188] sm:$0xff] }
0x161e   :  { %25160 = vmatprep.mubr.msk.f32.mxu1 %vm28339_vm1, %v28338_v0 }
0x1621   :  { %25161 = vmatmul.mubr.msk.f32.gmra.mrb[50].mxu1 %vm26_vm0, %v15829_v27  ;;  %v16688_v27 = vld [vmem:[%s37465_s0 + $0x190] sm:$0xff] }
0x1622   :  { %25163 = vmatprep.mubr.msk.f32.mxu1 %vm28339_vm1, %v28338_v0 }
0x1625   :  { %25164 = vmatmul.mubr.msk.f32.gmra.mrb[52].mxu1 %vm26_vm0, %v15830_v51  ;;  %v16689_v51 = vld [vmem:[%s37465_s0 + $0x198] sm:$0xff] }
0x1626   :  { %25166 = vmatprep.mubr.msk.f32.mxu1 %vm28339_vm1, %v28338_v0 }
0x1629   :  { %25167 = vmatmul.mubr.msk.f32.gmra.mrb[54].mxu1 %vm26_vm0, %v15831_v33  ;;  %v16690_v33 = vld [vmem:[%s37465_s0 + $0x1a0] sm:$0xff] }
0x162a   :  { %25169 = vmatprep.mubr.msk.f32.mxu1 %vm28339_vm1, %v28338_v0 }
0x162d   :  { %25170 = vmatmul.mubr.msk.f32.gmra.mrb[56].mxu1 %vm26_vm0, %v15832_v36  ;;  %v16691_v36 = vld [vmem:[%s37465_s0 + $0x1a8] sm:$0xff] }
0x162e   :  { %25172 = vmatprep.mubr.msk.f32.mxu1 %vm28339_vm1, %v28338_v0 }
0x1631   :  { %25173 = vmatmul.mubr.msk.f32.gmra.mrb[58].mxu1 %vm26_vm0, %v15833_v35  ;;  %v16692_v35 = vld [vmem:[%s37465_s0 + $0x1b0] sm:$0xff] }
0x1632   :  { %25175 = vmatprep.mubr.msk.f32.mxu1 %vm28339_vm1, %v28338_v0 }
0x1635   :  { %25176 = vmatmul.mubr.msk.f32.gmra.mrb[60].mxu1 %vm26_vm0, %v15834_v43  ;;  %v16693_v43 = vld [vmem:[%s37465_s0 + $0x1b8] sm:$0xff] }
0x1636   :  { %25178 = vmatprep.mubr.msk.f32.mxu1 %vm28339_vm1, %v28338_v0 }
0x1639   :  { %25179 = vmatmul.mubr.msk.f32.gmra.mrb[62].mxu1 %vm26_vm0, %v15835_v53  ;;  %v36930_v53 = vld [vmem:[%s37470_s5] ss:$0 sm:$0xff] }
0x163a   :  { %25181 = vmatprep.mubr.msk.f32.mxu1 %vm28339_vm1, %v28338_v0 }
0x163d   :  { %25182 = vmatmul.mubr.msk.f32.gmra.mrb[64].mxu1 %vm26_vm0, %v15836_v10  ;;  %v37716_v10 = vld [vmem:[#allocation3_spill] sm:$0xff] }
0x163e   :  { %25184 = vmatprep.mubr.msk.f32.mxu1 %vm28339_vm1, %v28338_v0 }
0x1641   :  { %25185 = vmatmul.mubr.msk.f32.gmra.mrb[66].mxu1 %vm26_vm0, %v15837_v45  ;;  %v9544_v45 = vadd.f32 %v36930_v53, %v37716_v10  ;;  %v16703_v10 = vld [vmem:[%s37465_s0 + $0x208] sm:$0xff] }
0x1642   :  { %25187 = vmatprep.mubr.msk.f32.mxu1 %vm28339_vm1, %v28338_v0 }
0x1645   :  { %25188 = vmatmul.mubr.msk.f32.gmra.mrb[68].mxu1 %vm26_vm0, %v15838_v12  ;;  %v16694_v12 = vld [vmem:[%s37465_s0 + $0x1c0] sm:$0xff] }
0x1646   :  { %25190 = vmatprep.mubr.msk.f32.mxu1 %vm28339_vm1, %v28338_v0 }
0x1649   :  { %25191 = vmatmul.mubr.msk.f32.gmra.mrb[70].mxu1 %vm26_vm0, %v15839_v11 }
0x164a   :  { %25193 = vmatprep.mubr.msk.f32.mxu1 %vm28339_vm1, %v28338_v0 }
0x164d   :  { %25194 = vmatmul.mubr.msk.f32.gmra.mrb[72].mxu1 %vm26_vm0, %v15840_v13  ;;  %v37717_v13 = vld [vmem:[#allocation4_spill] sm:$0xff] }
0x164e   :  { %25196 = vmatprep.mubr.msk.f32.mxu1 %vm28339_vm1, %v28338_v0 }
0x1651   :  { %25197 = vmatmul.mubr.msk.f32.gmra.mrb[74].mxu1 %vm26_vm0, %v15841_v55  ;;  %v9545_v55 = vadd.f32 %v36930_v53, %v37717_v13 }
0x1652   :  { %25199 = vmatprep.mubr.msk.f32.mxu1 %vm28339_vm1, %v28338_v0 }
0x1655   :  { %25200 = vmatmul.mubr.msk.f32.gmra.mrb[76].mxu1 %vm26_vm0, %v15842_v20 }
0x1656   :  { %25202 = vmatprep.mubr.msk.f32.mxu1 %vm28339_vm1, %v28338_v0 }
0x1659   :  { %25203 = vmatmul.mubr.msk.f32.gmra.mrb[78].mxu1 %vm26_vm0, %v15843_v5 }
0x165a   :  { %25205 = vmatprep.mubr.msk.f32.mxu1 %vm28339_vm1, %v28338_v0 }
0x165d   :  { %25206 = vmatmul.mubr.msk.f32.gmra.mrb[80].mxu1 %vm26_vm0, %v15844_v4  ;;  %v16695_v4 = vld [vmem:[%s37465_s0 + $0x1c8] sm:$0xff] }
0x165e   :  { %25210 = vmatprep.mubr.msk.f32.mxu1 %vm28339_vm1, %v28338_v0 }
0x1661   :  { %25211 = vmatmul.mubr.msk.f32.vlgmr.msra.gmra.mrb[82].mxu1 %vm26_vm0, %v16641_v7 }
0x1662   :  { %25213 = vmatprep.mubr.msk.f32.mxu1 %vm28339_vm1, %v28338_v0 }
0x1665   :  { %25214 = vmatmul.mubr.msk.f32.gmra.mrb[84].mxu1 %vm26_vm0, %v16642_v19 }
0x1666   :  { %25216 = vmatprep.mubr.msk.f32.mxu1 %vm28339_vm1, %v28338_v0 }
0x1669   :  { %25217 = vmatmul.mubr.msk.f32.gmra.mrb[86].mxu1 %vm26_vm0, %v16643_v38 }
0x166a   :  { %25219 = vmatprep.mubr.msk.f32.mxu1 %vm28339_vm1, %v28338_v0 }
0x166d   :  { %25220 = vmatmul.mubr.msk.f32.gmra.mrb[88].mxu1 %vm26_vm0, %v16644_v42 }
0x166e   :  { %25222 = vmatprep.mubr.msk.f32.mxu1 %vm28339_vm1, %v28338_v0 }
0x1671   :  { %25223 = vmatmul.mubr.msk.f32.gmra.mrb[90].mxu1 %vm26_vm0, %v16645_v1  ;;  %v16696_v1 = vld [vmem:[%s37465_s0 + $0x1d0] sm:$0xff] }
0x1672   :  { %25225 = vmatprep.mubr.msk.f32.mxu1 %vm28339_vm1, %v28338_v0 }
0x1675   :  { %25226 = vmatmul.mubr.msk.f32.gmra.mrb[92].mxu1 %vm26_vm0, %v16646_v48  ;;  %v37718_v48 = vld [vmem:[#allocation5_spill] sm:$0xff] }
0x1676   :  { %25228 = vmatprep.mubr.msk.f32.mxu1 %vm28339_vm1, %v28338_v0 }
0x1679   :  { %25229 = vmatmul.mubr.msk.f32.gmra.mrb[94].mxu1 %vm26_vm0, %v16647_v56  ;;  %v9546_v56 = vadd.f32 %v36930_v53, %v37718_v48  ;;  %v16705_v48 = vld [vmem:[%s37465_s0 + $0x218] sm:$0xff] }
0x167a   :  { %25231 = vmatprep.mubr.msk.f32.mxu1 %vm28339_vm1, %v28338_v0 }
0x167d   :  { %25232 = vmatmul.mubr.msk.f32.gmra.mrb[96].mxu1 %vm26_vm0, %v16648_v47 }
0x167e   :  { %25234 = vmatprep.mubr.msk.f32.mxu1 %vm28339_vm1, %v28338_v0 }
0x1681   :  { %25235 = vmatmul.mubr.msk.f32.gmra.mrb[98].mxu1 %vm26_vm0, %v16649_v52 }
0x1682   :  { %25237 = vmatprep.mubr.msk.f32.mxu1 %vm28339_vm1, %v28338_v0 }
0x1685   :  { %25238 = vmatmul.mubr.msk.f32.gmra.mrb[100].mxu1 %vm26_vm0, %v16650_v26 }
0x1686   :  { %25240 = vmatprep.mubr.msk.f32.mxu1 %vm28339_vm1, %v28338_v0 }
0x1689   :  { %25241 = vmatmul.mubr.msk.f32.gmra.mrb[102].mxu1 %vm26_vm0, %v16651_v3 }
0x168a   :  { %25243 = vmatprep.mubr.msk.f32.mxu1 %vm28339_vm1, %v28338_v0 }
0x168d   :  { %25244 = vmatmul.mubr.msk.f32.gmra.mrb[104].mxu1 %vm26_vm0, %v16652_v58  ;;  %v16697_v58 = vld [vmem:[%s37465_s0 + $0x1d8] sm:$0xff] }
0x168e   :  { %25246 = vmatprep.mubr.msk.f32.mxu1 %vm28339_vm1, %v28338_v0 }
0x1691   :  { %25247 = vmatmul.mubr.msk.f32.gmra.mrb[106].mxu1 %vm26_vm0, %v16653_v40  ;;  %v37719_v40 = vld [vmem:[#allocation6_spill] sm:$0xff] }
0x1692   :  { %25249 = vmatprep.mubr.msk.f32.mxu1 %vm28339_vm1, %v28338_v0 }
0x1695   :  { %25250 = vmatmul.mubr.msk.f32.gmra.mrb[108].mxu1 %vm26_vm0, %v16654_v57  ;;  %v9547_v57 = vadd.f32 %v36930_v53, %v37719_v40  ;;  %v16706_v40 = vld [vmem:[%s37465_s0 + $0x220] sm:$0xff] }
0x1696   :  { %25252 = vmatprep.mubr.msk.f32.mxu1 %vm28339_vm1, %v28338_v0 }
0x1699   :  { %25253 = vmatmul.mubr.msk.f32.gmra.mrb[110].mxu1 %vm26_vm0, %v16655_v28 }
0x169a   :  { %25255 = vmatprep.mubr.msk.f32.mxu1 %vm28339_vm1, %v28338_v0 }
0x169d   :  { %25256 = vmatmul.mubr.msk.f32.gmra.mrb[112].mxu1 %vm26_vm0, %v16656_v59 }
0x169e   :  { %25258 = vmatprep.mubr.msk.f32.mxu1 %vm28339_vm1, %v28338_v0 }
0x16a1   :  { %25259 = vmatmul.mubr.msk.f32.gmra.mrb[114].mxu1 %vm26_vm0, %v16657_v25 }
0x16a2   :  { %25261 = vmatprep.mubr.msk.f32.mxu1 %vm28339_vm1, %v28338_v0 }
0x16a5   :  { %25262 = vmatmul.mubr.msk.f32.gmra.mrb[116].mxu1 %vm26_vm0, %v16658_v17 }
0x16a6   :  { %25264 = vmatprep.mubr.msk.f32.mxu1 %vm28339_vm1, %v28338_v0 }
0x16a9   :  { %25265 = vmatmul.mubr.msk.f32.gmra.mrb[118].mxu1 %vm26_vm0, %v16659_v29  ;;  %v16698_v29 = vld [vmem:[%s37465_s0 + $0x1e0] sm:$0xff] }
0x16aa   :  { %25267 = vmatprep.mubr.msk.f32.mxu1 %vm28339_vm1, %v28338_v0 }
0x16ad   :  { %25268 = vmatmul.mubr.msk.f32.gmra.mrb[120].mxu1 %vm26_vm0, %v16660_v32  ;;  %v37720_v32 = vld [vmem:[#allocation7_spill] sm:$0xff] }
0x16ae   :  { %25270 = vmatprep.mubr.msk.f32.mxu1 %vm28339_vm1, %v28338_v0 }
0x16b1   :  { %25271 = vmatmul.mubr.msk.f32.gmra.mrb[122].mxu1 %vm26_vm0, %v16661_v41  ;;  %v9548_v41 = vadd.f32 %v36930_v53, %v37720_v32  ;;  %v16707_v32 = vld [vmem:[%s37465_s0 + $0x228] sm:$0xff] }
0x16b2   :  { %25273 = vmatprep.mubr.msk.f32.mxu1 %vm28339_vm1, %v28338_v0 }
0x16b5   :  { %25274 = vmatmul.mubr.msk.f32.gmra.mrb[124].mxu1 %vm26_vm0, %v16662_v31 }
0x16b6   :  { %25276 = vmatprep.mubr.msk.f32.mxu1 %vm28339_vm1, %v28338_v0 }
0x16b9   :  { %25277 = vmatmul.mubr.msk.f32.gmra.mrb[126].mxu1 %vm26_vm0, %v16663_v9 }
0x16ba   :  { %25279 = vmatprep.mubr.msk.f32.mxu1 %vm28339_vm1, %v28338_v0 }
0x16bd   :  { %25280 = vmatmul.mubr.msk.f32.gmra.mrb[128].mxu1 %vm26_vm0, %v16664_v21 }
0x16be   :  { %25282 = vmatprep.mubr.msk.f32.mxu1 %vm28339_vm1, %v28338_v0 }
0x16c1   :  { %25283 = vmatmul.mubr.msk.f32.gmra.mrb[130].mxu1 %vm26_vm0, %v16665_v63 }
0x16c2   :  { %25285 = vmatprep.mubr.msk.f32.mxu1 %vm28339_vm1, %v28338_v0 }
0x16c5   :  { %25286 = vmatmul.mubr.msk.f32.gmra.mrb[132].mxu1 %vm26_vm0, %v16666_v23  ;;  %v16699_v23 = vld [vmem:[%s37465_s0 + $0x1e8] sm:$0xff] }
0x16c6   :  { %25288 = vmatprep.mubr.msk.f32.mxu1 %vm28339_vm1, %v28338_v0 }
0x16c9   :  { %25289 = vmatmul.mubr.msk.f32.gmra.mrb[134].mxu1 %vm26_vm0, %v16667_v37  ;;  %v37721_v37 = vld [vmem:[#allocation8_spill] sm:$0xff] }
0x16ca   :  { %25291 = vmatprep.mubr.msk.f32.mxu1 %vm28339_vm1, %v28338_v0 }
0x16cd   :  { %25292 = vmatmul.mubr.msk.f32.gmra.mrb[136].mxu1 %vm26_vm0, %v16668_v2  ;;  %v9549_v2 = vadd.f32 %v36930_v53, %v37721_v37  ;;  %v16708_v37 = vld [vmem:[%s37465_s0 + $0x230] sm:$0xff] }
0x16ce   :  { %25294 = vmatprep.mubr.msk.f32.mxu1 %vm28339_vm1, %v28338_v0 }
0x16d1   :  { %25295 = vmatmul.mubr.msk.f32.gmra.mrb[138].mxu1 %vm26_vm0, %v16669_v60 }
0x16d2   :  { %25297 = vmatprep.mubr.msk.f32.mxu1 %vm28339_vm1, %v28338_v0 }
0x16d5   :  { %25298 = vmatmul.mubr.msk.f32.gmra.mrb[140].mxu1 %vm26_vm0, %v16670_v46 }
0x16d6   :  { %25300 = vmatprep.mubr.msk.f32.mxu1 %vm28339_vm1, %v28338_v0 }
0x16d9   :  { %25301 = vmatmul.mubr.msk.f32.gmra.mrb[142].mxu1 %vm26_vm0, %v16671_v39 }
0x16da   :  { %25303 = vmatprep.mubr.msk.f32.mxu1 %vm28339_vm1, %v28338_v0 }
0x16dd   :  { %25304 = vmatmul.mubr.msk.f32.gmra.mrb[144].mxu1 %vm26_vm0, %v16672_v61 }
0x16de   :  { %25306 = vmatprep.mubr.msk.f32.mxu1 %vm28339_vm1, %v28338_v0 }
0x16e1   :  { %25307 = vmatmul.mubr.msk.f32.gmra.mrb[146].mxu1 %vm26_vm0, %v16673_v49  ;;  %v16700_v49 = vld [vmem:[%s37465_s0 + $0x1f0] sm:$0xff] }
0x16e2   :  { %25309 = vmatprep.mubr.msk.f32.mxu1 %vm28339_vm1, %v28338_v0 }
0x16e5   :  { %25310 = vmatmul.mubr.msk.f32.gmra.mrb[148].mxu1 %vm26_vm0, %v16674_v54  ;;  %v37722_v54 = vld [vmem:[#allocation9_spill] sm:$0xff] }
0x16e6   :  { %25312 = vmatprep.mubr.msk.f32.mxu1 %vm28339_vm1, %v28338_v0 }
0x16e9   :  { %25313 = vmatmul.mubr.msk.f32.gmra.mrb[150].mxu1 %vm26_vm0, %v16675_v44  ;;  %v9550_v44 = vadd.f32 %v36930_v53, %v37722_v54  ;;  %v16709_v54 = vld [vmem:[%s37465_s0 + $0x238] sm:$0xff] }
0x16ea   :  { %25315 = vmatprep.mubr.msk.f32.mxu1 %vm28339_vm1, %v28338_v0 }
0x16ed   :  { %25316 = vmatmul.mubr.msk.f32.gmra.mrb[152].mxu1 %vm26_vm0, %v16676_v62 }
0x16ee   :  { %25318 = vmatprep.mubr.msk.f32.mxu1 %vm28339_vm1, %v28338_v0 }
0x16f1   :  { %25319 = vmatmul.mubr.msk.f32.gmra.mrb[154].mxu1 %vm26_vm0, %v16677_v6 }
0x16f2   :  { %25321 = vmatprep.mubr.msk.f32.mxu1 %vm28339_vm1, %v28338_v0 }
0x16f5   :  { %25322 = vmatmul.mubr.msk.f32.gmra.mrb[156].mxu1 %vm26_vm0, %v16678_v24 }
0x16f6   :  { %25324 = vmatprep.mubr.msk.f32.mxu1 %vm28339_vm1, %v28338_v0 }
0x16f9   :  { %25325 = vmatmul.mubr.msk.f32.gmra.mrb[158].mxu1 %vm26_vm0, %v16679_v8 }
0x16fa   :  { %25327 = vmatprep.mubr.msk.f32.mxu1 %vm28339_vm1, %v28338_v0 }
0x16fd   :  { %25328 = vmatmul.mubr.msk.f32.gmra.mrb[160].mxu1 %vm26_vm0, %v16680_v34  ;;  %v16701_v34 = vld [vmem:[%s37465_s0 + $0x1f8] sm:$0xff] }
0x16fe   :  { %25330 = vmatprep.mubr.msk.f32.mxu1 %vm28339_vm1, %v28338_v0 }
0x1701   :  { %25331 = vmatmul.mubr.msk.f32.gmra.mrb[0].mxu1 %vm26_vm0, %v16681_v14  ;;  %v37723_v14 = vld [vmem:[#allocation10_spill] sm:$0xff] }
0x1702   :  { %25333 = vmatprep.mubr.msk.f32.mxu1 %vm28339_vm1, %v28338_v0 }
0x1705   :  { %25334 = vmatmul.mubr.msk.f32.gmra.mrb[2].mxu1 %vm26_vm0, %v16682_v15  ;;  %v9551_v15 = vadd.f32 %v36930_v53, %v37723_v14  ;;  %v16710_v14 = vld [vmem:[%s37465_s0 + $0x240] sm:$0xff] }
0x1706   :  { %25336 = vmatprep.mubr.msk.f32.mxu1 %vm28339_vm1, %v28338_v0 }
0x1709   :  { %25337 = vmatmul.mubr.msk.f32.gmra.mrb[4].mxu1 %vm26_vm0, %v16683_v18 }
0x170a   :  { %25339 = vmatprep.mubr.msk.f32.mxu1 %vm28339_vm1, %v28338_v0 }
0x170d   :  { %25340 = vmatmul.mubr.msk.f32.gmra.mrb[6].mxu1 %vm26_vm0, %v16684_v16 }
0x170e   :  { %25342 = vmatprep.mubr.msk.f32.mxu1 %vm28339_vm1, %v28338_v0 }
0x1711   :  { %25343 = vmatmul.mubr.msk.f32.gmra.mrb[8].mxu1 %vm26_vm0, %v16685_v50 }
0x1712   :  { %25345 = vmatprep.mubr.msk.f32.mxu1 %vm28339_vm1, %v28338_v0 }
0x1715   :  { %25346 = vmatmul.mubr.msk.f32.gmra.mrb[10].mxu1 %vm26_vm0, %v16686_v22 }
0x1716   :  { %25348 = vmatprep.mubr.msk.f32.mxu1 %vm28339_vm1, %v28338_v0 }
0x1719   :  { %25349 = vmatmul.mubr.msk.f32.gmra.mrb[12].mxu1 %vm26_vm0, %v16687_v30  ;;  %v16702_v30 = vld [vmem:[%s37465_s0 + $0x200] sm:$0xff] }
0x171a   :  { %25351 = vmatprep.mubr.msk.f32.mxu1 %vm28339_vm1, %v28338_v0 }
0x171d   :  { %25352 = vmatmul.mubr.msk.f32.gmra.mrb[14].mxu1 %vm26_vm0, %v16688_v27  ;;  %v37724_v27 = vld [vmem:[#allocation11_spill] sm:$0xff] }
0x171e   :  { %25354 = vmatprep.mubr.msk.f32.mxu1 %vm28339_vm1, %v28338_v0 }
0x1721   :  { %25355 = vmatmul.mubr.msk.f32.gmra.mrb[16].mxu1 %vm26_vm0, %v16689_v51  ;;  %v9552_v51 = vadd.f32 %v36930_v53, %v37724_v27  ;;  %v16711_v27 = vld [vmem:[%s37465_s0 + $0x248] sm:$0xff] }
0x1722   :  { %25357 = vmatprep.mubr.msk.f32.mxu1 %vm28339_vm1, %v28338_v0 }
0x1725   :  { %25358 = vmatmul.mubr.msk.f32.gmra.mrb[18].mxu1 %vm26_vm0, %v16690_v33 }
0x1726   :  { %25360 = vmatprep.mubr.msk.f32.mxu1 %vm28339_vm1, %v28338_v0 }
0x1729   :  { %25361 = vmatmul.mubr.msk.f32.gmra.mrb[20].mxu1 %vm26_vm0, %v16691_v36 }
0x172a   :  { %25363 = vmatprep.mubr.msk.f32.mxu1 %vm28339_vm1, %v28338_v0 }
0x172d   :  { %25364 = vmatmul.mubr.msk.f32.gmra.mrb[22].mxu1 %vm26_vm0, %v16692_v35 }
0x172e   :  { %25366 = vmatprep.mubr.msk.f32.mxu1 %vm28339_vm1, %v28338_v0 }
0x1731   :  { %25367 = vmatmul.mubr.msk.f32.gmra.mrb[24].mxu1 %vm26_vm0, %v16693_v43 }
0x1732   :  { %25369 = vmatprep.mubr.msk.f32.mxu1 %vm28339_vm1, %v28338_v0 }
0x1734   :  { %v17032_v11 = vpop.f32.mrb[82].mxu1 }
0x1735   :  { %v25537_v20 = vadd.f32 %v17032_v11, %v9544_v45  ;;  %v25212_v5 = vpop.f32.mrb[83].mxu1  ;;  %25370 = vmatmul.mubr.msk.f32.gmra.mrb[26].mxu1 %vm26_vm0, %v16694_v12  ;;  %v37725_v45 = vld [vmem:[#allocation12_spill] sm:$0xff] }
0x1736   :  { %25372 = vmatprep.mubr.msk.f32.mxu1 %vm28339_vm1, %v28338_v0  ;;  %v9553_v12 = vadd.f32 %v36930_v53, %v37725_v45  ;;  %v16704_v5 = vld [vmem:[%s37465_s0 + $0x210] sm:$0xff] }
0x1737   :  { %v17517_v7 = vmax.f32 %v25537_v20, 0.0  ;;  %v16712_v45 = vld [vmem:[%s37465_s0 + $0x250] sm:$0xff] }
0x1738   :  { %v17037_v19 = vpop.f32.mrb[84].mxu1 }
0x1739   :  { %17598 = vst [vmem:[%s37471_s7] sm:$0xff] %v17517_v7  ;;  %v25539_v38 = vadd.f32 %v17037_v19, %v9545_v55  ;;  %v25215_v42 = vpop.f32.mrb[85].mxu1  ;;  %25373 = vmatmul.mubr.msk.f32.gmra.mrb[28].mxu1 %vm26_vm0, %v16695_v4  ;;  %v37726_v4 = vld [vmem:[#allocation13_spill] sm:$0xff] }
0x173a   :  { %25375 = vmatprep.mubr.msk.f32.mxu1 %vm28339_vm1, %v28338_v0  ;;  %v9554_v7 = vadd.f32 %v36930_v53, %v37726_v4  ;;  %v16713_v4 = vld [vmem:[%s37465_s0 + $0x258] sm:$0xff] }
0x173b   :  { %v17518_v47 = vmax.f32 %v25539_v38, 0.0 }
0x173c   :  { %v17042_v52 = vpop.f32.mrb[86].mxu1 }
0x173d   :  { %17599 = vst [vmem:[%s37471_s7 + $0x8] sm:$0xff] %v17518_v47  ;;  %v25541_v26 = vadd.f32 %v17042_v52, %v9546_v56  ;;  %v25218_v3 = vpop.f32.mrb[87].mxu1  ;;  %25376 = vmatmul.mubr.msk.f32.gmra.mrb[30].mxu1 %vm26_vm0, %v16696_v1  ;;  %v37727_v56 = vld [vmem:[#allocation14_spill] sm:$0xff] }
0x173e   :  { %25378 = vmatprep.mubr.msk.f32.mxu1 %vm28339_vm1, %v28338_v0  ;;  %v9555_v47 = vadd.f32 %v36930_v53, %v37727_v56  ;;  %v16714_v56 = vld [vmem:[%s37465_s0 + $0x260] sm:$0xff] }
0x173f   :  { %v17519_v28 = vmax.f32 %v25541_v26, 0.0 }
0x1740   :  { %v17047_v59 = vpop.f32.mrb[88].mxu1 }
0x1741   :  { %17600 = vst [vmem:[%s37471_s7 + $0x10] sm:$0xff] %v17519_v28  ;;  %v25543_v25 = vadd.f32 %v17047_v59, %v9547_v57  ;;  %v25221_v17 = vpop.f32.mrb[89].mxu1  ;;  %25379 = vmatmul.mubr.msk.f32.gmra.mrb[32].mxu1 %vm26_vm0, %v16697_v58  ;;  %v37728_v57 = vld [vmem:[#allocation15_spill] sm:$0xff] }
0x1742   :  { %25381 = vmatprep.mubr.msk.f32.mxu1 %vm28339_vm1, %v28338_v0  ;;  %v9556_v28 = vadd.f32 %v36930_v53, %v37728_v57  ;;  %v16715_v57 = vld [vmem:[%s37465_s0 + $0x268] sm:$0xff] }
0x1743   :  { %v17520_v31 = vmax.f32 %v25543_v25, 0.0 }
0x1744   :  { %v17052_v9 = vpop.f32.mrb[90].mxu1 }
0x1745   :  { %17601 = vst [vmem:[%s37471_s7 + $0x18] sm:$0xff] %v17520_v31  ;;  %v25545_v21 = vadd.f32 %v17052_v9, %v9548_v41  ;;  %v25224_v63 = vpop.f32.mrb[91].mxu1  ;;  %25382 = vmatmul.mubr.msk.f32.gmra.mrb[34].mxu1 %vm26_vm0, %v16698_v29  ;;  %v37729_v41 = vld [vmem:[#allocation16_spill] sm:$0xff] }
0x1746   :  { %25384 = vmatprep.mubr.msk.f32.mxu1 %vm28339_vm1, %v28338_v0  ;;  %v9557_v31 = vadd.f32 %v36930_v53, %v37729_v41  ;;  %v16716_v41 = vld [vmem:[%s37465_s0 + $0x270] sm:$0xff] }
0x1747   :  { %v17521_v60 = vmax.f32 %v25545_v21, 0.0 }
0x1748   :  { %v17057_v46 = vpop.f32.mrb[92].mxu1 }
0x1749   :  { %17602 = vst [vmem:[%s37471_s7 + $0x20] sm:$0xff] %v17521_v60  ;;  %v25547_v39 = vadd.f32 %v17057_v46, %v9549_v2  ;;  %v25227_v61 = vpop.f32.mrb[93].mxu1  ;;  %25385 = vmatmul.mubr.msk.f32.gmra.mrb[36].mxu1 %vm26_vm0, %v16699_v23  ;;  %v37730_v2 = vld [vmem:[#allocation17_spill] sm:$0xff] }
0x174a   :  { %25387 = vmatprep.mubr.msk.f32.mxu1 %vm28339_vm1, %v28338_v0  ;;  %v9558_v60 = vadd.f32 %v36930_v53, %v37730_v2  ;;  %v16717_v2 = vld [vmem:[%s37465_s0 + $0x278] sm:$0xff] }
0x174b   :  { %v17522_v62 = vmax.f32 %v25547_v39, 0.0 }
0x174c   :  { %v17062_v6 = vpop.f32.mrb[94].mxu1 }
0x174d   :  { %17603 = vst [vmem:[%s37471_s7 + $0x28] sm:$0xff] %v17522_v62  ;;  %v25549_v24 = vadd.f32 %v17062_v6, %v9550_v44  ;;  %v25230_v8 = vpop.f32.mrb[95].mxu1  ;;  %25388 = vmatmul.mubr.msk.f32.gmra.mrb[38].mxu1 %vm26_vm0, %v16700_v49  ;;  %v37731_v44 = vld [vmem:[#allocation18_spill] sm:$0xff] }
0x174e   :  { %25390 = vmatprep.mubr.msk.f32.mxu1 %vm28339_vm1, %v28338_v0  ;;  %v9559_v62 = vadd.f32 %v36930_v53, %v37731_v44  ;;  %v16718_v44 = vld [vmem:[%s37465_s0 + $0x280] sm:$0xff] }
0x174f   :  { %v17523_v18 = vmax.f32 %v25549_v24, 0.0 }
0x1750   :  { %v17067_v16 = vpop.f32.mrb[96].mxu1 }
0x1751   :  { %17604 = vst [vmem:[%s37471_s7 + $0x30] sm:$0xff] %v17523_v18  ;;  %v25551_v50 = vadd.f32 %v17067_v16, %v9551_v15  ;;  %v25233_v22 = vpop.f32.mrb[97].mxu1  ;;  %25391 = vmatmul.mubr.msk.f32.gmra.mrb[40].mxu1 %vm26_vm0, %v16701_v34  ;;  %v37732_v15 = vld [vmem:[#allocation19_spill] sm:$0xff] }
0x1752   :  { %25393 = vmatprep.mubr.msk.f32.mxu1 %vm28339_vm1, %v28338_v0  ;;  %v9560_v18 = vadd.f32 %v36930_v53, %v37732_v15  ;;  %v16719_v15 = vld [vmem:[%s37465_s0 + $0x288] sm:$0xff] }
0x1753   :  { %v17524_v33 = vmax.f32 %v25551_v50, 0.0 }
0x1754   :  { %v17072_v36 = vpop.f32.mrb[98].mxu1 }
0x1755   :  { %17605 = vst [vmem:[%s37471_s7 + $0x38] sm:$0xff] %v17524_v33  ;;  %v25553_v35 = vadd.f32 %v17072_v36, %v9552_v51  ;;  %v25236_v43 = vpop.f32.mrb[99].mxu1  ;;  %25394 = vmatmul.mubr.msk.f32.gmra.mrb[42].mxu1 %vm26_vm0, %v16702_v30  ;;  %v37733_v51 = vld [vmem:[#allocation20_spill] sm:$0xff] }
0x1756   :  { %25396 = vmatprep.mubr.msk.f32.mxu1 %vm28339_vm1, %v28338_v0  ;;  %v9561_v33 = vadd.f32 %v36930_v53, %v37733_v51  ;;  %v16720_v51 = vld [vmem:[%s37465_s0 + $0x290] sm:$0xff] }
0x1757   :  { %v17525_v11 = vmax.f32 %v25553_v35, 0.0 }
0x1758   :  { %v17077_v13 = vpop.f32.mrb[100].mxu1 }
0x1759   :  { %17606 = vst [vmem:[%s37471_s7 + $0x40] sm:$0xff] %v17525_v11  ;;  %v25555_v55 = vadd.f32 %v17077_v13, %v9553_v12  ;;  %v25239_v20 = vpop.f32.mrb[101].mxu1  ;;  %25397 = vmatmul.mubr.msk.f32.gmra.mrb[44].mxu1 %vm26_vm0, %v16703_v10  ;;  %v37734_v12 = vld [vmem:[#allocation21_spill] sm:$0xff] }
0x175a   :  { %25399 = vmatprep.mubr.msk.f32.mxu1 %vm28339_vm1, %v28338_v0  ;;  %v9562_v11 = vadd.f32 %v36930_v53, %v37734_v12  ;;  %v16721_v12 = vld [vmem:[%s37465_s0 + $0x298] sm:$0xff] }
0x175b   :  { %v17526_v19 = vmax.f32 %v25555_v55, 0.0 }
0x175c   :  { %v17082_v38 = vpop.f32.mrb[102].mxu1 }
0x175d   :  { %17607 = vst [vmem:[%s37471_s7 + $0x48] sm:$0xff] %v17526_v19  ;;  %v25557_v42 = vadd.f32 %v17082_v38, %v9554_v7  ;;  %v25242_v1 = vpop.f32.mrb[103].mxu1  ;;  %25400 = vmatmul.mubr.msk.f32.gmra.mrb[46].mxu1 %vm26_vm0, %v16704_v5  ;;  %v37735_v7 = vld [vmem:[#allocation22_spill] sm:$0xff] }
0x175e   :  { %25402 = vmatprep.mubr.msk.f32.mxu1 %vm28339_vm1, %v28338_v0  ;;  %v9563_v19 = vadd.f32 %v36930_v53, %v37735_v7  ;;  %v37744_v7 = vld [vmem:[#allocation31_spill] sm:$0xff] }
0x175f   :  { %v17527_v52 = vmax.f32 %v25557_v42, 0.0 }
0x1760   :  { %v17087_v26 = vpop.f32.mrb[104].mxu1 }
0x1761   :  { %17608 = vst [vmem:[%s37471_s7 + $0x50] sm:$0xff] %v17527_v52  ;;  %v25559_v3 = vadd.f32 %v17087_v26, %v9555_v47  ;;  %v25245_v58 = vpop.f32.mrb[105].mxu1  ;;  %25403 = vmatmul.mubr.msk.f32.gmra.mrb[48].mxu1 %vm26_vm0, %v16705_v48  ;;  %v37736_v47 = vld [vmem:[#allocation23_spill] sm:$0xff] }
0x1762   :  { %25405 = vmatprep.mubr.msk.f32.mxu1 %vm28339_vm1, %v28338_v0  ;;  %v9564_v52 = vadd.f32 %v36930_v53, %v37736_v47 }
0x1763   :  { %v17528_v59 = vmax.f32 %v25559_v3, 0.0 }
0x1764   :  { %v17092_v25 = vpop.f32.mrb[106].mxu1 }
0x1765   :  { %17609 = vst [vmem:[%s37471_s7 + $0x58] sm:$0xff] %v17528_v59  ;;  %v25561_v17 = vadd.f32 %v17092_v25, %v9556_v28  ;;  %v25248_v29 = vpop.f32.mrb[107].mxu1  ;;  %25406 = vmatmul.mubr.msk.f32.gmra.mrb[50].mxu1 %vm26_vm0, %v16706_v40  ;;  %v37737_v28 = vld [vmem:[#allocation24_spill] sm:$0xff] }
0x1766   :  { %25408 = vmatprep.mubr.msk.f32.mxu1 %vm28339_vm1, %v28338_v0  ;;  %v9565_v59 = vadd.f32 %v36930_v53, %v37737_v28 }
0x1767   :  { %v17529_v9 = vmax.f32 %v25561_v17, 0.0 }
0x1768   :  { %v17097_v21 = vpop.f32.mrb[108].mxu1 }
0x1769   :  { %17610 = vst [vmem:[%s37471_s7 + $0x60] sm:$0xff] %v17529_v9  ;;  %v25563_v63 = vadd.f32 %v17097_v21, %v9557_v31  ;;  %v25251_v23 = vpop.f32.mrb[109].mxu1  ;;  %25409 = vmatmul.mubr.msk.f32.gmra.mrb[52].mxu1 %vm26_vm0, %v16707_v32  ;;  %v37738_v31 = vld [vmem:[#allocation25_spill] sm:$0xff] }
0x176a   :  { %25411 = vmatprep.mubr.msk.f32.mxu1 %vm28339_vm1, %v28338_v0  ;;  %v9566_v9 = vadd.f32 %v36930_v53, %v37738_v31 }
0x176b   :  { %v17530_v46 = vmax.f32 %v25563_v63, 0.0 }
0x176c   :  { %v17102_v39 = vpop.f32.mrb[110].mxu1 }
0x176d   :  { %17611 = vst [vmem:[%s37471_s7 + $0x68] sm:$0xff] %v17530_v46  ;;  %v25565_v61 = vadd.f32 %v17102_v39, %v9558_v60  ;;  %v25254_v49 = vpop.f32.mrb[111].mxu1  ;;  %25412 = vmatmul.mubr.msk.f32.gmra.mrb[54].mxu1 %vm26_vm0, %v16708_v37  ;;  %v37739_v60 = vld [vmem:[#allocation26_spill] sm:$0xff] }
0x176e   :  { %25414 = vmatprep.mubr.msk.f32.mxu1 %vm28339_vm1, %v28338_v0  ;;  %v9567_v46 = vadd.f32 %v36930_v53, %v37739_v60 }
0x176f   :  { %v17531_v6 = vmax.f32 %v25565_v61, 0.0 }
0x1770   :  { %v17107_v24 = vpop.f32.mrb[112].mxu1 }
0x1771   :  { %17612 = vst [vmem:[%s37471_s7 + $0x70] sm:$0xff] %v17531_v6  ;;  %v25567_v8 = vadd.f32 %v17107_v24, %v9559_v62  ;;  %v25257_v34 = vpop.f32.mrb[113].mxu1  ;;  %25415 = vmatmul.mubr.msk.f32.gmra.mrb[56].mxu1 %vm26_vm0, %v16709_v54  ;;  %v37740_v62 = vld [vmem:[#allocation27_spill] sm:$0xff] }
0x1772   :  { %25417 = vmatprep.mubr.msk.f32.mxu1 %vm28339_vm1, %v28338_v0  ;;  %v9568_v6 = vadd.f32 %v36930_v53, %v37740_v62  ;;  %v37750_v62 = vld [vmem:[#allocation37_spill] sm:$0xff] }
0x1773   :  { %v17532_v16 = vmax.f32 %v25567_v8, 0.0 }
0x1774   :  { %v17112_v50 = vpop.f32.mrb[114].mxu1 }
0x1775   :  { %17613 = vst [vmem:[%s37471_s7 + $0x78] sm:$0xff] %v17532_v16  ;;  %v25569_v22 = vadd.f32 %v17112_v50, %v9560_v18  ;;  %v25260_v30 = vpop.f32.mrb[115].mxu1  ;;  %25418 = vmatmul.mubr.msk.f32.gmra.mrb[58].mxu1 %vm26_vm0, %v16710_v14  ;;  %v37741_v18 = vld [vmem:[#allocation28_spill] sm:$0xff] }
0x1776   :  { %25420 = vmatprep.mubr.msk.f32.mxu1 %vm28339_vm1, %v28338_v0  ;;  %v9569_v16 = vadd.f32 %v36930_v53, %v37741_v18 }
0x1777   :  { %v17533_v36 = vmax.f32 %v25569_v22, 0.0 }
0x1778   :  { %v17117_v35 = vpop.f32.mrb[116].mxu1 }
0x1779   :  { %17614 = vst [vmem:[%s37471_s7 + $0x80] sm:$0xff] %v17533_v36  ;;  %v25571_v43 = vadd.f32 %v17117_v35, %v9561_v33  ;;  %v25263_v10 = vpop.f32.mrb[117].mxu1  ;;  %25421 = vmatmul.mubr.msk.f32.gmra.mrb[60].mxu1 %vm26_vm0, %v16711_v27  ;;  %v37742_v33 = vld [vmem:[#allocation29_spill] sm:$0xff] }
0x177a   :  { %25423 = vmatprep.mubr.msk.f32.mxu1 %vm28339_vm1, %v28338_v0  ;;  %v9570_v36 = vadd.f32 %v36930_v53, %v37742_v33 }
0x177b   :  { %v17534_v13 = vmax.f32 %v25571_v43, 0.0 }
0x177c   :  { %v17122_v55 = vpop.f32.mrb[118].mxu1 }
0x177d   :  { %17615 = vst [vmem:[%s37471_s7 + $0x88] sm:$0xff] %v17534_v13  ;;  %v25573_v20 = vadd.f32 %v17122_v55, %v9562_v11  ;;  %v25266_v5 = vpop.f32.mrb[119].mxu1  ;;  %25424 = vmatmul.mubr.msk.f32.gmra.mrb[62].mxu1 %vm26_vm0, %v16712_v45  ;;  %v37743_v11 = vld [vmem:[#allocation30_spill] sm:$0xff] }
0x177e   :  { %25426 = vmatprep.mubr.msk.f32.mxu1 %vm28339_vm1, %v28338_v0  ;;  %v9571_v13 = vadd.f32 %v36930_v53, %v37743_v11 }
0x177f   :  { %v17535_v38 = vmax.f32 %v25573_v20, 0.0 }
0x1780   :  { %v17127_v42 = vpop.f32.mrb[120].mxu1 }
0x1781   :  { %17616 = vst [vmem:[%s37471_s7 + $0x90] sm:$0xff] %v17535_v38  ;;  %v25575_v1 = vadd.f32 %v17127_v42, %v9563_v19  ;;  %v25269_v48 = vpop.f32.mrb[121].mxu1  ;;  %25427 = vmatmul.mubr.msk.f32.gmra.mrb[64].mxu1 %vm26_vm0, %v16713_v4 }
0x1782   :  { %25429 = vmatprep.mubr.msk.f32.mxu1 %vm28339_vm1, %v28338_v0  ;;  %v37745_v48 = vld [vmem:[#allocation32_spill] sm:$0xff] }
0x1783   :  { %v17536_v26 = vmax.f32 %v25575_v1, 0.0 }
0x1784   :  { %v17132_v3 = vpop.f32.mrb[122].mxu1 }
0x1785   :  { %17617 = vst [vmem:[%s37471_s7 + $0x98] sm:$0xff] %v17536_v26  ;;  %v25577_v58 = vadd.f32 %v17132_v3, %v9564_v52  ;;  %v25272_v40 = vpop.f32.mrb[123].mxu1  ;;  %25430 = vmatmul.mubr.msk.f32.gmra.mrb[66].mxu1 %vm26_vm0, %v16714_v56  ;;  %v9573_v56 = vadd.f32 %v36930_v53, %v37745_v48 }
0x1786   :  { %25432 = vmatprep.mubr.msk.f32.mxu1 %vm28339_vm1, %v28338_v0 }
0x1787   :  { %v17537_v25 = vmax.f32 %v25577_v58, 0.0  ;;  %v37746_v58 = vld [vmem:[#allocation33_spill] sm:$0xff] }
0x1788   :  { %v17137_v17 = vpop.f32.mrb[124].mxu1  ;;  %v9574_v40 = vadd.f32 %v36930_v53, %v37746_v58 }
0x1789   :  { %17618 = vst [vmem:[%s37471_s7 + $0xa0] sm:$0xff] %v17537_v25  ;;  %v25579_v29 = vadd.f32 %v17137_v17, %v9565_v59  ;;  %v25275_v32 = vpop.f32.mrb[125].mxu1  ;;  %25433 = vmatmul.mubr.msk.f32.gmra.mrb[68].mxu1 %vm26_vm0, %v16715_v57  ;;  %v37747_v17 = vld [vmem:[#allocation34_spill] sm:$0xff] }
0x178a   :  { %25435 = vmatprep.mubr.msk.f32.mxu1 %vm28339_vm1, %v28338_v0 }
0x178b   :  { %v17538_v21 = vmax.f32 %v25579_v29, 0.0  ;;  %v9575_v29 = vadd.f32 %v36930_v53, %v37747_v17 }
0x178c   :  { %v17142_v63 = vpop.f32.mrb[126].mxu1 }
0x178d   :  { %17619 = vst [vmem:[%s37471_s7 + $0xa8] sm:$0xff] %v17538_v21  ;;  %v25581_v23 = vadd.f32 %v17142_v63, %v9566_v9  ;;  %v25278_v37 = vpop.f32.mrb[127].mxu1  ;;  %25436 = vmatmul.mubr.msk.f32.gmra.mrb[70].mxu1 %vm26_vm0, %v16716_v41  ;;  %v37748_v21 = vld [vmem:[#allocation35_spill] sm:$0xff] }
0x178e   :  { %25438 = vmatprep.mubr.msk.f32.mxu1 %vm28339_vm1, %v28338_v0  ;;  %v9576_v63 = vadd.f32 %v36930_v53, %v37748_v21 }
0x178f   :  { %v17539_v39 = vmax.f32 %v25581_v23, 0.0 }
0x1790   :  { %v17147_v61 = vpop.f32.mrb[128].mxu1 }
0x1791   :  { %17620 = vst [vmem:[%s37471_s7 + $0xb0] sm:$0xff] %v17539_v39  ;;  %v25583_v49 = vadd.f32 %v17147_v61, %v9567_v46  ;;  %v25281_v54 = vpop.f32.mrb[129].mxu1  ;;  %25439 = vmatmul.mubr.msk.f32.gmra.mrb[72].mxu1 %vm26_vm0, %v16717_v2  ;;  %v37749_v46 = vld [vmem:[#allocation36_spill] sm:$0xff] }
0x1792   :  { %25441 = vmatprep.mubr.msk.f32.mxu1 %vm28339_vm1, %v28338_v0  ;;  %v9577_v39 = vadd.f32 %v36930_v53, %v37749_v46 }
0x1793   :  { %v17540_v24 = vmax.f32 %v25583_v49, 0.0 }
0x1794   :  { %v17152_v8 = vpop.f32.mrb[130].mxu1 }
0x1795   :  { %17621 = vst [vmem:[%s37471_s7 + $0xb8] sm:$0xff] %v17540_v24  ;;  %v25585_v34 = vadd.f32 %v17152_v8, %v9568_v6  ;;  %v25284_v14 = vpop.f32.mrb[131].mxu1  ;;  %25442 = vmatmul.mubr.msk.f32.gmra.mrb[74].mxu1 %vm26_vm0, %v16718_v44  ;;  %v9578_v6 = vadd.f32 %v36930_v53, %v37750_v62 }
0x1796   :  { %25444 = vmatprep.mubr.msk.f32.mxu1 %vm28339_vm1, %v28338_v0 }
0x1797   :  { %v17541_v50 = vmax.f32 %v25585_v34, 0.0 }
0x1798   :  { %v17157_v22 = vpop.f32.mrb[132].mxu1 }
0x1799   :  { %17622 = vst [vmem:[%s37471_s7 + $0xc0] sm:$0xff] %v17541_v50  ;;  %v25587_v30 = vadd.f32 %v17157_v22, %v9569_v16  ;;  %v25287_v27 = vpop.f32.mrb[133].mxu1  ;;  %25445 = vmatmul.mubr.msk.f32.gmra.mrb[76].mxu1 %vm26_vm0, %v16719_v15  ;;  %v37751_v15 = vld [vmem:[#allocation38_spill] sm:$0xff] }
0x179a   :  { %25447 = vmatprep.mubr.msk.f32.mxu1 %vm28339_vm1, %v28338_v0  ;;  %v9579_v18 = vadd.f32 %v36930_v53, %v37751_v15  ;;  %v37752_v27 = vld [vmem:[#allocation39_spill] sm:$0xff] }
0x179b   :  { %v17542_v35 = vmax.f32 %v25587_v30, 0.0 }
0x179c   :  { %v17162_v43 = vpop.f32.mrb[134].mxu1 }
0x179d   :  { %17623 = vst [vmem:[%s37471_s7 + $0xc8] sm:$0xff] %v17542_v35  ;;  %v25589_v10 = vadd.f32 %v17162_v43, %v9570_v36  ;;  %v25290_v45 = vpop.f32.mrb[135].mxu1  ;;  %25448 = vmatmul.mubr.msk.f32.gmra.mrb[78].mxu1 %vm26_vm0, %v16720_v51  ;;  %v9580_v51 = vadd.f32 %v36930_v53, %v37752_v27 }
0x179e   :  { %25450 = vmatprep.mubr.msk.f32.mxu1 %vm28339_vm1, %v28338_v0  ;;  %v9572_v0 = vadd.f32 %v36930_v53, %v37744_v7 }
0x179f   :  { %v17543_v55 = vmax.f32 %v25589_v10, 0.0  ;;  %v37753_v10 = vld [vmem:[#allocation40_spill] sm:$0xff] }
0x17a0   :  { %v17167_v20 = vpop.f32.mrb[136].mxu1  ;;  %v9581_v45 = vadd.f32 %v36930_v53, %v37753_v10 }
0x17a1   :  { %17624 = vst [vmem:[%s37471_s7 + $0xd0] sm:$0xff] %v17543_v55  ;;  %v25591_v5 = vadd.f32 %v17167_v20, %v9571_v13  ;;  %v25293_v4 = vpop.f32.mrb[137].mxu1  ;;  %25451 = vmatmul.mubr.msk.f32.gmra.mrb[80].mxu1 %vm26_vm0, %v16721_v12  ;;  %v37754_v20 = vld [vmem:[#allocation41_spill] sm:$0xff] }
0x17a3   :  { %v17544_v19 = vmax.f32 %v25591_v5, 0.0  ;;  %v9582_v5 = vadd.f32 %v36930_v53, %v37754_v20 }
0x17a4   :  { %v17172_v38 = vpop.f32.mrb[138].mxu1 }
0x17a5   :  { %17625 = vst [vmem:[%s37471_s7 + $0xd8] sm:$0xff] %v17544_v19  ;;  %v25593_v42 = vadd.f32 %v17172_v38, %v9572_v0  ;;  %v25296_v1 = vpop.f32.mrb[139].mxu1  ;;  %v37755_v38 = vld [vmem:[#allocation42_spill] sm:$0xff] }
0x17a7   :  { %v17545_v47 = vmax.f32 %v25593_v42, 0.0  ;;  %v9583_v42 = vadd.f32 %v36930_v53, %v37755_v38 }
0x17a8   :  { %v17177_v52 = vpop.f32.mrb[140].mxu1 }
0x17a9   :  { %17626 = vst [vmem:[%s37471_s7 + $0xe0] sm:$0xff] %v17545_v47  ;;  %v25595_v26 = vadd.f32 %v17177_v52, %v9573_v56  ;;  %v25299_v3 = vpop.f32.mrb[141].mxu1 }
0x17ab   :  { %v17546_v57 = vmax.f32 %v25595_v26, 0.0 }
0x17ac   :  { %v17182_v28 = vpop.f32.mrb[142].mxu1 }
0x17ad   :  { %17627 = vst [vmem:[%s37471_s7 + $0xe8] sm:$0xff] %v17546_v57  ;;  %v25597_v59 = vadd.f32 %v17182_v28, %v9574_v40  ;;  %v25302_v25 = vpop.f32.mrb[143].mxu1 }
0x17af   :  { %v17547_v32 = vmax.f32 %v25597_v59, 0.0 }
0x17b0   :  { %v17187_v41 = vpop.f32.mrb[144].mxu1 }
0x17b1   :  { %17628 = vst [vmem:[%s37471_s7 + $0xf0] sm:$0xff] %v17547_v32  ;;  %v25599_v31 = vadd.f32 %v17187_v41, %v9575_v29  ;;  %v25305_v9 = vpop.f32.mrb[145].mxu1 }
0x17b3   :  { %v17548_v23 = vmax.f32 %v25599_v31, 0.0 }
0x17b4   :  { %v17192_v37 = vpop.f32.mrb[146].mxu1 }
0x17b5   :  { %17629 = vst [vmem:[%s37471_s7 + $0xf8] sm:$0xff] %v17548_v23  ;;  %v25601_v2 = vadd.f32 %v17192_v37, %v9576_v63  ;;  %v25308_v60 = vpop.f32.mrb[147].mxu1 }
0x17b7   :  { %v17549_v61 = vmax.f32 %v25601_v2, 0.0 }
0x17b8   :  { %v17197_v49 = vpop.f32.mrb[148].mxu1 }
0x17b9   :  { %17630 = vst [vmem:[%s37471_s7 + $0x100] sm:$0xff] %v17549_v61  ;;  %v25603_v54 = vadd.f32 %v17197_v49, %v9577_v39  ;;  %v25311_v44 = vpop.f32.mrb[149].mxu1 }
0x17bb   :  { %v17550_v24 = vmax.f32 %v25603_v54, 0.0 }
0x17bc   :  { %v17202_v8 = vpop.f32.mrb[150].mxu1 }
0x17bd   :  { %17631 = vst [vmem:[%s37471_s7 + $0x108] sm:$0xff] %v17550_v24  ;;  %v25605_v34 = vadd.f32 %v17202_v8, %v9578_v6  ;;  %v25314_v14 = vpop.f32.mrb[151].mxu1 }
0x17bf   :  { %v17551_v16 = vmax.f32 %v25605_v34, 0.0 }
0x17c0   :  { %v17207_v50 = vpop.f32.mrb[152].mxu1 }
0x17c1   :  { %17632 = vst [vmem:[%s37471_s7 + $0x110] sm:$0xff] %v17551_v16  ;;  %v25607_v22 = vadd.f32 %v17207_v50, %v9579_v18  ;;  %v25317_v30 = vpop.f32.mrb[153].mxu1 }
0x17c3   :  { %v17552_v33 = vmax.f32 %v25607_v22, 0.0 }
0x17c4   :  { %v17212_v36 = vpop.f32.mrb[154].mxu1 }
0x17c5   :  { %17633 = vst [vmem:[%s37471_s7 + $0x118] sm:$0xff] %v17552_v33  ;;  %v25609_v35 = vadd.f32 %v17212_v36, %v9580_v51  ;;  %v25320_v43 = vpop.f32.mrb[155].mxu1 }
0x17c7   :  { %v17553_v12 = vmax.f32 %v25609_v35, 0.0 }
0x17c8   :  { %v17217_v11 = vpop.f32.mrb[156].mxu1 }
0x17c9   :  { %17634 = vst [vmem:[%s37471_s7 + $0x120] sm:$0xff] %v17553_v12  ;;  %v25611_v13 = vadd.f32 %v17217_v11, %v9581_v45  ;;  %v25323_v55 = vpop.f32.mrb[157].mxu1 }
0x17cb   :  { %v17554_v4 = vmax.f32 %v25611_v13, 0.0 }
0x17cc   :  { %v17222_v7 = vpop.f32.mrb[158].mxu1 }
0x17cd   :  { %17635 = vst [vmem:[%s37471_s7 + $0x128] sm:$0xff] %v17554_v4  ;;  %v25613_v0 = vadd.f32 %v17222_v7, %v9582_v5  ;;  %v25326_v19 = vpop.f32.mrb[159].mxu1 }
0x17cf   :  { %v17555_v1 = vmax.f32 %v25613_v0, 0.0 }
0x17d0   :  { %v17227_v48 = vpop.f32.mrb[160].mxu1 }
0x17d1   :  { %17636 = vst [vmem:[%s37471_s7 + $0x130] sm:$0xff] %v17555_v1  ;;  %v25615_v56 = vadd.f32 %v17227_v48, %v9583_v42  ;;  %v25329_v47 = vpop.f32.mrb[161].mxu1 }
0x17d3   :  { %v17556_v52 = vmax.f32 %v25615_v56, 0.0 }
0x17d4   :  { %v17232_v26 = vpop.f32.mrb[0].mxu1 }
0x17d5   :  { %17637 = vst [vmem:[%s37471_s7 + $0x138] sm:$0xff] %v17556_v52  ;;  %v25616_v3 = vadd.f32 %v36930_v53, %v17232_v26  ;;  %v25332_v58 = vpop.f32.mrb[1].mxu1 }
0x17d7   :  { %v17557_v40 = vmax.f32 %v25616_v3, 0.0 }
0x17d8   :  { %v17237_v57 = vpop.f32.mrb[2].mxu1 }
0x17d9   :  { %17638 = vst [vmem:[%s37471_s7 + $0x140] sm:$0xff] %v17557_v40  ;;  %v25617_v28 = vadd.f32 %v36930_v53, %v17237_v57  ;;  %v25335_v59 = vpop.f32.mrb[3].mxu1 }
0x17db   :  { %v17558_v25 = vmax.f32 %v25617_v28, 0.0 }
0x17dc   :  { %v17242_v17 = vpop.f32.mrb[4].mxu1 }
0x17dd   :  { %17639 = vst [vmem:[%s37471_s7 + $0x148] sm:$0xff] %v17558_v25  ;;  %v25618_v29 = vadd.f32 %v36930_v53, %v17242_v17  ;;  %v25338_v32 = vpop.f32.mrb[5].mxu1 }
0x17df   :  { %v17559_v41 = vmax.f32 %v25618_v29, 0.0 }
0x17e0   :  { %v17247_v31 = vpop.f32.mrb[6].mxu1 }
0x17e1   :  { %17640 = vst [vmem:[%s37471_s7 + $0x150] sm:$0xff] %v17559_v41  ;;  %v25619_v9 = vadd.f32 %v36930_v53, %v17247_v31  ;;  %v25341_v21 = vpop.f32.mrb[7].mxu1 }
0x17e3   :  { %v17560_v63 = vmax.f32 %v25619_v9, 0.0 }
0x17e4   :  { %v17252_v23 = vpop.f32.mrb[8].mxu1 }
0x17e5   :  { %17641 = vst [vmem:[%s37471_s7 + $0x158] sm:$0xff] %v17560_v63  ;;  %v25620_v37 = vadd.f32 %v36930_v53, %v17252_v23  ;;  %v25344_v2 = vpop.f32.mrb[9].mxu1 }
0x17e7   :  { %v17561_v60 = vmax.f32 %v25620_v37, 0.0 }
0x17e8   :  { %v17257_v46 = vpop.f32.mrb[10].mxu1 }
0x17e9   :  { %17642 = vst [vmem:[%s37471_s7 + $0x160] sm:$0xff] %v17561_v60  ;;  %v25621_v39 = vadd.f32 %v36930_v53, %v17257_v46  ;;  %v25347_v61 = vpop.f32.mrb[11].mxu1 }
0x17eb   :  { %v17562_v49 = vmax.f32 %v25621_v39, 0.0 }
0x17ec   :  { %v17262_v54 = vpop.f32.mrb[12].mxu1 }
0x17ed   :  { %17643 = vst [vmem:[%s37471_s7 + $0x168] sm:$0xff] %v17562_v49  ;;  %v25622_v44 = vadd.f32 %v36930_v53, %v17262_v54  ;;  %v25350_v62 = vpop.f32.mrb[13].mxu1 }
0x17ef   :  { %v17563_v6 = vmax.f32 %v25622_v44, 0.0 }
0x17f0   :  { %v17267_v24 = vpop.f32.mrb[14].mxu1 }
0x17f1   :  { %17644 = vst [vmem:[%s37471_s7 + $0x170] sm:$0xff] %v17563_v6  ;;  %v25623_v8 = vadd.f32 %v36930_v53, %v17267_v24  ;;  %v25353_v34 = vpop.f32.mrb[15].mxu1 }
0x17f3   :  { %v17564_v14 = vmax.f32 %v25623_v8, 0.0 }
0x17f4   :  { %v17272_v15 = vpop.f32.mrb[16].mxu1 }
0x17f5   :  { %17645 = vst [vmem:[%s37471_s7 + $0x178] sm:$0xff] %v17564_v14  ;;  %v25624_v18 = vadd.f32 %v36930_v53, %v17272_v15  ;;  %v25356_v16 = vpop.f32.mrb[17].mxu1 }
0x17f7   :  { %v17565_v50 = vmax.f32 %v25624_v18, 0.0 }
0x17f8   :  { %v17277_v22 = vpop.f32.mrb[18].mxu1 }
0x17f9   :  { %17646 = vst [vmem:[%s37471_s7 + $0x180] sm:$0xff] %v17565_v50  ;;  %v25625_v30 = vadd.f32 %v36930_v53, %v17277_v22  ;;  %v25359_v27 = vpop.f32.mrb[19].mxu1 }
0x17fb   :  { %v17566_v51 = vmax.f32 %v25625_v30, 0.0 }
0x17fc   :  { %v17282_v33 = vpop.f32.mrb[20].mxu1 }
0x17fd   :  { %17647 = vst [vmem:[%s37471_s7 + $0x188] sm:$0xff] %v17566_v51  ;;  %v25626_v36 = vadd.f32 %v36930_v53, %v17282_v33  ;;  %v25362_v35 = vpop.f32.mrb[21].mxu1 }
0x17ff   :  { %v17567_v43 = vmax.f32 %v25626_v36, 0.0 }
0x1800   :  { %v17287_v10 = vpop.f32.mrb[22].mxu1 }
0x1801   :  { %17648 = vst [vmem:[%s37471_s7 + $0x190] sm:$0xff] %v17567_v43  ;;  %v25627_v45 = vadd.f32 %v36930_v53, %v17287_v10  ;;  %v25365_v12 = vpop.f32.mrb[23].mxu1 }
0x1803   :  { %v17568_v11 = vmax.f32 %v25627_v45, 0.0 }
0x1804   :  { %v17292_v13 = vpop.f32.mrb[24].mxu1 }
0x1805   :  { %17649 = vst [vmem:[%s37471_s7 + $0x198] sm:$0xff] %v17568_v11  ;;  %v25628_v55 = vadd.f32 %v36930_v53, %v17292_v13  ;;  %v25368_v20 = vpop.f32.mrb[25].mxu1 }
0x1807   :  { %v17569_v5 = vmax.f32 %v25628_v55, 0.0 }
0x1808   :  { %v17297_v4 = vpop.f32.mrb[26].mxu1 }
0x1809   :  { %17650 = vst [vmem:[%s37471_s7 + $0x1a0] sm:$0xff] %v17569_v5  ;;  %v25629_v7 = vadd.f32 %v36930_v53, %v17297_v4  ;;  %v25371_v0 = vpop.f32.mrb[27].mxu1 }
0x180b   :  { %v17570_v19 = vmax.f32 %v25629_v7, 0.0 }
0x180c   :  { %v17302_v38 = vpop.f32.mrb[28].mxu1 }
0x180d   :  { %17651 = vst [vmem:[%s37471_s7 + $0x1a8] sm:$0xff] %v17570_v19  ;;  %v25630_v42 = vadd.f32 %v36930_v53, %v17302_v38  ;;  %v25374_v1 = vpop.f32.mrb[29].mxu1 }
0x180f   :  { %v17571_v48 = vmax.f32 %v25630_v42, 0.0 }
0x1810   :  { %v17307_v56 = vpop.f32.mrb[30].mxu1 }
0x1811   :  { %17652 = vst [vmem:[%s37471_s7 + $0x1b0] sm:$0xff] %v17571_v48  ;;  %v25631_v47 = vadd.f32 %v36930_v53, %v17307_v56  ;;  %v25377_v52 = vpop.f32.mrb[31].mxu1 }
0x1813   :  { %v17572_v26 = vmax.f32 %v25631_v47, 0.0 }
0x1814   :  { %v17312_v3 = vpop.f32.mrb[32].mxu1 }
0x1815   :  { %17653 = vst [vmem:[%s37471_s7 + $0x1b8] sm:$0xff] %v17572_v26  ;;  %v25632_v58 = vadd.f32 %v36930_v53, %v17312_v3  ;;  %v25380_v40 = vpop.f32.mrb[33].mxu1 }
0x1817   :  { %v17573_v57 = vmax.f32 %v25632_v58, 0.0 }
0x1818   :  { %v17317_v28 = vpop.f32.mrb[34].mxu1 }
0x1819   :  { %17654 = vst [vmem:[%s37471_s7 + $0x1c0] sm:$0xff] %v17573_v57  ;;  %v25633_v59 = vadd.f32 %v36930_v53, %v17317_v28  ;;  %v25383_v25 = vpop.f32.mrb[35].mxu1 }
0x181b   :  { %v17574_v17 = vmax.f32 %v25633_v59, 0.0 }
0x181c   :  { %v17322_v29 = vpop.f32.mrb[36].mxu1 }
0x181d   :  { %17655 = vst [vmem:[%s37471_s7 + $0x1c8] sm:$0xff] %v17574_v17  ;;  %v25634_v32 = vadd.f32 %v36930_v53, %v17322_v29  ;;  %v25386_v41 = vpop.f32.mrb[37].mxu1 }
0x181f   :  { %v17575_v31 = vmax.f32 %v25634_v32, 0.0 }
0x1820   :  { %v17327_v9 = vpop.f32.mrb[38].mxu1 }
0x1821   :  { %17656 = vst [vmem:[%s37471_s7 + $0x1d0] sm:$0xff] %v17575_v31  ;;  %v25635_v21 = vadd.f32 %v36930_v53, %v17327_v9  ;;  %v25389_v63 = vpop.f32.mrb[39].mxu1 }
0x1823   :  { %v17576_v23 = vmax.f32 %v25635_v21, 0.0 }
0x1824   :  { %v17332_v37 = vpop.f32.mrb[40].mxu1 }
0x1825   :  { %17657 = vst [vmem:[%s37471_s7 + $0x1d8] sm:$0xff] %v17576_v23  ;;  %v25636_v2 = vadd.f32 %v36930_v53, %v17332_v37  ;;  %v25392_v60 = vpop.f32.mrb[41].mxu1 }
0x1827   :  { %v17577_v46 = vmax.f32 %v25636_v2, 0.0 }
0x1828   :  { %v17337_v39 = vpop.f32.mrb[42].mxu1 }
0x1829   :  { %17658 = vst [vmem:[%s37471_s7 + $0x1e0] sm:$0xff] %v17577_v46  ;;  %v25637_v61 = vadd.f32 %v36930_v53, %v17337_v39  ;;  %v25395_v49 = vpop.f32.mrb[43].mxu1 }
0x182a   :  { %v28337_v49 = vld [vmem:[%s37470_s5] ss:$0 sm:$0xff] }
0x182b   :  { %v17578_v54 = vmax.f32 %v25637_v61, 0.0 }
0x182c   :  { %v17342_v44 = vpop.f32.mrb[44].mxu1 }
0x182d   :  { %17659 = vst [vmem:[%s37471_s7 + $0x1e8] sm:$0xff] %v17578_v54  ;;  %v25638_v62 = vadd.f32 %v36930_v53, %v17342_v44  ;;  %v25398_v6 = vpop.f32.mrb[45].mxu1 }
0x182f   :  { %v17579_v24 = vmax.f32 %v25638_v62, 0.0 }
0x1830   :  { %v17347_v8 = vpop.f32.mrb[46].mxu1 }
0x1831   :  { %17660 = vst [vmem:[%s37471_s7 + $0x1f0] sm:$0xff] %v17579_v24  ;;  %v25639_v34 = vadd.f32 %v36930_v53, %v17347_v8  ;;  %v25401_v14 = vpop.f32.mrb[47].mxu1 }
0x1833   :  { %v17580_v15 = vmax.f32 %v25639_v34, 0.0 }
0x1834   :  { %v17352_v18 = vpop.f32.mrb[48].mxu1 }
0x1835   :  { %17661 = vst [vmem:[%s37471_s7 + $0x1f8] sm:$0xff] %v17580_v15  ;;  %v25640_v16 = vadd.f32 %v36930_v53, %v17352_v18  ;;  %v25404_v50 = vpop.f32.mrb[49].mxu1 }
0x1837   :  { %v17581_v22 = vmax.f32 %v25640_v16, 0.0 }
0x1838   :  { %v17357_v30 = vpop.f32.mrb[50].mxu1 }
0x1839   :  { %17662 = vst [vmem:[%s37471_s7 + $0x200] sm:$0xff] %v17581_v22  ;;  %v25641_v27 = vadd.f32 %v36930_v53, %v17357_v30  ;;  %v25407_v51 = vpop.f32.mrb[51].mxu1 }
0x183b   :  { %v17582_v33 = vmax.f32 %v25641_v27, 0.0 }
0x183c   :  { %v17362_v36 = vpop.f32.mrb[52].mxu1 }
0x183d   :  { %17663 = vst [vmem:[%s37471_s7 + $0x208] sm:$0xff] %v17582_v33  ;;  %v25642_v35 = vadd.f32 %v36930_v53, %v17362_v36  ;;  %v25410_v43 = vpop.f32.mrb[53].mxu1 }
0x183f   :  { %v17583_v10 = vmax.f32 %v25642_v35, 0.0 }
0x1840   :  { %v17367_v45 = vpop.f32.mrb[54].mxu1 }
0x1841   :  { %17664 = vst [vmem:[%s37471_s7 + $0x210] sm:$0xff] %v17583_v10  ;;  %v25643_v12 = vadd.f32 %v36930_v53, %v17367_v45  ;;  %v25413_v11 = vpop.f32.mrb[55].mxu1 }
0x1843   :  { %v17584_v13 = vmax.f32 %v25643_v12, 0.0 }
0x1844   :  { %v17372_v55 = vpop.f32.mrb[56].mxu1 }
0x1845   :  { %17665 = vst [vmem:[%s37471_s7 + $0x218] sm:$0xff] %v17584_v13  ;;  %v25644_v20 = vadd.f32 %v36930_v53, %v17372_v55  ;;  %v25416_v5 = vpop.f32.mrb[57].mxu1 }
0x1847   :  { %v17585_v4 = vmax.f32 %v25644_v20, 0.0 }
0x1848   :  { %v17377_v7 = vpop.f32.mrb[58].mxu1 }
0x1849   :  { %17666 = vst [vmem:[%s37471_s7 + $0x220] sm:$0xff] %v17585_v4  ;;  %v25645_v0 = vadd.f32 %v36930_v53, %v17377_v7  ;;  %v25419_v19 = vpop.f32.mrb[59].mxu1 }
0x184b   :  { %v17586_v38 = vmax.f32 %v25645_v0, 0.0 }
0x184c   :  { %v17382_v42 = vpop.f32.mrb[60].mxu1 }
0x184d   :  { %17667 = vst [vmem:[%s37471_s7 + $0x228] sm:$0xff] %v17586_v38  ;;  %v25646_v1 = vadd.f32 %v36930_v53, %v17382_v42  ;;  %v25422_v48 = vpop.f32.mrb[61].mxu1 }
0x184f   :  { %v17587_v56 = vmax.f32 %v25646_v1, 0.0 }
0x1850   :  { %v17387_v47 = vpop.f32.mrb[62].mxu1 }
0x1851   :  { %17668 = vst [vmem:[%s37471_s7 + $0x230] sm:$0xff] %v17587_v56  ;;  %v25647_v52 = vadd.f32 %v36930_v53, %v17387_v47  ;;  %v25425_v26 = vpop.f32.mrb[63].mxu1 }
0x1853   :  { %v17588_v3 = vmax.f32 %v25647_v52, 0.0 }
0x1854   :  { %v17392_v58 = vpop.f32.mrb[64].mxu1 }
0x1855   :  { %17669 = vst [vmem:[%s37471_s7 + $0x238] sm:$0xff] %v17588_v3  ;;  %v25648_v40 = vadd.f32 %v36930_v53, %v17392_v58  ;;  %v25428_v57 = vpop.f32.mrb[65].mxu1 }
0x1857   :  { %v17589_v28 = vmax.f32 %v25648_v40, 0.0 }
0x1858   :  { %v17397_v59 = vpop.f32.mrb[66].mxu1 }
0x1859   :  { %17670 = vst [vmem:[%s37471_s7 + $0x240] sm:$0xff] %v17589_v28  ;;  %v25649_v25 = vadd.f32 %v36930_v53, %v17397_v59  ;;  %v25431_v17 = vpop.f32.mrb[67].mxu1 }
0x185b   :  { %v17590_v29 = vmax.f32 %v25649_v25, 0.0 }
0x185c   :  { %v17402_v32 = vpop.f32.mrb[68].mxu1 }
0x185d   :  { %17671 = vst [vmem:[%s37471_s7 + $0x248] sm:$0xff] %v17590_v29  ;;  %v25650_v41 = vadd.f32 %v36930_v53, %v17402_v32  ;;  %v25434_v31 = vpop.f32.mrb[69].mxu1 }
0x185f   :  { %v17591_v9 = vmax.f32 %v25650_v41, 0.0 }
0x1860   :  { %v17407_v21 = vpop.f32.mrb[70].mxu1 }
0x1861   :  { %17672 = vst [vmem:[%s37471_s7 + $0x250] sm:$0xff] %v17591_v9  ;;  %v25651_v63 = vadd.f32 %v36930_v53, %v17407_v21  ;;  %v25437_v23 = vpop.f32.mrb[71].mxu1 }
0x1863   :  { %v17592_v37 = vmax.f32 %v25651_v63, 0.0 }
0x1864   :  { %v17412_v2 = vpop.f32.mrb[72].mxu1 }
0x1865   :  { %17673 = vst [vmem:[%s37471_s7 + $0x258] sm:$0xff] %v17592_v37  ;;  %v25652_v60 = vadd.f32 %v36930_v53, %v17412_v2  ;;  %v25440_v46 = vpop.f32.mrb[73].mxu1 }
0x1867   :  { %v17593_v39 = vmax.f32 %v25652_v60, 0.0 }
0x1868   :  { %v17417_v61 = vpop.f32.mrb[74].mxu1 }
0x1869   :  { %17674 = vst [vmem:[%s37471_s7 + $0x260] sm:$0xff] %v17593_v39  ;;  %v25653_v54 = vadd.f32 %v28337_v49, %v17417_v61  ;;  %v25443_v44 = vpop.f32.mrb[75].mxu1 }
0x186b   :  { %v17594_v62 = vmax.f32 %v25653_v54, 0.0 }
0x186c   :  { %v17422_v6 = vpop.f32.mrb[76].mxu1 }
0x186d   :  { %17675 = vst [vmem:[%s37471_s7 + $0x268] sm:$0xff] %v17594_v62  ;;  %v25654_v53 = vadd.f32 %v28337_v49, %v17422_v6  ;;  %v25446_v24 = vpop.f32.mrb[77].mxu1 }
0x186f   :  { %v17595_v8 = vmax.f32 %v25654_v53, 0.0 }
0x1870   :  { %v17427_v34 = vpop.f32.mrb[78].mxu1 }
0x1871   :  { %17676 = vst [vmem:[%s37471_s7 + $0x270] sm:$0xff] %v17595_v8  ;;  %v25655_v14 = vadd.f32 %v28337_v49, %v17427_v34  ;;  %v25449_v15 = vpop.f32.mrb[79].mxu1 }
0x1873   :  { %v17596_v18 = vmax.f32 %v25655_v14, 0.0 }
0x1874   :  { %v17432_v16 = vpop.f32.mrb[80].mxu1 }
0x1875   :  { %17677 = vst [vmem:[%s37471_s7 + $0x278] sm:$0xff] %v17596_v18  ;;  %v25656_v50 = vadd.f32 %v28337_v49, %v17432_v16  ;;  %v25452_v22 = vpop.f32.mrb[81].mxu1 }
0x1877   :  { %v17597_v30 = vmax.f32 %v25656_v50, 0.0 }
0x1879   :  { %17678 = vst [vmem:[%s37471_s7 + $0x280] sm:$0xff] %v17597_v30 }

</bundles_post_ra>
